<compile_context>
chip_gen: v5e
topology: v5e:2x2
jax: 0.10.0
libtpu: 0.0.40
codegen_flags: <defaults>
</compile_context>

<pallas_src>
import functools
import math

import numpy as np
import jax
import jax.numpy as jnp
from jax import lax
from jax.experimental import pallas as pl
from jax.experimental.pallas import tpu as pltpu


# ---------------------------------------------------------------------------
# In-kernel helpers (activations are (channels, B*H*W): lane-dense spatial dim)
# ---------------------------------------------------------------------------
def _im2col(a, masks, grid_w):
    """3x3 im2col stack of a flattened (cin, n) activation.

    Tap k = 3*(dy+1) + (dx+1).  Each tap is a lane rotation of the whole
    flattened activation by -(dy*grid_w + dx) (pltpu.roll, XLU); positions that
    would read across an image/row boundary are zeroed by the precomputed
    masks, which also covers the rotation wrap-around.  Returns (9*cin, n) bf16.
    """
    n = a.shape[1]
    cols = []
    for k in range(9):
        dy, dx = k // 3 - 1, k % 3 - 1
        delta = dy * grid_w + dx
        t = a if delta == 0 else pltpu.roll(a, (-delta) % n, 1)
        cols.append((t * masks[k:k + 1, :]).astype(jnp.bfloat16))
    return jnp.concatenate(cols, axis=0)           # (9*cin, n), tap-major rows


def _conv_mm(cols, w, b):
    """relu(W @ cols + b): one MXU matmul per conv layer, f32 accumulation."""
    y = jnp.dot(w, cols, preferred_element_type=jnp.float32)
    return jnp.maximum(y + b, 0.0)


# ---------------------------------------------------------------------------
# Fused kernel: whole twin-Q Critic in a single grid step (heads unrolled)
# ---------------------------------------------------------------------------
def _critic_kernel(xcols_ref, x2_ref, u_ref, mhi_ref, mlo_ref, ds_ref, pool_ref,
                   cw1, cb1, cw2, cb2, cw3, cb3, cw4, cb4,
                   fw1p, fw1s, fw1u, fb1, fw2, fb2, fw3, fb3,
                   o_ref, *, grid_w_hi, grid_w_lo):
    # Shared (head-independent) loads, hoisted out of the head loop.
    xcols = xcols_ref[...]                      # (9, n_hi) bf16, conv1 im2col
    m_hi = mhi_ref[...]                         # (9, n_hi) f32 boundary masks
    m_lo = mlo_ref[...]                         # (9, n_lo) f32 boundary masks
    ds_t = ds_ref[...]                          # (n_hi, n_lo) bf16, stride-2 sel
    pool = pool_ref[...]                        # (B, n_lo) bf16, sel + avg-pool
    x2b = x2_ref[...].astype(jnp.bfloat16)      # (B, state_dim)
    ub = u_ref[...].astype(jnp.bfloat16)        # (B, action_dim)

    for h in range(2):                          # twin heads, fully unrolled
        # conv1 (1->16, s1): input im2col prebuilt on the host.
        a1 = _conv_mm(xcols, cw1[h], cb1[h])                          # (16, n_hi)
        # conv2 (16->32, s1)
        a2 = _conv_mm(_im2col(a1, m_hi, grid_w_hi), cw2[h], cb2[h])   # (32, n_hi)
        # conv3 (32->16, s2): full-res conv then 0/1 column selection
        # (ReLU commutes with selection).
        a3f = _conv_mm(_im2col(a2, m_hi, grid_w_hi), cw3[h], cb3[h])  # (16, n_hi)
        a3 = jnp.dot(a3f.astype(jnp.bfloat16), ds_t,
                     preferred_element_type=jnp.float32)              # (16, n_lo)
        # conv4 (16->10, s2) + global average pool fused into one matmul.
        a4f = _conv_mm(_im2col(a3, m_lo, grid_w_lo), cw4[h], cb4[h])  # (10, n_lo)
        pooled = lax.dot_general(pool, a4f.astype(jnp.bfloat16),
                                 (((1,), (1,)), ((), ())),
                                 preferred_element_type=jnp.float32)  # (B, 10)
        # FC head: cat([pooled, x2, u]) -> 400 -> 300 -> 1, concat folded into
        # three small matmuls on the split fc1 weight blocks.
        z = (jnp.dot(pooled.astype(jnp.bfloat16), fw1p[h],
                     preferred_element_type=jnp.float32)
             + jnp.dot(x2b, fw1s[h], preferred_element_type=jnp.float32)
             + jnp.dot(ub, fw1u[h], preferred_element_type=jnp.float32)
             + fb1[h])
        z = jnp.maximum(z, 0.0)                                       # (B, 400)
        z = jnp.maximum(jnp.dot(z.astype(jnp.bfloat16), fw2[h],
                                preferred_element_type=jnp.float32) + fb2[h],
                        0.0)                                          # (B, 300)
        q = jnp.sum(z * fw3[h], axis=1, keepdims=True) + fb3[h]       # (B, 1)
        o_ref[h] = q.astype(o_ref.dtype)


# ---------------------------------------------------------------------------
# Host-side constants (numpy at trace time; shapes are static under jit)
# ---------------------------------------------------------------------------
def _boundary_masks(B, H, W):
    """(9, B*H*W) f32: 1 where the 3x3 tap stays inside the (padded) image."""
    n = B * H * W
    m = np.zeros((9, n), np.float32)
    y = np.tile(np.repeat(np.arange(H), W), B)
    x = np.tile(np.tile(np.arange(W), H), B)
    for k in range(9):
        dy, dx = k // 3 - 1, k % 3 - 1
        ok = (y + dy >= 0) & (y + dy < H) & (x + dx >= 0) & (x + dx < W)
        m[k] = ok.astype(np.float32)
    return m


def _downsample_t(B, H, W):
    """(B*H*W, B*H/2*W/2) 0/1 selection of even (y, x) positions (stride 2)."""
    Ho, Wo = H // 2, W // 2
    S = np.zeros((B * H * W, B * Ho * Wo), np.float32)
    for b in range(B):
        for yo in range(Ho):
            for xo in range(Wo):
                S[b * H * W + 2 * yo * W + 2 * xo,
                  b * Ho * Wo + yo * Wo + xo] = 1.0
    return S


def _pool_mat(B, Hlo, Wlo):
    """(B, B*Hlo*Wlo): stride-2 selection fused with global average pooling."""
    Ho, Wo = Hlo // 2, Wlo // 2
    P = np.zeros((B, B * Hlo * Wlo), np.float32)
    inv = 1.0 / (Ho * Wo)
    for b in range(B):
        for yo in range(Ho):
            for xo in range(Wo):
                P[b, b * Hlo * Wlo + 2 * yo * Wlo + 2 * xo] = inv
    return P


# ---------------------------------------------------------------------------
# Parameters (PyTorch-default-style uniform init), pre-packed & head-stacked
# ---------------------------------------------------------------------------
def init_critic_params(key, state_dim, action_dim):
    fc_in = 10 + state_dim + action_dim
    keys = iter(jax.random.split(key, 28))

    def uniform(k, shape, bound):
        return jax.random.uniform(k, shape, jnp.float32, -bound, bound)

    def conv_layer(cin, cout):
        bound = 1.0 / math.sqrt(cin * 9)
        ws = jnp.stack([uniform(next(keys), (cout, 9 * cin), bound)
                        for _ in range(2)])
        bs = jnp.stack([uniform(next(keys), (cout, 1), bound) for _ in range(2)])
        return ws.astype(jnp.bfloat16), bs

    def fc_layer(din, dout, w_dtype=jnp.bfloat16):
        bound = 1.0 / math.sqrt(din)
        ws = jnp.stack([uniform(next(keys), (din, dout), bound)
                        for _ in range(2)])
        bs = jnp.stack([uniform(next(keys), (1, dout), bound) for _ in range(2)])
        return ws.astype(w_dtype), bs

    cw1, cb1 = conv_layer(1, 16)     # conv1/conv5
    cw2, cb2 = conv_layer(16, 32)    # conv2/conv6
    cw3, cb3 = conv_layer(32, 16)    # conv3/conv7 (stride 2)
    cw4, cb4 = conv_layer(16, 10)    # conv4/conv8 (stride 2)
    fw1, fb1 = fc_layer(fc_in, 400)
    fw2, fb2 = fc_layer(400, 300)
    fw3, fb3 = fc_layer(300, 1, w_dtype=jnp.float32)
    fw3 = fw3.reshape(2, 1, 300)     # row-vector form for the final VPU dot

    return dict(
        cw1=cw1, cb1=cb1, cw2=cw2, cb2=cb2, cw3=cw3, cb3=cb3, cw4=cw4, cb4=cb4,
        fw1p=fw1[:, :10, :],                      # pooled-features block
        fw1s=fw1[:, 10:10 + state_dim, :],        # x2 block
        fw1u=fw1[:, 10 + state_dim:, :],          # u block
        fb1=fb1, fw2=fw2, fb2=fb2, fw3=fw3, fb3=fb3)


# ---------------------------------------------------------------------------
# Forward
# ---------------------------------------------------------------------------
def critic_forward(params, x1, x2, u):
    B, C, H, W = x1.shape
    assert C == 1 and H % 4 == 0 and W % 4 == 0, "expects (B, 1, H, W), H,W % 4 == 0"
    # dsT grows as (B*H*W) * (B*H*W/4); keep it VMEM-small.
    assert B * H * W <= 4096, "fused kernel sized for small spatial inputs"

    Hlo, Wlo = H // 2, W // 2
    n_hi, n_lo = B * H * W, B * Hlo * Wlo

    x2 = x2.astype(jnp.float32)
    u = u.astype(jnp.float32)

    # conv1 im2col built on the host: 9 shifted copies of the padded input,
    # shared by both heads (boundary zeros come from the padding).
    ximg = x1.astype(jnp.float32).reshape(B, H, W)
    xpad = jnp.pad(ximg, ((0, 0), (1, 1), (1, 1)))
    taps = [xpad[:, 1 + dy:1 + dy + H, 1 + dx:1 + dx + W]
            for dy in (-1, 0, 1) for dx in (-1, 0, 1)]
    xcols = jnp.stack(taps, axis=0).reshape(9, n_hi).astype(jnp.bfloat16)

    m_hi = jnp.asarray(_boundary_masks(B, H, W))                 # (9, n_hi) f32
    m_lo = jnp.asarray(_boundary_masks(B, Hlo, Wlo))             # (9, n_lo) f32
    ds_t = jnp.asarray(_downsample_t(B, H, W), dtype=jnp.bfloat16)
    pool = jnp.asarray(_pool_mat(B, Hlo, Wlo), dtype=jnp.bfloat16)

    p = params
    out = pl.pallas_call(
        functools.partial(_critic_kernel, grid_w_hi=W, grid_w_lo=Wlo),
        out_shape=jax.ShapeDtypeStruct((2, B, 1), jnp.float32),
    )(xcols, x2, u, m_hi, m_lo, ds_t, pool,
      p["cw1"], p["cb1"], p["cw2"], p["cb2"], p["cw3"], p["cb3"],
      p["cw4"], p["cb4"],
      p["fw1p"], p["fw1s"], p["fw1u"], p["fb1"],
      p["fw2"], p["fb2"], p["fw3"], p["fb3"])

    return out[0], out[1]


def critic_q1(params, x1, x2, u):
    q1, _ = critic_forward(params, x1, x2, u)
    return q1


# ---------------------------------------------------------------------------
# Pure-JAX reference (same weights, f32 activations) for a parity check
# ---------------------------------------------------------------------------
def _reference_forward(params, x1, x2, u):
    x1 = x1.astype(jnp.float32)
    x2 = x2.astype(jnp.float32)
    u = u.astype(jnp.float32)

    def conv(x, w, b, cin, cout, stride):
        w4 = w.astype(jnp.float32).reshape(cout, 3, 3, cin).transpose(0, 3, 1, 2)
        y = lax.conv_general_dilated(
            x, w4, window_strides=(stride, stride), padding=((1, 1), (1, 1)),
            dimension_numbers=("NCHW", "OIHW", "NCHW"))
        return jax.nn.relu(y + b.reshape(1, cout, 1, 1))

    p = params
    qs = []
    for h in range(2):
        a = conv(x1, p["cw1"][h], p["cb1"][h], 1, 16, 1)
        a = conv(a, p["cw2"][h], p["cb2"][h], 16, 32, 1)
        a = conv(a, p["cw3"][h], p["cb3"][h], 32, 16, 2)
        a = conv(a, p["cw4"][h], p["cb4"][h], 16, 10, 2)
        pooled = jnp.mean(a, axis=(2, 3))                           # (B, 10)
        w1 = jnp.concatenate([p["fw1p"][h], p["fw1s"][h], p["fw1u"][h]],
                             axis=0).astype(jnp.float32)
        z = jnp.concatenate([pooled, x2, u], axis=1)
        z = jax.nn.relu(z @ w1 + p["fb1"][h])
        z = jax.nn.relu(z @ p["fw2"][h].astype(jnp.float32) + p["fb2"][h])
        q = z @ p["fw3"][h].T + p["fb3"][h]
        qs.append(q)
    return qs[0], qs[1]


# ---------------------------------------------------------------------------
if __name__ == "__main__":
    key = jax.random.PRNGKey(0)
    k_p, k_x1, k_x2, k_u = jax.random.split(key, 4)

    batch, state_dim, action_dim, spatial = 2, 4, 2, 16
    params = init_critic_params(k_p, state_dim, action_dim)

    x1 = jax.random.normal(k_x1, (batch, 1, spatial, spatial), jnp.float32)  # NCHW
    x2 = jax.random.normal(k_x2, (batch, state_dim), jnp.float32)
    u = jax.random.normal(k_u, (batch, action_dim), jnp.float32)

    fwd = jax.jit(critic_forward)
    q1, q2 = fwd(params, x1, x2, u)
    jax.block_until_ready((q1, q2))
    assert q1.shape == (batch, 1) and q2.shape == (batch, 1)
    assert bool(jnp.all(jnp.isfinite(q1))) and bool(jnp.all(jnp.isfinite(q2)))

    # Parity vs a pure-JAX reference (bf16 MXU operands -> loose tolerance).
    r1, r2 = _reference_forward(params, x1, x2, u)
    np.testing.assert_allclose(np.asarray(q1), np.asarray(r1), rtol=5e-2, atol=5e-2)
    np.testing.assert_allclose(np.asarray(q2), np.asarray(r2), rtol=5e-2, atol=5e-2)

    print("KERNEL_OK")
</pallas_src>

<mosaic_0001>
module attributes {stable_mosaic.version = 11 : i64} {
  func.func @_critic_kernel(%arg0: memref<9x512xbf16, #tpu.memory_space<vmem>>, %arg1: memref<2x4xf32, #tpu.memory_space<vmem>>, %arg2: memref<2x2xf32, #tpu.memory_space<vmem>>, %arg3: memref<9x512xf32, #tpu.memory_space<vmem>>, %arg4: memref<9x128xf32, #tpu.memory_space<vmem>>, %arg5: memref<512x128xbf16, #tpu.memory_space<vmem>>, %arg6: memref<2x128xbf16, #tpu.memory_space<vmem>>, %arg7: memref<2x16x9xbf16, #tpu.memory_space<vmem>>, %arg8: memref<2x16x1xf32, #tpu.memory_space<vmem>>, %arg9: memref<2x32x144xbf16, #tpu.memory_space<vmem>>, %arg10: memref<2x32x1xf32, #tpu.memory_space<vmem>>, %arg11: memref<2x16x288xbf16, #tpu.memory_space<vmem>>, %arg12: memref<2x16x1xf32, #tpu.memory_space<vmem>>, %arg13: memref<2x10x144xbf16, #tpu.memory_space<vmem>>, %arg14: memref<2x10x1xf32, #tpu.memory_space<vmem>>, %arg15: memref<2x10x400xbf16, #tpu.memory_space<vmem>>, %arg16: memref<2x4x400xbf16, #tpu.memory_space<vmem>>, %arg17: memref<2x2x400xbf16, #tpu.memory_space<vmem>>, %arg18: memref<2x1x400xf32, #tpu.memory_space<vmem>>, %arg19: memref<2x400x300xbf16, #tpu.memory_space<vmem>>, %arg20: memref<2x1x300xf32, #tpu.memory_space<vmem>>, %arg21: memref<2x1x300xf32, #tpu.memory_space<vmem>>, %arg22: memref<2x1x1xf32, #tpu.memory_space<vmem>>, %arg23: memref<2x2x1xf32, #tpu.memory_space<vmem>>) attributes {dimension_semantics = [], scalar_prefetch = 0 : i64, scratch_operands = 0 : i64, tpu.core_type = #tpu.core_type<tc>} {
    %c0 = arith.constant 0 : index
    %c0_0 = arith.constant 0 : index
    %0 = vector.load %arg0[%c0, %c0_0] : memref<9x512xbf16, #tpu.memory_space<vmem>>, vector<9x512xbf16>
    %c0_1 = arith.constant 0 : index
    %c0_2 = arith.constant 0 : index
    %1 = vector.load %arg3[%c0_1, %c0_2] : memref<9x512xf32, #tpu.memory_space<vmem>>, vector<9x512xf32>
    %c0_3 = arith.constant 0 : index
    %c0_4 = arith.constant 0 : index
    %2 = vector.load %arg4[%c0_3, %c0_4] : memref<9x128xf32, #tpu.memory_space<vmem>>, vector<9x128xf32>
    %c0_5 = arith.constant 0 : index
    %c0_6 = arith.constant 0 : index
    %3 = vector.load %arg5[%c0_5, %c0_6] : memref<512x128xbf16, #tpu.memory_space<vmem>>, vector<512x128xbf16>
    %c0_7 = arith.constant 0 : index
    %c0_8 = arith.constant 0 : index
    %4 = vector.load %arg6[%c0_7, %c0_8] : memref<2x128xbf16, #tpu.memory_space<vmem>>, vector<2x128xbf16>
    %c0_9 = arith.constant 0 : index
    %c0_10 = arith.constant 0 : index
    %5 = vector.load %arg1[%c0_9, %c0_10] : memref<2x4xf32, #tpu.memory_space<vmem>>, vector<2x4xf32>
    %6 = arith.truncf %5 : vector<2x4xf32> to vector<2x4xbf16>
    %c0_11 = arith.constant 0 : index
    %c0_12 = arith.constant 0 : index
    %7 = vector.load %arg2[%c0_11, %c0_12] : memref<2x2xf32, #tpu.memory_space<vmem>>, vector<2x2xf32>
    %8 = arith.truncf %7 : vector<2x2xf32> to vector<2x2xbf16>
    %c0_13 = arith.constant 0 : index
    %c0_14 = arith.constant 0 : index
    %c0_15 = arith.constant 0 : index
    %9 = vector.load %arg7[%c0_13, %c0_14, %c0_15] : memref<2x16x9xbf16, #tpu.memory_space<vmem>>, vector<1x16x9xbf16>
    %10 = vector.shape_cast %9 : vector<1x16x9xbf16> to vector<16x9xbf16>
    %c0_16 = arith.constant 0 : index
    %c0_17 = arith.constant 0 : index
    %c0_18 = arith.constant 0 : index
    %11 = vector.load %arg8[%c0_16, %c0_17, %c0_18] : memref<2x16x1xf32, #tpu.memory_space<vmem>>, vector<1x16x1xf32>
    %12 = vector.shape_cast %11 : vector<1x16x1xf32> to vector<16x1xf32>
    %cst = arith.constant dense<0.000000e+00> : vector<16x512xf32>
    %13 = tpu.matmul %10, %0, %cst {dimension_numbers = #tpu.dot_dimension_numbers<[1], [0], [0], [1], [0, 0, 1, 1], [], []>} : vector<16x9xbf16>, vector<9x512xbf16>, vector<16x512xf32> -> vector<16x512xf32>
    %14 = vector.broadcast %12 : vector<16x1xf32> to vector<16x512xf32>
    %15 = arith.addf %13, %14 : vector<16x512xf32>
    %cst_19 = arith.constant 0.000000e+00 : f32
    %16 = vector.broadcast %cst_19 : f32 to vector<16x512xf32>
    %17 = arith.maximumf %15, %16 : vector<16x512xf32>
    %c17_i32 = arith.constant 17 : i32
    %18 = tpu.dynamic_rotate %17 by %c17_i32 dim 1 : vector<16x512xf32>, i32 -> vector<16x512xf32>
    %19 = vector.extract_strided_slice %1 {offsets = [0, 0], sizes = [1, 512], strides = [1, 1]} : vector<9x512xf32> to vector<1x512xf32>
    %20 = vector.broadcast %19 : vector<1x512xf32> to vector<16x512xf32>
    %21 = arith.mulf %18, %20 : vector<16x512xf32>
    %22 = arith.truncf %21 : vector<16x512xf32> to vector<16x512xbf16>
    %c16_i32 = arith.constant 16 : i32
    %23 = tpu.dynamic_rotate %17 by %c16_i32 dim 1 : vector<16x512xf32>, i32 -> vector<16x512xf32>
    %24 = vector.extract_strided_slice %1 {offsets = [1, 0], sizes = [1, 512], strides = [1, 1]} : vector<9x512xf32> to vector<1x512xf32>
    %25 = vector.broadcast %24 : vector<1x512xf32> to vector<16x512xf32>
    %26 = arith.mulf %23, %25 : vector<16x512xf32>
    %27 = arith.truncf %26 : vector<16x512xf32> to vector<16x512xbf16>
    %c15_i32 = arith.constant 15 : i32
    %28 = tpu.dynamic_rotate %17 by %c15_i32 dim 1 : vector<16x512xf32>, i32 -> vector<16x512xf32>
    %29 = vector.extract_strided_slice %1 {offsets = [2, 0], sizes = [1, 512], strides = [1, 1]} : vector<9x512xf32> to vector<1x512xf32>
    %30 = vector.broadcast %29 : vector<1x512xf32> to vector<16x512xf32>
    %31 = arith.mulf %28, %30 : vector<16x512xf32>
    %32 = arith.truncf %31 : vector<16x512xf32> to vector<16x512xbf16>
    %c1_i32 = arith.constant 1 : i32
    %33 = tpu.dynamic_rotate %17 by %c1_i32 dim 1 : vector<16x512xf32>, i32 -> vector<16x512xf32>
    %34 = vector.extract_strided_slice %1 {offsets = [3, 0], sizes = [1, 512], strides = [1, 1]} : vector<9x512xf32> to vector<1x512xf32>
    %35 = vector.broadcast %34 : vector<1x512xf32> to vector<16x512xf32>
    %36 = arith.mulf %33, %35 : vector<16x512xf32>
    %37 = arith.truncf %36 : vector<16x512xf32> to vector<16x512xbf16>
    %38 = vector.extract_strided_slice %1 {offsets = [4, 0], sizes = [1, 512], strides = [1, 1]} : vector<9x512xf32> to vector<1x512xf32>
    %39 = vector.broadcast %38 : vector<1x512xf32> to vector<16x512xf32>
    %40 = arith.mulf %17, %39 : vector<16x512xf32>
    %41 = arith.truncf %40 : vector<16x512xf32> to vector<16x512xbf16>
    %c511_i32 = arith.constant 511 : i32
    %42 = tpu.dynamic_rotate %17 by %c511_i32 dim 1 : vector<16x512xf32>, i32 -> vector<16x512xf32>
    %43 = vector.extract_strided_slice %1 {offsets = [5, 0], sizes = [1, 512], strides = [1, 1]} : vector<9x512xf32> to vector<1x512xf32>
    %44 = vector.broadcast %43 : vector<1x512xf32> to vector<16x512xf32>
    %45 = arith.mulf %42, %44 : vector<16x512xf32>
    %46 = arith.truncf %45 : vector<16x512xf32> to vector<16x512xbf16>
    %c497_i32 = arith.constant 497 : i32
    %47 = tpu.dynamic_rotate %17 by %c497_i32 dim 1 : vector<16x512xf32>, i32 -> vector<16x512xf32>
    %48 = vector.extract_strided_slice %1 {offsets = [6, 0], sizes = [1, 512], strides = [1, 1]} : vector<9x512xf32> to vector<1x512xf32>
    %49 = vector.broadcast %48 : vector<1x512xf32> to vector<16x512xf32>
    %50 = arith.mulf %47, %49 : vector<16x512xf32>
    %51 = arith.truncf %50 : vector<16x512xf32> to vector<16x512xbf16>
    %c496_i32 = arith.constant 496 : i32
    %52 = tpu.dynamic_rotate %17 by %c496_i32 dim 1 : vector<16x512xf32>, i32 -> vector<16x512xf32>
    %53 = vector.extract_strided_slice %1 {offsets = [7, 0], sizes = [1, 512], strides = [1, 1]} : vector<9x512xf32> to vector<1x512xf32>
    %54 = vector.broadcast %53 : vector<1x512xf32> to vector<16x512xf32>
    %55 = arith.mulf %52, %54 : vector<16x512xf32>
    %56 = arith.truncf %55 : vector<16x512xf32> to vector<16x512xbf16>
    %c495_i32 = arith.constant 495 : i32
    %57 = tpu.dynamic_rotate %17 by %c495_i32 dim 1 : vector<16x512xf32>, i32 -> vector<16x512xf32>
    %58 = vector.extract_strided_slice %1 {offsets = [8, 0], sizes = [1, 512], strides = [1, 1]} : vector<9x512xf32> to vector<1x512xf32>
    %59 = vector.broadcast %58 : vector<1x512xf32> to vector<16x512xf32>
    %60 = arith.mulf %57, %59 : vector<16x512xf32>
    %61 = arith.truncf %60 : vector<16x512xf32> to vector<16x512xbf16>
    %62 = tpu.concatenate %22, %27, %32, %37, %41, %46, %51, %56, %61 in 0 : vector<16x512xbf16>, vector<16x512xbf16>, vector<16x512xbf16>, vector<16x512xbf16>, vector<16x512xbf16>, vector<16x512xbf16>, vector<16x512xbf16>, vector<16x512xbf16>, vector<16x512xbf16> -> vector<144x512xbf16>
    %c0_20 = arith.constant 0 : index
    %c0_21 = arith.constant 0 : index
    %c0_22 = arith.constant 0 : index
    %63 = vector.load %arg9[%c0_20, %c0_21, %c0_22] : memref<2x32x144xbf16, #tpu.memory_space<vmem>>, vector<1x32x144xbf16>
    %64 = vector.shape_cast %63 : vector<1x32x144xbf16> to vector<32x144xbf16>
    %c0_23 = arith.constant 0 : index
    %c0_24 = arith.constant 0 : index
    %c0_25 = arith.constant 0 : index
    %65 = vector.load %arg10[%c0_23, %c0_24, %c0_25] : memref<2x32x1xf32, #tpu.memory_space<vmem>>, vector<1x32x1xf32>
    %66 = vector.shape_cast %65 : vector<1x32x1xf32> to vector<32x1xf32>
    %cst_26 = arith.constant dense<0.000000e+00> : vector<32x512xf32>
    %67 = tpu.matmul %64, %62, %cst_26 {dimension_numbers = #tpu.dot_dimension_numbers<[1], [0], [0], [1], [0, 0, 1, 1], [], []>} : vector<32x144xbf16>, vector<144x512xbf16>, vector<32x512xf32> -> vector<32x512xf32>
    %68 = vector.broadcast %66 : vector<32x1xf32> to vector<32x512xf32>
    %69 = arith.addf %67, %68 : vector<32x512xf32>
    %cst_27 = arith.constant 0.000000e+00 : f32
    %70 = vector.broadcast %cst_27 : f32 to vector<32x512xf32>
    %71 = arith.maximumf %69, %70 : vector<32x512xf32>
    %c17_i32_28 = arith.constant 17 : i32
    %72 = tpu.dynamic_rotate %71 by %c17_i32_28 dim 1 : vector<32x512xf32>, i32 -> vector<32x512xf32>
    %73 = vector.extract_strided_slice %1 {offsets = [0, 0], sizes = [1, 512], strides = [1, 1]} : vector<9x512xf32> to vector<1x512xf32>
    %74 = vector.broadcast %73 : vector<1x512xf32> to vector<32x512xf32>
    %75 = arith.mulf %72, %74 : vector<32x512xf32>
    %76 = arith.truncf %75 : vector<32x512xf32> to vector<32x512xbf16>
    %c16_i32_29 = arith.constant 16 : i32
    %77 = tpu.dynamic_rotate %71 by %c16_i32_29 dim 1 : vector<32x512xf32>, i32 -> vector<32x512xf32>
    %78 = vector.extract_strided_slice %1 {offsets = [1, 0], sizes = [1, 512], strides = [1, 1]} : vector<9x512xf32> to vector<1x512xf32>
    %79 = vector.broadcast %78 : vector<1x512xf32> to vector<32x512xf32>
    %80 = arith.mulf %77, %79 : vector<32x512xf32>
    %81 = arith.truncf %80 : vector<32x512xf32> to vector<32x512xbf16>
    %c15_i32_30 = arith.constant 15 : i32
    %82 = tpu.dynamic_rotate %71 by %c15_i32_30 dim 1 : vector<32x512xf32>, i32 -> vector<32x512xf32>
    %83 = vector.extract_strided_slice %1 {offsets = [2, 0], sizes = [1, 512], strides = [1, 1]} : vector<9x512xf32> to vector<1x512xf32>
    %84 = vector.broadcast %83 : vector<1x512xf32> to vector<32x512xf32>
    %85 = arith.mulf %82, %84 : vector<32x512xf32>
    %86 = arith.truncf %85 : vector<32x512xf32> to vector<32x512xbf16>
    %c1_i32_31 = arith.constant 1 : i32
    %87 = tpu.dynamic_rotate %71 by %c1_i32_31 dim 1 : vector<32x512xf32>, i32 -> vector<32x512xf32>
    %88 = vector.extract_strided_slice %1 {offsets = [3, 0], sizes = [1, 512], strides = [1, 1]} : vector<9x512xf32> to vector<1x512xf32>
    %89 = vector.broadcast %88 : vector<1x512xf32> to vector<32x512xf32>
    %90 = arith.mulf %87, %89 : vector<32x512xf32>
    %91 = arith.truncf %90 : vector<32x512xf32> to vector<32x512xbf16>
    %92 = vector.extract_strided_slice %1 {offsets = [4, 0], sizes = [1, 512], strides = [1, 1]} : vector<9x512xf32> to vector<1x512xf32>
    %93 = vector.broadcast %92 : vector<1x512xf32> to vector<32x512xf32>
    %94 = arith.mulf %71, %93 : vector<32x512xf32>
    %95 = arith.truncf %94 : vector<32x512xf32> to vector<32x512xbf16>
    %c511_i32_32 = arith.constant 511 : i32
    %96 = tpu.dynamic_rotate %71 by %c511_i32_32 dim 1 : vector<32x512xf32>, i32 -> vector<32x512xf32>
    %97 = vector.extract_strided_slice %1 {offsets = [5, 0], sizes = [1, 512], strides = [1, 1]} : vector<9x512xf32> to vector<1x512xf32>
    %98 = vector.broadcast %97 : vector<1x512xf32> to vector<32x512xf32>
    %99 = arith.mulf %96, %98 : vector<32x512xf32>
    %100 = arith.truncf %99 : vector<32x512xf32> to vector<32x512xbf16>
    %c497_i32_33 = arith.constant 497 : i32
    %101 = tpu.dynamic_rotate %71 by %c497_i32_33 dim 1 : vector<32x512xf32>, i32 -> vector<32x512xf32>
    %102 = vector.extract_strided_slice %1 {offsets = [6, 0], sizes = [1, 512], strides = [1, 1]} : vector<9x512xf32> to vector<1x512xf32>
    %103 = vector.broadcast %102 : vector<1x512xf32> to vector<32x512xf32>
    %104 = arith.mulf %101, %103 : vector<32x512xf32>
    %105 = arith.truncf %104 : vector<32x512xf32> to vector<32x512xbf16>
    %c496_i32_34 = arith.constant 496 : i32
    %106 = tpu.dynamic_rotate %71 by %c496_i32_34 dim 1 : vector<32x512xf32>, i32 -> vector<32x512xf32>
    %107 = vector.extract_strided_slice %1 {offsets = [7, 0], sizes = [1, 512], strides = [1, 1]} : vector<9x512xf32> to vector<1x512xf32>
    %108 = vector.broadcast %107 : vector<1x512xf32> to vector<32x512xf32>
    %109 = arith.mulf %106, %108 : vector<32x512xf32>
    %110 = arith.truncf %109 : vector<32x512xf32> to vector<32x512xbf16>
    %c495_i32_35 = arith.constant 495 : i32
    %111 = tpu.dynamic_rotate %71 by %c495_i32_35 dim 1 : vector<32x512xf32>, i32 -> vector<32x512xf32>
    %112 = vector.extract_strided_slice %1 {offsets = [8, 0], sizes = [1, 512], strides = [1, 1]} : vector<9x512xf32> to vector<1x512xf32>
    %113 = vector.broadcast %112 : vector<1x512xf32> to vector<32x512xf32>
    %114 = arith.mulf %111, %113 : vector<32x512xf32>
    %115 = arith.truncf %114 : vector<32x512xf32> to vector<32x512xbf16>
    %116 = tpu.concatenate %76, %81, %86, %91, %95, %100, %105, %110, %115 in 0 : vector<32x512xbf16>, vector<32x512xbf16>, vector<32x512xbf16>, vector<32x512xbf16>, vector<32x512xbf16>, vector<32x512xbf16>, vector<32x512xbf16>, vector<32x512xbf16>, vector<32x512xbf16> -> vector<288x512xbf16>
    %c0_36 = arith.constant 0 : index
    %c0_37 = arith.constant 0 : index
    %c0_38 = arith.constant 0 : index
    %117 = vector.load %arg11[%c0_36, %c0_37, %c0_38] : memref<2x16x288xbf16, #tpu.memory_space<vmem>>, vector<1x16x288xbf16>
    %118 = vector.shape_cast %117 : vector<1x16x288xbf16> to vector<16x288xbf16>
    %c0_39 = arith.constant 0 : index
    %c0_40 = arith.constant 0 : index
    %c0_41 = arith.constant 0 : index
    %119 = vector.load %arg12[%c0_39, %c0_40, %c0_41] : memref<2x16x1xf32, #tpu.memory_space<vmem>>, vector<1x16x1xf32>
    %120 = vector.shape_cast %119 : vector<1x16x1xf32> to vector<16x1xf32>
    %cst_42 = arith.constant dense<0.000000e+00> : vector<16x512xf32>
    %121 = tpu.matmul %118, %116, %cst_42 {dimension_numbers = #tpu.dot_dimension_numbers<[1], [0], [0], [1], [0, 0, 1, 1], [], []>} : vector<16x288xbf16>, vector<288x512xbf16>, vector<16x512xf32> -> vector<16x512xf32>
    %122 = vector.broadcast %120 : vector<16x1xf32> to vector<16x512xf32>
    %123 = arith.addf %121, %122 : vector<16x512xf32>
    %cst_43 = arith.constant 0.000000e+00 : f32
    %124 = vector.broadcast %cst_43 : f32 to vector<16x512xf32>
    %125 = arith.maximumf %123, %124 : vector<16x512xf32>
    %126 = arith.truncf %125 : vector<16x512xf32> to vector<16x512xbf16>
    %cst_44 = arith.constant dense<0.000000e+00> : vector<16x128xf32>
    %127 = tpu.matmul %126, %3, %cst_44 {dimension_numbers = #tpu.dot_dimension_numbers<[1], [0], [0], [1], [0, 0, 1, 1], [], []>} : vector<16x512xbf16>, vector<512x128xbf16>, vector<16x128xf32> -> vector<16x128xf32>
    %c9_i32 = arith.constant 9 : i32
    %128 = tpu.dynamic_rotate %127 by %c9_i32 dim 1 : vector<16x128xf32>, i32 -> vector<16x128xf32>
    %129 = vector.extract_strided_slice %2 {offsets = [0, 0], sizes = [1, 128], strides = [1, 1]} : vector<9x128xf32> to vector<1x128xf32>
    %130 = vector.broadcast %129 : vector<1x128xf32> to vector<16x128xf32>
    %131 = arith.mulf %128, %130 : vector<16x128xf32>
    %132 = arith.truncf %131 : vector<16x128xf32> to vector<16x128xbf16>
    %c8_i32 = arith.constant 8 : i32
    %133 = tpu.dynamic_rotate %127 by %c8_i32 dim 1 : vector<16x128xf32>, i32 -> vector<16x128xf32>
    %134 = vector.extract_strided_slice %2 {offsets = [1, 0], sizes = [1, 128], strides = [1, 1]} : vector<9x128xf32> to vector<1x128xf32>
    %135 = vector.broadcast %134 : vector<1x128xf32> to vector<16x128xf32>
    %136 = arith.mulf %133, %135 : vector<16x128xf32>
    %137 = arith.truncf %136 : vector<16x128xf32> to vector<16x128xbf16>
    %c7_i32 = arith.constant 7 : i32
    %138 = tpu.dynamic_rotate %127 by %c7_i32 dim 1 : vector<16x128xf32>, i32 -> vector<16x128xf32>
    %139 = vector.extract_strided_slice %2 {offsets = [2, 0], sizes = [1, 128], strides = [1, 1]} : vector<9x128xf32> to vector<1x128xf32>
    %140 = vector.broadcast %139 : vector<1x128xf32> to vector<16x128xf32>
    %141 = arith.mulf %138, %140 : vector<16x128xf32>
    %142 = arith.truncf %141 : vector<16x128xf32> to vector<16x128xbf16>
    %c1_i32_45 = arith.constant 1 : i32
    %143 = tpu.dynamic_rotate %127 by %c1_i32_45 dim 1 : vector<16x128xf32>, i32 -> vector<16x128xf32>
    %144 = vector.extract_strided_slice %2 {offsets = [3, 0], sizes = [1, 128], strides = [1, 1]} : vector<9x128xf32> to vector<1x128xf32>
    %145 = vector.broadcast %144 : vector<1x128xf32> to vector<16x128xf32>
    %146 = arith.mulf %143, %145 : vector<16x128xf32>
    %147 = arith.truncf %146 : vector<16x128xf32> to vector<16x128xbf16>
    %148 = vector.extract_strided_slice %2 {offsets = [4, 0], sizes = [1, 128], strides = [1, 1]} : vector<9x128xf32> to vector<1x128xf32>
    %149 = vector.broadcast %148 : vector<1x128xf32> to vector<16x128xf32>
    %150 = arith.mulf %127, %149 : vector<16x128xf32>
    %151 = arith.truncf %150 : vector<16x128xf32> to vector<16x128xbf16>
    %c127_i32 = arith.constant 127 : i32
    %152 = tpu.dynamic_rotate %127 by %c127_i32 dim 1 : vector<16x128xf32>, i32 -> vector<16x128xf32>
    %153 = vector.extract_strided_slice %2 {offsets = [5, 0], sizes = [1, 128], strides = [1, 1]} : vector<9x128xf32> to vector<1x128xf32>
    %154 = vector.broadcast %153 : vector<1x128xf32> to vector<16x128xf32>
    %155 = arith.mulf %152, %154 : vector<16x128xf32>
    %156 = arith.truncf %155 : vector<16x128xf32> to vector<16x128xbf16>
    %c121_i32 = arith.constant 121 : i32
    %157 = tpu.dynamic_rotate %127 by %c121_i32 dim 1 : vector<16x128xf32>, i32 -> vector<16x128xf32>
    %158 = vector.extract_strided_slice %2 {offsets = [6, 0], sizes = [1, 128], strides = [1, 1]} : vector<9x128xf32> to vector<1x128xf32>
    %159 = vector.broadcast %158 : vector<1x128xf32> to vector<16x128xf32>
    %160 = arith.mulf %157, %159 : vector<16x128xf32>
    %161 = arith.truncf %160 : vector<16x128xf32> to vector<16x128xbf16>
    %c120_i32 = arith.constant 120 : i32
    %162 = tpu.dynamic_rotate %127 by %c120_i32 dim 1 : vector<16x128xf32>, i32 -> vector<16x128xf32>
    %163 = vector.extract_strided_slice %2 {offsets = [7, 0], sizes = [1, 128], strides = [1, 1]} : vector<9x128xf32> to vector<1x128xf32>
    %164 = vector.broadcast %163 : vector<1x128xf32> to vector<16x128xf32>
    %165 = arith.mulf %162, %164 : vector<16x128xf32>
    %166 = arith.truncf %165 : vector<16x128xf32> to vector<16x128xbf16>
    %c119_i32 = arith.constant 119 : i32
    %167 = tpu.dynamic_rotate %127 by %c119_i32 dim 1 : vector<16x128xf32>, i32 -> vector<16x128xf32>
    %168 = vector.extract_strided_slice %2 {offsets = [8, 0], sizes = [1, 128], strides = [1, 1]} : vector<9x128xf32> to vector<1x128xf32>
    %169 = vector.broadcast %168 : vector<1x128xf32> to vector<16x128xf32>
    %170 = arith.mulf %167, %169 : vector<16x128xf32>
    %171 = arith.truncf %170 : vector<16x128xf32> to vector<16x128xbf16>
    %172 = tpu.concatenate %132, %137, %142, %147, %151, %156, %161, %166, %171 in 0 : vector<16x128xbf16>, vector<16x128xbf16>, vector<16x128xbf16>, vector<16x128xbf16>, vector<16x128xbf16>, vector<16x128xbf16>, vector<16x128xbf16>, vector<16x128xbf16>, vector<16x128xbf16> -> vector<144x128xbf16>
    %c0_46 = arith.constant 0 : index
    %c0_47 = arith.constant 0 : index
    %c0_48 = arith.constant 0 : index
    %173 = vector.load %arg13[%c0_46, %c0_47, %c0_48] : memref<2x10x144xbf16, #tpu.memory_space<vmem>>, vector<1x10x144xbf16>
    %174 = vector.shape_cast %173 : vector<1x10x144xbf16> to vector<10x144xbf16>
    %c0_49 = arith.constant 0 : index
    %c0_50 = arith.constant 0 : index
    %c0_51 = arith.constant 0 : index
    %175 = vector.load %arg14[%c0_49, %c0_50, %c0_51] : memref<2x10x1xf32, #tpu.memory_space<vmem>>, vector<1x10x1xf32>
    %176 = vector.shape_cast %175 : vector<1x10x1xf32> to vector<10x1xf32>
    %cst_52 = arith.constant dense<0.000000e+00> : vector<10x128xf32>
    %177 = tpu.matmul %174, %172, %cst_52 {dimension_numbers = #tpu.dot_dimension_numbers<[1], [0], [0], [1], [0, 0, 1, 1], [], []>} : vector<10x144xbf16>, vector<144x128xbf16>, vector<10x128xf32> -> vector<10x128xf32>
    %178 = vector.broadcast %176 : vector<10x1xf32> to vector<10x128xf32>
    %179 = arith.addf %177, %178 : vector<10x128xf32>
    %cst_53 = arith.constant 0.000000e+00 : f32
    %180 = vector.broadcast %cst_53 : f32 to vector<10x128xf32>
    %181 = arith.maximumf %179, %180 : vector<10x128xf32>
    %182 = arith.truncf %181 : vector<10x128xf32> to vector<10x128xbf16>
    %cst_54 = arith.constant dense<0.000000e+00> : vector<2x10xf32>
    %183 = tpu.matmul %4, %182, %cst_54 {dimension_numbers = #tpu.dot_dimension_numbers<[1], [1], [0], [0], [0, 0, 1, 0], [], []>} : vector<2x128xbf16>, vector<10x128xbf16>, vector<2x10xf32> -> vector<2x10xf32>
    %184 = arith.truncf %183 : vector<2x10xf32> to vector<2x10xbf16>
    %c0_55 = arith.constant 0 : index
    %c0_56 = arith.constant 0 : index
    %c0_57 = arith.constant 0 : index
    %185 = vector.load %arg15[%c0_55, %c0_56, %c0_57] : memref<2x10x400xbf16, #tpu.memory_space<vmem>>, vector<1x10x400xbf16>
    %186 = vector.shape_cast %185 : vector<1x10x400xbf16> to vector<10x400xbf16>
    %cst_58 = arith.constant dense<0.000000e+00> : vector<2x400xf32>
    %187 = tpu.matmul %184, %186, %cst_58 {dimension_numbers = #tpu.dot_dimension_numbers<[1], [0], [0], [1], [0, 0, 1, 1], [], []>} : vector<2x10xbf16>, vector<10x400xbf16>, vector<2x400xf32> -> vector<2x400xf32>
    %c0_59 = arith.constant 0 : index
    %c0_60 = arith.constant 0 : index
    %c0_61 = arith.constant 0 : index
    %188 = vector.load %arg16[%c0_59, %c0_60, %c0_61] : memref<2x4x400xbf16, #tpu.memory_space<vmem>>, vector<1x4x400xbf16>
    %189 = vector.shape_cast %188 : vector<1x4x400xbf16> to vector<4x400xbf16>
    %cst_62 = arith.constant dense<0.000000e+00> : vector<2x400xf32>
    %190 = tpu.matmul %6, %189, %cst_62 {dimension_numbers = #tpu.dot_dimension_numbers<[1], [0], [0], [1], [0, 0, 1, 1], [], []>} : vector<2x4xbf16>, vector<4x400xbf16>, vector<2x400xf32> -> vector<2x400xf32>
    %191 = arith.addf %187, %190 : vector<2x400xf32>
    %c0_63 = arith.constant 0 : index
    %c0_64 = arith.constant 0 : index
    %c0_65 = arith.constant 0 : index
    %192 = vector.load %arg17[%c0_63, %c0_64, %c0_65] : memref<2x2x400xbf16, #tpu.memory_space<vmem>>, vector<1x2x400xbf16>
    %193 = vector.shape_cast %192 : vector<1x2x400xbf16> to vector<2x400xbf16>
    %cst_66 = arith.constant dense<0.000000e+00> : vector<2x400xf32>
    %194 = tpu.matmul %8, %193, %cst_66 {dimension_numbers = #tpu.dot_dimension_numbers<[1], [0], [0], [1], [0, 0, 1, 1], [], []>} : vector<2x2xbf16>, vector<2x400xbf16>, vector<2x400xf32> -> vector<2x400xf32>
    %195 = arith.addf %191, %194 : vector<2x400xf32>
    %c0_67 = arith.constant 0 : index
    %c0_68 = arith.constant 0 : index
    %c0_69 = arith.constant 0 : index
    %196 = vector.load %arg18[%c0_67, %c0_68, %c0_69] : memref<2x1x400xf32, #tpu.memory_space<vmem>>, vector<1x1x400xf32>
    %197 = vector.shape_cast %196 : vector<1x1x400xf32> to vector<1x400xf32>
    %198 = vector.broadcast %197 : vector<1x400xf32> to vector<2x400xf32>
    %199 = arith.addf %195, %198 : vector<2x400xf32>
    %cst_70 = arith.constant 0.000000e+00 : f32
    %200 = vector.broadcast %cst_70 : f32 to vector<2x400xf32>
    %201 = arith.maximumf %199, %200 : vector<2x400xf32>
    %202 = arith.truncf %201 : vector<2x400xf32> to vector<2x400xbf16>
    %c0_71 = arith.constant 0 : index
    %c0_72 = arith.constant 0 : index
    %c0_73 = arith.constant 0 : index
    %203 = vector.load %arg19[%c0_71, %c0_72, %c0_73] : memref<2x400x300xbf16, #tpu.memory_space<vmem>>, vector<1x400x300xbf16>
    %204 = vector.shape_cast %203 : vector<1x400x300xbf16> to vector<400x300xbf16>
    %cst_74 = arith.constant dense<0.000000e+00> : vector<2x300xf32>
    %205 = tpu.matmul %202, %204, %cst_74 {dimension_numbers = #tpu.dot_dimension_numbers<[1], [0], [0], [1], [0, 0, 1, 1], [], []>} : vector<2x400xbf16>, vector<400x300xbf16>, vector<2x300xf32> -> vector<2x300xf32>
    %c0_75 = arith.constant 0 : index
    %c0_76 = arith.constant 0 : index
    %c0_77 = arith.constant 0 : index
    %206 = vector.load %arg20[%c0_75, %c0_76, %c0_77] : memref<2x1x300xf32, #tpu.memory_space<vmem>>, vector<1x1x300xf32>
    %207 = vector.shape_cast %206 : vector<1x1x300xf32> to vector<1x300xf32>
    %208 = vector.broadcast %207 : vector<1x300xf32> to vector<2x300xf32>
    %209 = arith.addf %205, %208 : vector<2x300xf32>
    %cst_78 = arith.constant 0.000000e+00 : f32
    %210 = vector.broadcast %cst_78 : f32 to vector<2x300xf32>
    %211 = arith.maximumf %209, %210 : vector<2x300xf32>
    %c0_79 = arith.constant 0 : index
    %c0_80 = arith.constant 0 : index
    %c0_81 = arith.constant 0 : index
    %212 = vector.load %arg21[%c0_79, %c0_80, %c0_81] : memref<2x1x300xf32, #tpu.memory_space<vmem>>, vector<1x1x300xf32>
    %213 = vector.shape_cast %212 : vector<1x1x300xf32> to vector<1x300xf32>
    %214 = vector.broadcast %213 : vector<1x300xf32> to vector<2x300xf32>
    %215 = arith.mulf %211, %214 : vector<2x300xf32>
    %cst_82 = arith.constant dense<0.000000e+00> : vector<2xf32>
    %216 = vector.multi_reduction <add>, %215, %cst_82 [1] : vector<2x300xf32> to vector<2xf32>
    %217 = vector.shape_cast %216 : vector<2xf32> to vector<2x1xf32>
    %c0_83 = arith.constant 0 : index
    %c0_84 = arith.constant 0 : index
    %c0_85 = arith.constant 0 : index
    %218 = vector.load %arg22[%c0_83, %c0_84, %c0_85] : memref<2x1x1xf32, #tpu.memory_space<vmem>>, vector<1x1x1xf32>
    %219 = vector.shape_cast %218 : vector<1x1x1xf32> to vector<1x1xf32>
    %220 = vector.broadcast %219 : vector<1x1xf32> to vector<2x1xf32>
    %221 = arith.addf %217, %220 : vector<2x1xf32>
    %c0_86 = arith.constant 0 : index
    %c0_87 = arith.constant 0 : index
    %c0_88 = arith.constant 0 : index
    %222 = vector.load %arg23[%c0_86, %c0_87, %c0_88] : memref<2x2x1xf32, #tpu.memory_space<vmem>>, vector<1x2x1xf32>
    %223 = vector.shape_cast %222 : vector<1x2x1xf32> to vector<2x1xf32>
    %224 = vector.shape_cast %221 : vector<2x1xf32> to vector<1x2x1xf32>
    tpu.vector_store %arg23[%c0_86, %c0_87, %c0_88], %224 {strides = array<i32>} : memref<2x2x1xf32, #tpu.memory_space<vmem>>, vector<1x2x1xf32>,
    %c1 = arith.constant 1 : index
    %c0_89 = arith.constant 0 : index
    %c0_90 = arith.constant 0 : index
    %225 = vector.load %arg7[%c1, %c0_89, %c0_90] : memref<2x16x9xbf16, #tpu.memory_space<vmem>>, vector<1x16x9xbf16>
    %226 = vector.shape_cast %225 : vector<1x16x9xbf16> to vector<16x9xbf16>
    %c1_91 = arith.constant 1 : index
    %c0_92 = arith.constant 0 : index
    %c0_93 = arith.constant 0 : index
    %227 = vector.load %arg8[%c1_91, %c0_92, %c0_93] : memref<2x16x1xf32, #tpu.memory_space<vmem>>, vector<1x16x1xf32>
    %228 = vector.shape_cast %227 : vector<1x16x1xf32> to vector<16x1xf32>
    %cst_94 = arith.constant dense<0.000000e+00> : vector<16x512xf32>
    %229 = tpu.matmul %226, %0, %cst_94 {dimension_numbers = #tpu.dot_dimension_numbers<[1], [0], [0], [1], [0, 0, 1, 1], [], []>} : vector<16x9xbf16>, vector<9x512xbf16>, vector<16x512xf32> -> vector<16x512xf32>
    %230 = vector.broadcast %228 : vector<16x1xf32> to vector<16x512xf32>
    %231 = arith.addf %229, %230 : vector<16x512xf32>
    %cst_95 = arith.constant 0.000000e+00 : f32
    %232 = vector.broadcast %cst_95 : f32 to vector<16x512xf32>
    %233 = arith.maximumf %231, %232 : vector<16x512xf32>
    %c17_i32_96 = arith.constant 17 : i32
    %234 = tpu.dynamic_rotate %233 by %c17_i32_96 dim 1 : vector<16x512xf32>, i32 -> vector<16x512xf32>
    %235 = vector.extract_strided_slice %1 {offsets = [0, 0], sizes = [1, 512], strides = [1, 1]} : vector<9x512xf32> to vector<1x512xf32>
    %236 = vector.broadcast %235 : vector<1x512xf32> to vector<16x512xf32>
    %237 = arith.mulf %234, %236 : vector<16x512xf32>
    %238 = arith.truncf %237 : vector<16x512xf32> to vector<16x512xbf16>
    %c16_i32_97 = arith.constant 16 : i32
    %239 = tpu.dynamic_rotate %233 by %c16_i32_97 dim 1 : vector<16x512xf32>, i32 -> vector<16x512xf32>
    %240 = vector.extract_strided_slice %1 {offsets = [1, 0], sizes = [1, 512], strides = [1, 1]} : vector<9x512xf32> to vector<1x512xf32>
    %241 = vector.broadcast %240 : vector<1x512xf32> to vector<16x512xf32>
    %242 = arith.mulf %239, %241 : vector<16x512xf32>
    %243 = arith.truncf %242 : vector<16x512xf32> to vector<16x512xbf16>
    %c15_i32_98 = arith.constant 15 : i32
    %244 = tpu.dynamic_rotate %233 by %c15_i32_98 dim 1 : vector<16x512xf32>, i32 -> vector<16x512xf32>
    %245 = vector.extract_strided_slice %1 {offsets = [2, 0], sizes = [1, 512], strides = [1, 1]} : vector<9x512xf32> to vector<1x512xf32>
    %246 = vector.broadcast %245 : vector<1x512xf32> to vector<16x512xf32>
    %247 = arith.mulf %244, %246 : vector<16x512xf32>
    %248 = arith.truncf %247 : vector<16x512xf32> to vector<16x512xbf16>
    %c1_i32_99 = arith.constant 1 : i32
    %249 = tpu.dynamic_rotate %233 by %c1_i32_99 dim 1 : vector<16x512xf32>, i32 -> vector<16x512xf32>
    %250 = vector.extract_strided_slice %1 {offsets = [3, 0], sizes = [1, 512], strides = [1, 1]} : vector<9x512xf32> to vector<1x512xf32>
    %251 = vector.broadcast %250 : vector<1x512xf32> to vector<16x512xf32>
    %252 = arith.mulf %249, %251 : vector<16x512xf32>
    %253 = arith.truncf %252 : vector<16x512xf32> to vector<16x512xbf16>
    %254 = vector.extract_strided_slice %1 {offsets = [4, 0], sizes = [1, 512], strides = [1, 1]} : vector<9x512xf32> to vector<1x512xf32>
    %255 = vector.broadcast %254 : vector<1x512xf32> to vector<16x512xf32>
    %256 = arith.mulf %233, %255 : vector<16x512xf32>
    %257 = arith.truncf %256 : vector<16x512xf32> to vector<16x512xbf16>
    %c511_i32_100 = arith.constant 511 : i32
    %258 = tpu.dynamic_rotate %233 by %c511_i32_100 dim 1 : vector<16x512xf32>, i32 -> vector<16x512xf32>
    %259 = vector.extract_strided_slice %1 {offsets = [5, 0], sizes = [1, 512], strides = [1, 1]} : vector<9x512xf32> to vector<1x512xf32>
    %260 = vector.broadcast %259 : vector<1x512xf32> to vector<16x512xf32>
    %261 = arith.mulf %258, %260 : vector<16x512xf32>
    %262 = arith.truncf %261 : vector<16x512xf32> to vector<16x512xbf16>
    %c497_i32_101 = arith.constant 497 : i32
    %263 = tpu.dynamic_rotate %233 by %c497_i32_101 dim 1 : vector<16x512xf32>, i32 -> vector<16x512xf32>
    %264 = vector.extract_strided_slice %1 {offsets = [6, 0], sizes = [1, 512], strides = [1, 1]} : vector<9x512xf32> to vector<1x512xf32>
    %265 = vector.broadcast %264 : vector<1x512xf32> to vector<16x512xf32>
    %266 = arith.mulf %263, %265 : vector<16x512xf32>
    %267 = arith.truncf %266 : vector<16x512xf32> to vector<16x512xbf16>
    %c496_i32_102 = arith.constant 496 : i32
    %268 = tpu.dynamic_rotate %233 by %c496_i32_102 dim 1 : vector<16x512xf32>, i32 -> vector<16x512xf32>
    %269 = vector.extract_strided_slice %1 {offsets = [7, 0], sizes = [1, 512], strides = [1, 1]} : vector<9x512xf32> to vector<1x512xf32>
    %270 = vector.broadcast %269 : vector<1x512xf32> to vector<16x512xf32>
    %271 = arith.mulf %268, %270 : vector<16x512xf32>
    %272 = arith.truncf %271 : vector<16x512xf32> to vector<16x512xbf16>
    %c495_i32_103 = arith.constant 495 : i32
    %273 = tpu.dynamic_rotate %233 by %c495_i32_103 dim 1 : vector<16x512xf32>, i32 -> vector<16x512xf32>
    %274 = vector.extract_strided_slice %1 {offsets = [8, 0], sizes = [1, 512], strides = [1, 1]} : vector<9x512xf32> to vector<1x512xf32>
    %275 = vector.broadcast %274 : vector<1x512xf32> to vector<16x512xf32>
    %276 = arith.mulf %273, %275 : vector<16x512xf32>
    %277 = arith.truncf %276 : vector<16x512xf32> to vector<16x512xbf16>
    %278 = tpu.concatenate %238, %243, %248, %253, %257, %262, %267, %272, %277 in 0 : vector<16x512xbf16>, vector<16x512xbf16>, vector<16x512xbf16>, vector<16x512xbf16>, vector<16x512xbf16>, vector<16x512xbf16>, vector<16x512xbf16>, vector<16x512xbf16>, vector<16x512xbf16> -> vector<144x512xbf16>
    %c1_104 = arith.constant 1 : index
    %c0_105 = arith.constant 0 : index
    %c0_106 = arith.constant 0 : index
    %279 = vector.load %arg9[%c1_104, %c0_105, %c0_106] : memref<2x32x144xbf16, #tpu.memory_space<vmem>>, vector<1x32x144xbf16>
    %280 = vector.shape_cast %279 : vector<1x32x144xbf16> to vector<32x144xbf16>
    %c1_107 = arith.constant 1 : index
    %c0_108 = arith.constant 0 : index
    %c0_109 = arith.constant 0 : index
    %281 = vector.load %arg10[%c1_107, %c0_108, %c0_109] : memref<2x32x1xf32, #tpu.memory_space<vmem>>, vector<1x32x1xf32>
    %282 = vector.shape_cast %281 : vector<1x32x1xf32> to vector<32x1xf32>
    %cst_110 = arith.constant dense<0.000000e+00> : vector<32x512xf32>
    %283 = tpu.matmul %280, %278, %cst_110 {dimension_numbers = #tpu.dot_dimension_numbers<[1], [0], [0], [1], [0, 0, 1, 1], [], []>} : vector<32x144xbf16>, vector<144x512xbf16>, vector<32x512xf32> -> vector<32x512xf32>
    %284 = vector.broadcast %282 : vector<32x1xf32> to vector<32x512xf32>
    %285 = arith.addf %283, %284 : vector<32x512xf32>
    %cst_111 = arith.constant 0.000000e+00 : f32
    %286 = vector.broadcast %cst_111 : f32 to vector<32x512xf32>
    %287 = arith.maximumf %285, %286 : vector<32x512xf32>
    %c17_i32_112 = arith.constant 17 : i32
    %288 = tpu.dynamic_rotate %287 by %c17_i32_112 dim 1 : vector<32x512xf32>, i32 -> vector<32x512xf32>
    %289 = vector.extract_strided_slice %1 {offsets = [0, 0], sizes = [1, 512], strides = [1, 1]} : vector<9x512xf32> to vector<1x512xf32>
    %290 = vector.broadcast %289 : vector<1x512xf32> to vector<32x512xf32>
    %291 = arith.mulf %288, %290 : vector<32x512xf32>
    %292 = arith.truncf %291 : vector<32x512xf32> to vector<32x512xbf16>
    %c16_i32_113 = arith.constant 16 : i32
    %293 = tpu.dynamic_rotate %287 by %c16_i32_113 dim 1 : vector<32x512xf32>, i32 -> vector<32x512xf32>
    %294 = vector.extract_strided_slice %1 {offsets = [1, 0], sizes = [1, 512], strides = [1, 1]} : vector<9x512xf32> to vector<1x512xf32>
    %295 = vector.broadcast %294 : vector<1x512xf32> to vector<32x512xf32>
    %296 = arith.mulf %293, %295 : vector<32x512xf32>
    %297 = arith.truncf %296 : vector<32x512xf32> to vector<32x512xbf16>
    %c15_i32_114 = arith.constant 15 : i32
    %298 = tpu.dynamic_rotate %287 by %c15_i32_114 dim 1 : vector<32x512xf32>, i32 -> vector<32x512xf32>
    %299 = vector.extract_strided_slice %1 {offsets = [2, 0], sizes = [1, 512], strides = [1, 1]} : vector<9x512xf32> to vector<1x512xf32>
    %300 = vector.broadcast %299 : vector<1x512xf32> to vector<32x512xf32>
    %301 = arith.mulf %298, %300 : vector<32x512xf32>
    %302 = arith.truncf %301 : vector<32x512xf32> to vector<32x512xbf16>
    %c1_i32_115 = arith.constant 1 : i32
    %303 = tpu.dynamic_rotate %287 by %c1_i32_115 dim 1 : vector<32x512xf32>, i32 -> vector<32x512xf32>
    %304 = vector.extract_strided_slice %1 {offsets = [3, 0], sizes = [1, 512], strides = [1, 1]} : vector<9x512xf32> to vector<1x512xf32>
    %305 = vector.broadcast %304 : vector<1x512xf32> to vector<32x512xf32>
    %306 = arith.mulf %303, %305 : vector<32x512xf32>
    %307 = arith.truncf %306 : vector<32x512xf32> to vector<32x512xbf16>
    %308 = vector.extract_strided_slice %1 {offsets = [4, 0], sizes = [1, 512], strides = [1, 1]} : vector<9x512xf32> to vector<1x512xf32>
    %309 = vector.broadcast %308 : vector<1x512xf32> to vector<32x512xf32>
    %310 = arith.mulf %287, %309 : vector<32x512xf32>
    %311 = arith.truncf %310 : vector<32x512xf32> to vector<32x512xbf16>
    %c511_i32_116 = arith.constant 511 : i32
    %312 = tpu.dynamic_rotate %287 by %c511_i32_116 dim 1 : vector<32x512xf32>, i32 -> vector<32x512xf32>
    %313 = vector.extract_strided_slice %1 {offsets = [5, 0], sizes = [1, 512], strides = [1, 1]} : vector<9x512xf32> to vector<1x512xf32>
    %314 = vector.broadcast %313 : vector<1x512xf32> to vector<32x512xf32>
    %315 = arith.mulf %312, %314 : vector<32x512xf32>
    %316 = arith.truncf %315 : vector<32x512xf32> to vector<32x512xbf16>
    %c497_i32_117 = arith.constant 497 : i32
    %317 = tpu.dynamic_rotate %287 by %c497_i32_117 dim 1 : vector<32x512xf32>, i32 -> vector<32x512xf32>
    %318 = vector.extract_strided_slice %1 {offsets = [6, 0], sizes = [1, 512], strides = [1, 1]} : vector<9x512xf32> to vector<1x512xf32>
    %319 = vector.broadcast %318 : vector<1x512xf32> to vector<32x512xf32>
    %320 = arith.mulf %317, %319 : vector<32x512xf32>
    %321 = arith.truncf %320 : vector<32x512xf32> to vector<32x512xbf16>
    %c496_i32_118 = arith.constant 496 : i32
    %322 = tpu.dynamic_rotate %287 by %c496_i32_118 dim 1 : vector<32x512xf32>, i32 -> vector<32x512xf32>
    %323 = vector.extract_strided_slice %1 {offsets = [7, 0], sizes = [1, 512], strides = [1, 1]} : vector<9x512xf32> to vector<1x512xf32>
    %324 = vector.broadcast %323 : vector<1x512xf32> to vector<32x512xf32>
    %325 = arith.mulf %322, %324 : vector<32x512xf32>
    %326 = arith.truncf %325 : vector<32x512xf32> to vector<32x512xbf16>
    %c495_i32_119 = arith.constant 495 : i32
    %327 = tpu.dynamic_rotate %287 by %c495_i32_119 dim 1 : vector<32x512xf32>, i32 -> vector<32x512xf32>
    %328 = vector.extract_strided_slice %1 {offsets = [8, 0], sizes = [1, 512], strides = [1, 1]} : vector<9x512xf32> to vector<1x512xf32>
    %329 = vector.broadcast %328 : vector<1x512xf32> to vector<32x512xf32>
    %330 = arith.mulf %327, %329 : vector<32x512xf32>
    %331 = arith.truncf %330 : vector<32x512xf32> to vector<32x512xbf16>
    %332 = tpu.concatenate %292, %297, %302, %307, %311, %316, %321, %326, %331 in 0 : vector<32x512xbf16>, vector<32x512xbf16>, vector<32x512xbf16>, vector<32x512xbf16>, vector<32x512xbf16>, vector<32x512xbf16>, vector<32x512xbf16>, vector<32x512xbf16>, vector<32x512xbf16> -> vector<288x512xbf16>
    %c1_120 = arith.constant 1 : index
    %c0_121 = arith.constant 0 : index
    %c0_122 = arith.constant 0 : index
    %333 = vector.load %arg11[%c1_120, %c0_121, %c0_122] : memref<2x16x288xbf16, #tpu.memory_space<vmem>>, vector<1x16x288xbf16>
    %334 = vector.shape_cast %333 : vector<1x16x288xbf16> to vector<16x288xbf16>
    %c1_123 = arith.constant 1 : index
    %c0_124 = arith.constant 0 : index
    %c0_125 = arith.constant 0 : index
    %335 = vector.load %arg12[%c1_123, %c0_124, %c0_125] : memref<2x16x1xf32, #tpu.memory_space<vmem>>, vector<1x16x1xf32>
    %336 = vector.shape_cast %335 : vector<1x16x1xf32> to vector<16x1xf32>
    %cst_126 = arith.constant dense<0.000000e+00> : vector<16x512xf32>
    %337 = tpu.matmul %334, %332, %cst_126 {dimension_numbers = #tpu.dot_dimension_numbers<[1], [0], [0], [1], [0, 0, 1, 1], [], []>} : vector<16x288xbf16>, vector<288x512xbf16>, vector<16x512xf32> -> vector<16x512xf32>
    %338 = vector.broadcast %336 : vector<16x1xf32> to vector<16x512xf32>
    %339 = arith.addf %337, %338 : vector<16x512xf32>
    %cst_127 = arith.constant 0.000000e+00 : f32
    %340 = vector.broadcast %cst_127 : f32 to vector<16x512xf32>
    %341 = arith.maximumf %339, %340 : vector<16x512xf32>
    %342 = arith.truncf %341 : vector<16x512xf32> to vector<16x512xbf16>
    %cst_128 = arith.constant dense<0.000000e+00> : vector<16x128xf32>
    %343 = tpu.matmul %342, %3, %cst_128 {dimension_numbers = #tpu.dot_dimension_numbers<[1], [0], [0], [1], [0, 0, 1, 1], [], []>} : vector<16x512xbf16>, vector<512x128xbf16>, vector<16x128xf32> -> vector<16x128xf32>
    %c9_i32_129 = arith.constant 9 : i32
    %344 = tpu.dynamic_rotate %343 by %c9_i32_129 dim 1 : vector<16x128xf32>, i32 -> vector<16x128xf32>
    %345 = vector.extract_strided_slice %2 {offsets = [0, 0], sizes = [1, 128], strides = [1, 1]} : vector<9x128xf32> to vector<1x128xf32>
    %346 = vector.broadcast %345 : vector<1x128xf32> to vector<16x128xf32>
    %347 = arith.mulf %344, %346 : vector<16x128xf32>
    %348 = arith.truncf %347 : vector<16x128xf32> to vector<16x128xbf16>
    %c8_i32_130 = arith.constant 8 : i32
    %349 = tpu.dynamic_rotate %343 by %c8_i32_130 dim 1 : vector<16x128xf32>, i32 -> vector<16x128xf32>
    %350 = vector.extract_strided_slice %2 {offsets = [1, 0], sizes = [1, 128], strides = [1, 1]} : vector<9x128xf32> to vector<1x128xf32>
    %351 = vector.broadcast %350 : vector<1x128xf32> to vector<16x128xf32>
    %352 = arith.mulf %349, %351 : vector<16x128xf32>
    %353 = arith.truncf %352 : vector<16x128xf32> to vector<16x128xbf16>
    %c7_i32_131 = arith.constant 7 : i32
    %354 = tpu.dynamic_rotate %343 by %c7_i32_131 dim 1 : vector<16x128xf32>, i32 -> vector<16x128xf32>
    %355 = vector.extract_strided_slice %2 {offsets = [2, 0], sizes = [1, 128], strides = [1, 1]} : vector<9x128xf32> to vector<1x128xf32>
    %356 = vector.broadcast %355 : vector<1x128xf32> to vector<16x128xf32>
    %357 = arith.mulf %354, %356 : vector<16x128xf32>
    %358 = arith.truncf %357 : vector<16x128xf32> to vector<16x128xbf16>
    %c1_i32_132 = arith.constant 1 : i32
    %359 = tpu.dynamic_rotate %343 by %c1_i32_132 dim 1 : vector<16x128xf32>, i32 -> vector<16x128xf32>
    %360 = vector.extract_strided_slice %2 {offsets = [3, 0], sizes = [1, 128], strides = [1, 1]} : vector<9x128xf32> to vector<1x128xf32>
    %361 = vector.broadcast %360 : vector<1x128xf32> to vector<16x128xf32>
    %362 = arith.mulf %359, %361 : vector<16x128xf32>
    %363 = arith.truncf %362 : vector<16x128xf32> to vector<16x128xbf16>
    %364 = vector.extract_strided_slice %2 {offsets = [4, 0], sizes = [1, 128], strides = [1, 1]} : vector<9x128xf32> to vector<1x128xf32>
    %365 = vector.broadcast %364 : vector<1x128xf32> to vector<16x128xf32>
    %366 = arith.mulf %343, %365 : vector<16x128xf32>
    %367 = arith.truncf %366 : vector<16x128xf32> to vector<16x128xbf16>
    %c127_i32_133 = arith.constant 127 : i32
    %368 = tpu.dynamic_rotate %343 by %c127_i32_133 dim 1 : vector<16x128xf32>, i32 -> vector<16x128xf32>
    %369 = vector.extract_strided_slice %2 {offsets = [5, 0], sizes = [1, 128], strides = [1, 1]} : vector<9x128xf32> to vector<1x128xf32>
    %370 = vector.broadcast %369 : vector<1x128xf32> to vector<16x128xf32>
    %371 = arith.mulf %368, %370 : vector<16x128xf32>
    %372 = arith.truncf %371 : vector<16x128xf32> to vector<16x128xbf16>
    %c121_i32_134 = arith.constant 121 : i32
    %373 = tpu.dynamic_rotate %343 by %c121_i32_134 dim 1 : vector<16x128xf32>, i32 -> vector<16x128xf32>
    %374 = vector.extract_strided_slice %2 {offsets = [6, 0], sizes = [1, 128], strides = [1, 1]} : vector<9x128xf32> to vector<1x128xf32>
    %375 = vector.broadcast %374 : vector<1x128xf32> to vector<16x128xf32>
    %376 = arith.mulf %373, %375 : vector<16x128xf32>
    %377 = arith.truncf %376 : vector<16x128xf32> to vector<16x128xbf16>
    %c120_i32_135 = arith.constant 120 : i32
    %378 = tpu.dynamic_rotate %343 by %c120_i32_135 dim 1 : vector<16x128xf32>, i32 -> vector<16x128xf32>
    %379 = vector.extract_strided_slice %2 {offsets = [7, 0], sizes = [1, 128], strides = [1, 1]} : vector<9x128xf32> to vector<1x128xf32>
    %380 = vector.broadcast %379 : vector<1x128xf32> to vector<16x128xf32>
    %381 = arith.mulf %378, %380 : vector<16x128xf32>
    %382 = arith.truncf %381 : vector<16x128xf32> to vector<16x128xbf16>
    %c119_i32_136 = arith.constant 119 : i32
    %383 = tpu.dynamic_rotate %343 by %c119_i32_136 dim 1 : vector<16x128xf32>, i32 -> vector<16x128xf32>
    %384 = vector.extract_strided_slice %2 {offsets = [8, 0], sizes = [1, 128], strides = [1, 1]} : vector<9x128xf32> to vector<1x128xf32>
    %385 = vector.broadcast %384 : vector<1x128xf32> to vector<16x128xf32>
    %386 = arith.mulf %383, %385 : vector<16x128xf32>
    %387 = arith.truncf %386 : vector<16x128xf32> to vector<16x128xbf16>
    %388 = tpu.concatenate %348, %353, %358, %363, %367, %372, %377, %382, %387 in 0 : vector<16x128xbf16>, vector<16x128xbf16>, vector<16x128xbf16>, vector<16x128xbf16>, vector<16x128xbf16>, vector<16x128xbf16>, vector<16x128xbf16>, vector<16x128xbf16>, vector<16x128xbf16> -> vector<144x128xbf16>
    %c1_137 = arith.constant 1 : index
    %c0_138 = arith.constant 0 : index
    %c0_139 = arith.constant 0 : index
    %389 = vector.load %arg13[%c1_137, %c0_138, %c0_139] : memref<2x10x144xbf16, #tpu.memory_space<vmem>>, vector<1x10x144xbf16>
    %390 = vector.shape_cast %389 : vector<1x10x144xbf16> to vector<10x144xbf16>
    %c1_140 = arith.constant 1 : index
    %c0_141 = arith.constant 0 : index
    %c0_142 = arith.constant 0 : index
    %391 = vector.load %arg14[%c1_140, %c0_141, %c0_142] : memref<2x10x1xf32, #tpu.memory_space<vmem>>, vector<1x10x1xf32>
    %392 = vector.shape_cast %391 : vector<1x10x1xf32> to vector<10x1xf32>
    %cst_143 = arith.constant dense<0.000000e+00> : vector<10x128xf32>
    %393 = tpu.matmul %390, %388, %cst_143 {dimension_numbers = #tpu.dot_dimension_numbers<[1], [0], [0], [1], [0, 0, 1, 1], [], []>} : vector<10x144xbf16>, vector<144x128xbf16>, vector<10x128xf32> -> vector<10x128xf32>
    %394 = vector.broadcast %392 : vector<10x1xf32> to vector<10x128xf32>
    %395 = arith.addf %393, %394 : vector<10x128xf32>
    %cst_144 = arith.constant 0.000000e+00 : f32
    %396 = vector.broadcast %cst_144 : f32 to vector<10x128xf32>
    %397 = arith.maximumf %395, %396 : vector<10x128xf32>
    %398 = arith.truncf %397 : vector<10x128xf32> to vector<10x128xbf16>
    %cst_145 = arith.constant dense<0.000000e+00> : vector<2x10xf32>
    %399 = tpu.matmul %4, %398, %cst_145 {dimension_numbers = #tpu.dot_dimension_numbers<[1], [1], [0], [0], [0, 0, 1, 0], [], []>} : vector<2x128xbf16>, vector<10x128xbf16>, vector<2x10xf32> -> vector<2x10xf32>
    %400 = arith.truncf %399 : vector<2x10xf32> to vector<2x10xbf16>
    %c1_146 = arith.constant 1 : index
    %c0_147 = arith.constant 0 : index
    %c0_148 = arith.constant 0 : index
    %401 = vector.load %arg15[%c1_146, %c0_147, %c0_148] : memref<2x10x400xbf16, #tpu.memory_space<vmem>>, vector<1x10x400xbf16>
    %402 = vector.shape_cast %401 : vector<1x10x400xbf16> to vector<10x400xbf16>
    %cst_149 = arith.constant dense<0.000000e+00> : vector<2x400xf32>
    %403 = tpu.matmul %400, %402, %cst_149 {dimension_numbers = #tpu.dot_dimension_numbers<[1], [0], [0], [1], [0, 0, 1, 1], [], []>} : vector<2x10xbf16>, vector<10x400xbf16>, vector<2x400xf32> -> vector<2x400xf32>
    %c1_150 = arith.constant 1 : index
    %c0_151 = arith.constant 0 : index
    %c0_152 = arith.constant 0 : index
    %404 = vector.load %arg16[%c1_150, %c0_151, %c0_152] : memref<2x4x400xbf16, #tpu.memory_space<vmem>>, vector<1x4x400xbf16>
    %405 = vector.shape_cast %404 : vector<1x4x400xbf16> to vector<4x400xbf16>
    %cst_153 = arith.constant dense<0.000000e+00> : vector<2x400xf32>
    %406 = tpu.matmul %6, %405, %cst_153 {dimension_numbers = #tpu.dot_dimension_numbers<[1], [0], [0], [1], [0, 0, 1, 1], [], []>} : vector<2x4xbf16>, vector<4x400xbf16>, vector<2x400xf32> -> vector<2x400xf32>
    %407 = arith.addf %403, %406 : vector<2x400xf32>
    %c1_154 = arith.constant 1 : index
    %c0_155 = arith.constant 0 : index
    %c0_156 = arith.constant 0 : index
    %408 = vector.load %arg17[%c1_154, %c0_155, %c0_156] : memref<2x2x400xbf16, #tpu.memory_space<vmem>>, vector<1x2x400xbf16>
    %409 = vector.shape_cast %408 : vector<1x2x400xbf16> to vector<2x400xbf16>
    %cst_157 = arith.constant dense<0.000000e+00> : vector<2x400xf32>
    %410 = tpu.matmul %8, %409, %cst_157 {dimension_numbers = #tpu.dot_dimension_numbers<[1], [0], [0], [1], [0, 0, 1, 1], [], []>} : vector<2x2xbf16>, vector<2x400xbf16>, vector<2x400xf32> -> vector<2x400xf32>
    %411 = arith.addf %407, %410 : vector<2x400xf32>
    %c1_158 = arith.constant 1 : index
    %c0_159 = arith.constant 0 : index
    %c0_160 = arith.constant 0 : index
    %412 = vector.load %arg18[%c1_158, %c0_159, %c0_160] : memref<2x1x400xf32, #tpu.memory_space<vmem>>, vector<1x1x400xf32>
    %413 = vector.shape_cast %412 : vector<1x1x400xf32> to vector<1x400xf32>
    %414 = vector.broadcast %413 : vector<1x400xf32> to vector<2x400xf32>
    %415 = arith.addf %411, %414 : vector<2x400xf32>
    %cst_161 = arith.constant 0.000000e+00 : f32
    %416 = vector.broadcast %cst_161 : f32 to vector<2x400xf32>
    %417 = arith.maximumf %415, %416 : vector<2x400xf32>
    %418 = arith.truncf %417 : vector<2x400xf32> to vector<2x400xbf16>
    %c1_162 = arith.constant 1 : index
    %c0_163 = arith.constant 0 : index
    %c0_164 = arith.constant 0 : index
    %419 = vector.load %arg19[%c1_162, %c0_163, %c0_164] : memref<2x400x300xbf16, #tpu.memory_space<vmem>>, vector<1x400x300xbf16>
    %420 = vector.shape_cast %419 : vector<1x400x300xbf16> to vector<400x300xbf16>
    %cst_165 = arith.constant dense<0.000000e+00> : vector<2x300xf32>
    %421 = tpu.matmul %418, %420, %cst_165 {dimension_numbers = #tpu.dot_dimension_numbers<[1], [0], [0], [1], [0, 0, 1, 1], [], []>} : vector<2x400xbf16>, vector<400x300xbf16>, vector<2x300xf32> -> vector<2x300xf32>
    %c1_166 = arith.constant 1 : index
    %c0_167 = arith.constant 0 : index
    %c0_168 = arith.constant 0 : index
    %422 = vector.load %arg20[%c1_166, %c0_167, %c0_168] : memref<2x1x300xf32, #tpu.memory_space<vmem>>, vector<1x1x300xf32>
    %423 = vector.shape_cast %422 : vector<1x1x300xf32> to vector<1x300xf32>
    %424 = vector.broadcast %423 : vector<1x300xf32> to vector<2x300xf32>
    %425 = arith.addf %421, %424 : vector<2x300xf32>
    %cst_169 = arith.constant 0.000000e+00 : f32
    %426 = vector.broadcast %cst_169 : f32 to vector<2x300xf32>
    %427 = arith.maximumf %425, %426 : vector<2x300xf32>
    %c1_170 = arith.constant 1 : index
    %c0_171 = arith.constant 0 : index
    %c0_172 = arith.constant 0 : index
    %428 = vector.load %arg21[%c1_170, %c0_171, %c0_172] : memref<2x1x300xf32, #tpu.memory_space<vmem>>, vector<1x1x300xf32>
    %429 = vector.shape_cast %428 : vector<1x1x300xf32> to vector<1x300xf32>
    %430 = vector.broadcast %429 : vector<1x300xf32> to vector<2x300xf32>
    %431 = arith.mulf %427, %430 : vector<2x300xf32>
    %cst_173 = arith.constant dense<0.000000e+00> : vector<2xf32>
    %432 = vector.multi_reduction <add>, %431, %cst_173 [1] : vector<2x300xf32> to vector<2xf32>
    %433 = vector.shape_cast %432 : vector<2xf32> to vector<2x1xf32>
    %c1_174 = arith.constant 1 : index
    %c0_175 = arith.constant 0 : index
    %c0_176 = arith.constant 0 : index
    %434 = vector.load %arg22[%c1_174, %c0_175, %c0_176] : memref<2x1x1xf32, #tpu.memory_space<vmem>>, vector<1x1x1xf32>
    %435 = vector.shape_cast %434 : vector<1x1x1xf32> to vector<1x1xf32>
    %436 = vector.broadcast %435 : vector<1x1xf32> to vector<2x1xf32>
    %437 = arith.addf %433, %436 : vector<2x1xf32>
    %c1_177 = arith.constant 1 : index
    %c0_178 = arith.constant 0 : index
    %c0_179 = arith.constant 0 : index
    %438 = vector.load %arg23[%c1_177, %c0_178, %c0_179] : memref<2x2x1xf32, #tpu.memory_space<vmem>>, vector<1x2x1xf32>
    %439 = vector.shape_cast %438 : vector<1x2x1xf32> to vector<2x1xf32>
    %440 = vector.shape_cast %437 : vector<2x1xf32> to vector<1x2x1xf32>
    tpu.vector_store %arg23[%c1_177, %c0_178, %c0_179], %440 {strides = array<i32>} : memref<2x2x1xf32, #tpu.memory_space<vmem>>, vector<1x2x1xf32>,
    return
  }
}

</mosaic_0001>

<bundles_post_ra>
// kernel: critic_forward.1
= control target key start
LH: loop header
LB: loop body
LE: loop exit
PB: predicated region body
PF: predicated region fallthrough
CT: control target
= control target key end

     0   :  { %s13393_s0 = inlined_call_operand.vmem [shape: bf16[9,512], index: 0, kind: input, shape index: {}]   ;;  %s13394_s1 = inlined_call_operand.vmem [shape: f32[2,4], index: 1, kind: input, shape index: {}]   ;;  %s13395_s2 = inlined_call_operand.vmem [shape: f32[2,2], index: 2, kind: input, shape index: {}]   ;;  %s13396_s3 = inlined_call_operand.vmem [shape: f32[9,512], index: 3, kind: input, shape index: {}]   ;;  %s13397_s4 = inlined_call_operand.vmem [shape: f32[9,128], index: 4, kind: input, shape index: {}]   ;;  %s13398_s5 = inlined_call_operand.vmem [shape: bf16[512,128], index: 5, kind: input, shape index: {}]   ;;  %s13399_s6 = inlined_call_operand.vmem [shape: bf16[2,128], index: 6, kind: input, shape index: {}]   ;;  %s13400_s7 = inlined_call_operand.vmem [shape: bf16[2,16,9], index: 7, kind: input, shape index: {}]   ;;  %s13401_s8 = inlined_call_operand.vmem [shape: f32[2,16,1], index: 8, kind: input, shape index: {}]   ;;  %s13402_s9 = inlined_call_operand.vmem [shape: bf16[2,32,144], index: 9, kind: input, shape index: {}]   ;;  %s13403_s10 = inlined_call_operand.vmem [shape: f32[2,32,1], index: 10, kind: input, shape index: {}]   ;;  %s13404_s11 = inlined_call_operand.vmem [shape: bf16[2,16,288], index: 11, kind: input, shape index: {}]   ;;  %s13405_s12 = inlined_call_operand.vmem [shape: f32[2,16,1], index: 12, kind: input, shape index: {}]   ;;  %s13406_s13 = inlined_call_operand.vmem [shape: bf16[2,10,144], index: 13, kind: input, shape index: {}]   ;;  %s13407_s14 = inlined_call_operand.vmem [shape: f32[2,10,1], index: 14, kind: input, shape index: {}]   ;;  %s13408_s15 = inlined_call_operand.vmem [shape: bf16[2,10,400], index: 15, kind: input, shape index: {}]   ;;  %s13409_s16 = inlined_call_operand.vmem [shape: bf16[2,4,400], index: 16, kind: input, shape index: {}]   ;;  %s13410_s17 = inlined_call_operand.vmem [shape: bf16[2,2,400], index: 17, kind: input, shape index: {}]   ;;  %s13411_s18 = inlined_call_operand.vmem [shape: f32[2,1,400], index: 18, kind: input, shape index: {}]   ;;  %s13412_s19 = inlined_call_operand.hbm [shape: bf16[2,400,300], index: 19, kind: input, shape index: {}]   ;;  %s13413_s20 = inlined_call_operand.vmem [shape: f32[2,1,300], index: 20, kind: input, shape index: {}]   ;;  %s13414_s21 = inlined_call_operand.vmem [shape: f32[2,1,300], index: 21, kind: input, shape index: {}]   ;;  %s13415_s22 = inlined_call_operand.vmem [shape: f32[2,1,1], index: 22, kind: input, shape index: {}]   ;;  %s13416_s23 = inlined_call_operand.vmem [shape: f32[2,2,1], index: 23, kind: output, shape index: {}]  }
   0x1   :  { %13793 = sst [smem:[#allocation125_spill]] %s13393_s0 }
   0x2   :  { %13794 = sst [smem:[#allocation126_spill]] %s13394_s1 }
   0x3   :  { %13795 = sst [smem:[#allocation127_spill]] %s13395_s2 }
   0x4   :  { %13796 = sst [smem:[#allocation128_spill]] %s13396_s3 }
   0x5   :  { %13797 = sst [smem:[#allocation129_spill]] %s13397_s4 }
   0x6   :  { %13798 = sst [smem:[#allocation130_spill]] %s13398_s5 }
   0x7   :  { %13799 = sst [smem:[#allocation131_spill]] %s13399_s6 }
   0x8   :  { %13800 = sst [smem:[#allocation132_spill]] %s13400_s7 }
   0x9   :  { %28 = vsyncpa [#allocation3], 0  ;;  %s71_s24 = sshll.u32 %s13412_s19, 4  ;;  %s8059_s25 = smov [#allocation2]   ;;  %s72_s24 = int_to_ptr.hbm [resolvable:$true] %s71_s24 }
   0xa   :  { %s73_s5 = sshll.u32 %s8059_s25, 4  ;;  %s8060_s1 = smov 192   ;;  %s74_s5 = int_to_ptr.vmem [resolvable:$true] %s73_s5 }
   0xb   :  { %s8061_s26 = smov 12  }
   0xc   :  { %79 = dma.hbm_to_vmem [thread:$0]  %s72_s24, 19200, %s74_s5, [#allocation3], %s8060_s1, %s8060_s1, %s8061_s26  }
   0xd   :  { %8057 = dma.done.wait [#allocation3], 19200  }
   0xe   :  { %8058 = vsyncadd [#allocation3], 4294948096  ;;  %vm213_vm0 = vcmask 1043456   ;;  %v8062_v0 = vmov 0   ;;  %vm214_vm1 = vcmask 1044480   ;;  %v8063_v1 = vmov 65535  }
   0xf   :  { %7977 = vset.pattern.permute.xlu0 %v8062_v0  ;;  %7979 = vset.pattern.permute.xlu2 %v8062_v0  ;;  %v215_v2 = vsel %vm213_vm0, 4294967295, %v8063_v1  ;;  %s13801_s6 = sld [smem:[#allocation125_spill]]  ;;  %vm209_vm2 = vcmask 72704   ;;  %v176_v18 = vld [vmem:[%s13401_s8] sm:$0xff]  ;;  %v177_v22 = vld [vmem:[%s13401_s8 + $0x8] sm:$0xff]  ;;  %s8064_s5 = smov 112  }
  0x10   :  { %7978 = vset.pattern.permute.xlu1 %v8062_v0  ;;  %v216_v3 = vsel %vm214_vm1, %v215_v2, 0  ;;  %s13803_s7 = sld [smem:[#allocation132_spill]]  ;;  %180 = vperm.xlu0 %7977, %v176_v18   ;;  %s13624_s1 = smov 15   ;;  %v824_v18 = vld [vmem:[%s13403_s10 + $0x8] sm:$0xff]  ;;  %vm865_vm11 = vcmask 130048   ;;  %vm2031_vm12 = vcmask 261120  }
  0x11   :  { %s13807_s30 = sld [smem:[#allocation128_spill]]  ;;  %s13622_s26 = smov 113   ;;  %vm2680_vm13 = vcmask 1041408   ;;  %vm2676_vm14 = vcmask 31744   ;;  %vm2836_vm15 = vcmask 1040384   ;;  %vm13640_vm0 = vcmask 80896  }
  0x12   :  { %s13620_s19 = smov 16   ;;  %s13634_s2 = smov 127  }
  0x13   :  { %s13618_s27 = smov 111   ;;  %s13632_s28 = smov 1  }
  0x14   :  { %s13616_s29 = smov 17   ;;  %s14165_s0 = sld [smem:[#allocation130_spill]] }
  0x15   :  { %v6797_v4 = vld [vmem:[%s13801_s6] sm:$0xf]  ;;  %v7746_v5 = vld [vmem:[%s13801_s6 + $0xc] sm:$0x10]  ;;  %v7744_v6 = vld [vmem:[%s13801_s6 + $0x4] sm:$0xf] }
  0x16   :  { %v6798_v7 = vor.u32 %v7746_v5, %v6797_v4  ;;  %v6799_v8 = vld [vmem:[%s13801_s6 + $0x10] sm:$0x10]  ;;  %v6805_v9 = vld [vmem:[%s13801_s6 + $0x8] sm:$0xf]  ;;  %v7747_v10 = vld [vmem:[%s13801_s6 + $0x14] sm:$0x10] }
  0x17   :  { %v6802_v11 = vor.u32 %v7744_v6, %v6799_v8  ;;  %v6806_v12 = vor.u32 %v7747_v10, %v6805_v9  ;;  %v7745_v13 = vld [vmem:[%s13801_s6 + $0xc] sm:$0xf]  ;;  %v6807_v14 = vld [vmem:[%s13801_s6 + $0x18] sm:$0x10]  ;;  %v7780_v17 = vld [vmem:[%s13803_s7] sm:$0xff]  ;;  %s14168_s3 = sld [smem:[#allocation129_spill]] }
  0x18   :  { %v8226_v15 = vand.u32 %v6798_v7, %v216_v3  ;;  %v6810_v16 = vor.u32 %v7745_v13, %v6807_v14  ;;  %185 = vperm.xlu0 %7977, %v177_v22   ;;  %v8254_v23 = vld [vmem:[%s13807_s30] sm:$0xff]  ;;  %v8259_v24 = vld [vmem:[%s13807_s30 + $0x8] sm:$0xff]  ;;  %v825_v13 = vld [vmem:[%s13403_s10 + $0x10] sm:$0xff]  ;;  %s13630_s4 = smov 121   ;;  %s13628_s24 = smov 120  }
  0x19   :  { %v8234_v19 = vand.u32 %v6802_v11, %v216_v3  ;;  %v8236_v20 = vand.u32 %v6806_v12, %v216_v3  ;;  %v8262_v29 = vperm.slane %v8254_v23, 4  ;;  %v8265_v31 = vperm.slane %v8259_v24, 4  ;;  %s13626_s25 = smov 7   ;;  %s13638_s6 = smov 119  }
  0x1a   :  { %13802 = vst [vmem:[#allocation5_spill] sm:$0xff] %v8226_v15  ;;  %236 = vmatpush.bf16.msra.mxu0 %v8226_v15  ;;  %v8239_v21 = vand.u32 %v6810_v16, %v216_v3 }
  0x1b   :  { %13804 = vst [vmem:[#allocation6_spill] sm:$0xff] %v8234_v19  ;;  %250 = vmatpush.bf16.msra.mxu1 %v8234_v19  ;;  %264 = vmatpush.bf16.msra.mxu2 %v8236_v20 }
  0x1c   :  { %13805 = vst [vmem:[#allocation7_spill] sm:$0xff] %v8236_v20  ;;  %278 = vmatpush.bf16.msra.mxu3 %v8239_v21 }
  0x1d   :  { %13806 = vst [vmem:[#allocation8_spill] sm:$0xff] %v8239_v21  ;;  %6811 = vmatmul.msk.bf16.vlgmr.msra.gmra.mxu0 %vm209_vm2, %v7780_v17 }
  0x1e   :  { %6812 = vmatmul.msk.bf16.vlgmr.msra.gmra.mxu1 %vm209_vm2, %v7780_v17  ;;  %6813 = vmatmul.msk.bf16.vlgmr.msra.gmra.mxu2 %vm209_vm2, %v7780_v17  ;;  %13808 = vst [vmem:[#allocation9_spill] sm:$0xff] %v8262_v29 }
  0x1f   :  { %6814 = vmatmul.msk.bf16.vlgmr.msra.gmra.mxu3 %vm209_vm2, %v7780_v17  ;;  %13809 = vst [vmem:[#allocation10_spill] sm:$0xff] %v8265_v31 }
  0x82   :  { %v181_v25 = vpop.permute.xlu0 %180 }
  0x8a   :  { %v186_v44 = vpop.permute.xlu0 %185 }
  0x9a   :  { %v238_v26 = vpop.f32.mrf.mxu0 }
  0x9b   :  { %v239_v27 = vadd.f32 %v238_v26, %v181_v25  ;;  %v252_v28 = vpop.f32.mrf.mxu1 }
  0x9c   :  { %v253_v30 = vadd.f32 %v252_v28, %v181_v25 }
  0x9d   :  { %v285_v32 = vmax.f32 %v239_v27, 0.0 }
  0x9e   :  { %v286_v33 = vmax.f32 %v253_v30, 0.0 }
  0x9f   :  { %557 = vrot.lane.b32.xlu1 %v285_v32, %s8064_s5  ;;  %v463_v34 = vmul.f32 %v8262_v29, %v285_v32 }
  0xa0   :  { %381 = vrot.lane.b32.xlu0 %v286_v33, %s13624_s1  ;;  %561 = vrot.lane.b32.xlu2 %v286_v33, %s8064_s5  ;;  %v464_v35 = vmul.f32 %v8265_v31, %v286_v33 }
  0xa1   :  { %v266_v37 = vpop.f32.mrf.mxu2 }
  0xa2   :  { %v8272_v36 = vpack.c.bf16 %v464_v35, %v463_v34  ;;  %v267_v38 = vadd.f32 %v266_v37, %v181_v25  ;;  %v280_v40 = vpop.f32.mrf.mxu3  ;;  %v240_v43 = vpop.f32.mrf.mxu0 }
  0xa3   :  { %v281_v41 = vadd.f32 %v280_v40, %v181_v25  ;;  %v241_v45 = vadd.f32 %v240_v43, %v186_v44  ;;  %v254_v47 = vpop.f32.mrf.mxu1  ;;  %v8476_v40 = vld [vmem:[%s13807_s30 + $0x10] sm:$0xff] }
  0xa4   :  { %v8277_v39 = vmax.f32 %v267_v38, 0.0  ;;  %v255_v48 = vadd.f32 %v254_v47, %v186_v44  ;;  %v8484_v43 = vperm.slane %v8476_v40, 4 }
  0xa5   :  { %v8295_v42 = vmax.f32 %v281_v41, 0.0  ;;  %v8313_v46 = vmax.f32 %v241_v45, 0.0  ;;  %v8481_v41 = vld [vmem:[%s13807_s30 + $0x18] sm:$0xff] }
  0xa6   :  { %v8321_v49 = vmax.f32 %v255_v48, 0.0  ;;  %13819 = vst [vmem:[#allocation20_spill] sm:$0xff] %v8484_v43  ;;  %v309_v48 = vlaneseq }
  0xa7   :  { %520 = vrot.lane.b32.xlu1 %v286_v33, %s13622_s26  ;;  %v467_v45 = vmul.f32 %v8262_v29, %v8313_v46 }
  0xa8   :  { %336 = vrot.lane.b32.xlu0 %v285_v32, %s13620_s19  ;;  %516 = vrot.lane.b32.xlu2 %v285_v32, %s13622_s26  ;;  %v468_v47 = vmul.f32 %v8265_v31, %v8321_v49  ;;  %v8507_v20 = vand.u32 127, %v309_v48  ;;  %v8527_v48 = vperm.slane %v8254_v23, 7 }
  0xa9   :  { %v268_v51 = vpop.f32.mrf.mxu2 }
  0xaa   :  { %v269_v52 = vadd.f32 %v268_v51, %v186_v44  ;;  %v282_v56 = vpop.f32.mrf.mxu3  ;;  %vm573_vm3 = vcmp.lt.s32.totalorder %v8507_v20, 112  ;;  %13829 = vst [vmem:[#allocation30_spill] sm:$0xff] %v8527_v48  ;;  %vm532_vm4 = vcmp.lt.s32.totalorder %v8507_v20, 113  ;;  %vm491_vm5 = vcmp.lt.s32.totalorder %v8507_v20, 127 }
  0xab   :  { %v283_v58 = vadd.f32 %v282_v56, %v186_v44  ;;  %v8487_v44 = vperm.slane %v8481_v41, 4  ;;  %vm352_vm6 = vcmp.lt.s32.totalorder %v8507_v20, 16  ;;  %vm614_vm7 = vcmp.lt.s32.totalorder %v8507_v20, 111 }
  0xac   :  { %v8345_v54 = vmax.f32 %v269_v52, 0.0  ;;  %vm434_vm8 = vcmp.lt.s32.totalorder %v8507_v20, 1  ;;  %vm393_vm9 = vcmp.lt.s32.totalorder %v8507_v20, 15  ;;  %vm311_vm10 = vcmp.lt.s32.totalorder %v8507_v20, 17 }
  0xad   :  { %v8367_v61 = vmax.f32 %v283_v58, 0.0  ;;  %13820 = vst [vmem:[#allocation21_spill] sm:$0xff] %v8487_v44 }
  0xae   :  { %v469_v52 = vmul.f32 %v8484_v43, %v8345_v54 }
  0xaf   :  { %479 = vrot.lane.b32.xlu1 %v286_v33, %s13634_s2  ;;  %v470_v56 = vmul.f32 %v8487_v44, %v8367_v61 }
  0xb0   :  { %565 = vrot.lane.b32.xlu0 %v8277_v39, %s8064_s5  ;;  %475 = vrot.lane.b32.xlu2 %v285_v32, %s13634_s2 }
  0xb1   :  { %v8509_v21 = vpack.c.bf16 %v470_v56, %v469_v52 }
  0xb3   :  { %13823 = vst [vmem:[#allocation24_spill] sm:$0xff] %v8509_v21  ;;  %v729_v31 = vunpack.c.l.b16 %v8509_v21 }
  0xb7   :  { %602 = vrot.lane.b32.xlu1 %v286_v33, %s13618_s27 }
  0xb8   :  { %524 = vrot.lane.b32.xlu0 %v8277_v39, %s13622_s26  ;;  %598 = vrot.lane.b32.xlu2 %v285_v32, %s13618_s27 }
  0xbf   :  { %422 = vrot.lane.b32.xlu1 %v286_v33, %s13632_s28 }
  0xc0   :  { %483 = vrot.lane.b32.xlu0 %v8277_v39, %s13634_s2  ;;  %418 = vrot.lane.b32.xlu2 %v285_v32, %s13632_s28 }
  0xc7   :  { %377 = vrot.lane.b32.xlu1 %v285_v32, %s13624_s1 }
  0xc8   :  { %606 = vrot.lane.b32.xlu0 %v8277_v39, %s13618_s27  ;;  %340 = vrot.lane.b32.xlu2 %v286_v33, %s13620_s19 }
  0xcf   :  { %297 = vrot.lane.b32.xlu1 %v286_v33, %s13616_s29 }
  0xd0   :  { %430 = vrot.lane.b32.xlu0 %v8295_v42, %s13632_s28  ;;  %293 = vrot.lane.b32.xlu2 %v285_v32, %s13616_s29 }
  0xd7   :  { %528 = vrot.lane.b32.xlu1 %v8295_v42, %s13622_s26 }
  0xd8   :  { %487 = vrot.lane.b32.xlu0 %v8295_v42, %s13634_s2  ;;  %569 = vrot.lane.b32.xlu2 %v8295_v42, %s8064_s5 }
  0xdf   :  { %348 = vrot.lane.b32.xlu1 %v8295_v42, %s13620_s19 }
  0xe0   :  { %305 = vrot.lane.b32.xlu0 %v8295_v42, %s13616_s29  ;;  %389 = vrot.lane.b32.xlu2 %v8295_v42, %s13624_s1 }
  0xe7   :  { %385 = vrot.lane.b32.xlu1 %v8277_v39, %s13624_s1 }
  0xe8   :  { %518 = vrot.lane.b32.xlu0 %v8313_v46, %s13622_s26  ;;  %426 = vrot.lane.b32.xlu2 %v8277_v39, %s13632_s28 }
  0xef   :  { %559 = vrot.lane.b32.xlu1 %v8313_v46, %s8064_s5 }
  0xf0   :  { %477 = vrot.lane.b32.xlu0 %v8313_v46, %s13634_s2  ;;  %563 = vrot.lane.b32.xlu2 %v8321_v49, %s8064_s5 }
  0xf7   :  { %383 = vrot.lane.b32.xlu1 %v8321_v49, %s13624_s1 }
  0xf8   :  { %600 = vrot.lane.b32.xlu0 %v8313_v46, %s13618_s27  ;;  %522 = vrot.lane.b32.xlu2 %v8321_v49, %s13622_s26 }
  0xfa   :  { %v8335_v50 = vpop.permute.xlu2 %561 }
  0xff   :  { %338 = vrot.lane.b32.xlu1 %v8313_v46, %s13620_s19 }
 0x100   :  { %420 = vrot.lane.b32.xlu0 %v8313_v46, %s13632_s28  ;;  %481 = vrot.lane.b32.xlu2 %v8321_v49, %s13634_s2 }
 0x102   :  { %v8343_v53 = vpop.permute.xlu2 %516 }
 0x107   :  { %567 = vrot.lane.b32.xlu1 %v8345_v54, %s8064_s5 }
 0x108   :  { %342 = vrot.lane.b32.xlu0 %v8321_v49, %s13620_s19  ;;  %604 = vrot.lane.b32.xlu2 %v8321_v49, %s13618_s27 }
 0x10a   :  { %v8353_v55 = vpop.permute.xlu2 %475 }
 0x10f   :  { %526 = vrot.lane.b32.xlu1 %v8345_v54, %s13622_s26 }
 0x110   :  { %295 = vrot.lane.b32.xlu0 %v8313_v46, %s13616_s29  ;;  %424 = vrot.lane.b32.xlu2 %v8321_v49, %s13632_s28 }
 0x111   :  { %v8361_v57 = vpop.permute.xlu1 %557 }
 0x112   :  { %v8363_v59 = vpop.permute.xlu0 %381  ;;  %v8365_v60 = vpop.permute.xlu2 %598 }
 0x113   :  { %13810 = vst [vmem:[#allocation11_spill] sm:$0xff] %v8363_v59 }
 0x114   :  { %13811 = vst [vmem:[#allocation12_spill] sm:$0xff] %v8365_v60 }
 0x117   :  { %485 = vrot.lane.b32.xlu1 %v8345_v54, %s13634_s2 }
 0x118   :  { %571 = vrot.lane.b32.xlu0 %v8367_v61, %s8064_s5  ;;  %379 = vrot.lane.b32.xlu2 %v8313_v46, %s13624_s1  ;;  %v466_v46 = vmul.f32 %v8487_v44, %v8295_v42  ;;  %v8548_v44 = vperm.slane %v8254_v23, 5 }
 0x119   :  { %v8375_v62 = vpop.permute.xlu1 %520 }
 0x11a   :  { %v8377_v63 = vpop.permute.xlu0 %336  ;;  %v8379_v0 = vpop.permute.xlu2 %418  ;;  %13833 = vst [vmem:[#allocation34_spill] sm:$0xff] %v8548_v44 }
 0x11b   :  { %13812 = vst [vmem:[#allocation13_spill] sm:$0xff] %v8377_v63 }
 0x11f   :  { %608 = vrot.lane.b32.xlu1 %v8345_v54, %s13618_s27 }
 0x120   :  { %391 = vrot.lane.b32.xlu0 %v8367_v61, %s13624_s1  ;;  %299 = vrot.lane.b32.xlu2 %v8321_v49, %s13616_s29  ;;  %v473_v49 = vpack.c.bf16 %v468_v47, %v467_v45  ;;  %v723_v45 = vunpack.c.l.b16 %v8272_v36  ;;  %v724_v47 = vunpack.c.h.b16 %v8272_v36 }
 0x121   :  { %v8387_v1 = vpop.permute.xlu1 %479 }
 0x122   :  { %v8389_v2 = vpop.permute.xlu0 %565  ;;  %v8391_v3 = vpop.permute.xlu2 %340  ;;  %v728_v15 = vunpack.c.h.b16 %v473_v49 }
 0x123   :  { %13813 = vst [vmem:[#allocation14_spill] sm:$0xff] %v8391_v3  ;;  %v576_v52 = vsel %vm573_vm3, %v8335_v50, %v8389_v2 }
 0x124   :  { %v8541_v36 = vpack.c.b16 %v728_v15, %v724_v47  ;;  %v8559_v15 = vperm.slane %v8259_v24, 1  ;;  %v8570_v47 = vperm.slane %v8259_v24, 3 }
 0x126   :  { %13831 = vst [vmem:[#allocation32_spill] sm:$0xff] %v8541_v36  ;;  %v8596_v36 = vperm.slane %v8259_v24, 2 }
 0x127   :  { %432 = vrot.lane.b32.xlu1 %v8367_v61, %s13632_s28  ;;  %13835 = vst [vmem:[#allocation36_spill] sm:$0xff] %v8559_v15 }
 0x128   :  { %428 = vrot.lane.b32.xlu0 %v8345_v54, %s13632_s28  ;;  %530 = vrot.lane.b32.xlu2 %v8367_v61, %s13622_s26  ;;  %13838 = vst [vmem:[#allocation39_spill] sm:$0xff] %v8570_v47 }
 0x129   :  { %v8399_v4 = vpop.permute.xlu1 %602  ;;  %13841 = vst [vmem:[#allocation42_spill] sm:$0xff] %v8596_v36 }
 0x12a   :  { %v8401_v5 = vpop.permute.xlu0 %524  ;;  %v8403_v6 = vpop.permute.xlu2 %293 }
 0x12f   :  { %489 = vrot.lane.b32.xlu1 %v8367_v61, %s13634_s2 }
 0x130   :  { %344 = vrot.lane.b32.xlu0 %v8277_v39, %s13620_s19  ;;  %350 = vrot.lane.b32.xlu2 %v8367_v61, %s13620_s19 }
 0x131   :  { %v8411_v7 = vpop.permute.xlu1 %422 }
 0x132   :  { %v8413_v8 = vpop.permute.xlu0 %483  ;;  %v8415_v9 = vpop.permute.xlu2 %569 }
 0x137   :  { %307 = vrot.lane.b32.xlu1 %v8367_v61, %s13616_s29 }
 0x138   :  { %612 = vrot.lane.b32.xlu0 %v8367_v61, %s13618_s27  ;;  %387 = vrot.lane.b32.xlu2 %v8345_v54, %s13624_s1 }
 0x139   :  { %v8423_v10 = vpop.permute.xlu1 %377 }
 0x13a   :  { %v8425_v11 = vpop.permute.xlu0 %606  ;;  %v8427_v12 = vpop.permute.xlu2 %389 }
 0x13b   :  { %13814 = vst [vmem:[#allocation15_spill] sm:$0xff] %v8425_v11 }
 0x13c   :  { %13815 = vst [vmem:[#allocation16_spill] sm:$0xff] %v8427_v12 }
 0x13f   :  { %346 = vrot.lane.b32.xlu1 %v8345_v54, %s13620_s19 }
 0x140   :  { %839 = vperm.xlu0 %7977, %v825_v13   ;;  %610 = vrot.lane.b32.xlu2 %v8295_v42, %s13618_s27 }
 0x141   :  { %v8436_v14 = vpop.permute.xlu1 %297 }
 0x142   :  { %v8438_v16 = vpop.permute.xlu0 %430  ;;  %v8440_v17 = vpop.permute.xlu2 %426 }
 0x147   :  { %301 = vrot.lane.b32.xlu1 %v8277_v39, %s13616_s29 }
 0x148   :  { %834 = vperm.xlu0 %7977, %v824_v18   ;;  %303 = vrot.lane.b32.xlu2 %v8345_v54, %s13616_s29  ;;  %v465_v18 = vmul.f32 %v8484_v43, %v8277_v39  ;;  %v727_v54 = vunpack.c.l.b16 %v473_v49  ;;  %v8518_v39 = vperm.slane %v8259_v24, 7  ;;  %v8544_v49 = vperm.slane %v8254_v23, 6 }
 0x149   :  { %v8449_v22 = vpop.permute.xlu1 %528 }
 0x14a   :  { %v8451_v25 = vpop.permute.xlu0 %487  ;;  %v8453_v26 = vpop.permute.xlu2 %563  ;;  %v8511_v19 = vpack.c.bf16 %v466_v46, %v465_v18  ;;  %13826 = vst [vmem:[#allocation27_spill] sm:$0xff] %v8518_v39  ;;  %v578_v18 = vsel %vm573_vm3, %v8361_v57, %v8335_v50  ;;  %v8539_v46 = vpack.c.b16 %v727_v54, %v723_v45  ;;  %v587_v50 = vmul.f32 %v8518_v39, %v576_v52 }
 0x14b   :  { %13832 = vst [vmem:[#allocation33_spill] sm:$0xff] %v8544_v49  ;;  %v586_v54 = vmul.f32 %v8527_v48, %v578_v18  ;;  %v8563_v45 = vperm.slane %v8259_v24, 6  ;;  %v8573_v52 = vperm.slane %v8476_v40, 7 }
 0x14c   :  { %13824 = vst [vmem:[#allocation25_spill] sm:$0xff] %v8511_v19  ;;  %v725_v56 = vunpack.c.l.b16 %v8511_v19  ;;  %v537_v19 = vsel %vm532_vm4, %v8343_v53, %v8375_v62 }
 0x14d   :  { %13830 = vst [vmem:[#allocation31_spill] sm:$0xff] %v8539_v46  ;;  %v545_v21 = vmul.f32 %v8544_v49, %v537_v19  ;;  %v8599_v19 = vperm.slane %v8254_v23, 2 }
 0x14e   :  { %v8550_v29 = vpack.c.b16 %v729_v31, %v725_v56  ;;  %13836 = vst [vmem:[#allocation37_spill] sm:$0xff] %v8563_v45  ;;  %v8567_v31 = vperm.slane %v8259_v24, 5  ;;  %v8576_v56 = vperm.slane %v8481_v41, 7 }
 0x14f   :  { %13839 = vst [vmem:[#allocation40_spill] sm:$0xff] %v8573_v52 }
 0x150   :  { %13834 = vst [vmem:[#allocation35_spill] sm:$0xff] %v8550_v29  ;;  %v496_v29 = vsel %vm491_vm5, %v8353_v55, %v8387_v1 }
 0x151   :  { %v8455_v27 = vpop.permute.xlu1 %348  ;;  %13837 = vst [vmem:[#allocation38_spill] sm:$0xff] %v8567_v31 }
 0x152   :  { %13816 = vst [vmem:[#allocation17_spill] sm:$0xff] %v8455_v27  ;;  %v8457_v28 = vpop.permute.xlu0 %305  ;;  %v8459_v30 = vpop.permute.xlu2 %522  ;;  %v504_v27 = vmul.f32 %v8548_v44, %v496_v29  ;;  %v580_v29 = vsel %vm573_vm3, %v8415_v9, %v8361_v57  ;;  %v619_v57 = vsel %vm614_vm7, %v8365_v60, %v8399_v4  ;;  %v398_v60 = vsel %vm393_vm9, %v8423_v10, %v8363_v59 }
 0x153   :  { %13817 = vst [vmem:[#allocation18_spill] sm:$0xff] %v8457_v28 }
 0x154   :  { %13840 = vst [vmem:[#allocation41_spill] sm:$0xff] %v8576_v56 }
 0x155   :  { %13842 = vst [vmem:[#allocation43_spill] sm:$0xff] %v8599_v19 }
 0x159   :  { %v8461_v32 = vpop.permute.xlu1 %385 }
 0x15a   :  { %13818 = vst [vmem:[#allocation19_spill] sm:$0xff] %v8461_v32  ;;  %v8463_v33 = vpop.permute.xlu0 %518  ;;  %v8465_v34 = vpop.permute.xlu2 %481  ;;  %v357_v32 = vsel %vm352_vm6, %v8377_v63, %v8391_v3 }
 0x15b   :  { %v8620_v63 = vmul.f32 %v8559_v15, %v357_v32 }
 0x15d   :  { %13846 = vst [vmem:[#allocation47_spill] sm:$0xff] %v8620_v63 }
 0x161   :  { %v8467_v35 = vpop.permute.xlu1 %559 }
 0x162   :  { %v8469_v37 = vpop.permute.xlu0 %477  ;;  %v8471_v38 = vpop.permute.xlu2 %604  ;;  %v579_v18 = vsel %vm573_vm3, %v8467_v35, %v8453_v26 }
 0x163   :  { %v590_v28 = vmul.f32 %v8527_v48, %v579_v18  ;;  %v589_v48 = vmul.f32 %v8576_v56, %v580_v29 }
 0x169   :  { %v8493_v51 = vpop.permute.xlu1 %383 }
 0x16a   :  { %13821 = vst [vmem:[#allocation22_spill] sm:$0xff] %v8493_v51  ;;  %v8499_v58 = vpop.permute.xlu0 %600  ;;  %v8501_v13 = vpop.permute.xlu2 %424  ;;  %v594_v51 = vpack.c.bf16 %v587_v50, %v586_v54  ;;  %v8626_v50 = vperm.slane %v8476_v40, 3  ;;  %v8644_v54 = vld [vmem:[%s13807_s30 + $0x28] ss:$0 sm:$0xff] }
 0x16b   :  { %13822 = vst [vmem:[#allocation23_spill] sm:$0xff] %v8501_v13  ;;  %v8614_v13 = vperm.slane %v8254_v23, 3 }
 0x16c   :  { %13848 = vst [vmem:[#allocation49_spill] sm:$0xff] %v8626_v50  ;;  %v783_v18 = vunpack.c.l.b16 %v594_v51 }
 0x16d   :  { %13845 = vst [vmem:[#allocation46_spill] sm:$0xff] %v8614_v13 }
 0x171   :  { %v8514_v61 = vpop.permute.xlu1 %338 }
 0x172   :  { %13825 = vst [vmem:[#allocation26_spill] sm:$0xff] %v8514_v61  ;;  %v8520_v43 = vpop.permute.xlu0 %420  ;;  %v8522_v42 = vpop.permute.xlu2 %379 }
 0x173   :  { %13827 = vst [vmem:[#allocation28_spill] sm:$0xff] %v8520_v43  ;;  %v535_v43 = vsel %vm532_vm4, %v8375_v62, %v8401_v5  ;;  %v494_v62 = vsel %vm491_vm5, %v8387_v1, %v8413_v8  ;;  %v8647_v1 = vperm.slane %v8481_v41, 3 }
 0x174   :  { %13828 = vst [vmem:[#allocation29_spill] sm:$0xff] %v8522_v42  ;;  %v546_v32 = vmul.f32 %v8563_v45, %v535_v43 }
 0x175   :  { %13849 = vst [vmem:[#allocation50_spill] sm:$0xff] %v8647_v1 }
 0x179   :  { %v8593_v61 = vpop.permute.xlu1 %567 }
 0x17a   :  { %v8601_v46 = vpop.permute.xlu0 %342  ;;  %v577_v42 = vsel %vm573_vm3, %v8453_v26, %v8593_v61  ;;  %v8607_v3 = vpop.permute.xlu2 %299  ;;  %v8623_v26 = vperm.slane %v8259_v24, 0 }
 0x17b   :  { %13843 = vst [vmem:[#allocation44_spill] sm:$0xff] %v8601_v46  ;;  %v591_v46 = vmul.f32 %v8518_v39, %v577_v42  ;;  %v574_v42 = vsel %vm573_vm3, %v8389_v2, %v8415_v9  ;;  %v784_v39 = vunpack.c.h.b16 %v594_v51  ;;  %v8652_v2 = vld [vmem:[%s13807_s30 + $0x20] ss:$0 sm:$0xff]  ;;  %v617_v9 = vsel %vm614_vm7, %v8399_v4, %v8425_v11 }
 0x17c   :  { %13844 = vst [vmem:[#allocation45_spill] sm:$0xff] %v8607_v3  ;;  %v588_v51 = vmul.f32 %v8573_v52, %v574_v42  ;;  %v538_v3 = vsel %vm532_vm4, %v8463_v33, %v8459_v30  ;;  %v400_v4 = vsel %vm393_vm9, %v8427_v12, %v8423_v10  ;;  %v628_v29 = vmul.f32 %v8644_v54, %v617_v9 }
 0x17d   :  { %13847 = vst [vmem:[#allocation48_spill] sm:$0xff] %v8623_v26  ;;  %v596_v24 = vpack.c.bf16 %v591_v46, %v590_v28  ;;  %v505_v46 = vmul.f32 %v8567_v31, %v494_v62  ;;  %v8682_v11 = vperm.slane %v8476_v40, 5  ;;  %v553_v10 = vpack.c.bf16 %v546_v32, %v545_v21 }
 0x17e   :  { %v549_v9 = vmul.f32 %v8544_v49, %v538_v3  ;;  %v406_v21 = vmul.f32 %v8599_v19, %v400_v4  ;;  %v8707_v32 = vperm.slane %v8476_v40, 6  ;;  %v8710_v3 = vperm.slane %v8481_v41, 6 }
 0x17f   :  { %v787_v28 = vunpack.c.l.b16 %v596_v24  ;;  %v788_v43 = vunpack.c.h.b16 %v596_v24  ;;  %13850 = vst [vmem:[#allocation51_spill] sm:$0xff] %v8682_v11  ;;  %v763_v49 = vunpack.c.l.b16 %v553_v10 }
 0x180   :  { %13853 = vst [vmem:[#allocation54_spill] sm:$0xff] %v8707_v32 }
 0x181   :  { %v8677_v62 = vpop.permute.xlu1 %526  ;;  %v791_v42 = vpack.c.b16 %v787_v28, %v783_v18  ;;  %v792_v24 = vpack.c.b16 %v788_v43, %v784_v39  ;;  %v627_v18 = vmul.f32 %v8652_v2, %v619_v57  ;;  %v8694_v39 = vperm.slane %v8481_v41, 5  ;;  %13854 = vst [vmem:[#allocation55_spill] sm:$0xff] %v8710_v3 }
 0x182   :  { %v8684_v15 = vpop.permute.xlu0 %295  ;;  %v536_v59 = vsel %vm532_vm4, %v8459_v30, %v8677_v62  ;;  %v8690_v63 = vpop.permute.xlu2 %530  ;;  %v439_v43 = vsel %vm434_vm8, %v8379_v0, %v8411_v7  ;;  %v407_v30 = vmul.f32 %v8596_v36, %v398_v60  ;;  %v512_v57 = vpack.c.bf16 %v505_v46, %v504_v27 }
 0x183   :  { %13851 = vst [vmem:[#allocation52_spill] sm:$0xff] %v8684_v15  ;;  %v550_v28 = vmul.f32 %v8563_v45, %v536_v59  ;;  %872 = vmatpush.bf16.msrb.mxu0 %v791_v42  ;;  %v8702_v15 = vpack.c.bf16 %v589_v48, %v588_v51  ;;  %910 = vmatpush.bf16.msrb.mxu2 %v792_v24  ;;  %v8713_v42 = vperm.slane %v8254_v23, 0  ;;  %v764_v45 = vunpack.c.h.b16 %v553_v10 }
 0x184   :  { %13852 = vst [vmem:[#allocation53_spill] sm:$0xff] %v8694_v39  ;;  %v8715_v48 = vpack.c.bf16 %v628_v29, %v627_v18  ;;  %v8718_v60 = vmul.f32 %v8570_v47, %v439_v43  ;;  %v8721_v51 = vperm.slane %v8254_v23, 1  ;;  %v497_v27 = vsel %vm491_vm5, %v8469_v37, %v8465_v34 }
 0x185   :  { %v555_v59 = vpack.c.bf16 %v550_v28, %v549_v9  ;;  %13855 = vst [vmem:[#allocation56_spill] sm:$0xff] %v8713_v42  ;;  %v8729_v46 = vpack.c.bf16 %v407_v30, %v406_v21  ;;  %v743_v28 = vunpack.c.l.b16 %v512_v57  ;;  %v744_v23 = vunpack.c.h.b16 %v512_v57 }
 0x186   :  { %13856 = vst [vmem:[#allocation57_spill] sm:$0xff] %v8721_v51  ;;  %v8734_v43 = vperm.slane %v8476_v40, 2  ;;  %v508_v21 = vmul.f32 %v8548_v44, %v497_v27 }
 0x187   :  { %v767_v4 = vunpack.c.l.b16 %v555_v59  ;;  %v768_v24 = vunpack.c.h.b16 %v555_v59  ;;  %v8737_v59 = vperm.slane %v8481_v41, 2 }
 0x188   :  { %13857 = vst [vmem:[#allocation58_spill] sm:$0xff] %v8734_v43 }
 0x189   :  { %v8731_v29 = vpop.permute.xlu1 %485  ;;  %v771_v10 = vpack.c.b16 %v767_v4, %v763_v49  ;;  %v772_v18 = vpack.c.b16 %v768_v24, %v764_v45  ;;  %13858 = vst [vmem:[#allocation59_spill] sm:$0xff] %v8737_v59  ;;  %v435_v49 = vsel %vm434_vm8, %v8440_v17, %v8438_v16  ;;  %v437_v45 = vsel %vm434_vm8, %v8411_v7, %v8440_v17 }
 0x18a   :  { %v572_v9 = vpop.permute.xlu0 %571  ;;  %v495_v12 = vsel %vm491_vm5, %v8465_v34, %v8731_v29  ;;  %v8760_v24 = vpop.permute.xlu2 %350  ;;  %v316_v17 = vsel %vm311_vm10, %v8403_v6, %v8436_v14  ;;  %v450_v27 = vmul.f32 %v8647_v1, %v435_v49  ;;  %v492_v49 = vsel %vm491_vm5, %v8413_v8, %v8451_v25 }
 0x18b   :  { %v509_v57 = vmul.f32 %v8567_v31, %v495_v12  ;;  %873 = vmatpush.bf16.msrb.mxu0 %v771_v10  ;;  %v575_v34 = vsel %vm573_vm3, %v8593_v61, %v572_v9  ;;  %v581_v4 = vsel %vm573_vm3, %v572_v9, %v8467_v35  ;;  %911 = vmatpush.bf16.msrb.mxu2 %v772_v18 }
 0x18c   :  { %v441_v12 = vsel %vm434_vm8, %v8438_v16, %v8379_v0  ;;  %v449_v9 = vmul.f32 %v8626_v50, %v437_v45  ;;  %v533_v10 = vsel %vm532_vm4, %v8401_v5, %v8449_v22  ;;  %v620_v0 = vsel %vm614_vm7, %v8499_v58, %v8471_v38 }
 0x18d   :  { %v514_v61 = vpack.c.bf16 %v509_v57, %v508_v21  ;;  %v592_v16 = vmul.f32 %v8573_v52, %v575_v34  ;;  %v593_v18 = vmul.f32 %v8576_v56, %v581_v4  ;;  %v539_v5 = vsel %vm532_vm4, %v8449_v22, %v8343_v53  ;;  %v13859_v4 = vld [vmem:[#allocation13_spill] sm:$0xff] }
 0x18e   :  { %v534_v45 = vsel %vm532_vm4, %v8677_v62, %v8690_v63  ;;  %v540_v34 = vsel %vm532_vm4, %v8690_v63, %v8463_v33  ;;  %v498_v8 = vsel %vm491_vm5, %v8451_v25, %v8353_v55  ;;  %v447_v62 = vmul.f32 %v8614_v13, %v441_v12 }
 0x18f   :  { %v747_v21 = vunpack.c.l.b16 %v514_v61  ;;  %v748_v57 = vunpack.c.h.b16 %v514_v61  ;;  %v13860_v61 = vld [vmem:[#allocation17_spill] sm:$0xff]  ;;  %v547_v30 = vmul.f32 %v8707_v32, %v533_v10  ;;  %v631_v63 = vmul.f32 %v8652_v2, %v620_v0 }
 0x190   :  { %v359_v53 = vsel %vm352_vm6, %v13860_v61, %v13859_v4  ;;  %v551_v25 = vmul.f32 %v8707_v32, %v534_v45  ;;  %v552_v4 = vmul.f32 %v8710_v3, %v540_v34  ;;  %v8822_v56 = vpack.c.bf16 %v593_v18, %v592_v16  ;;  %v13863_v18 = vld [vmem:[#allocation28_spill] sm:$0xff]  ;;  %v13866_v34 = vld [vmem:[#allocation31_spill] sm:$0xff] }
 0x191   :  { %v8809_v22 = vpop.permute.xlu1 %608  ;;  %v751_v35 = vpack.c.b16 %v747_v21, %v743_v28  ;;  %v752_v7 = vpack.c.b16 %v748_v57, %v744_v23  ;;  %v506_v23 = vmul.f32 %v8682_v11, %v492_v49  ;;  %v507_v2 = vmul.f32 %v8694_v39, %v498_v8  ;;  %v13861_v21 = vld [vmem:[#allocation18_spill] sm:$0xff] }
 0x192   :  { %v8814_v33 = vpop.permute.xlu0 %391  ;;  %v618_v55 = vsel %vm614_vm7, %v8471_v38, %v8809_v22  ;;  %v548_v12 = vmul.f32 %v8710_v3, %v539_v5  ;;  %v365_v10 = vmul.f32 %v8721_v51, %v359_v53  ;;  %v325_v38 = vmul.f32 %v8623_v26, %v316_v17  ;;  %v13864_v49 = vld [vmem:[#allocation22_spill] sm:$0xff]  ;;  %v13865_v5 = vld [vmem:[#allocation29_spill] sm:$0xff]  ;;  %v13867_v3 = vld [vmem:[#allocation32_spill] sm:$0xff] }
 0x193   :  { %v632_v28 = vmul.f32 %v8644_v54, %v618_v55  ;;  %874 = vmatpush.bf16.msrb.mxu0 %v751_v35  ;;  %912 = vmatpush.bf16.msrb.mxu2 %v752_v7  ;;  %v8830_v0 = vpack.c.bf16 %v450_v27, %v449_v9  ;;  %v318_v16 = vsel %vm311_vm10, %v13861_v21, %v8403_v6  ;;  %v13862_v35 = vld [vmem:[#allocation23_spill] sm:$0xff]  ;;  %v8848_v9 = vpop.permute.xlu2 %387  ;;  %v789_v45 = vunpack.c.l.b16 %v8822_v56 }
 0x194   :  { %v440_v57 = vsel %vm434_vm8, %v13863_v18, %v13862_v35  ;;  %v399_v7 = vsel %vm393_vm9, %v13865_v5, %v13864_v49  ;;  %v401_v17 = vsel %vm393_vm9, %v8814_v33, %v13865_v5  ;;  %v455_v6 = vpack.c.bf16 %v8718_v60, %v447_v62  ;;  %v7781_v60 = vld [vmem:[%s13402_s9 + $0x4] sm:$0xf]  ;;  %v6819_v62 = vld [vmem:[%s13402_s9 + $0x8] sm:$0xf0] }
 0x195   :  { %v637_v54 = vpack.c.bf16 %v632_v28, %v631_v63  ;;  %v8851_v27 = vpack.c.bf16 %v552_v4, %v551_v25  ;;  %v8855_v63 = vpack.c.bf16 %v507_v2, %v506_v23  ;;  %v8857_v55 = vpack.c.bf16 %v548_v12, %v547_v30  ;;  %v13868_v25 = vld [vmem:[#allocation47_spill] sm:$0xff] }
 0x196   :  { %v324_v28 = vmul.f32 %v8713_v42, %v318_v16  ;;  %v8868_v4 = vpack.c.bf16 %v13868_v25, %v365_v10  ;;  %v410_v23 = vmul.f32 %v8599_v19, %v401_v17  ;;  %v13871_v16 = vunpack.c.h.b16 %v8715_v48  ;;  %v13872_v10 = vld [vmem:[#allocation44_spill] sm:$0xff] }
 0x197   :  { %875 = vmatpush.bf16.msrb.mxu0 %v13866_v34  ;;  %v807_v8 = vunpack.c.l.b16 %v637_v54  ;;  %v808_v53 = vunpack.c.h.b16 %v637_v54  ;;  %913 = vmatpush.bf16.msrb.mxu2 %v13867_v3  ;;  %v13869_v54 = vld [vmem:[#allocation26_spill] sm:$0xff]  ;;  %v13870_v3 = vunpack.c.l.b16 %v8715_v48  ;;  %v452_v34 = vmul.f32 %v8570_v47, %v440_v57 }
 0x198   :  { %v360_v30 = vsel %vm352_vm6, %v8760_v24, %v13869_v54  ;;  %v411_v32 = vmul.f32 %v8596_v36, %v399_v7  ;;  %v358_v25 = vsel %vm352_vm6, %v13869_v54, %v13872_v10  ;;  %v13873_v48 = vunpack.c.l.b16 %v8702_v15 }
 0x199   :  { %v433_v2 = vpop.permute.xlu1 %432  ;;  %v811_v12 = vpack.c.b16 %v807_v8, %v13870_v3  ;;  %v812_v5 = vpack.c.b16 %v808_v53, %v13871_v16  ;;  %v769_v57 = vunpack.c.l.b16 %v8851_v27  ;;  %v8892_v53 = vor.u32 %v7781_v60, %v6819_v62 }
 0x19a   :  { %v429_v52 = vpop.permute.xlu0 %428  ;;  %v442_v17 = vsel %vm434_vm8, %v433_v2, %v13863_v18  ;;  %v793_v8 = vpack.c.b16 %v789_v45, %v13873_v48  ;;  %v369_v7 = vmul.f32 %v8721_v51, %v360_v30  ;;  %v703_v54 = vunpack.c.l.b16 %v455_v6 }
 0x19b   :  { %v451_v19 = vmul.f32 %v8614_v13, %v442_v17  ;;  %898 = vmatpush.bf16.msrb.mxu1 %v811_v12  ;;  %936 = vmatpush.bf16.msrb.mxu3 %v812_v5  ;;  %v8895_v3 = vpack.c.bf16 %v325_v38, %v324_v28  ;;  %v765_v18 = vunpack.c.l.b16 %v8857_v55  ;;  %v704_v17 = vunpack.c.h.b16 %v455_v6  ;;  %v13874_v13 = vld [vmem:[#allocation36_spill] sm:$0xff]  ;;  %v13876_v6 = vld [vmem:[#allocation19_spill] sm:$0xff] }
 0x19c   :  { %v416_v12 = vpack.c.bf16 %v411_v32, %v410_v23  ;;  %v370_v36 = vmul.f32 %v13874_v13, %v358_v25  ;;  %v663_v45 = vunpack.c.l.b16 %v8868_v4  ;;  %v745_v60 = vunpack.c.l.b16 %v8855_v63  ;;  %v13875_v32 = vld [vmem:[#allocation16_spill] sm:$0xff]  ;;  %v13877_v5 = vld [vmem:[#allocation11_spill] sm:$0xff]  ;;  %v611_v25 = vpop.permute.xlu2 %610 }
 0x19d   :  { %v457_v16 = vpack.c.bf16 %v452_v34, %v451_v19  ;;  %v773_v30 = vpack.c.b16 %v769_v57, %v765_v18  ;;  %v664_v19 = vunpack.c.h.b16 %v8868_v4  ;;  %v394_v23 = vsel %vm393_vm9, %v13876_v6, %v13875_v32 }
 0x19e   :  { %6831 = vmatmul.msk.bf16.vlgmr.msrb.gmra.mxu1 %vm865_vm11, %v8892_v53  ;;  %6833 = vmatmul.msk.bf16.vlgmr.msrb.gmra.mxu3 %vm865_vm11, %v8892_v53  ;;  %v396_v34 = vsel %vm393_vm9, %v13877_v5, %v13876_v6  ;;  %v375_v48 = vpack.c.bf16 %v370_v36, %v369_v7  ;;  %v687_v62 = vunpack.c.l.b16 %v416_v12  ;;  %v688_v4 = vunpack.c.h.b16 %v416_v12  ;;  %v7982_v6 = vld [vmem:[%s13807_s30 + $0x30] ss:$0 sm:$0xff]  ;;  %v7983_v36 = vld [vmem:[%s13807_s30 + $0x38] ss:$0 sm:$0xff] }
 0x19f   :  { %948 = vmatpush.bf16.msra.mxu1 %v793_v8  ;;  %v707_v38 = vunpack.c.l.b16 %v457_v16  ;;  %v708_v28 = vunpack.c.h.b16 %v457_v16  ;;  %v438_v51 = vsel %vm434_vm8, %v13862_v35, %v429_v52  ;;  %v436_v32 = vsel %vm434_vm8, %v429_v52, %v433_v2  ;;  %v13879_v2 = vld [vmem:[#allocation12_spill] sm:$0xff] }
 0x1a0   :  { %v621_v12 = vsel %vm614_vm7, %v611_v25, %v13879_v2  ;;  %v13881_v5 = vld [vmem:[#allocation52_spill] sm:$0xff]  ;;  %v397_v8 = vsel %vm393_vm9, %v13864_v49, %v8848_v9  ;;  %v6827_v49 = vld [vmem:[%s13402_s9 + $0x18] sm:$0xf0] }
 0x1a1   :  { %v490_v57 = vpop.permute.xlu1 %489  ;;  %v711_v18 = vpack.c.b16 %v707_v38, %v703_v54  ;;  %v712_v16 = vpack.c.b16 %v708_v28, %v704_v17  ;;  %v13878_v17 = vld [vmem:[#allocation15_spill] sm:$0xff]  ;;  %v13880_v28 = vld [vmem:[#allocation45_spill] sm:$0xff] }
 0x1a2   :  { %v345_v7 = vpop.permute.xlu0 %344  ;;  %v493_v54 = vsel %vm491_vm5, %v8731_v29, %v490_v57  ;;  %v499_v35 = vsel %vm491_vm5, %v490_v57, %v8469_v37  ;;  %v615_v52 = vsel %vm614_vm7, %v13878_v17, %v611_v25  ;;  %v317_v29 = vsel %vm311_vm10, %v13881_v5, %v13880_v28 }
 0x1a3   :  { %949 = vmatpush.bf16.msra.mxu1 %v773_v30  ;;  %v510_v30 = vmul.f32 %v8682_v11, %v493_v54  ;;  %v511_v38 = vmul.f32 %v8694_v39, %v499_v35  ;;  %876 = vmatpush.bf16.msrb.mxu0 %v711_v18  ;;  %v395_v37 = vsel %vm393_vm9, %v8848_v9, %v8814_v33  ;;  %v667_v57 = vunpack.c.l.b16 %v375_v48 }
 0x1a4   :  { %914 = vmatpush.bf16.msrb.mxu2 %v712_v16  ;;  %v668_v17 = vunpack.c.h.b16 %v375_v48  ;;  %v453_v25 = vmul.f32 %v8626_v50, %v438_v51  ;;  %v454_v54 = vmul.f32 %v8647_v1, %v436_v32  ;;  %v13882_v18 = vunpack.c.l.b16 %v8729_v46 }
 0x1a5   :  { %v8951_v2 = vpack.c.bf16 %v511_v38, %v510_v30  ;;  %v629_v39 = vmul.f32 %v7982_v6, %v615_v52  ;;  %v630_v11 = vmul.f32 %v7983_v36, %v621_v12  ;;  %v13883_v33 = vunpack.c.h.b16 %v8729_v46  ;;  %v7783_v30 = vld [vmem:[%s13402_s9 + $0x14] sm:$0xf] }
 0x1a6   :  { %v691_v35 = vpack.c.b16 %v687_v62, %v13882_v18  ;;  %v408_v48 = vmul.f32 %v8734_v43, %v396_v34  ;;  %v409_v51 = vmul.f32 %v8737_v59, %v394_v23  ;;  %v8964_v32 = vperm.slane %v8476_v40, 1 }
 0x1a7   :  { %v692_v16 = vpack.c.b16 %v688_v4, %v13883_v33  ;;  %v749_v62 = vunpack.c.l.b16 %v8951_v2  ;;  %v329_v46 = vmul.f32 %v8623_v26, %v317_v29  ;;  %v790_v9 = vunpack.c.h.b16 %v8822_v56 }
 0x1a8   :  { %13884 = vst [vmem:[#allocation13_spill] sm:$0xff] %v8964_v32  ;;  %877 = vmatpush.bf16.msrb.mxu0 %v691_v35  ;;  %v8976_v23 = vperm.slane %v8481_v41, 1  ;;  %v671_v34 = vpack.c.b16 %v667_v57, %v663_v45  ;;  %v412_v4 = vmul.f32 %v8734_v43, %v397_v8  ;;  %v413_v52 = vmul.f32 %v8737_v59, %v395_v37  ;;  %v13923_v59 = vld [vmem:[#allocation30_spill] sm:$0xff] }
 0x1a9   :  { %915 = vmatpush.bf16.msrb.mxu2 %v692_v16  ;;  %v8980_v12 = vpack.c.bf16 %v454_v54, %v453_v25  ;;  %v308_v38 = vpop.permute.xlu1 %307  ;;  %v753_v18 = vpack.c.b16 %v749_v62, %v745_v60  ;;  %v636_v35 = vpack.c.bf16 %v630_v11, %v629_v39  ;;  %v672_v56 = vpack.c.b16 %v668_v17, %v664_v19  ;;  %v6817_v60 = vld [vmem:[%s13402_s9] sm:$0xf]  ;;  %v7782_v19 = vld [vmem:[%s13402_s9 + $0x4] sm:$0xf0] }
 0x1aa   :  { %13885 = vst [vmem:[#allocation17_spill] sm:$0xff] %v8976_v23  ;;  %v613_v33 = vpop.permute.xlu0 %612  ;;  %v319_v29 = vsel %vm311_vm10, %v308_v38, %v13881_v5  ;;  %v8985_v1 = vor.u32 %v7783_v30, %v6827_v49  ;;  %v353_v45 = vsel %vm352_vm6, %v345_v7, %v13860_v61  ;;  %v13886_v61 = vld [vmem:[#allocation14_spill] sm:$0xff]  ;;  %v9007_v57 = vpack.c.bf16 %v409_v51, %v408_v48 }
 0x1ab   :  { %v616_v8 = vsel %vm614_vm7, %v8809_v22, %v613_v33  ;;  %v622_v11 = vsel %vm614_vm7, %v613_v33, %v8499_v58  ;;  %v328_v39 = vmul.f32 %v8713_v42, %v319_v29  ;;  %v355_v5 = vsel %vm352_vm6, %v13886_v61, %v345_v7  ;;  %950 = vmatpush.bf16.msra.mxu1 %v753_v18 }
 0x1ac   :  { %878 = vmatpush.bf16.msrb.mxu0 %v671_v34  ;;  %v633_v22 = vmul.f32 %v7982_v6, %v616_v8  ;;  %v634_v37 = vmul.f32 %v7983_v36, %v622_v11  ;;  %v644_v58 = vunpack.c.h.b16 %v8895_v3  ;;  %v9009_v17 = vpack.c.bf16 %v413_v52, %v412_v4  ;;  %v13888_v4 = vld [vmem:[#allocation35_spill] sm:$0xff] }
 0x1ad   :  { %916 = vmatpush.bf16.msrb.mxu2 %v672_v56  ;;  %v334_v25 = vpack.c.bf16 %v329_v46, %v328_v39  ;;  %v709_v54 = vunpack.c.l.b16 %v8980_v12  ;;  %v13887_v62 = vunpack.c.h.b16 %v8702_v15  ;;  %v9014_v49 = vor.u32 %v7782_v19, %v6817_v60 }
 0x1ae   :  { %v638_v16 = vpack.c.bf16 %v634_v37, %v633_v22  ;;  %6832 = vmatmul.msk.bf16.gmra.mxu1 %vm865_vm11, %v8985_v1  ;;  %v770_v6 = vunpack.c.h.b16 %v8851_v27  ;;  %v367_v36 = vmul.f32 %v8964_v32, %v355_v5  ;;  %v368_v7 = vmul.f32 %v8976_v23, %v353_v45  ;;  %6834 = vmatmul.msk.bf16.gmra.mxu3 %vm865_vm11, %v8985_v1 }
 0x1af   :  { %v794_v30 = vpack.c.b16 %v790_v9, %v13887_v62  ;;  %v647_v48 = vunpack.c.l.b16 %v334_v25  ;;  %v648_v51 = vunpack.c.h.b16 %v334_v25  ;;  %v805_v46 = vunpack.c.l.b16 %v636_v35  ;;  %951 = vmatpush.bf16.msra.mxu1 %v13888_v4  ;;  %v823_v62 = vld [vmem:[%s13403_s10] sm:$0xff] }
 0x1b0   :  { %v806_v34 = vunpack.c.h.b16 %v636_v35  ;;  %v809_v15 = vunpack.c.l.b16 %v638_v16  ;;  %v810_v9 = vunpack.c.h.b16 %v638_v16  ;;  %v13889_v18 = vunpack.c.l.b16 %v8895_v3  ;;  %v304_v3 = vpop.permute.xlu2 %303  ;;  %829 = vperm.xlu2 %7979, %v823_v62  }
 0x1b1   :  { %v347_v52 = vpop.permute.xlu1 %346  ;;  %v652_v27 = vpack.c.b16 %v648_v51, %v644_v58  ;;  %v13890_v29 = vunpack.c.l.b16 %v8830_v0  ;;  %v689_v45 = vunpack.c.l.b16 %v9009_v17  ;;  %v9035_v60 = vpack.c.bf16 %v368_v7, %v367_v36  ;;  %v13893_v51 = vld [vmem:[#allocation24_spill] sm:$0xff] }
 0x1b2   :  { %v651_v33 = vpack.c.b16 %v647_v48, %v13889_v18  ;;  %v354_v8 = vsel %vm352_vm6, %v347_v52, %v8760_v24  ;;  %v356_v35 = vsel %vm352_vm6, %v13872_v10, %v347_v52  ;;  %v813_v11 = vpack.c.b16 %v809_v15, %v805_v46 }
 0x1b3   :  { %v713_v56 = vpack.c.b16 %v709_v54, %v13890_v29  ;;  %v814_v39 = vpack.c.b16 %v810_v9, %v806_v34  ;;  %v9038_v19 = vperm.slane %v8481_v41, 0  ;;  %v371_v61 = vmul.f32 %v8964_v32, %v356_v35  ;;  %917 = vmatpush.bf16.msrb.mxu2 %v652_v27  ;;  %v6825_v29 = vld [vmem:[%s13402_s9 + $0x10] sm:$0xf] }
 0x1b4   :  { %v372_v5 = vmul.f32 %v8976_v23, %v354_v8  ;;  %879 = vmatpush.bf16.msrb.mxu0 %v651_v33  ;;  %v313_v24 = vsel %vm311_vm10, %v304_v3, %v308_v38  ;;  %974 = vmatpush.bf16.msra.mxu3 %v813_v11  ;;  %v685_v10 = vunpack.c.l.b16 %v9007_v57  ;;  %v766_v22 = vunpack.c.h.b16 %v8857_v55 }
 0x1b5   :  { %13891 = vst [vmem:[#allocation18_spill] sm:$0xff] %v9038_v19  ;;  %952 = vmatpush.bf16.msra.mxu1 %v713_v56  ;;  %v9047_v37 = vperm.slane %v8476_v40, 0  ;;  %v315_v58 = vsel %vm311_vm10, %v13880_v28, %v304_v3  ;;  %v331_v54 = vmul.f32 %v9038_v19, %v313_v24  ;;  %v665_v55 = vunpack.c.l.b16 %v9035_v60  ;;  %v826_v28 = vld [vmem:[%s13403_s10 + $0x18] sm:$0xff] }
 0x1b6   :  { %v376_v41 = vpack.c.bf16 %v372_v5, %v371_v61  ;;  %918 = vmatmul.bf16.vlgmr.msrb.gmra.mxu2 %v9014_v49  ;;  %v693_v38 = vpack.c.b16 %v689_v45, %v685_v10  ;;  %v774_v25 = vpack.c.b16 %v770_v6, %v766_v22  ;;  %v750_v40 = vunpack.c.h.b16 %v8951_v2  ;;  %844 = vperm.xlu1 %7978, %v826_v28   ;;  %v7784_v56 = vld [vmem:[%s13402_s9 + $0x14] sm:$0xf0] }
 0x1b7   :  { %13892 = vst [vmem:[#allocation23_spill] sm:$0xff] %v9047_v37  ;;  %1012 = vmatpush.bf16.msra.mxu2 %v814_v39  ;;  %880 = vmatmul.bf16.vlgmr.msrb.gmra.mxu0 %v9014_v49  ;;  %v746_v7 = vunpack.c.h.b16 %v8855_v63  ;;  %v730_v46 = vunpack.c.h.b16 %v13893_v51  ;;  %v13894_v63 = vld [vmem:[#allocation25_spill] sm:$0xff]  ;;  %v706_v8 = vunpack.c.h.b16 %v8830_v0  ;;  %v6826_v35 = vor.u32 %v7784_v56, %v6825_v29 }
 0x1b8   :  { %986 = vmatpush.bf16.msra.mxu0 %v794_v30  ;;  %v669_v16 = vunpack.c.l.b16 %v376_v41  ;;  %v330_v30 = vmul.f32 %v9047_v37, %v315_v58  ;;  %v726_v18 = vunpack.c.h.b16 %v13894_v63  ;;  %v690_v39 = vunpack.c.h.b16 %v9009_v17  ;;  %v9096_v58 = vpop.permute.xlu0 %839 }
 0x1b9   :  { %953 = vmatpush.bf16.msra.mxu1 %v693_v38  ;;  %v302_v6 = vpop.permute.xlu1 %301  ;;  %v754_v4 = vpack.c.b16 %v750_v40, %v746_v7  ;;  %v670_v61 = vunpack.c.h.b16 %v376_v41  ;;  %v666_v5 = vunpack.c.h.b16 %v9035_v60 }
 0x1ba   :  { %v673_v36 = vpack.c.b16 %v669_v16, %v665_v55  ;;  %v312_v2 = vsel %vm311_vm10, %v302_v6, %v13861_v21  ;;  %v314_v48 = vsel %vm311_vm10, %v8436_v14, %v302_v6  ;;  %v335_v34 = vpack.c.bf16 %v331_v54, %v330_v30 }
 0x1bb   :  { %v326_v15 = vmul.f32 %v9047_v37, %v314_v48  ;;  %v327_v9 = vmul.f32 %v9038_v19, %v312_v2  ;;  %v734_v33 = vpack.c.b16 %v730_v46, %v726_v18  ;;  %v710_v14 = vunpack.c.h.b16 %v8980_v12  ;;  %v13895_v2 = vld [vmem:[#allocation9_spill] sm:$0xff] }
 0x1bc   :  { %987 = vmatpush.bf16.msra.mxu0 %v774_v25  ;;  %v649_v27 = vunpack.c.l.b16 %v335_v34  ;;  %v686_v12 = vunpack.c.h.b16 %v9007_v57  ;;  %v674_v24 = vpack.c.b16 %v670_v61, %v666_v5  ;;  %v650_v0 = vunpack.c.h.b16 %v335_v34  ;;  %v13896_v34 = vld [vmem:[#allocation10_spill] sm:$0xff] }
 0x1bd   :  { %954 = vmatpush.bf16.msra.mxu1 %v673_v36  ;;  %v333_v52 = vpack.c.bf16 %v327_v9, %v326_v15  ;;  %v714_v11 = vpack.c.b16 %v710_v14, %v706_v8 }
 0x1be   :  { %6835 = vmatmul.msk.bf16.vlgmr.msra.gmra.mxu3 %vm865_vm11, %v8892_v53  ;;  %v694_v3 = vpack.c.b16 %v690_v39, %v686_v12 }
 0x1bf   :  { %v645_v21 = vunpack.c.l.b16 %v333_v52  ;;  %v646_v10 = vunpack.c.h.b16 %v333_v52 }
 0x1c0   :  { %988 = vmatpush.bf16.msra.mxu0 %v754_v4  ;;  %v9103_v62 = vpop.permute.xlu0 %834 }
 0x1c1   :  { %v653_v45 = vpack.c.b16 %v649_v27, %v645_v21  ;;  %v654_v22 = vpack.c.b16 %v650_v0, %v646_v10 }
 0x1c3   :  { %955 = vmatpush.bf16.msra.mxu1 %v653_v45 }
 0x1c4   :  { %989 = vmatpush.bf16.msra.mxu0 %v734_v33 }
 0x1c6   :  { %923 = vmatmul.bf16.gmra.mxu2 %v6826_v35  ;;  %956 = vmatmul.bf16.vlgmr.msra.gmra.mxu1 %v9014_v49 }
 0x1c7   :  { %885 = vmatmul.bf16.gmra.mxu0 %v6826_v35 }
 0x1c8   :  { %990 = vmatpush.bf16.msra.mxu0 %v714_v11 }
 0x1cc   :  { %991 = vmatpush.bf16.msra.mxu0 %v694_v3 }
 0x1ce   :  { %6836 = vmatmul.msk.bf16.gmra.mxu3 %vm865_vm11, %v8985_v1 }
 0x1d0   :  { %992 = vmatpush.bf16.msra.mxu0 %v674_v24 }
 0x1d4   :  { %993 = vmatpush.bf16.msra.mxu0 %v654_v22 }
 0x1d6   :  { %6837 = vmatmul.msk.bf16.vlgmr.msra.gmra.mxu2 %vm865_vm11, %v8892_v53  ;;  %961 = vmatmul.bf16.gmra.mxu1 %v6826_v35 }
 0x1d7   :  { %994 = vmatmul.bf16.vlgmr.msra.gmra.mxu0 %v9014_v49 }
 0x1e6   :  { %6838 = vmatmul.msk.bf16.gmra.mxu2 %vm865_vm11, %v8985_v1 }
 0x1e7   :  { %999 = vmatmul.bf16.gmra.mxu0 %v6826_v35 }
 0x20a   :  { %v9098_v25 = vpop.permute.xlu2 %829 }
 0x21b   :  { %v900_v57 = vpop.f32.mrf.mxu1 }
 0x221   :  { %v938_v17 = vpop.f32.mrf.mxu3 }
 0x223   :  { %v902_v60 = vpop.f32.mrf.mxu1 }
 0x228   :  { %v9133_v29 = vpop.permute.xlu1 %844 }
 0x229   :  { %v940_v41 = vpop.f32.mrf.mxu3 }
 0x22b   :  { %v905_v38 = vpop.f32.mrf.mxu1 }
 0x231   :  { %v943_v55 = vpop.f32.mrf.mxu3 }
 0x233   :  { %v907_v30 = vpop.f32.mrf.mxu1 }
 0x234   :  { %v881_v54 = vpop.f32.mrf.mxu0 }
 0x235   :  { %v882_v49 = vadd.f32 %v881_v54, %v9098_v25 }
 0x237   :  { %v901_v16 = vadd.f32 %v900_v57, %v882_v49 }
 0x239   :  { %v9101_v53 = vmax.f32 %v901_v16, 0.0  ;;  %v919_v40 = vpop.f32.mrf.mxu2  ;;  %v945_v51 = vpop.f32.mrf.mxu3 }
 0x23a   :  { %v920_v1 = vadd.f32 %v919_v40, %v9098_v25 }
 0x23b   :  { %1568 = vrot.lane.b32.xlu2 %v9101_v53, %s13618_s27  ;;  %1496 = vrot.lane.b32.xlu1 %v9101_v53, %s8064_s5  ;;  %v1328_v48 = vmul.f32 %v9101_v53, %v13895_v2 }
 0x23c   :  { %v883_v28 = vpop.f32.mrf.mxu0  ;;  %v939_v6 = vadd.f32 %v938_v17, %v920_v1 }
 0x23d   :  { %v884_v36 = vadd.f32 %v883_v28, %v9103_v62 }
 0x23e   :  { %v9111_v7 = vmax.f32 %v939_v6, 0.0 }
 0x23f   :  { %v903_v46 = vadd.f32 %v902_v60, %v884_v36 }
 0x240   :  { %1504 = vrot.lane.b32.xlu0 %v9111_v7, %s8064_s5  ;;  %v1329_v15 = vmul.f32 %v9111_v7, %v13896_v34 }
 0x241   :  { %v921_v9 = vpop.f32.mrf.mxu2  ;;  %v9126_v18 = vmax.f32 %v903_v46, 0.0  ;;  %v976_v8 = vpop.f32.mrf.mxu3 }
 0x242   :  { %v922_v4 = vadd.f32 %v921_v9, %v9103_v62  ;;  %v9124_v52 = vpack.c.bf16 %v1329_v15, %v1328_v48 }
 0x243   :  { %1040 = vrot.lane.b32.xlu2 %v9101_v53, %s13616_s29  ;;  %1424 = vrot.lane.b32.xlu1 %v9101_v53, %s13622_s26  ;;  %v957_v21 = vpop.f32.mrf.mxu1  ;;  %v1332_v56 = vmul.f32 %v9126_v18, %v13895_v2 }
 0x244   :  { %v886_v63 = vpop.f32.mrf.mxu0  ;;  %v941_v33 = vadd.f32 %v940_v41, %v922_v4  ;;  %v958_v14 = vadd.f32 %v957_v21, %v9098_v25  ;;  %v1809_v61 = vunpack.c.h.b16 %v9124_v52 }
 0x245   :  { %v887_v11 = vadd.f32 %v886_v63, %v9096_v58 }
 0x246   :  { %v9128_v27 = vmax.f32 %v941_v33, 0.0  ;;  %v977_v5 = vadd.f32 %v976_v8, %v958_v14 }
 0x247   :  { %v906_v22 = vadd.f32 %v905_v38, %v887_v11 }
 0x248   :  { %1432 = vrot.lane.b32.xlu0 %v9111_v7, %s13622_s26  ;;  %v1333_v45 = vmul.f32 %v9128_v27, %v13896_v34  ;;  %v9152_v60 = vmax.f32 %v977_v5, 0.0 }
 0x249   :  { %v924_v35 = vpop.f32.mrf.mxu2  ;;  %v9158_v49 = vmax.f32 %v906_v22, 0.0  ;;  %v978_v9 = vpop.f32.mrf.mxu3 }
 0x24a   :  { %v925_v39 = vadd.f32 %v924_v35, %v9096_v58  ;;  %v9145_v12 = vpack.c.bf16 %v1333_v45, %v1332_v56  ;;  %13898 = vst [vmem:[#allocation22_spill] sm:$0xff] %v9152_v60 }
 0x24b   :  { %1498 = vrot.lane.b32.xlu2 %v9126_v18, %s8064_s5  ;;  %1352 = vrot.lane.b32.xlu1 %v9101_v53, %s13634_s2  ;;  %v1336_v28 = vmul.f32 %v9158_v49, %v13895_v2 }
 0x24c   :  { %v888_v3 = vpop.f32.mrf.mxu0  ;;  %v944_v24 = vadd.f32 %v943_v55, %v925_v39  ;;  %v1813_v0 = vunpack.c.h.b16 %v9145_v12 }
 0x24d   :  { %v889_v10 = vadd.f32 %v888_v3, %v9133_v29 }
 0x24e   :  { %v9150_v17 = vpack.c.b16 %v1813_v0, %v1809_v61  ;;  %v9154_v41 = vmax.f32 %v944_v24, 0.0 }
 0x24f   :  { %v908_v57 = vadd.f32 %v907_v30, %v889_v10 }
 0x250   :  { %13897 = vst [vmem:[#allocation28_spill] sm:$0xff] %v9150_v17  ;;  %1360 = vrot.lane.b32.xlu0 %v9111_v7, %s13634_s2  ;;  %v1337_v40 = vmul.f32 %v9154_v41, %v13896_v34 }
 0x251   :  { %v926_v54 = vpop.f32.mrf.mxu2  ;;  %v9160_v16 = vmax.f32 %v908_v57, 0.0  ;;  %v981_v39 = vpop.f32.mrf.mxu3 }
 0x252   :  { %v927_v55 = vadd.f32 %v926_v54, %v9133_v29  ;;  %v9179_v36 = vpack.c.bf16 %v1337_v40, %v1336_v28 }
 0x253   :  { %1512 = vrot.lane.b32.xlu2 %v9152_v60, %s8064_s5  ;;  %1256 = vrot.lane.b32.xlu1 %v9101_v53, %s13632_s28  ;;  %v1340_v30 = vmul.f32 %v9160_v16, %v13895_v2 }
 0x254   :  { %v946_v38 = vadd.f32 %v945_v51, %v927_v55  ;;  %v1817_v51 = vunpack.c.h.b16 %v9179_v36 }
 0x256   :  { %v9169_v1 = vmax.f32 %v946_v38, 0.0 }
 0x258   :  { %1264 = vrot.lane.b32.xlu0 %v9111_v7, %s13632_s28  ;;  %v1341_v6 = vmul.f32 %v9169_v1, %v13896_v34 }
 0x259   :  { %v983_v2 = vpop.f32.mrf.mxu3 }
 0x25a   :  { %v9185_v48 = vpack.c.bf16 %v1341_v6, %v1340_v30 }
 0x25b   :  { %1426 = vrot.lane.b32.xlu2 %v9126_v18, %s13622_s26  ;;  %1184 = vrot.lane.b32.xlu1 %v9101_v53, %s13624_s1 }
 0x25c   :  { %v1821_v46 = vunpack.c.h.b16 %v9185_v48 }
 0x25e   :  { %v9189_v15 = vpack.c.b16 %v1821_v46, %v1817_v51 }
 0x260   :  { %13899 = vst [vmem:[#allocation29_spill] sm:$0xff] %v9189_v15  ;;  %1192 = vrot.lane.b32.xlu0 %v9111_v7, %s13624_s1 }
 0x263   :  { %1440 = vrot.lane.b32.xlu2 %v9152_v60, %s13622_s26  ;;  %1112 = vrot.lane.b32.xlu1 %v9101_v53, %s13620_s19  ;;  %v959_v53 = vpop.f32.mrf.mxu1 }
 0x268   :  { %1120 = vrot.lane.b32.xlu0 %v9111_v7, %s13620_s19 }
 0x26b   :  { %1354 = vrot.lane.b32.xlu2 %v9126_v18, %s13634_s2  ;;  %1576 = vrot.lane.b32.xlu1 %v9111_v7, %s13618_s27 }
 0x270   :  { %1272 = vrot.lane.b32.xlu0 %v9152_v60, %s13632_s28 }
 0x273   :  { %1368 = vrot.lane.b32.xlu2 %v9152_v60, %s13634_s2  ;;  %1048 = vrot.lane.b32.xlu1 %v9111_v7, %s13616_s29  ;;  %v960_v7 = vadd.f32 %v959_v53, %v9103_v62 }
 0x275   :  { %v979_v4 = vadd.f32 %v978_v9, %v960_v7 }
 0x278   :  { %1570 = vrot.lane.b32.xlu0 %v9126_v18, %s13618_s27 }
 0x27b   :  { %1258 = vrot.lane.b32.xlu2 %v9126_v18, %s13632_s28  ;;  %1128 = vrot.lane.b32.xlu1 %v9152_v60, %s13620_s19 }
 0x280   :  { %1584 = vrot.lane.b32.xlu0 %v9152_v60, %s13618_s27 }
 0x283   :  { %1186 = vrot.lane.b32.xlu2 %v9126_v18, %s13624_s1  ;;  %1506 = vrot.lane.b32.xlu1 %v9128_v27, %s8064_s5 }
 0x288   :  { %1042 = vrot.lane.b32.xlu0 %v9126_v18, %s13616_s29 }
 0x28b   :  { %1114 = vrot.lane.b32.xlu2 %v9126_v18, %s13620_s19  ;;  %1434 = vrot.lane.b32.xlu1 %v9128_v27, %s13622_s26  ;;  %v9236_v18 = vmax.f32 %v979_v4, 0.0 }
 0x28d   :  { %13901 = vst [vmem:[#allocation32_spill] sm:$0xff] %v9236_v18 }
 0x290   :  { %1200 = vrot.lane.b32.xlu0 %v9152_v60, %s13624_s1 }
 0x293   :  { %1578 = vrot.lane.b32.xlu2 %v9128_v27, %s13618_s27  ;;  %1362 = vrot.lane.b32.xlu1 %v9128_v27, %s13634_s2 }
 0x295   :  { %v9234_v63 = vpop.permute.xlu2 %1568 }
 0x296   :  { %13900 = vst [vmem:[#allocation31_spill] sm:$0xff] %v9234_v63 }
 0x298   :  { %1514 = vrot.lane.b32.xlu0 %v9236_v18, %s8064_s5 }
 0x29b   :  { %1050 = vrot.lane.b32.xlu2 %v9128_v27, %s13616_s29  ;;  %1266 = vrot.lane.b32.xlu1 %v9128_v27, %s13632_s28 }
 0x29d   :  { %v9244_v33 = vpop.permute.xlu2 %1040 }
 0x29e   :  { %13902 = vst [vmem:[#allocation47_spill] sm:$0xff] %v9244_v33 }
 0x2a0   :  { %1442 = vrot.lane.b32.xlu0 %v9236_v18, %s13622_s26 }
 0x2a3   :  { %1130 = vrot.lane.b32.xlu2 %v9236_v18, %s13620_s19  ;;  %1194 = vrot.lane.b32.xlu1 %v9128_v27, %s13624_s1 }
 0x2a5   :  { %v9252_v21 = vpop.permute.xlu2 %1498 }
 0x2a6   :  { %13903 = vst [vmem:[#allocation26_spill] sm:$0xff] %v9252_v21 }
 0x2a8   :  { %1370 = vrot.lane.b32.xlu0 %v9236_v18, %s13634_s2 }
 0x2ab   :  { %1580 = vrot.lane.b32.xlu2 %v9154_v41, %s13618_s27  ;;  %1122 = vrot.lane.b32.xlu1 %v9128_v27, %s13620_s19  ;;  %v962_v27 = vpop.f32.mrf.mxu1 }
 0x2ac   :  { %v963_v11 = vadd.f32 %v962_v27, %v9096_v58 }
 0x2ad   :  { %v9260_v14 = vpop.permute.xlu2 %1512  ;;  %v9262_v56 = vpop.permute.xlu1 %1496 }
 0x2ae   :  { %13904 = vst [vmem:[#allocation44_spill] sm:$0xff] %v9260_v14  ;;  %v982_v61 = vadd.f32 %v981_v39, %v963_v11 }
 0x2af   :  { %13905 = vst [vmem:[#allocation16_spill] sm:$0xff] %v9262_v56 }
 0x2b0   :  { %1572 = vrot.lane.b32.xlu0 %v9158_v49, %s13618_s27  ;;  %v9289_v10 = vmax.f32 %v982_v61, 0.0 }
 0x2b2   :  { %v9266_v45 = vpop.permute.xlu0 %1504 }
 0x2b3   :  { %1052 = vrot.lane.b32.xlu2 %v9154_v41, %s13616_s29  ;;  %1500 = vrot.lane.b32.xlu1 %v9158_v49, %s8064_s5  ;;  %v1536_v23 = vsel %vm573_vm3, %v9262_v56, %v9266_v45 }
 0x2b5   :  { %v9272_v8 = vpop.permute.xlu2 %1426  ;;  %v9274_v35 = vpop.permute.xlu1 %1424 }
 0x2b6   :  { %13906 = vst [vmem:[#allocation19_spill] sm:$0xff] %v9272_v8 }
 0x2b7   :  { %13907 = vst [vmem:[#allocation11_spill] sm:$0xff] %v9274_v35 }
 0x2b8   :  { %1044 = vrot.lane.b32.xlu0 %v9158_v49, %s13616_s29 }
 0x2ba   :  { %v9279_v3 = vpop.permute.xlu0 %1432 }
 0x2bb   :  { %1502 = vrot.lane.b32.xlu2 %v9160_v16, %s8064_s5  ;;  %1428 = vrot.lane.b32.xlu1 %v9158_v49, %s13622_s26 }
 0x2bd   :  { %v9285_v5 = vpop.permute.xlu2 %1440  ;;  %v9287_v24 = vpop.permute.xlu1 %1352 }
 0x2be   :  { %13908 = vst [vmem:[#allocation15_spill] sm:$0xff] %v9285_v5  ;;  %v1460_v32 = vsel %vm532_vm4, %v9279_v3, %v9285_v5 }
 0x2bf   :  { %13909 = vst [vmem:[#allocation12_spill] sm:$0xff] %v9287_v24 }
 0x2c0   :  { %1508 = vrot.lane.b32.xlu0 %v9154_v41, %s8064_s5 }
 0x2c2   :  { %v9293_v0 = vpop.permute.xlu0 %1360 }
 0x2c3   :  { %1516 = vrot.lane.b32.xlu2 %v9289_v10, %s8064_s5  ;;  %1356 = vrot.lane.b32.xlu1 %v9158_v49, %s13634_s2 }
 0x2c5   :  { %v9299_v22 = vpop.permute.xlu2 %1354  ;;  %v9301_v57 = vpop.permute.xlu1 %1256 }
 0x2c6   :  { %13910 = vst [vmem:[#allocation45_spill] sm:$0xff] %v9299_v22 }
 0x2c8   :  { %1436 = vrot.lane.b32.xlu0 %v9154_v41, %s13622_s26 }
 0x2ca   :  { %v9305_v54 = vpop.permute.xlu0 %1264 }
 0x2cb   :  { %1430 = vrot.lane.b32.xlu2 %v9160_v16, %s13622_s26  ;;  %1260 = vrot.lane.b32.xlu1 %v9158_v49, %s13632_s28 }
 0x2cd   :  { %v9311_v55 = vpop.permute.xlu2 %1368  ;;  %v9313_v38 = vpop.permute.xlu1 %1184 }
 0x2ce   :  { %13911 = vst [vmem:[#allocation52_spill] sm:$0xff] %v9311_v55 }
 0x2d0   :  { %1364 = vrot.lane.b32.xlu0 %v9154_v41, %s13634_s2 }
 0x2d2   :  { %v9317_v40 = vpop.permute.xlu0 %1192 }
 0x2d3   :  { %1444 = vrot.lane.b32.xlu2 %v9289_v10, %s13622_s26  ;;  %1188 = vrot.lane.b32.xlu1 %v9158_v49, %s13624_s1 }
 0x2d5   :  { %v9323_v28 = vpop.permute.xlu2 %1258  ;;  %v9325_v30 = vpop.permute.xlu1 %1112 }
 0x2d6   :  { %13912 = vst [vmem:[#allocation14_spill] sm:$0xff] %v9323_v28 }
 0x2d8   :  { %1268 = vrot.lane.b32.xlu0 %v9154_v41, %s13632_s28 }
 0x2da   :  { %v9329_v6 = vpop.permute.xlu0 %1120 }
 0x2db   :  { %1358 = vrot.lane.b32.xlu2 %v9160_v16, %s13634_s2  ;;  %1116 = vrot.lane.b32.xlu1 %v9158_v49, %s13620_s19 }
 0x2dd   :  { %v9335_v51 = vpop.permute.xlu2 %1186  ;;  %v9337_v46 = vpop.permute.xlu1 %1576 }
 0x2de   :  { %13913 = vst [vmem:[#allocation35_spill] sm:$0xff] %v9335_v51 }
 0x2e0   :  { %1196 = vrot.lane.b32.xlu0 %v9154_v41, %s13624_s1 }
 0x2e2   :  { %v9341_v53 = vpop.permute.xlu0 %1272 }
 0x2e3   :  { %1372 = vrot.lane.b32.xlu2 %v9289_v10, %s13634_s2  ;;  %1274 = vrot.lane.b32.xlu1 %v9236_v18, %s13632_s28 }
 0x2e5   :  { %v9347_v7 = vpop.permute.xlu2 %1114  ;;  %v9349_v9 = vpop.permute.xlu1 %1048 }
 0x2e6   :  { %13914 = vst [vmem:[#allocation24_spill] sm:$0xff] %v9347_v7  ;;  %v1544_v7 = vmul.f32 %v1536_v23, %v13923_v59 }
 0x2e7   :  { %13915 = vst [vmem:[#allocation25_spill] sm:$0xff] %v9349_v9 }
 0x2e8   :  { %1124 = vrot.lane.b32.xlu0 %v9154_v41, %s13620_s19  ;;  %v964_v41 = vpop.f32.mrf.mxu1 }
 0x2e9   :  { %v965_v34 = vadd.f32 %v964_v41, %v9133_v29 }
 0x2ea   :  { %v9353_v49 = vpop.permute.xlu0 %1570 }
 0x2eb   :  { %13916 = vst [vmem:[#allocation60_spill] sm:$0xff] %v9353_v49  ;;  %1262 = vrot.lane.b32.xlu2 %v9160_v16, %s13632_s28  ;;  %1586 = vrot.lane.b32.xlu1 %v9236_v18, %s13618_s27  ;;  %v984_v17 = vadd.f32 %v983_v2, %v965_v34 }
 0x2ed   :  { %v9359_v4 = vpop.permute.xlu2 %1578  ;;  %v9361_v27 = vpop.permute.xlu1 %1128  ;;  %v9384_v42 = vmax.f32 %v984_v17, 0.0  ;;  %v1532_v17 = vsel %vm573_vm3, %v9266_v45, %v9260_v14 }
 0x2ee   :  { %13917 = vst [vmem:[#allocation61_spill] sm:$0xff] %v9361_v27 }
 0x2f0   :  { %1582 = vrot.lane.b32.xlu0 %v9169_v1, %s13618_s27 }
 0x2f2   :  { %v9365_v11 = vpop.permute.xlu0 %1584 }
 0x2f3   :  { %13918 = vst [vmem:[#allocation62_spill] sm:$0xff] %v9365_v11  ;;  %1190 = vrot.lane.b32.xlu2 %v9160_v16, %s13624_s1  ;;  %1202 = vrot.lane.b32.xlu1 %v9236_v18, %s13624_s1 }
 0x2f5   :  { %v9371_v39 = vpop.permute.xlu2 %1050  ;;  %v1507_v61 = vpop.permute.xlu1 %1506 }
 0x2f6   :  { %13919 = vst [vmem:[#allocation63_spill] sm:$0xff] %v9371_v39  ;;  %v1537_v51 = vsel %vm573_vm3, %v9252_v21, %v1507_v61 }
 0x2f8   :  { %1054 = vrot.lane.b32.xlu0 %v9169_v1, %s13616_s29 }
 0x2fa   :  { %v9376_v15 = vpop.permute.xlu0 %1042 }
 0x2fb   :  { %13920 = vst [vmem:[#allocation64_spill] sm:$0xff] %v9376_v15  ;;  %1118 = vrot.lane.b32.xlu2 %v9160_v16, %s13620_s19  ;;  %1276 = vrot.lane.b32.xlu1 %v9289_v10, %s13632_s28 }
 0x2fd   :  { %v9382_v19 = vpop.permute.xlu2 %1130  ;;  %v1435_v37 = vpop.permute.xlu1 %1434 }
 0x2fe   :  { %13921 = vst [vmem:[#allocation65_spill] sm:$0xff] %v9382_v19  ;;  %v13924_v19 = vld [vmem:[#allocation27_spill] sm:$0xff] }
 0x2ff   :  { %v1545_v43 = vmul.f32 %v1532_v17, %v13924_v19  ;;  %v1548_v17 = vmul.f32 %v1537_v51, %v13923_v59 }
 0x300   :  { %1518 = vrot.lane.b32.xlu0 %v9384_v42, %s8064_s5 }
 0x301   :  { %v9420_v45 = vpack.c.bf16 %v1545_v43, %v1544_v7  ;;  %v1464_v43 = vsel %vm532_vm4, %v9274_v35, %v9279_v3  ;;  %v13928_v7 = vld [vmem:[#allocation37_spill] sm:$0xff] }
 0x302   :  { %v9388_v41 = vpop.permute.xlu0 %1200  ;;  %v1473_v51 = vmul.f32 %v1460_v32, %v13928_v7 }
 0x303   :  { %13922 = vst [vmem:[#allocation66_spill] sm:$0xff] %v9388_v41  ;;  %1204 = vrot.lane.b32.xlu2 %v9289_v10, %s13624_s1  ;;  %1574 = vrot.lane.b32.xlu1 %v9160_v16, %s13618_s27  ;;  %v995_v41 = vpop.f32.mrf.mxu0 }
 0x305   :  { %v9394_v2 = vpop.permute.xlu2 %1580  ;;  %v1363_v34 = vpop.permute.xlu1 %1362 }
 0x308   :  { %1446 = vrot.lane.b32.xlu0 %v9384_v42, %s13622_s26 }
 0x30a   :  { %v9411_v28 = vpop.permute.xlu0 %1514 }
 0x30b   :  { %13925 = vst [vmem:[#allocation67_spill] sm:$0xff] %v9411_v28  ;;  %1278 = vrot.lane.b32.xlu2 %v9384_v42, %s13632_s28  ;;  %1588 = vrot.lane.b32.xlu1 %v9289_v10, %s13618_s27  ;;  %v1533_v23 = vsel %vm573_vm3, %v1507_v61, %v9411_v28  ;;  %v1929_v61 = vunpack.c.h.b16 %v9420_v45  ;;  %v1465_v28 = vsel %vm532_vm4, %v9272_v8, %v1435_v37 }
 0x30c   :  { %v1549_v56 = vmul.f32 %v1533_v23, %v13924_v19 }
 0x30d   :  { %v9424_v14 = vpop.permute.xlu2 %1052  ;;  %v9426_v21 = vpop.permute.xlu1 %1266 }
 0x30e   :  { %13926 = vst [vmem:[#allocation68_spill] sm:$0xff] %v9424_v14  ;;  %v9432_v26 = vpack.c.bf16 %v1549_v56, %v1548_v17  ;;  %v13929_v56 = vld [vmem:[#allocation33_spill] sm:$0xff] }
 0x30f   :  { %13927 = vst [vmem:[#allocation69_spill] sm:$0xff] %v9426_v21  ;;  %v1472_v17 = vmul.f32 %v1464_v43, %v13929_v56  ;;  %v1476_v8 = vmul.f32 %v1465_v28, %v13929_v56  ;;  %v996_v28 = vadd.f32 %v995_v41, %v9098_v25 }
 0x310   :  { %1374 = vrot.lane.b32.xlu0 %v9384_v42, %s13634_s2  ;;  %v1933_v23 = vunpack.c.h.b16 %v9432_v26 }
 0x311   :  { %v9458_v35 = vpack.c.bf16 %v1473_v51, %v1472_v17 }
 0x312   :  { %v9447_v5 = vpop.permute.xlu0 %1442  ;;  %v9453_v32 = vpack.c.b16 %v1933_v23, %v1929_v61  ;;  %v1014_v23 = vpop.f32.mrf.mxu2 }
 0x313   :  { %13930 = vst [vmem:[#allocation70_spill] sm:$0xff] %v9447_v5  ;;  %1590 = vrot.lane.b32.xlu2 %v9384_v42, %s13618_s27  ;;  %1046 = vrot.lane.b32.xlu1 %v9160_v16, %s13616_s29  ;;  %v1461_v3 = vsel %vm532_vm4, %v1435_v37, %v9447_v5  ;;  %v1388_v16 = vsel %vm491_vm5, %v9293_v0, %v9311_v55  ;;  %v1889_v17 = vunpack.c.h.b16 %v9458_v35 }
 0x314   :  { %13931 = vst [vmem:[#allocation71_spill] sm:$0xff] %v9453_v32  ;;  %v1477_v43 = vmul.f32 %v1461_v3, %v13928_v7  ;;  %v1392_v37 = vsel %vm491_vm5, %v9287_v24, %v9293_v0  ;;  %v1401_v51 = vmul.f32 %v1388_v16, %v8567_v31 }
 0x315   :  { %v9462_v14 = vpop.permute.xlu2 %1502  ;;  %v9464_v21 = vpop.permute.xlu1 %1194  ;;  %v1400_v55 = vmul.f32 %v1392_v37, %v8548_v44 }
 0x316   :  { %13932 = vst [vmem:[#allocation72_spill] sm:$0xff] %v9462_v14  ;;  %v9470_v61 = vpack.c.bf16 %v1477_v43, %v1476_v8  ;;  %v1393_v8 = vsel %vm491_vm5, %v9299_v22, %v1363_v34  ;;  %v1015_v43 = vadd.f32 %v1014_v23, %v996_v28 }
 0x317   :  { %13933 = vst [vmem:[#allocation73_spill] sm:$0xff] %v9464_v21  ;;  %v9497_v41 = vpack.c.bf16 %v1401_v51, %v1400_v55  ;;  %v1404_v16 = vmul.f32 %v1393_v8, %v8548_v44 }
 0x318   :  { %13934 = vst [vmem:[#allocation74_spill] sm:$0xff] %v9470_v61  ;;  %1206 = vrot.lane.b32.xlu0 %v9384_v42, %s13624_s1  ;;  %v1893_v3 = vunpack.c.h.b16 %v9470_v61  ;;  %v9505_v24 = vmax.f32 %v1015_v43, 0.0  ;;  %v997_v43 = vpop.f32.mrf.mxu0 }
 0x31a   :  { %v9486_v32 = vpop.permute.xlu0 %1370  ;;  %v9492_v25 = vpack.c.b16 %v1893_v3, %v1889_v17  ;;  %13939 = vst [vmem:[#allocation79_spill] sm:$0xff] %v9505_v24  ;;  %v1849_v17 = vunpack.c.h.b16 %v9497_v41 }
 0x31b   :  { %13935 = vst [vmem:[#allocation75_spill] sm:$0xff] %v9486_v32  ;;  %1134 = vrot.lane.b32.xlu2 %v9384_v42, %s13620_s19  ;;  %1132 = vrot.lane.b32.xlu1 %v9289_v10, %s13620_s19  ;;  %v1389_v0 = vsel %vm491_vm5, %v1363_v34, %v9486_v32 }
 0x31c   :  { %13936 = vst [vmem:[#allocation76_spill] sm:$0xff] %v9492_v25  ;;  %v1405_v23 = vmul.f32 %v1389_v0, %v8567_v31  ;;  %v1016_v0 = vpop.f32.mrf.mxu2 }
 0x31d   :  { %v9501_v37 = vpop.permute.xlu2 %1516  ;;  %v9503_v28 = vpop.permute.xlu1 %1122 }
 0x31e   :  { %13937 = vst [vmem:[#allocation77_spill] sm:$0xff] %v9501_v37  ;;  %v9507_v22 = vpack.c.bf16 %v1405_v23, %v1404_v16  ;;  %v998_v16 = vadd.f32 %v997_v43, %v9103_v62 }
 0x31f   :  { %13938 = vst [vmem:[#allocation78_spill] sm:$0xff] %v9503_v28 }
 0x320   :  { %13940 = vst [vmem:[#allocation80_spill] sm:$0xff] %v9507_v22  ;;  %1064 = vrot.lane.b32.xlu0 %v9505_v24, %s13616_s29  ;;  %v1853_v55 = vunpack.c.h.b16 %v9507_v22  ;;  %v1017_v23 = vadd.f32 %v1016_v0, %v998_v16  ;;  %v1000_v5 = vpop.f32.mrf.mxu0 }
 0x321   :  { %v1001_v22 = vadd.f32 %v1000_v5, %v9096_v58 }
 0x322   :  { %v9513_v34 = vpop.permute.xlu0 %1572  ;;  %v9519_v51 = vpack.c.b16 %v1853_v55, %v1849_v17 }
 0x323   :  { %13941 = vst [vmem:[#allocation81_spill] sm:$0xff] %v9513_v34  ;;  %1280 = vrot.lane.b32.xlu2 %v9505_v24, %s13632_s28  ;;  %1510 = vrot.lane.b32.xlu1 %v9169_v1, %s8064_s5 }
 0x324   :  { %13942 = vst [vmem:[#allocation82_spill] sm:$0xff] %v9519_v51  ;;  %v9538_v51 = vmax.f32 %v1017_v23, 0.0 }
 0x325   :  { %v9521_v3 = vpop.permute.xlu2 %1430  ;;  %v9523_v8 = vpop.permute.xlu1 %1500 }
 0x326   :  { %13943 = vst [vmem:[#allocation83_spill] sm:$0xff] %v9521_v3 }
 0x327   :  { %13944 = vst [vmem:[#allocation84_spill] sm:$0xff] %v9523_v8 }
 0x328   :  { %1448 = vrot.lane.b32.xlu0 %v9505_v24, %s13622_s26  ;;  %13948 = vst [vmem:[#allocation88_spill] sm:$0xff] %v9538_v51  ;;  %v1002_v58 = vpop.f32.mrf.mxu0 }
 0x32a   :  { %v9528_v25 = vpop.permute.xlu0 %1044 }
 0x32b   :  { %13945 = vst [vmem:[#allocation85_spill] sm:$0xff] %v9528_v25  ;;  %1208 = vrot.lane.b32.xlu2 %v9505_v24, %s13624_s1  ;;  %1438 = vrot.lane.b32.xlu1 %v9169_v1, %s13622_s26  ;;  %v1019_v25 = vpop.f32.mrf.mxu2 }
 0x32c   :  { %v1020_v21 = vadd.f32 %v1019_v25, %v1001_v22  ;;  %v1003_v25 = vadd.f32 %v1002_v58, %v9133_v29 }
 0x32d   :  { %v9534_v17 = vpop.permute.xlu2 %1444  ;;  %v9536_v55 = vpop.permute.xlu1 %1428 }
 0x32e   :  { %13946 = vst [vmem:[#allocation86_spill] sm:$0xff] %v9534_v17 }
 0x32f   :  { %13947 = vst [vmem:[#allocation87_spill] sm:$0xff] %v9536_v55 }
 0x330   :  { %1282 = vrot.lane.b32.xlu0 %v9538_v51, %s13632_s28 }
 0x332   :  { %v9542_v62 = vpop.permute.xlu0 %1508 }
 0x333   :  { %1136 = vrot.lane.b32.xlu2 %v9505_v24, %s13620_s19  ;;  %1366 = vrot.lane.b32.xlu1 %v9169_v1, %s13634_s2 }
 0x335   :  { %v9548_v43 = vpop.permute.xlu2 %1358  ;;  %v9550_v0 = vpop.permute.xlu1 %1356 }
 0x336   :  { %13949 = vst [vmem:[#allocation89_spill] sm:$0xff] %v9548_v43 }
 0x337   :  { %13950 = vst [vmem:[#allocation90_spill] sm:$0xff] %v9550_v0 }
 0x338   :  { %1210 = vrot.lane.b32.xlu0 %v9538_v51, %s13624_s1 }
 0x33a   :  { %v9554_v16 = vpop.permute.xlu0 %1436 }
 0x33b   :  { %1520 = vrot.lane.b32.xlu2 %v9505_v24, %s8064_s5  ;;  %1270 = vrot.lane.b32.xlu1 %v9169_v1, %s13632_s28 }
 0x33d   :  { %v9560_v23 = vpop.permute.xlu2 %1372  ;;  %v9562_v32 = vpop.permute.xlu1 %1260 }
 0x33e   :  { %13951 = vst [vmem:[#allocation91_spill] sm:$0xff] %v9560_v23 }
 0x33f   :  { %13952 = vst [vmem:[#allocation92_spill] sm:$0xff] %v9562_v32  ;;  %v9577_v32 = vmax.f32 %v1020_v21, 0.0  ;;  %v1021_v21 = vpop.f32.mrf.mxu2 }
 0x340   :  { %1138 = vrot.lane.b32.xlu0 %v9538_v51, %s13620_s19 }
 0x341   :  { %13955 = vst [vmem:[#allocation95_spill] sm:$0xff] %v9577_v32 }
 0x342   :  { %v9567_v28 = vpop.permute.xlu0 %1364 }
 0x343   :  { %1592 = vrot.lane.b32.xlu2 %v9505_v24, %s13618_s27  ;;  %1198 = vrot.lane.b32.xlu1 %v9169_v1, %s13624_s1 }
 0x345   :  { %v9573_v61 = vpop.permute.xlu2 %1262  ;;  %v9575_v50 = vpop.permute.xlu1 %1188 }
 0x346   :  { %13953 = vst [vmem:[#allocation93_spill] sm:$0xff] %v9573_v61  ;;  %v1022_v61 = vadd.f32 %v1021_v21, %v1003_v25 }
 0x347   :  { %13954 = vst [vmem:[#allocation94_spill] sm:$0xff] %v9575_v50 }
 0x348   :  { %1522 = vrot.lane.b32.xlu0 %v9538_v51, %s8064_s5 }
 0x34a   :  { %v9581_v13 = vpop.permute.xlu0 %1268 }
 0x34b   :  { %13956 = vst [vmem:[#allocation96_spill] sm:$0xff] %v9581_v13  ;;  %1284 = vrot.lane.b32.xlu2 %v9577_v32, %s13632_s28  ;;  %1126 = vrot.lane.b32.xlu1 %v9169_v1, %s13620_s19 }
 0x34d   :  { %v9587_v5 = vpop.permute.xlu2 %1190  ;;  %v9589_v22 = vpop.permute.xlu1 %1116 }
 0x34e   :  { %13957 = vst [vmem:[#allocation97_spill] sm:$0xff] %v9587_v5 }
 0x34f   :  { %13958 = vst [vmem:[#allocation98_spill] sm:$0xff] %v9589_v22  ;;  %v9604_v22 = vmax.f32 %v1022_v61, 0.0 }
 0x350   :  { %1452 = vrot.lane.b32.xlu0 %v9577_v32, %s13622_s26 }
 0x351   :  { %13962 = vst [vmem:[#allocation102_spill] sm:$0xff] %v9604_v22 }
 0x352   :  { %v9594_v50 = vpop.permute.xlu0 %1196 }
 0x353   :  { %13959 = vst [vmem:[#allocation99_spill] sm:$0xff] %v9594_v50  ;;  %1212 = vrot.lane.b32.xlu2 %v9577_v32, %s13624_s1  ;;  %1066 = vrot.lane.b32.xlu1 %v9538_v51, %s13616_s29 }
 0x355   :  { %v9600_v1 = vpop.permute.xlu2 %1118  ;;  %v9602_v5 = vpop.permute.xlu1 %1274 }
 0x356   :  { %13960 = vst [vmem:[#allocation100_spill] sm:$0xff] %v9600_v1 }
 0x357   :  { %13961 = vst [vmem:[#allocation101_spill] sm:$0xff] %v9602_v5 }
 0x358   :  { %1286 = vrot.lane.b32.xlu0 %v9604_v22, %s13632_s28 }
 0x35a   :  { %v9608_v29 = vpop.permute.xlu0 %1124 }
 0x35b   :  { %13963 = vst [vmem:[#allocation103_spill] sm:$0xff] %v9608_v29  ;;  %1140 = vrot.lane.b32.xlu2 %v9577_v32, %s13620_s19  ;;  %1450 = vrot.lane.b32.xlu1 %v9538_v51, %s13622_s26 }
 0x35d   :  { %v9614_v58 = vpop.permute.xlu2 %1204  ;;  %v9616_v25 = vpop.permute.xlu1 %1586 }
 0x35e   :  { %13964 = vst [vmem:[#allocation104_spill] sm:$0xff] %v9614_v58  ;;  %v1605_v13 = vsel %vm614_vm7, %v9359_v4, %v9616_v25 }
 0x35f   :  { %13965 = vst [vmem:[#allocation105_spill] sm:$0xff] %v9616_v25 }
 0x360   :  { %1214 = vrot.lane.b32.xlu0 %v9604_v22, %s13624_s1  ;;  %s14179_s1 = sld [smem:[#allocation131_spill]] }
 0x362   :  { %v1583_v61 = vpop.permute.xlu0 %1582 }
 0x363   :  { %1596 = vrot.lane.b32.xlu2 %v9577_v32, %s13618_s27  ;;  %1068 = vrot.lane.b32.xlu1 %v9577_v32, %s13616_s29 }
 0x365   :  { %v9624_v21 = vpop.permute.xlu2 %1278  ;;  %v9626_v1 = vpop.permute.xlu1 %1202 }
 0x366   :  { %13966 = vst [vmem:[#allocation106_spill] sm:$0xff] %v9624_v21 }
 0x367   :  { %13967 = vst [vmem:[#allocation107_spill] sm:$0xff] %v9626_v1 }
 0x368   :  { %1142 = vrot.lane.b32.xlu0 %v9604_v22, %s13620_s19  ;;  %s13636_s19 = smov 9  }
 0x36a   :  { %v9630_v58 = vpop.permute.xlu0 %1054 }
 0x36b   :  { %13968 = vst [vmem:[#allocation108_spill] sm:$0xff] %v9630_v58  ;;  %1070 = vrot.lane.b32.xlu2 %v9604_v22, %s13616_s29  ;;  %1524 = vrot.lane.b32.xlu1 %v9577_v32, %s8064_s5 }
 0x36d   :  { %v9636_v29 = vpop.permute.xlu2 %1590  ;;  %v9638_v5 = vpop.permute.xlu1 %1276 }
 0x36e   :  { %13969 = vst [vmem:[#allocation109_spill] sm:$0xff] %v9636_v29 }
 0x36f   :  { %13970 = vst [vmem:[#allocation110_spill] sm:$0xff] %v9638_v5  ;;  %v1607_v5 = vsel %vm614_vm7, %v1583_v61, %v9636_v29  ;;  %v7988_v29 = vld [vmem:[%s13807_s30 + $0x28] ss:$0 sm:$0xff] }
 0x370   :  { %1594 = vrot.lane.b32.xlu0 %v9538_v51, %s13618_s27  ;;  %v1629_v25 = vmul.f32 %v7988_v29, %v1607_v5 }
 0x372   :  { %v9642_v21 = vpop.permute.xlu0 %1518 }
 0x373   :  { %13971 = vst [vmem:[#allocation111_spill] sm:$0xff] %v9642_v21  ;;  %1526 = vrot.lane.b32.xlu2 %v9604_v22, %s8064_s5  ;;  %1060 = vrot.lane.b32.xlu1 %v9289_v10, %s13616_s29 }
 0x375   :  { %v9648_v58 = vpop.permute.xlu2 %1134  ;;  %v9650_v1 = vpop.permute.xlu1 %1574 }
 0x376   :  { %13972 = vst [vmem:[#allocation112_spill] sm:$0xff] %v9648_v58  ;;  %v1611_v50 = vsel %vm614_vm7, %v9650_v1, %v1583_v61  ;;  %v7987_v58 = vld [vmem:[%s13807_s30 + $0x20] ss:$0 sm:$0xff]  ;;  %v1610_v61 = vsel %vm614_vm7, %v9513_v34, %v9394_v2  ;;  %v1621_v34 = vmul.f32 %v7988_v29, %v1605_v13 }
 0x377   :  { %13973 = vst [vmem:[#allocation113_spill] sm:$0xff] %v9650_v1  ;;  %v1628_v43 = vmul.f32 %v7987_v58, %v1611_v50  ;;  %v1609_v1 = vsel %vm614_vm7, %v9353_v49, %v9359_v4  ;;  %v1604_v50 = vsel %vm614_vm7, %v9337_v46, %v9365_v11  ;;  %v1608_v49 = vsel %vm614_vm7, %v9234_v63, %v9337_v46 }
 0x378   :  { %1598 = vrot.lane.b32.xlu0 %v9604_v22, %s13618_s27  ;;  %v1624_v11 = vmul.f32 %v7987_v58, %v1610_v61  ;;  %v1620_v5 = vmul.f32 %v7987_v58, %v1609_v1  ;;  %v1617_v33 = vmul.f32 %v7988_v29, %v1604_v50  ;;  %v1616_v13 = vmul.f32 %v7987_v58, %v1608_v49  ;;  %v2004_v58 = vld [vmem:[%s13405_s12] sm:$0xff]  ;;  %s14195_s27 = smov 17  }
 0x379   :  { %v9700_v39 = vpack.c.bf16 %v1629_v25, %v1628_v43  ;;  %v2005_v25 = vld [vmem:[%s13405_s12 + $0x8] sm:$0xff]  ;;  %v1534_v61 = vsel %vm573_vm3, %v9542_v62, %v9501_v37  ;;  %v1538_v50 = vsel %vm573_vm3, %v9523_v8, %v9542_v62 }
 0x37a   :  { %v9667_v31 = vpop.permute.xlu0 %1446  ;;  %v9706_v9 = vpack.c.bf16 %v1621_v34, %v1620_v5  ;;  %v9716_v46 = vpack.c.bf16 %v1617_v33, %v1616_v13 }
 0x37b   :  { %13974 = vst [vmem:[#allocation114_spill] sm:$0xff] %v9667_v31  ;;  %1062 = vrot.lane.b32.xlu2 %v9384_v42, %s13616_s29  ;;  %1454 = vrot.lane.b32.xlu1 %v9604_v22, %s13622_s26  ;;  %s14194_s26 = smov 1  }
 0x37c   :  { %v1972_v34 = vunpack.c.l.b16 %v9706_v9  ;;  %v1968_v43 = vunpack.c.l.b16 %v9716_v46 }
 0x37d   :  { %v9688_v44 = vpop.permute.xlu2 %1280  ;;  %v9690_v15 = vpop.permute.xlu1 %1588 }
 0x37e   :  { %13975 = vst [vmem:[#allocation115_spill] sm:$0xff] %v9688_v44  ;;  %v1606_v4 = vsel %vm614_vm7, %v9394_v2, %v9690_v15  ;;  %v1980_v2 = vunpack.c.l.b16 %v9700_v39  ;;  %v1984_v1 = vpack.c.b16 %v1972_v34, %v1968_v43 }
 0x37f   :  { %13976 = vst [vmem:[#allocation116_spill] sm:$0xff] %v9690_v15  ;;  %v1625_v27 = vmul.f32 %v7988_v29, %v1606_v4 }
 0x380   :  { %1380 = vrot.lane.b32.xlu0 %v9577_v32, %s13634_s2  ;;  %v1888_v32 = vunpack.c.l.b16 %v9458_v35  ;;  %v1390_v35 = vsel %vm491_vm5, %v9567_v28, %v9560_v23 }
 0x381   :  { %v9702_v44 = vpack.c.bf16 %v1625_v27, %v1624_v11 }
 0x382   :  { %v9710_v0 = vpop.permute.xlu0 %1374 }
 0x383   :  { %v1976_v15 = vunpack.c.l.b16 %v9702_v44  ;;  %13977 = vst [vmem:[#allocation117_spill] sm:$0xff] %v9710_v0  ;;  %1056 = vrot.lane.b32.xlu2 %v9152_v60, %s13616_s29  ;;  %1382 = vrot.lane.b32.xlu1 %v9604_v22, %s13634_s2  ;;  %v13982_v22 = vld [vmem:[#allocation20_spill] sm:$0xff] }
 0x385   :  { %v9718_v27 = vpop.permute.xlu2 %1208  ;;  %v9720_v11 = vpop.permute.xlu1 %1046  ;;  %v1988_v49 = vpack.c.b16 %v1980_v2, %v1976_v15  ;;  %v1552_v2 = vmul.f32 %v1538_v50, %v13923_v59  ;;  %v1466_v50 = vsel %vm532_vm4, %v9536_v55, %v9554_v16 }
 0x387   :  { %2069 = vmatpush.bf16.msrb.mxu0 %v1988_v49  ;;  %v1553_v49 = vmul.f32 %v1534_v61, %v13924_v19  ;;  %v1462_v61 = vsel %vm532_vm4, %v9554_v16, %v9534_v17  ;;  %v9786_v16 = vmul.f32 %v9289_v10, %v13982_v22  ;;  %v14004_v17 = vld [vmem:[#allocation69_spill] sm:$0xff] }
 0x388   :  { %1058 = vrot.lane.b32.xlu0 %v9236_v18, %s13616_s29  ;;  %s8075_s29 = smov 8  }
 0x389   :  { %v1564_v60 = vpack.c.bf16 %v1553_v49, %v1552_v2  ;;  %v1481_v2 = vmul.f32 %v1462_v61, %v13928_v7  ;;  %13983 = vst [vmem:[#allocation122_spill] sm:$0xff] %v9786_v16 }
 0x38a   :  { %v9726_v29 = vpop.permute.xlu0 %1206 }
 0x38b   :  { %13978 = vst [vmem:[#allocation118_spill] sm:$0xff] %v9726_v29  ;;  %1378 = vrot.lane.b32.xlu2 %v9538_v51, %s13634_s2  ;;  %1376 = vrot.lane.b32.xlu1 %v9505_v24, %s13634_s2  ;;  %v1816_v24 = vunpack.c.l.b16 %v9179_v36  ;;  %v1224_v36 = vsel %vm393_vm9, %v9313_v38, %v9317_v40  ;;  %v1928_v51 = vunpack.c.l.b16 %v9420_v45  ;;  %v1152_v45 = vsel %vm352_vm6, %v9325_v30, %v9329_v6 }
 0x38c   :  { %2070 = vmatpush.bf16.msrb.mxu0 %v1984_v1 }
 0x38d   :  { %v9732_v33 = vpop.permute.xlu2 %1136  ;;  %v9734_v15 = vpop.permute.xlu1 %1132 }
 0x390   :  { %2008 = vperm.xlu0 %7977, %v2004_v58   ;;  %v1812_v58 = vunpack.c.l.b16 %v9145_v12 }
 0x392   :  { %v9750_v4 = vpop.permute.xlu0 %1064 }
 0x393   :  { %13979 = vst [vmem:[#allocation119_spill] sm:$0xff] %v9750_v4  ;;  %2013 = vperm.xlu1 %7978, %v2005_v25   ;;  %v1808_v25 = vunpack.c.l.b16 %v9124_v52  ;;  %v1480_v52 = vmul.f32 %v1466_v50, %v13929_v56 }
 0x395   :  { %v9752_v5 = vpop.permute.xlu2 %1520  ;;  %v1511_v13 = vpop.permute.xlu1 %1510  ;;  %v1492_v16 = vpack.c.bf16 %v1481_v2, %v1480_v52  ;;  %v13988_v2 = vld [vmem:[#allocation25_spill] sm:$0xff] }
 0x396   :  { %v1535_v34 = vsel %vm573_vm3, %v1511_v13, %v9642_v21  ;;  %v1539_v43 = vsel %vm573_vm3, %v9462_v14, %v1511_v13  ;;  %v13998_v21 = vld [vmem:[#allocation66_spill] sm:$0xff] }
 0x397   :  { %v1556_v62 = vmul.f32 %v1539_v43, %v13923_v59  ;;  %v1557_v1 = vmul.f32 %v1535_v34, %v13924_v19  ;;  %v1820_v34 = vunpack.c.l.b16 %v9185_v48  ;;  %v9777_v59 = vpack.c.b16 %v1812_v58, %v1808_v25 }
 0x398   :  { %v1296_v25 = vsel %vm434_vm8, %v9301_v57, %v9305_v54 }
 0x399   :  { %v1566_v13 = vpack.c.bf16 %v1557_v1, %v1556_v62  ;;  %v1936_v62 = vunpack.c.l.b16 %v1564_v60  ;;  %v1937_v1 = vunpack.c.h.b16 %v1564_v60  ;;  %v9803_v10 = vpack.c.b16 %v1820_v34, %v1816_v24  ;;  %v13986_v24 = vld [vmem:[#allocation42_spill] sm:$0xff] }
 0x39a   :  { %v9774_v18 = vpop.permute.xlu0 %1448  ;;  %v9819_v34 = vmul.f32 %v1224_v36, %v13986_v24  ;;  %v13990_v36 = vld [vmem:[#allocation61_spill] sm:$0xff] }
 0x39b   :  { %13980 = vst [vmem:[#allocation120_spill] sm:$0xff] %v9774_v18  ;;  %v1940_v43 = vunpack.c.l.b16 %v1566_v13  ;;  %v1941_v12 = vunpack.c.h.b16 %v1566_v13  ;;  %v1932_v13 = vunpack.c.l.b16 %v9432_v26  ;;  %v1848_v26 = vunpack.c.l.b16 %v9497_v41 }
 0x39d   :  { %v9781_v49 = vpop.permute.xlu2 %1592  ;;  %v1439_v19 = vpop.permute.xlu1 %1438  ;;  %v1948_v50 = vpack.c.b16 %v1940_v43, %v1936_v62  ;;  %v13989_v62 = vld [vmem:[#allocation47_spill] sm:$0xff] }
 0x39e   :  { %13981 = vst [vmem:[#allocation121_spill] sm:$0xff] %v9781_v49  ;;  %v1463_v48 = vsel %vm532_vm4, %v1439_v19, %v9667_v31  ;;  %v1467_v58 = vsel %vm532_vm4, %v9521_v3, %v1439_v19  ;;  %v9807_v19 = vpack.c.b16 %v1941_v12, %v1937_v1  ;;  %v9813_v3 = vmul.f32 %v9384_v42, %v13982_v22  ;;  %v13987_v12 = vld [vmem:[#allocation90_spill] sm:$0xff]  ;;  %v13997_v31 = vld [vmem:[#allocation49_spill] sm:$0xff] }
 0x39f   :  { %v1484_v60 = vmul.f32 %v1467_v58, %v13929_v56  ;;  %v1485_v61 = vmul.f32 %v1463_v48, %v13928_v7  ;;  %v9816_v58 = vmul.f32 %v1296_v25, %v8570_v47  ;;  %2049 = vmatpush.bf16.msrb.mxu3 %v1948_v50  ;;  %v1292_v42 = vsel %vm434_vm8, %v9305_v54, %v9341_v53  ;;  %v13992_v50 = vld [vmem:[#allocation64_spill] sm:$0xff] }
 0x3a0   :  { %13984 = vst [vmem:[#allocation123_spill] sm:$0xff] %v9807_v19  ;;  %v1394_v41 = vsel %vm491_vm5, %v13987_v12, %v9567_v28  ;;  %v1080_v1 = vsel %vm311_vm10, %v13989_v62, %v13988_v2  ;;  %v1944_v48 = vpack.c.b16 %v1932_v13, %v1928_v51  ;;  %v1896_v22 = vunpack.c.l.b16 %v1492_v16  ;;  %v13993_v12 = vld [vmem:[#allocation34_spill] sm:$0xff]  ;;  %v13996_v19 = vld [vmem:[#allocation36_spill] sm:$0xff] }
 0x3a1   :  { %13985 = vst [vmem:[#allocation124_spill] sm:$0xff] %v9813_v3  ;;  %v1494_v43 = vpack.c.bf16 %v1485_v61, %v1484_v60  ;;  %v1148_v60 = vsel %vm352_vm6, %v9329_v6, %v13990_v36  ;;  %v13991_v61 = vld [vmem:[#allocation63_spill] sm:$0xff]  ;;  %v1897_v3 = vunpack.c.h.b16 %v1492_v16  ;;  %v1408_v2 = vmul.f32 %v1394_v41, %v13993_v12  ;;  %v13994_v51 = vld [vmem:[#allocation38_spill] sm:$0xff]  ;;  %v13995_v6 = vld [vmem:[#allocation89_spill] sm:$0xff] }
 0x3a2   :  { %v9838_v52 = vpop.permute.xlu0 %1282  ;;  %v1081_v28 = vsel %vm311_vm10, %v13992_v50, %v13991_v61  ;;  %v1409_v13 = vmul.f32 %v1390_v35, %v13994_v51  ;;  %v9863_v61 = vmul.f32 %v1152_v45, %v13996_v19  ;;  %v1306_v14 = vmul.f32 %v1292_v42, %v13997_v31  ;;  %v13999_v35 = vld [vmem:[#allocation74_spill] sm:$0xff]  ;;  %v14002_v45 = vld [vmem:[#allocation13_spill] sm:$0xff]  ;;  %v14013_v50 = vld [vmem:[#allocation80_spill] sm:$0xff] }
 0x3a3   :  { %v1900_v25 = vunpack.c.l.b16 %v1494_v43  ;;  %v1901_v54 = vunpack.c.h.b16 %v1494_v43  ;;  %2050 = vmatpush.bf16.msrb.mxu3 %v1944_v48  ;;  %v1220_v16 = vsel %vm393_vm9, %v9317_v40, %v13998_v21  ;;  %v1892_v41 = vunpack.c.l.b16 %v13999_v35  ;;  %v14005_v35 = vld [vmem:[#allocation14_spill] sm:$0xff] }
 0x3a4   :  { %v9879_v55 = vmul.f32 %v1148_v60, %v14002_v45  ;;  %v1969_v40 = vunpack.c.h.b16 %v9716_v46  ;;  %v1852_v29 = vunpack.c.l.b16 %v14013_v50  ;;  %v14020_v50 = vld [vmem:[#allocation92_spill] sm:$0xff] }
 0x3a5   :  { %v9852_v56 = vpop.permute.xlu2 %1284  ;;  %v1367_v7 = vpop.permute.xlu1 %1366  ;;  %v1908_v8 = vpack.c.b16 %v1900_v25, %v1896_v22  ;;  %v9873_v37 = vpack.c.b16 %v1901_v54, %v1897_v3  ;;  %v14007_v22 = vld [vmem:[#allocation35_spill] sm:$0xff]  ;;  %v14008_v54 = vld [vmem:[#allocation58_spill] sm:$0xff] }
 0x3a6   :  { %v1391_v43 = vsel %vm491_vm5, %v1367_v7, %v9710_v0  ;;  %v1395_v23 = vsel %vm491_vm5, %v13995_v6, %v1367_v7  ;;  %v14001_v7 = vld [vmem:[#allocation48_spill] sm:$0xff]  ;;  %v9894_v60 = vmul.f32 %v1220_v16, %v14008_v54 }
 0x3a7   :  { %v1412_v48 = vmul.f32 %v1395_v23, %v13993_v12  ;;  %v1413_v0 = vmul.f32 %v1391_v43, %v13994_v51  ;;  %14000 = vst [vmem:[#allocation47_spill] sm:$0xff] %v9873_v37  ;;  %v9876_v6 = vmul.f32 %v1080_v1, %v14001_v7  ;;  %v9882_v42 = vmul.f32 %v1081_v28, %v14001_v7  ;;  %v14006_v43 = vld [vmem:[#allocation73_spill] sm:$0xff]  ;;  %v14010_v12 = vld [vmem:[#allocation78_spill] sm:$0xff]  ;;  %v14011_v51 = vld [vmem:[#allocation24_spill] sm:$0xff] }
 0x3a8   :  { %v1297_v23 = vsel %vm434_vm8, %v14005_v35, %v14004_v17  ;;  %v1225_v3 = vsel %vm393_vm9, %v14007_v22, %v14006_v43  ;;  %v1420_v1 = vpack.c.bf16 %v1409_v13, %v1408_v2  ;;  %2051 = vmatpush.bf16.msrb.mxu3 %v1908_v8  ;;  %v14009_v28 = vld [vmem:[#allocation65_spill] sm:$0xff]  ;;  %v1153_v37 = vsel %vm352_vm6, %v14011_v51, %v14010_v12  ;;  %v14014_v2 = vld [vmem:[#allocation68_spill] sm:$0xff]  ;;  %v14016_v13 = vld [vmem:[#allocation115_spill] sm:$0xff] }
 0x3a9   :  { %14003 = vst [vmem:[#allocation61_spill] sm:$0xff] %v9882_v42  ;;  %v1422_v25 = vpack.c.bf16 %v1413_v0, %v1412_v48  ;;  %v1149_v46 = vsel %vm352_vm6, %v14010_v12, %v14009_v28  ;;  %v14015_v0 = vld [vmem:[#allocation85_spill] sm:$0xff]  ;;  %v1300_v16 = vsel %vm434_vm8, %v14016_v13, %v9301_v57  ;;  %v1904_v48 = vpack.c.b16 %v1892_v41, %v1888_v32  ;;  %v14019_v51 = vld [vmem:[#allocation96_spill] sm:$0xff] }
 0x3aa   :  { %v9904_v42 = vpop.permute.xlu0 %1210  ;;  %v1082_v8 = vsel %vm311_vm10, %v14015_v0, %v14014_v2  ;;  %v9916_v22 = vmul.f32 %v1297_v23, %v8570_v47  ;;  %v9919_v12 = vmul.f32 %v1225_v3, %v13986_v24  ;;  %v1288_v2 = vsel %vm434_vm8, %v9341_v53, %v14016_v13  ;;  %v14025_v23 = vld [vmem:[#allocation99_spill] sm:$0xff]  ;;  %v14026_v3 = vld [vmem:[#allocation94_spill] sm:$0xff] }
 0x3ab   :  { %14012 = vst [vmem:[#allocation66_spill] sm:$0xff] %v9904_v42  ;;  %v1860_v28 = vunpack.c.l.b16 %v1422_v25  ;;  %v1298_v42 = vsel %vm434_vm8, %v14020_v50, %v14019_v51  ;;  %v9934_v32 = vmul.f32 %v1153_v37, %v13996_v19  ;;  %v9937_v41 = vmul.f32 %v1149_v46, %v14002_v45  ;;  %v14028_v53 = vld [vmem:[#allocation46_spill] sm:$0xff] }
 0x3ac   :  { %14017 = vst [vmem:[#allocation74_spill] sm:$0xff] %v9916_v22  ;;  %2052 = vmatpush.bf16.msrb.mxu3 %v1904_v48  ;;  %v1856_v22 = vunpack.c.l.b16 %v1420_v1  ;;  %v9944_v18 = vmul.f32 %v1082_v8, %v14001_v7  ;;  %v1304_v13 = vmul.f32 %v1300_v16, %v14028_v53  ;;  %v9948_v37 = vmul.f32 %v1298_v42, %v8570_v47  ;;  %v14031_v48 = vld [vmem:[#allocation103_spill] sm:$0xff]  ;;  %v14033_v42 = vld [vmem:[#allocation104_spill] sm:$0xff] }
 0x3ad   :  { %14018 = vst [vmem:[#allocation69_spill] sm:$0xff] %v9919_v12  ;;  %v9929_v0 = vpop.permute.xlu2 %1212  ;;  %v9931_v57 = vpop.permute.xlu1 %1270  ;;  %v1226_v12 = vsel %vm393_vm9, %v14026_v3, %v14025_v23  ;;  %v1861_v63 = vunpack.c.h.b16 %v1422_v25  ;;  %v14030_v3 = vld [vmem:[#allocation101_spill] sm:$0xff] }
 0x3ae   :  { %14021 = vst [vmem:[#allocation14_spill] sm:$0xff] %v9929_v0  ;;  %v1864_v0 = vpack.c.b16 %v1852_v29, %v1848_v26  ;;  %v9952_v49 = vmul.f32 %v1226_v12, %v13986_v24  ;;  %v1293_v8 = vsel %vm434_vm8, %v14004_v17, %v14030_v3  ;;  %v1228_v26 = vsel %vm393_vm9, %v9718_v27, %v9313_v38  ;;  %v14056_v24 = vld [vmem:[#allocation35_spill] sm:$0xff] }
 0x3af   :  { %14022 = vst [vmem:[#allocation73_spill] sm:$0xff] %v9931_v57  ;;  %v1857_v57 = vunpack.c.h.b16 %v1420_v1  ;;  %v1216_v17 = vsel %vm393_vm9, %v13998_v21, %v9718_v27  ;;  %v1973_v1 = vunpack.c.h.b16 %v9706_v9  ;;  %v9986_v12 = vpack.c.bf16 %v9816_v58, %v1304_v13 }
 0x3b0   :  { %14023 = vst [vmem:[#allocation78_spill] sm:$0xff] %v9934_v32  ;;  %v14029_v32 = vld [vmem:[#allocation50_spill] sm:$0xff]  ;;  %v1156_v9 = vsel %vm352_vm6, %v9732_v33, %v9325_v30  ;;  %v1310_v21 = vmul.f32 %v1293_v8, %v13997_v31  ;;  %v1977_v30 = vunpack.c.h.b16 %v9702_v44 }
 0x3b1   :  { %14024 = vst [vmem:[#allocation80_spill] sm:$0xff] %v9937_v41  ;;  %v1307_v46 = vmul.f32 %v1288_v2, %v14029_v32  ;;  %v1868_v41 = vpack.c.b16 %v1860_v28, %v1856_v22  ;;  %v1222_v22 = vsel %vm393_vm9, %v14025_v23, %v14033_v42  ;;  %v9975_v25 = vpack.c.b16 %v1861_v63, %v1857_v57  ;;  %v14035_v28 = vld [vmem:[#allocation107_spill] sm:$0xff]  ;;  %v14036_v2 = vld [vmem:[#allocation110_spill] sm:$0xff] }
 0x3b2   :  { %14027 = vst [vmem:[#allocation115_spill] sm:$0xff] %v9944_v18  ;;  %v14032_v18 = vld [vmem:[#allocation98_spill] sm:$0xff]  ;;  %v1221_v38 = vsel %vm393_vm9, %v14006_v43, %v14035_v28  ;;  %v1294_v16 = vsel %vm434_vm8, %v14019_v51, %v14036_v2  ;;  %v9992_v63 = vpop.permute.xlu0 %1138  ;;  %v14037_v43 = vld [vmem:[#allocation43_spill] sm:$0xff]  ;;  %v1144_v51 = vsel %vm352_vm6, %v13990_v36, %v9732_v33  ;;  %v14039_v33 = vld [vmem:[#allocation57_spill] sm:$0xff] }
 0x3b3   :  { %v1154_v29 = vsel %vm352_vm6, %v14032_v18, %v14031_v48  ;;  %2053 = vmatpush.bf16.msrb.mxu3 %v1868_v41  ;;  %14034 = vst [vmem:[#allocation96_spill] sm:$0xff] %v9975_v25  ;;  %v9995_v27 = vpack.c.bf16 %v1307_v46, %v1306_v14  ;;  %v1232_v57 = vmul.f32 %v1228_v26, %v14037_v43  ;;  %v14038_v23 = vld [vmem:[#allocation59_spill] sm:$0xff]  ;;  %v14040_v25 = vld [vmem:[#allocation108_spill] sm:$0xff] }
 0x3b4   :  { %v10003_v58 = vmul.f32 %v1154_v29, %v13996_v19  ;;  %v10006_v41 = vmul.f32 %v1222_v22, %v14008_v54  ;;  %v1235_v13 = vmul.f32 %v1216_v17, %v14038_v23  ;;  %v10015_v46 = vmul.f32 %v1221_v38, %v14008_v54  ;;  %v14041_v17 = vld [vmem:[#allocation17_spill] sm:$0xff] }
 0x3b5   :  { %v10010_v8 = vpop.permute.xlu2 %1140  ;;  %v10012_v14 = vpop.permute.xlu1 %1198  ;;  %v10018_v26 = vmul.f32 %v1294_v16, %v13997_v31  ;;  %v1160_v36 = vmul.f32 %v1156_v9, %v14039_v33  ;;  %v1985_v29 = vpack.c.b16 %v1973_v1, %v1969_v40  ;;  %v1981_v22 = vunpack.c.h.b16 %v9700_v39  ;;  %v14043_v16 = vld [vmem:[#allocation44_spill] sm:$0xff] }
 0x3b6   :  { %v1083_v44 = vsel %vm311_vm10, %v9720_v11, %v14040_v25  ;;  %v1163_v19 = vmul.f32 %v1144_v51, %v14041_v17  ;;  %v10029_v38 = vpack.c.bf16 %v9819_v34, %v1232_v57  ;;  %v10038_v1 = vpack.c.bf16 %v1235_v13, %v9894_v60  ;;  %v14044_v51 = vld [vmem:[#allocation16_spill] sm:$0xff] }
 0x3b7   :  { %2054 = vmatpush.bf16.msrb.mxu3 %v1864_v0  ;;  %v1084_v0 = vsel %vm311_vm10, %v9750_v4, %v13989_v62  ;;  %v1528_v9 = vsel %vm573_vm3, %v14043_v16, %v9752_v5  ;;  %v1540_v34 = vsel %vm573_vm3, %v9752_v5, %v14044_v51  ;;  %v1989_v57 = vpack.c.b16 %v1981_v22, %v1977_v30  ;;  %v14046_v30 = vld [vmem:[#allocation56_spill] sm:$0xff]  ;;  %v14058_v4 = vld [vmem:[#allocation74_spill] sm:$0xff] }
 0x3b8   :  { %14042 = vst [vmem:[#allocation92_spill] sm:$0xff] %v10038_v1  ;;  %v10049_v62 = vmul.f32 %v1083_v44, %v14001_v7  ;;  %v10052_v40 = vpack.c.bf16 %v9863_v61, %v1160_v36  ;;  %v1289_v60 = vsel %vm434_vm8, %v14030_v3, %v9838_v52  ;;  %v1301_v13 = vsel %vm434_vm8, %v9838_v52, %v14005_v35  ;;  %v14047_v52 = vld [vmem:[#allocation40_spill] sm:$0xff]  ;;  %v14057_v7 = vld [vmem:[#allocation66_spill] sm:$0xff] }
 0x3b9   :  { %v10064_v5 = vpack.c.bf16 %v1163_v19, %v9879_v55  ;;  %v1150_v61 = vsel %vm352_vm6, %v14031_v48, %v9734_v15  ;;  %v1088_v36 = vmul.f32 %v1084_v0, %v14046_v30  ;;  %v1302_v3 = vsel %vm434_vm8, %v9852_v56, %v14020_v50 }
 0x3ba   :  { %14045 = vst [vmem:[#allocation99_spill] sm:$0xff] %v10049_v62  ;;  %v10075_v22 = vpop.permute.xlu0 %1522  ;;  %v1546_v35 = vmul.f32 %v1528_v9, %v14047_v52  ;;  %v1308_v16 = vmul.f32 %v1301_v13, %v14028_v53  ;;  %v1311_v48 = vmul.f32 %v1289_v60, %v14029_v32  ;;  %v1290_v0 = vsel %vm434_vm8, %v14036_v2, %v9852_v56  ;;  %v14050_v56 = vld [vmem:[#allocation121_spill] sm:$0xff]  ;;  %v14051_v2 = vld [vmem:[#allocation62_spill] sm:$0xff]  ;;  %v14052_v9 = vld [vmem:[#allocation31_spill] sm:$0xff] }
 0x3bb   :  { %2055 = vmatpush.bf16.msrb.mxu3 %v9803_v10  ;;  %v14048_v10 = vld [vmem:[#allocation41_spill] sm:$0xff]  ;;  %v1312_v19 = vmul.f32 %v1302_v3, %v14028_v53  ;;  %v10100_v55 = vpack.c.bf16 %v9876_v6, %v1088_v36  ;;  %v1600_v39 = vsel %vm614_vm7, %v14051_v2, %v14050_v56  ;;  %v14054_v60 = vld [vmem:[#allocation120_spill] sm:$0xff]  ;;  %v14055_v13 = vld [vmem:[#allocation15_spill] sm:$0xff]  ;;  %v1315_v36 = vmul.f32 %v1290_v0, %v14029_v32 }
 0x3bc   :  { %v1547_v44 = vmul.f32 %v1540_v34, %v14048_v10  ;;  %v10093_v34 = vmul.f32 %v1150_v61, %v14002_v45  ;;  %v1612_v61 = vsel %vm614_vm7, %v14050_v56, %v14052_v9  ;;  %v1456_v6 = vsel %vm532_vm4, %v14055_v13, %v14054_v60  ;;  %v14062_v0 = vld [vmem:[#allocation11_spill] sm:$0xff] }
 0x3bd   :  { %v10087_v50 = vpop.permute.xlu2 %1596  ;;  %v10089_v51 = vpop.permute.xlu1 %1126  ;;  %14049 = vst [vmem:[#allocation101_spill] sm:$0xff] %v10100_v55  ;;  %v1229_v2 = vsel %vm393_vm9, %v14057_v7, %v14056_v24  ;;  %v1322_v62 = vpack.c.bf16 %v14058_v4, %v1308_v16  ;;  %v10123_v9 = vpack.c.bf16 %v1311_v48, %v1310_v21  ;;  %v1468_v56 = vsel %vm532_vm4, %v14054_v60, %v14062_v0  ;;  %v10140_v4 = vld [vmem:[%s13807_s30 + $0x30] ss:$0 sm:$0xff]  ;;  %v14063_v0 = vld [vmem:[#allocation54_spill] sm:$0xff]  ;;  %v14072_v55 = vld [vmem:[#allocation65_spill] sm:$0xff] }
 0x3be   :  { %v10111_v3 = vpack.c.bf16 %v1547_v44, %v1546_v35  ;;  %v14060_v35 = vld [vmem:[#allocation94_spill] sm:$0xff]  ;;  %v1618_v24 = vmul.f32 %v10140_v4, %v1600_v39  ;;  %v10150_v21 = vpack.c.bf16 %v9948_v37, %v1312_v19  ;;  %v1236_v16 = vmul.f32 %v1229_v2, %v14037_v43  ;;  %v14066_v2 = vld [vmem:[#allocation55_spill] sm:$0xff] }
 0x3bf   :  { %2056 = vmatpush.bf16.msrb.mxu3 %v9777_v59  ;;  %14059 = vst [vmem:[#allocation98_spill] sm:$0xff] %v10123_v9  ;;  %v14061_v44 = vld [vmem:[#allocation14_spill] sm:$0xff]  ;;  %v10162_v59 = vmul.f32 %v1456_v6, %v14063_v0  ;;  %v10165_v37 = vpack.c.bf16 %v1315_v36, %v10018_v26  ;;  %v1774_v39 = vunpack.c.l.b16 %v10123_v9  ;;  %v14069_v36 = vld [vmem:[#allocation73_spill] sm:$0xff] }
 0x3c0   :  { %14053 = vst [vmem:[#allocation103_spill] sm:$0xff] %v10111_v3  ;;  %v1230_v13 = vsel %vm393_vm9, %v14061_v44, %v14060_v35  ;;  %v1218_v48 = vsel %vm393_vm9, %v14033_v42, %v14061_v44  ;;  %v10170_v3 = vmul.f32 %v1468_v56, %v14066_v2  ;;  %v1773_v44 = vunpack.c.h.b16 %v1322_v62  ;;  %v14071_v56 = vld [vmem:[#allocation69_spill] sm:$0xff] }
 0x3c1   :  { %14064 = vst [vmem:[#allocation104_spill] sm:$0xff] %v10162_v59  ;;  %v1776_v6 = vunpack.c.l.b16 %v10150_v21  ;;  %v1243_v26 = vmul.f32 %v1218_v48, %v14038_v23  ;;  %v14070_v59 = vld [vmem:[#allocation93_spill] sm:$0xff]  ;;  %v1778_v9 = vunpack.c.l.b16 %v10165_v37  ;;  %v14076_v2 = vunpack.c.l.b16 %v9986_v12 }
 0x3c2   :  { %v10157_v60 = vpop.permute.xlu0 %1452  ;;  %14065 = vst [vmem:[#allocation107_spill] sm:$0xff] %v10165_v37 }
 0x3c3   :  { %2111 = vmatpush.bf16.msra.mxu3 %v1989_v57  ;;  %v1217_v57 = vsel %vm393_vm9, %v14035_v28, %v14057_v7  ;;  %v10146_v7 = vld [vmem:[%s13807_s30 + $0x38] ss:$0 sm:$0xff]  ;;  %14067 = vst [vmem:[#allocation110_spill] sm:$0xff] %v10170_v3  ;;  %v1250_v3 = vpack.c.bf16 %v14071_v56, %v1236_v16  ;;  %v14075_v16 = vld [vmem:[#allocation106_spill] sm:$0xff] }
 0x3c4   :  { %v1619_v28 = vmul.f32 %v10146_v7, %v1612_v61  ;;  %v1239_v19 = vmul.f32 %v1217_v57, %v14038_v23  ;;  %v1240_v61 = vmul.f32 %v1230_v13, %v14037_v43  ;;  %v1299_v57 = vsel %vm434_vm8, %v14070_v59, %v14069_v36 }
 0x3c5   :  { %v10172_v42 = vpop.permute.xlu1 %1066  ;;  %v1777_v13 = vunpack.c.h.b16 %v10150_v21  ;;  %v10193_v48 = vpop.permute.xlu2 %1070  ;;  %v1317_v56 = vmul.f32 %v1299_v57, %v8570_v47 }
 0x3c6   :  { %v10175_v35 = vpack.c.bf16 %v1619_v28, %v1618_v24  ;;  %v14073_v24 = vld [vmem:[#allocation24_spill] sm:$0xff]  ;;  %v10200_v21 = vpack.c.bf16 %v9952_v49, %v1240_v61  ;;  %v10220_v49 = vpack.c.bf16 %v1243_v26, %v10006_v41  ;;  %v1733_v26 = vunpack.c.h.b16 %v1250_v3 }
 0x3c7   :  { %2112 = vmatpush.bf16.msra.mxu3 %v1985_v29  ;;  %v1772_v29 = vunpack.c.l.b16 %v1322_v62  ;;  %v1145_v62 = vsel %vm352_vm6, %v14072_v55, %v9992_v63  ;;  %v1157_v28 = vsel %vm352_vm6, %v9992_v63, %v14073_v24  ;;  %v1295_v55 = vsel %vm434_vm8, %v14069_v36, %v14075_v16 }
 0x3c8   :  { %14068 = vst [vmem:[#allocation108_spill] sm:$0xff] %v10175_v35  ;;  %v10197_v35 = vpack.c.bf16 %v1239_v19, %v10015_v46  ;;  %v14077_v24 = vunpack.c.h.b16 %v9986_v12  ;;  %v14078_v46 = vunpack.c.l.b16 %v9995_v27  ;;  %v1164_v61 = vmul.f32 %v1157_v28, %v14039_v33  ;;  %v7785_v12 = vld [vmem:[%s13404_s11 + $0x4] sm:$0xf] }
 0x3c9   :  { %v10209_v63 = vpack.c.b16 %v1772_v29, %v14076_v2  ;;  %v1167_v36 = vmul.f32 %v1145_v62, %v14041_v17  ;;  %v1158_v2 = vsel %vm352_vm6, %v10010_v8, %v14032_v18  ;;  %v1318_v41 = vmul.f32 %v1295_v55, %v13997_v31 }
 0x3ca   :  { %14074 = vst [vmem:[#allocation44_spill] sm:$0xff] %v10197_v35  ;;  %v10213_v37 = vpack.c.b16 %v1773_v44, %v14077_v24  ;;  %v10217_v19 = vpack.c.b16 %v1774_v39, %v14078_v46  ;;  %v6843_v39 = vld [vmem:[%s13404_s11 + $0xc] sm:$0xf0]  ;;  %v1287_v29 = vpop.permute.xlu0 %1286  ;;  %v1732_v44 = vunpack.c.l.b16 %v1250_v3  ;;  %v1734_v24 = vunpack.c.l.b16 %v10197_v35 }
 0x3cb   :  { %v10235_v57 = vor.u32 %v7785_v12, %v6843_v39  ;;  %v1291_v62 = vsel %vm434_vm8, %v14075_v16, %v1287_v29  ;;  %v1303_v18 = vsel %vm434_vm8, %v1287_v29, %v14070_v59  ;;  %v1146_v55 = vsel %vm352_vm6, %v9734_v15, %v10010_v8  ;;  %v14079_v59 = vld [vmem:[#allocation78_spill] sm:$0xff]  ;;  %v14080_v29 = vld [vmem:[#allocation80_spill] sm:$0xff]  ;;  %v14081_v15 = vld [vmem:[#allocation97_spill] sm:$0xff] }
 0x3cc   :  { %v1168_v3 = vmul.f32 %v1158_v2, %v14039_v33  ;;  %v1316_v46 = vmul.f32 %v1303_v18, %v14028_v53  ;;  %v1319_v12 = vmul.f32 %v1291_v62, %v14029_v32  ;;  %v1178_v39 = vpack.c.bf16 %v14079_v59, %v1164_v61 }
 0x3cd   :  { %v10252_v16 = vpop.permute.xlu1 %1450  ;;  %2057 = vmatmul.bf16.vlgmr.msrb.gmra.mxu3 %v10235_v57  ;;  %v10257_v28 = vpack.c.bf16 %v1167_v36, %v14080_v29  ;;  %v1227_v8 = vsel %vm393_vm9, %v14081_v15, %v10012_v14  ;;  %v14082_v18 = vunpack.c.l.b16 %v10029_v38  ;;  %v1171_v61 = vmul.f32 %v1146_v55, %v14041_v17  ;;  %v14083_v36 = vld [vmem:[#allocation118_spill] sm:$0xff] }
 0x3ce   :  { %v1326_v2 = vpack.c.bf16 %v1317_v56, %v1316_v46  ;;  %v10265_v62 = vpack.c.bf16 %v1319_v12, %v1318_v41  ;;  %v1223_v59 = vsel %vm393_vm9, %v10012_v14, %v14083_v36  ;;  %v14084_v29 = vunpack.c.h.b16 %v10029_v38  ;;  %v10288_v12 = vpop.permute.xlu2 %1526 }
 0x3cf   :  { %v10269_v32 = vpack.c.b16 %v1732_v44, %v14082_v18  ;;  %v14085_v31 = vunpack.c.l.b16 %v10038_v1  ;;  %v10285_v41 = vpack.c.bf16 %v10003_v58, %v1168_v3  ;;  %v14086_v18 = vld [vmem:[#allocation42_spill] sm:$0xff]  ;;  %v1692_v14 = vunpack.c.l.b16 %v1178_v39  ;;  %v14087_v3 = vld [vmem:[#allocation67_spill] sm:$0xff] }
 0x3d0   :  { %v10278_v47 = vpack.c.b16 %v1733_v26, %v14084_v29  ;;  %v1780_v44 = vunpack.c.l.b16 %v1326_v2  ;;  %v1781_v46 = vunpack.c.h.b16 %v1326_v2  ;;  %v1782_v55 = vunpack.c.l.b16 %v10265_v62 }
 0x3d1   :  { %v10282_v56 = vpack.c.b16 %v1734_v24, %v14085_v31  ;;  %v1245_v53 = vmul.f32 %v1227_v8, %v14086_v18  ;;  %v1693_v35 = vunpack.c.h.b16 %v1178_v39  ;;  %v1694_v38 = vunpack.c.l.b16 %v10257_v28 }
 0x3d2   :  { %v1246_v26 = vmul.f32 %v1223_v59, %v14008_v54  ;;  %v1215_v29 = vpop.permute.xlu0 %1214  ;;  %v1788_v31 = vpack.c.b16 %v1780_v44, %v1776_v6  ;;  %v1789_v24 = vpack.c.b16 %v1781_v46, %v1777_v13  ;;  %v1790_v1 = vpack.c.b16 %v1782_v55, %v1778_v9  ;;  %v14088_v59 = vld [vmem:[#allocation26_spill] sm:$0xff]  ;;  %v14101_v54 = vld [vmem:[#allocation85_spill] sm:$0xff] }
 0x3d3   :  { %v10294_v58 = vpack.c.bf16 %v1171_v61, %v10093_v34  ;;  %v1529_v2 = vsel %vm573_vm3, %v14087_v3, %v10075_v22  ;;  %v1219_v39 = vsel %vm393_vm9, %v14083_v36, %v1215_v29  ;;  %v1231_v8 = vsel %vm393_vm9, %v1215_v29, %v14081_v15 }
 0x3d4   :  { %v1541_v9 = vsel %vm573_vm3, %v10075_v22, %v14088_v59  ;;  %v1244_v34 = vmul.f32 %v1231_v8, %v14037_v43  ;;  %v1247_v6 = vmul.f32 %v1219_v39, %v14038_v23  ;;  %2035 = vmatpush.bf16.msrb.mxu1 %v1788_v31  ;;  %2077 = vmatpush.bf16.msrb.mxu2 %v1789_v24  ;;  %v14089_v15 = vunpack.c.l.b16 %v10052_v40  ;;  %v14092_v24 = vld [vmem:[#allocation100_spill] sm:$0xff] }
 0x3d5   :  { %v10312_v13 = vpop.permute.xlu1 %1068  ;;  %2119 = vmatpush.bf16.msra.mxu0 %v1790_v1  ;;  %v14090_v46 = vunpack.c.h.b16 %v10052_v40  ;;  %v14091_v55 = vunpack.c.l.b16 %v10064_v5  ;;  %v10329_v31 = vmul.f32 %v1529_v2, %v14047_v52  ;;  %v1155_v1 = vsel %vm352_vm6, %v14092_v24, %v10089_v51  ;;  %v14093_v40 = vld [vmem:[#allocation116_spill] sm:$0xff] }
 0x3d6   :  { %v10318_v44 = vpack.c.b16 %v1692_v14, %v14089_v15  ;;  %v1254_v3 = vpack.c.bf16 %v1245_v53, %v1244_v34  ;;  %v10335_v39 = vpack.c.bf16 %v1247_v6, %v1246_v26  ;;  %v10338_v14 = vmul.f32 %v1541_v9, %v14048_v10  ;;  %v14095_v26 = vld [vmem:[#allocation64_spill] sm:$0xff] }
 0x3d7   :  { %v10322_v22 = vpack.c.b16 %v1693_v35, %v14090_v46  ;;  %v10326_v29 = vpack.c.b16 %v1694_v38, %v14091_v55  ;;  %v1602_v35 = vsel %vm614_vm7, %v14093_v40, %v10087_v50  ;;  %v14094_v38 = vld [vmem:[#allocation81_spill] sm:$0xff]  ;;  %v1087_v53 = vsel %vm311_vm10, %v10193_v48, %v9720_v11  ;;  %v7787_v11 = vld [vmem:[%s13404_s11 + $0x10] sm:$0xf0] }
 0x3d8   :  { %v1614_v2 = vsel %vm614_vm7, %v10087_v50, %v14094_v38  ;;  %v1085_v8 = vsel %vm311_vm10, %v10172_v42, %v14095_v26  ;;  %2036 = vmatpush.bf16.msrb.mxu1 %v10209_v63  ;;  %2078 = vmatpush.bf16.msrb.mxu2 %v10213_v37  ;;  %v1740_v59 = vunpack.c.l.b16 %v1254_v3  ;;  %v1741_v9 = vunpack.c.h.b16 %v1254_v3  ;;  %v6849_v50 = vld [vmem:[%s13404_s11 + $0x8] sm:$0xf]  ;;  %v14096_v6 = vld [vmem:[#allocation112_spill] sm:$0xff]  ;;  %v1063_v3 = vpop.permute.xlu2 %1062 }
 0x3d9   :  { %v1742_v34 = vunpack.c.l.b16 %v10335_v39  ;;  %v1151_v15 = vsel %vm352_vm6, %v10089_v51, %v14096_v6  ;;  %v14097_v63 = vld [vmem:[#allocation36_spill] sm:$0xff]  ;;  %2120 = vmatpush.bf16.msra.mxu0 %v10217_v19  ;;  %v10371_v37 = vor.u32 %v7787_v11, %v6849_v50  ;;  %v1100_v55 = vmul.f32 %v1087_v53, %v14046_v30 }
 0x3da   :  { %v1173_v46 = vmul.f32 %v1155_v1, %v14097_v63  ;;  %v1143_v40 = vpop.permute.xlu0 %1142  ;;  %v14098_v38 = vunpack.c.l.b16 %v10200_v21  ;;  %v14099_v36 = vunpack.c.h.b16 %v10200_v21  ;;  %v14100_v23 = vunpack.c.l.b16 %v10220_v49 }
 0x3db   :  { %v1092_v1 = vmul.f32 %v1085_v8, %v14046_v30  ;;  %v1086_v19 = vsel %vm311_vm10, %v10312_v13, %v14101_v54  ;;  %v1147_v53 = vsel %vm352_vm6, %v14096_v6, %v1143_v40  ;;  %6851 = vmatmul.msk.bf16.vlgmr.msrb.gmra.mxu0 %vm2031_vm12, %v10371_v37  ;;  %v1698_v8 = vunpack.c.l.b16 %v10294_v58 }
 0x3dc   :  { %v1748_v26 = vpack.c.b16 %v1740_v59, %v14098_v38  ;;  %v1749_v61 = vpack.c.b16 %v1741_v9, %v14099_v36  ;;  %v1750_v51 = vpack.c.b16 %v1742_v34, %v14100_v23  ;;  %v1159_v59 = vsel %vm352_vm6, %v1143_v40, %v14092_v24  ;;  %v14102_v24 = vld [vmem:[#allocation86_spill] sm:$0xff]  ;;  %v14104_v38 = vld [vmem:[#allocation99_spill] sm:$0xff] }
 0x3dd   :  { %v1174_v23 = vmul.f32 %v1151_v15, %v14002_v45  ;;  %v1172_v21 = vmul.f32 %v1159_v59, %v14039_v33  ;;  %v1175_v36 = vmul.f32 %v1147_v53, %v14041_v17  ;;  %v1525_v54 = vpop.permute.xlu1 %1524  ;;  %v1626_v9 = vmul.f32 %v10140_v4, %v1602_v35  ;;  %6852 = vmatmul.msk.bf16.vlgmr.msra.gmra.mxu3 %vm2031_vm12, %v10371_v37  ;;  %v14106_v53 = vld [vmem:[#allocation77_spill] sm:$0xff] }
 0x3de   :  { %2037 = vmatpush.bf16.msrb.mxu1 %v1748_v26  ;;  %2079 = vmatpush.bf16.msrb.mxu2 %v1749_v61  ;;  %v1627_v34 = vmul.f32 %v10146_v7, %v1614_v2  ;;  %v1458_v50 = vsel %vm532_vm4, %v14102_v24, %v10157_v60  ;;  %v1075_v11 = vsel %vm311_vm10, %v1063_v3, %v10193_v48  ;;  %v14103_v2 = vld [vmem:[#allocation87_spill] sm:$0xff]  ;;  %v14105_v26 = vld [vmem:[#allocation61_spill] sm:$0xff]  ;;  %v14111_v24 = vld [vmem:[#allocation18_spill] sm:$0xff] }
 0x3df   :  { %2121 = vmatpush.bf16.msra.mxu0 %v1750_v51  ;;  %v1079_v61 = vsel %vm311_vm10, %v14040_v25, %v1063_v3  ;;  %v1096_v6 = vmul.f32 %v1086_v19, %v14046_v30  ;;  %v1182_v15 = vpack.c.bf16 %v1173_v46, %v1172_v21  ;;  %v10410_v35 = vpack.c.bf16 %v1175_v36, %v1174_v23  ;;  %v14107_v46 = vld [vmem:[#allocation84_spill] sm:$0xff]  ;;  %v14110_v36 = vld [vmem:[#allocation23_spill] sm:$0xff] }
 0x3e0   :  { %v1470_v40 = vsel %vm532_vm4, %v10157_v60, %v14103_v2  ;;  %v1110_v48 = vpack.c.bf16 %v14104_v38, %v1100_v55  ;;  %v10420_v51 = vpack.c.bf16 %v14105_v26, %v1092_v1  ;;  %v1530_v25 = vsel %vm573_vm3, %v14106_v53, %v1525_v54  ;;  %v14108_v55 = vld [vmem:[#allocation111_spill] sm:$0xff]  ;;  %v14109_v23 = vld [vmem:[#allocation72_spill] sm:$0xff] }
 0x3e1   :  { %v1542_v3 = vsel %vm573_vm3, %v1525_v54, %v14107_v46  ;;  %v1700_v19 = vunpack.c.l.b16 %v1182_v15  ;;  %v1701_v59 = vunpack.c.h.b16 %v1182_v15  ;;  %v1702_v60 = vunpack.c.l.b16 %v10410_v35 }
 0x3e2   :  { %2038 = vmatpush.bf16.msrb.mxu1 %v10269_v32  ;;  %2080 = vmatpush.bf16.msrb.mxu2 %v10278_v47  ;;  %v1531_v1 = vsel %vm573_vm3, %v14108_v55, %v10288_v12  ;;  %v1543_v21 = vsel %vm573_vm3, %v10288_v12, %v14109_v23  ;;  %v1102_v54 = vmul.f32 %v1079_v61, %v14110_v36  ;;  %v14112_v47 = vld [vmem:[#allocation115_spill] sm:$0xff]  ;;  %v1595_v2 = vpop.permute.xlu0 %1594  ;;  %v14113_v38 = vunpack.c.l.b16 %v10285_v41 }
 0x3e3   :  { %v1103_v32 = vmul.f32 %v1075_v11, %v14111_v24  ;;  %2122 = vmatpush.bf16.msra.mxu0 %v10282_v56  ;;  %v1108_v15 = vpack.c.bf16 %v14112_v47, %v1096_v6  ;;  %v14114_v53 = vunpack.c.h.b16 %v10285_v41  ;;  %v1710_v55 = vpack.c.b16 %v1702_v60, %v1698_v8  ;;  %v14115_v6 = vld [vmem:[#allocation55_spill] sm:$0xff]  ;;  %v14119_v47 = vld [vmem:[#allocation70_spill] sm:$0xff] }
 0x3e4   :  { %v1708_v26 = vpack.c.b16 %v1700_v19, %v14113_v38  ;;  %v10449_v17 = vpack.c.bf16 %v10338_v14, %v10329_v31  ;;  %v10451_v12 = vpack.c.bf16 %v1627_v34, %v1626_v9  ;;  %v1554_v11 = vmul.f32 %v1530_v25, %v14047_v52 }
 0x3e5   :  { %v1709_v46 = vpack.c.b16 %v1701_v59, %v14114_v53  ;;  %v1555_v56 = vmul.f32 %v1542_v3, %v14048_v10  ;;  %v10456_v61 = vmul.f32 %v1458_v50, %v14063_v0  ;;  %v10459_v23 = vmul.f32 %v1470_v40, %v14115_v6  ;;  %v1061_v8 = vpop.permute.xlu1 %1060  ;;  %v14116_v50 = vld [vmem:[#allocation68_spill] sm:$0xff] }
 0x3e6   :  { %v1558_v41 = vmul.f32 %v1531_v1, %v14047_v52  ;;  %2039 = vmatpush.bf16.msrb.mxu1 %v1708_v26  ;;  %v1652_v31 = vunpack.c.l.b16 %v10420_v51  ;;  %v1559_v14 = vmul.f32 %v1543_v21, %v14048_v10  ;;  %v10464_v9 = vpack.c.bf16 %v1103_v32, %v1102_v54  ;;  %v14117_v1 = vld [vmem:[#allocation105_spill] sm:$0xff]  ;;  %v14118_v54 = vld [vmem:[#allocation60_spill] sm:$0xff] }
 0x3e7   :  { %2081 = vmatpush.bf16.msrb.mxu2 %v1709_v46  ;;  %2123 = vmatpush.bf16.msra.mxu0 %v1710_v55  ;;  %v1074_v34 = vsel %vm311_vm10, %v1061_v8, %v10312_v13  ;;  %v1078_v40 = vsel %vm311_vm10, %v14116_v50, %v1061_v8  ;;  %v1656_v3 = vunpack.c.l.b16 %v1108_v15  ;;  %v1660_v19 = vunpack.c.l.b16 %v1110_v48  ;;  %v14120_v26 = vld [vmem:[#allocation101_spill] sm:$0xff] }
 0x3e8   :  { %v1098_v25 = vmul.f32 %v1078_v40, %v14110_v36  ;;  %v1657_v59 = vunpack.c.h.b16 %v1108_v15  ;;  %v10473_v60 = vpack.c.bf16 %v1555_v56, %v1554_v11  ;;  %v1601_v21 = vsel %vm614_vm7, %v14117_v1, %v1595_v2  ;;  %v14123_v50 = vld [vmem:[#allocation109_spill] sm:$0xff] }
 0x3e9   :  { %v1613_v32 = vsel %vm614_vm7, %v1595_v2, %v14118_v54  ;;  %v1099_v13 = vmul.f32 %v1074_v34, %v14111_v24  ;;  %v1457_v38 = vsel %vm532_vm4, %v14119_v47, %v10252_v16  ;;  %v1661_v15 = vunpack.c.h.b16 %v1110_v48  ;;  %v14122_v2 = vld [vmem:[#allocation19_spill] sm:$0xff]  ;;  %v14124_v40 = vld [vmem:[#allocation113_spill] sm:$0xff]  ;;  %v6841_v54 = vld [vmem:[%s13404_s11] sm:$0xf] }
 0x3ea   :  { %2040 = vmatpush.bf16.msrb.mxu1 %v10318_v44  ;;  %v14121_v53 = vunpack.c.l.b16 %v14120_v26  ;;  %v1653_v55 = vunpack.c.h.b16 %v10420_v51  ;;  %v10491_v11 = vpack.c.bf16 %v1559_v14, %v1558_v41  ;;  %v1469_v56 = vsel %vm532_vm4, %v10252_v16, %v14122_v2  ;;  %v1599_v34 = vpop.permute.xlu0 %1598  ;;  %v14126_v47 = vld [vmem:[#allocation114_spill] sm:$0xff] }
 0x3eb   :  { %2082 = vmatpush.bf16.msrb.mxu2 %v10322_v22  ;;  %v10497_v8 = vpack.c.bf16 %v1099_v13, %v1098_v25  ;;  %2124 = vmatpush.bf16.msra.mxu0 %v10326_v29  ;;  %v1662_v44 = vunpack.c.l.b16 %v10464_v9  ;;  %v1057_v22 = vpop.permute.xlu2 %1056  ;;  %v1622_v48 = vmul.f32 %v10140_v4, %v1601_v21  ;;  %v1668_v51 = vpack.c.b16 %v1660_v19, %v1656_v3 }
 0x3ec   :  { %v1664_v46 = vpack.c.b16 %v1652_v31, %v14121_v53  ;;  %v1623_v31 = vmul.f32 %v10146_v7, %v1613_v32  ;;  %v1669_v41 = vpack.c.b16 %v1661_v15, %v1657_v59  ;;  %v1938_v14 = vunpack.c.l.b16 %v10473_v60  ;;  %v7786_v32 = vld [vmem:[%s13404_s11 + $0x8] sm:$0xf0] }
 0x3ed   :  { %v1603_v16 = vsel %vm614_vm7, %v14123_v50, %v1599_v34  ;;  %v1615_v29 = vsel %vm614_vm7, %v1599_v34, %v14124_v40  ;;  %v1658_v25 = vunpack.c.l.b16 %v10497_v8  ;;  %v1455_v3 = vpop.permute.xlu1 %1454  ;;  %v14125_v19 = vunpack.c.h.b16 %v14120_v26  ;;  %v14127_v15 = vld [vmem:[#allocation83_spill] sm:$0xff] }
 0x3ee   :  { %v1630_v1 = vmul.f32 %v10140_v4, %v1603_v16  ;;  %v1631_v21 = vmul.f32 %v10146_v7, %v1615_v29  ;;  %2041 = vmatpush.bf16.msrb.mxu1 %v1668_v51  ;;  %v1934_v13 = vunpack.c.l.b16 %v10449_v17  ;;  %v1942_v4 = vunpack.c.l.b16 %v10491_v11 }
 0x3ef   :  { %2083 = vmatpush.bf16.msrb.mxu2 %v1669_v41  ;;  %v1665_v59 = vpack.c.b16 %v1653_v55, %v14125_v19  ;;  %v1459_v7 = vsel %vm532_vm4, %v14126_v47, %v1455_v3  ;;  %v1471_v26 = vsel %vm532_vm4, %v1455_v3, %v14127_v15  ;;  %v1670_v53 = vpack.c.b16 %v1662_v44, %v1658_v25  ;;  %v14133_v15 = vld [vmem:[#allocation91_spill] sm:$0xff] }
 0x3f0   :  { %v10529_v55 = vpack.c.bf16 %v1623_v31, %v1622_v48  ;;  %v10531_v2 = vpack.c.bf16 %v1631_v21, %v1630_v1  ;;  %v1486_v34 = vmul.f32 %v1459_v7, %v14063_v0  ;;  %v1487_v51 = vmul.f32 %v1471_v26, %v14115_v6  ;;  %v14128_v31 = vld [vmem:[#allocation103_spill] sm:$0xff]  ;;  %v14129_v1 = vld [vmem:[#allocation104_spill] sm:$0xff]  ;;  %v14130_v21 = vld [vmem:[#allocation110_spill] sm:$0xff] }
 0x3f1   :  { %v1478_v41 = vmul.f32 %v1457_v38, %v14063_v0  ;;  %v1479_v50 = vmul.f32 %v1469_v56, %v14115_v6  ;;  %2125 = vmatpush.bf16.msra.mxu0 %v1670_v53  ;;  %v1950_v16 = vpack.c.b16 %v1942_v4, %v1938_v14  ;;  %v10537_v40 = vor.u32 %v7786_v32, %v6841_v54  ;;  %v14131_v56 = vld [vmem:[#allocation123_spill] sm:$0xff]  ;;  %v14132_v14 = vld [vmem:[#allocation108_spill] sm:$0xff] }
 0x3f2   :  { %v1978_v29 = vunpack.c.l.b16 %v10451_v12  ;;  %v1982_v44 = vunpack.c.l.b16 %v10531_v2  ;;  %v10541_v48 = vpack.c.bf16 %v1487_v51, %v1486_v34  ;;  %2042 = vmatpush.bf16.msrb.mxu1 %v1664_v46  ;;  %v1930_v25 = vunpack.c.l.b16 %v14128_v31  ;;  %v1381_v32 = vpop.permute.xlu0 %1380  ;;  %v14135_v53 = vld [vmem:[#allocation119_spill] sm:$0xff]  ;;  %v14136_v34 = vld [vmem:[#allocation25_spill] sm:$0xff] }
 0x3f3   :  { %2084 = vmatpush.bf16.msrb.mxu2 %v1665_v59  ;;  %v10546_v3 = vpack.c.bf16 %v14130_v21, %v14129_v1  ;;  %v10550_v38 = vpack.c.bf16 %v10459_v23, %v10456_v61  ;;  %v1970_v19 = vunpack.c.l.b16 %v14132_v14  ;;  %v1931_v54 = vunpack.c.h.b16 %v14128_v31  ;;  %v14134_v23 = vld [vmem:[#allocation90_spill] sm:$0xff]  ;;  %v14138_v31 = vld [vmem:[#allocation53_spill] sm:$0xff] }
 0x3f4   :  { %v1990_v46 = vpack.c.b16 %v1982_v44, %v1978_v29  ;;  %v1946_v59 = vpack.c.b16 %v1934_v13, %v1930_v25  ;;  %v1974_v4 = vunpack.c.l.b16 %v10529_v55  ;;  %v1935_v47 = vunpack.c.h.b16 %v10449_v17  ;;  %v14139_v1 = vld [vmem:[#allocation117_spill] sm:$0xff] }
 0x3f5   :  { %v10557_v7 = vpack.c.bf16 %v1479_v50, %v1478_v41  ;;  %v1386_v61 = vsel %vm491_vm5, %v14133_v15, %v1381_v32  ;;  %v1398_v26 = vsel %vm491_vm5, %v1381_v32, %v14134_v23  ;;  %2043 = vmatmul.bf16.vlgmr.msrb.gmra.mxu1 %v10537_v40  ;;  %v1902_v13 = vunpack.c.l.b16 %v10541_v48  ;;  %v1379_v50 = vpop.permute.xlu2 %1378  ;;  %v1383_v44 = vpop.permute.xlu1 %1382  ;;  %v14141_v15 = vld [vmem:[#allocation71_spill] sm:$0xff] }
 0x3f6   :  { %2091 = vmatpush.bf16.msra.mxu1 %v14131_v56  ;;  %2085 = vmatmul.bf16.vlgmr.msrb.gmra.mxu2 %v10537_v40  ;;  %v1072_v17 = vsel %vm311_vm10, %v1057_v22, %v14135_v53  ;;  %v1076_v51 = vsel %vm311_vm10, %v14136_v34, %v1057_v22  ;;  %v1939_v41 = vunpack.c.h.b16 %v10473_v60  ;;  %v1411_v25 = vmul.f32 %v1398_v26, %v14138_v31  ;;  %v14140_v56 = vld [vmem:[#allocation89_spill] sm:$0xff]  ;;  %v14142_v26 = vld [vmem:[#allocation75_spill] sm:$0xff] }
 0x3f7   :  { %2133 = vmatpush.bf16.msra.mxu2 %v1950_v16  ;;  %v14137_v16 = vld [vmem:[#allocation51_spill] sm:$0xff]  ;;  %2153 = vmatpush.bf16.msrb.mxu3 %v1990_v46  ;;  %v1387_v21 = vsel %vm491_vm5, %v14139_v1, %v1383_v44  ;;  %v1399_v32 = vsel %vm491_vm5, %v1383_v44, %v14140_v56  ;;  %v1898_v60 = vunpack.c.l.b16 %v10550_v38  ;;  %v1943_v22 = vunpack.c.h.b16 %v10491_v11  ;;  %v14143_v34 = vld [vmem:[#allocation45_spill] sm:$0xff] }
 0x3f8   :  { %v1410_v29 = vmul.f32 %v1386_v61, %v14137_v16  ;;  %v1414_v61 = vmul.f32 %v1387_v21, %v14137_v16  ;;  %v1415_v46 = vmul.f32 %v1399_v32, %v14138_v31  ;;  %v1986_v23 = vpack.c.b16 %v1974_v4, %v1970_v19  ;;  %v14144_v4 = vld [vmem:[#allocation47_spill] sm:$0xff] }
 0x3f9   :  { %v1385_v53 = vsel %vm491_vm5, %v14142_v26, %v1379_v50  ;;  %v1397_v44 = vsel %vm491_vm5, %v1379_v50, %v14143_v34  ;;  %v1910_v1 = vpack.c.b16 %v1902_v13, %v1898_v60  ;;  %v1090_v56 = vmul.f32 %v1076_v51, %v14110_v36  ;;  %v14145_v26 = vld [vmem:[#allocation21_spill] sm:$0xff]  ;;  %v14146_v50 = vld [vmem:[#allocation95_spill] sm:$0xff]  ;;  %v14147_v60 = vld [vmem:[#allocation88_spill] sm:$0xff] }
 0x3fa   :  { %2092 = vmatpush.bf16.msra.mxu1 %v14141_v15  ;;  %v1091_v11 = vmul.f32 %v1072_v17, %v14111_v24  ;;  %v10597_v15 = vpack.c.bf16 %v1415_v46, %v1414_v61  ;;  %v1951_v21 = vpack.c.b16 %v1943_v22, %v1939_v41  ;;  %v10599_v19 = vpack.c.bf16 %v1411_v25, %v1410_v29  ;;  %v1059_v61 = vpop.permute.xlu0 %1058  ;;  %v14148_v29 = vld [vmem:[#allocation102_spill] sm:$0xff]  ;;  %v14149_v46 = vld [vmem:[#allocation63_spill] sm:$0xff] }
 0x3fb   :  { %2134 = vmatpush.bf16.msra.mxu2 %v1946_v59  ;;  %v1894_v59 = vunpack.c.l.b16 %v10557_v7  ;;  %2154 = vmatpush.bf16.msrb.mxu3 %v1986_v23  ;;  %v1890_v32 = vunpack.c.l.b16 %v10546_v3  ;;  %v1339_v13 = vmul.f32 %v14146_v50, %v14145_v26  ;;  %v1335_v34 = vmul.f32 %v14147_v60, %v14145_v26  ;;  %v14151_v60 = vld [vmem:[#allocation12_spill] sm:$0xff] }
 0x3fc   :  { %v1406_v51 = vmul.f32 %v1385_v53, %v14137_v16  ;;  %v1407_v17 = vmul.f32 %v1397_v44, %v14138_v31  ;;  %v1947_v41 = vpack.c.b16 %v1935_v47, %v1931_v54  ;;  %v1343_v25 = vmul.f32 %v14148_v29, %v14145_v26 }
 0x3fd   :  { %v1073_v22 = vsel %vm311_vm10, %v1059_v61, %v10172_v42  ;;  %v1077_v23 = vsel %vm311_vm10, %v14149_v46, %v1059_v61  ;;  %v10620_v53 = vpack.c.bf16 %v1091_v11, %v1090_v56  ;;  %v1377_v44 = vpop.permute.xlu1 %1376  ;;  %v14150_v42 = vld [vmem:[#allocation52_spill] sm:$0xff]  ;;  %v1858_v56 = vunpack.c.l.b16 %v10599_v19 }
 0x3fe   :  { %2093 = vmatpush.bf16.msra.mxu1 %v14144_v4  ;;  %v1862_v4 = vunpack.c.l.b16 %v10597_v15  ;;  %6853 = vmatmul.msk.bf16.vlgmr.msrb.gmra.mxu3 %vm2031_vm12, %v10371_v37  ;;  %v1094_v54 = vmul.f32 %v1077_v23, %v14110_v36  ;;  %v1095_v47 = vmul.f32 %v1073_v22, %v14111_v24  ;;  %v1384_v50 = vsel %vm491_vm5, %v14150_v42, %v1377_v44  ;;  %v14153_v42 = vld [vmem:[#allocation124_spill] sm:$0xff] }
 0x3ff   :  { %2135 = vmatpush.bf16.msra.mxu2 %v1910_v1  ;;  %2175 = vmatpush.bf16.msra.mxu3 %v1951_v21  ;;  %v1906_v1 = vpack.c.b16 %v1894_v59, %v1890_v32  ;;  %v1903_v21 = vunpack.c.h.b16 %v10541_v48  ;;  %v1396_v59 = vsel %vm491_vm5, %v1377_v44, %v14151_v60  ;;  %v14152_v32 = vld [vmem:[#allocation76_spill] sm:$0xff]  ;;  %v1899_v11 = vunpack.c.h.b16 %v10550_v38 }
 0x400   :  { %v1419_v61 = vpack.c.bf16 %v1407_v17, %v1406_v51  ;;  %v10634_v29 = vpack.c.bf16 %v1095_v47, %v1094_v54  ;;  %v1402_v48 = vmul.f32 %v1384_v50, %v14137_v16  ;;  %v1403_v22 = vmul.f32 %v1396_v59, %v14138_v31  ;;  %v14154_v17 = vld [vmem:[#allocation96_spill] sm:$0xff]  ;;  %v14155_v54 = vld [vmem:[#allocation122_spill] sm:$0xff]  ;;  %v14213_v16 = vld [vmem:[#allocation27_spill] sm:$0xff] }
 0x401   :  { %v1983_v46 = vunpack.c.h.b16 %v10531_v2  ;;  %v1870_v23 = vpack.c.b16 %v1862_v4, %v1858_v56  ;;  %v1895_v44 = vunpack.c.h.b16 %v10557_v7  ;;  %v1351_v60 = vpack.c.bf16 %v1343_v25, %v14153_v42  ;;  %v14156_v2 = vld [vmem:[#allocation79_spill] sm:$0xff]  ;;  %v14157_v47 = vld [vmem:[#allocation20_spill] sm:$0xff] }
 0x402   :  { %2094 = vmatpush.bf16.msra.mxu1 %v14152_v32  ;;  %v1911_v32 = vpack.c.b16 %v1903_v21, %v1899_v11  ;;  %v1650_v24 = vunpack.c.l.b16 %v10620_v53  ;;  %v1654_v38 = vunpack.c.l.b16 %v10634_v29  ;;  %v1979_v51 = vunpack.c.h.b16 %v10451_v12  ;;  %v14158_v7 = vld [vmem:[#allocation32_spill] sm:$0xff] }
 0x403   :  { %2136 = vmatpush.bf16.msra.mxu2 %v1906_v1  ;;  %2176 = vmatpush.bf16.msra.mxu3 %v1947_v41  ;;  %v1417_v1 = vpack.c.bf16 %v1403_v22, %v1402_v48  ;;  %v1349_v41 = vpack.c.bf16 %v1339_v13, %v14155_v54  ;;  %v1331_v4 = vmul.f32 %v14156_v2, %v14145_v26  ;;  %v1891_v21 = vunpack.c.h.b16 %v10546_v3  ;;  %v14159_v48 = vld [vmem:[#allocation22_spill] sm:$0xff] }
 0x404   :  { %v1334_v50 = vmul.f32 %v14158_v7, %v14157_v47  ;;  %v1666_v25 = vpack.c.b16 %v1654_v38, %v1650_v24  ;;  %v1854_v56 = vunpack.c.l.b16 %v1419_v61  ;;  %v1991_v11 = vpack.c.b16 %v1983_v46, %v1979_v51  ;;  %v14160_v2 = vld [vmem:[#allocation82_spill] sm:$0xff]  ;;  %v14161_v7 = vld [vmem:[#allocation29_spill] sm:$0xff] }
 0x405   :  { %v1850_v59 = vunpack.c.l.b16 %v1417_v1  ;;  %v1975_v12 = vunpack.c.h.b16 %v10529_v55  ;;  %v1330_v22 = vmul.f32 %v14159_v48, %v14157_v47  ;;  %v1907_v13 = vpack.c.b16 %v1895_v44, %v1891_v21  ;;  %v7755_v48 = vld [vmem:[%s14165_s0 + $0x38] sm:$0xff] }
 0x406   :  { %2095 = vmatpush.bf16.msra.mxu1 %v14154_v17  ;;  %2126 = vmatpush.bf16.msra.mxu0 %v1666_v25  ;;  %v1863_v17 = vunpack.c.h.b16 %v10597_v15  ;;  %v1822_v54 = vunpack.c.l.b16 %v1351_v60  ;;  %v1971_v24 = vunpack.c.h.b16 %v14132_v14  ;;  %v1859_v3 = vunpack.c.h.b16 %v10599_v19  ;;  %v14162_v25 = vld [vmem:[#allocation107_spill] sm:$0xff] }
 0x407   :  { %2137 = vmatpush.bf16.msra.mxu2 %v1870_v23  ;;  %2177 = vmatpush.bf16.msra.mxu3 %v1911_v32  ;;  %v1347_v23 = vpack.c.bf16 %v1335_v34, %v1334_v50  ;;  %v1866_v42 = vpack.c.b16 %v1854_v56, %v1850_v59  ;;  %v1818_v55 = vunpack.c.l.b16 %v1349_v41  ;;  %v1345_v46 = vpack.c.bf16 %v1331_v4, %v1330_v22  ;;  %v14163_v56 = vld [vmem:[#allocation28_spill] sm:$0xff] }
 0x408   :  { %v1987_v34 = vpack.c.b16 %v1975_v12, %v1971_v24  ;;  %v1871_v32 = vpack.c.b16 %v1863_v17, %v1859_v3  ;;  %v1851_v38 = vunpack.c.h.b16 %v1417_v1  ;;  %v1783_v15 = vunpack.c.h.b16 %v10265_v62  ;;  %v14164_v12 = vld [vmem:[#allocation98_spill] sm:$0xff]  ;;  %v14166_v24 = vld [vmem:[#allocation44_spill] sm:$0xff] }
 0x409   :  { %2127 = vmatmul.bf16.vlgmr.msra.gmra.mxu0 %v10537_v40  ;;  %v1830_v44 = vpack.c.b16 %v1822_v54, %v1818_v55  ;;  %v1814_v51 = vunpack.c.l.b16 %v1347_v23  ;;  %v1855_v14 = vunpack.c.h.b16 %v1419_v61  ;;  %v1810_v50 = vunpack.c.l.b16 %v1345_v46  ;;  %v14167_v55 = vld [vmem:[#allocation92_spill] sm:$0xff] }
 0x40a   :  { %2096 = vmatpush.bf16.msra.mxu1 %v14160_v2  ;;  %2195 = vmatpush.bf16.msrb.mxu0 %v1991_v11  ;;  %v1779_v19 = vunpack.c.h.b16 %v14162_v25  ;;  %v1823_v59 = vunpack.c.h.b16 %v1351_v60  ;;  %v1775_v1 = vunpack.c.h.b16 %v14164_v12  ;;  %v1819_v62 = vunpack.c.h.b16 %v1349_v41  ;;  %v7754_v60 = vld [vmem:[%s14165_s0 + $0x30] sm:$0xff]  ;;  %v7759_v12 = vld [vmem:[%s14165_s0 + $0x58] sm:$0xff] }
 0x40b   :  { %2178 = vmatpush.bf16.msra.mxu3 %v1907_v13  ;;  %2138 = vmatpush.bf16.msra.mxu2 %v1866_v42  ;;  %v1867_v21 = vpack.c.b16 %v1855_v14, %v1851_v38  ;;  %v1826_v4 = vpack.c.b16 %v1814_v51, %v1810_v50  ;;  %v1771_v61 = vunpack.c.h.b16 %v9995_v27  ;;  %v1815_v13 = vunpack.c.h.b16 %v1347_v23  ;;  %v7753_v23 = vld [vmem:[%s14165_s0 + $0x28] sm:$0xff]  ;;  %v7770_v25 = vld [vmem:[%s14165_s0 + $0xb0] sm:$0xff] }
 0x40c   :  { %v1791_v11 = vpack.c.b16 %v1783_v15, %v1779_v19  ;;  %v1831_v22 = vpack.c.b16 %v1823_v59, %v1819_v62  ;;  %v1743_v41 = vunpack.c.h.b16 %v10335_v39  ;;  %v1811_v17 = vunpack.c.h.b16 %v1345_v46  ;;  %v7761_v50 = vld [vmem:[%s14165_s0 + $0x68] sm:$0xff]  ;;  %v7760_v19 = vld [vmem:[%s14165_s0 + $0x60] sm:$0xff] }
 0x40d   :  { %v1787_v42 = vpack.c.b16 %v1775_v1, %v1771_v61  ;;  %v1739_v54 = vunpack.c.h.b16 %v10220_v49  ;;  %v1735_v3 = vunpack.c.h.b16 %v14166_v24  ;;  %v1703_v49 = vunpack.c.h.b16 %v10410_v35  ;;  %v7768_v62 = vld [vmem:[%s14165_s0 + $0xa0] sm:$0xff]  ;;  %v10740_v61 = vpop.permute.xlu1 %2013  ;;  %v7766_v24 = vld [vmem:[%s14165_s0 + $0x90] sm:$0xff] }
 0x40e   :  { %2097 = vmatpush.bf16.msra.mxu1 %v14161_v7  ;;  %2196 = vmatpush.bf16.msrb.mxu0 %v1987_v34  ;;  %v1827_v27 = vpack.c.b16 %v1815_v13, %v1811_v17  ;;  %v1731_v34 = vunpack.c.h.b16 %v14167_v55  ;;  %v1699_v46 = vunpack.c.h.b16 %v10294_v58  ;;  %v1691_v38 = vunpack.c.h.b16 %v10064_v5  ;;  %v7752_v5 = vld [vmem:[%s14165_s0 + $0x20] sm:$0xff]  ;;  %v7750_v58 = vld [vmem:[%s14165_s0 + $0x10] sm:$0xff] }
 0x40f   :  { %2179 = vmatpush.bf16.msra.mxu3 %v1871_v32  ;;  %2139 = vmatpush.bf16.msra.mxu2 %v1830_v44  ;;  %v1751_v2 = vpack.c.b16 %v1743_v41, %v1739_v54  ;;  %v1695_v44 = vunpack.c.h.b16 %v10257_v28  ;;  %v1659_v15 = vunpack.c.h.b16 %v10497_v8  ;;  %v1655_v35 = vunpack.c.h.b16 %v10634_v29  ;;  %v7751_v28 = vld [vmem:[%s14165_s0 + $0x18] sm:$0xff] }
 0x410   :  { %v1747_v39 = vpack.c.b16 %v1735_v3, %v1731_v34  ;;  %v1711_v32 = vpack.c.b16 %v1703_v49, %v1699_v46  ;;  %v7763_v8 = vld [vmem:[%s14165_s0 + $0x78] sm:$0xff]  ;;  %v7756_v3 = vld [vmem:[%s14165_s0 + $0x40] sm:$0xff] }
 0x411   :  { %v1707_v51 = vpack.c.b16 %v1695_v44, %v1691_v38  ;;  %v7771_v29 = vld [vmem:[%s14165_s0 + $0xb8] sm:$0xff]  ;;  %v7764_v38 = vld [vmem:[%s14165_s0 + $0x80] sm:$0xff] }
 0x412   :  { %2098 = vmatpush.bf16.msra.mxu1 %v14163_v56  ;;  %2421 = vmatpush.bf16.msra.mxu0 %v7763_v8  ;;  %v10725_v56 = vpop.permute.xlu0 %2008  ;;  %v7779_v44 = vld [vmem:[%s14165_s0 + $0xf8] sm:$0xff] }
 0x413   :  { %2180 = vmatpush.bf16.msra.mxu3 %v1867_v21  ;;  %2140 = vmatpush.bf16.msra.mxu2 %v1826_v4 }
 0x415   :  { %2099 = vmatmul.bf16.vlgmr.msra.gmra.mxu1 %v10235_v57 }
 0x416   :  { %2161 = vmatpush.bf16.msrb.mxu1 %v1791_v11  ;;  %2141 = vmatmul.bf16.vlgmr.msra.gmra.mxu2 %v10235_v57  ;;  %v7769_v11 = vld [vmem:[%s14165_s0 + $0xa8] sm:$0xff] }
 0x417   :  { %2407 = vmatpush.bf16.msrb.mxu2 %v7755_v48  ;;  %2181 = vmatpush.bf16.msra.mxu3 %v1831_v22  ;;  %v7758_v48 = vld [vmem:[%s14165_s0 + $0x50] sm:$0xff] }
 0x419   :  { %6854 = vmatmul.msk.bf16.vlgmr.msrb.gmra.mxu0 %vm2031_vm12, %v10371_v37  ;;  %v1663_v37 = vunpack.c.h.b16 %v10464_v9  ;;  %v7749_v9 = vld [vmem:[%s14165_s0 + $0x8] sm:$0xff] }
 0x41a   :  { %2162 = vmatpush.bf16.msrb.mxu1 %v1787_v42 }
 0x41b   :  { %2408 = vmatpush.bf16.msrb.mxu2 %v7754_v60  ;;  %2182 = vmatpush.bf16.msra.mxu3 %v1827_v27  ;;  %v1671_v7 = vpack.c.b16 %v1663_v37, %v1659_v15  ;;  %v7767_v27 = vld [vmem:[%s14165_s0 + $0x98] sm:$0xff]  ;;  %v7777_v15 = vld [vmem:[%s14165_s0 + $0xe8] sm:$0xff] }
 0x41e   :  { %2163 = vmatpush.bf16.msrb.mxu1 %v1751_v2  ;;  %2183 = vmatmul.bf16.vlgmr.msra.gmra.mxu3 %v10235_v57  ;;  %v1651_v57 = vunpack.c.h.b16 %v10620_v53  ;;  %v7762_v53 = vld [vmem:[%s14165_s0 + $0x70] sm:$0xff] }
 0x41f   :  { %2409 = vmatpush.bf16.msrb.mxu2 %v7753_v23  ;;  %2422 = vmatpush.bf16.msra.mxu0 %v7762_v53  ;;  %v7757_v23 = vld [vmem:[%s14165_s0 + $0x48] sm:$0xff] }
 0x420   :  { %v1667_v14 = vpack.c.b16 %v1655_v35, %v1651_v57  ;;  %2449 = vmatpush.bf16.msrb.mxu3 %v7779_v44 }
 0x422   :  { %2164 = vmatpush.bf16.msrb.mxu1 %v1747_v39 }
 0x423   :  { %2410 = vmatpush.bf16.msrb.mxu2 %v7752_v5  ;;  %2423 = vmatpush.bf16.msra.mxu0 %v7761_v50 }
 0x426   :  { %2165 = vmatpush.bf16.msrb.mxu1 %v1711_v32  ;;  %v7765_v32 = vld [vmem:[%s14165_s0 + $0x88] sm:$0xff] }
 0x427   :  { %2411 = vmatpush.bf16.msrb.mxu2 %v7751_v28  ;;  %2424 = vmatpush.bf16.msra.mxu0 %v7760_v19  ;;  %v7774_v19 = vld [vmem:[%s14165_s0 + $0xd0] sm:$0xff] }
 0x42a   :  { %2166 = vmatpush.bf16.msrb.mxu1 %v1707_v51  ;;  %v7778_v51 = vld [vmem:[%s14165_s0 + $0xf0] sm:$0xff] }
 0x42b   :  { %2412 = vmatpush.bf16.msrb.mxu2 %v7750_v58  ;;  %2425 = vmatpush.bf16.msra.mxu0 %v7759_v12  ;;  %v7775_v58 = vld [vmem:[%s14165_s0 + $0xd8] sm:$0xff] }
 0x42c   :  { %2450 = vmatpush.bf16.msrb.mxu3 %v7778_v51 }
 0x42e   :  { %2167 = vmatpush.bf16.msrb.mxu1 %v1671_v7 }
 0x42f   :  { %2413 = vmatpush.bf16.msrb.mxu2 %v7749_v9  ;;  %2426 = vmatpush.bf16.msra.mxu0 %v7758_v48 }
 0x430   :  { %2451 = vmatpush.bf16.msrb.mxu3 %v7777_v15 }
 0x432   :  { %2168 = vmatpush.bf16.msrb.mxu1 %v1667_v14  ;;  %v7776_v14 = vld [vmem:[%s14165_s0 + $0xe0] sm:$0xff] }
 0x433   :  { %2427 = vmatpush.bf16.msra.mxu0 %v7757_v23 }
 0x434   :  { %2452 = vmatpush.bf16.msrb.mxu3 %v7776_v14 }
 0x435   :  { %2169 = vmatmul.bf16.vlgmr.msrb.gmra.mxu1 %v10537_v40  ;;  %v7748_v40 = vld [vmem:[%s14165_s0] sm:$0xff] }
 0x436   :  { %2414 = vmatpush.bf16.msrb.mxu2 %v7748_v40  ;;  %2435 = vmatpush.bf16.msra.mxu1 %v7771_v29 }
 0x437   :  { %2428 = vmatpush.bf16.msra.mxu0 %v7756_v3 }
 0x438   :  { %2453 = vmatpush.bf16.msrb.mxu3 %v7775_v58 }
 0x43a   :  { %2436 = vmatpush.bf16.msra.mxu1 %v7770_v25 }
 0x43c   :  { %2454 = vmatpush.bf16.msrb.mxu3 %v7774_v19 }
 0x43e   :  { %2437 = vmatpush.bf16.msra.mxu1 %v7769_v11 }
 0x442   :  { %2438 = vmatpush.bf16.msra.mxu1 %v7768_v62 }
 0x446   :  { %2439 = vmatpush.bf16.msra.mxu1 %v7767_v27 }
 0x44a   :  { %2440 = vmatpush.bf16.msra.mxu1 %v7766_v24 }
 0x44e   :  { %2441 = vmatpush.bf16.msra.mxu1 %v7765_v32 }
 0x450   :  { %v2058_v21 = vpop.f32.mrf.mxu3 }
 0x452   :  { %2442 = vmatpush.bf16.msra.mxu1 %v7764_v38 }
 0x458   :  { %v2072_v59 = vpop.f32.mrf.mxu0  ;;  %v2060_v60 = vpop.f32.mrf.mxu3 }
 0x460   :  { %v2074_v41 = vpop.f32.mrf.mxu0  ;;  %v2114_v39 = vpop.f32.mrf.mxu3 }
 0x468   :  { %v2116_v37 = vpop.f32.mrf.mxu3 }
 0x472   :  { %v2044_v4 = vpop.f32.mrf.mxu1 }
 0x473   :  { %v2045_v1 = vadd.f32 %v2044_v4, %v10725_v56 }
 0x475   :  { %v2059_v22 = vadd.f32 %v2058_v21, %v2045_v1  ;;  %v7773_v1 = vld [vmem:[%s14165_s0 + $0xc8] sm:$0xff] }
 0x476   :  { %2455 = vmatpush.bf16.msrb.mxu3 %v7773_v1 }
 0x477   :  { %v2073_v17 = vadd.f32 %v2072_v59, %v2059_v22 }
 0x479   :  { %v2203_v55 = vmax.f32 %v2073_v17, 0.0  ;;  %v2086_v46 = vpop.f32.mrf.mxu2 }
 0x47a   :  { %v2046_v13 = vpop.f32.mrf.mxu1  ;;  %v2087_v5 = vadd.f32 %v2086_v46, %v10725_v56 }
 0x47b   :  { %v2047_v42 = vadd.f32 %v2046_v13, %v10740_v61 }
 0x47d   :  { %v2061_v54 = vadd.f32 %v2060_v60, %v2047_v42  ;;  %v7772_v42 = vld [vmem:[%s14165_s0 + $0xc0] sm:$0xff] }
 0x47e   :  { %2456 = vmatpush.bf16.msrb.mxu3 %v7772_v42  ;;  %v7341_v42 = vld [vmem:[%s13403_s10 + $0x30] sm:$0xff] }
 0x47f   :  { %v2075_v2 = vadd.f32 %v2074_v41, %v2061_v54 }
 0x481   :  { %v2207_v34 = vmax.f32 %v2075_v2, 0.0  ;;  %v2088_v7 = vpop.f32.mrf.mxu2  ;;  %v2156_v40 = vpop.f32.mrf.mxu3 }
 0x482   :  { %v2089_v9 = vadd.f32 %v2088_v7, %v10740_v61 }
 0x483   :  { %v2211_v49 = vpack.c.bf16 %v2207_v34, %v2203_v55 }
 0x485   :  { %2415 = vmatmul.bf16.vlgmr.msrb.gmra.mxu2 %v2211_v49 }
 0x486   :  { %v2128_v57 = vpop.f32.mrf.mxu0 }
 0x487   :  { %v2129_v25 = vadd.f32 %v2128_v57, %v10725_v56 }
 0x489   :  { %v2158_v41 = vpop.f32.mrf.mxu3 }
 0x48e   :  { %v2130_v21 = vpop.f32.mrf.mxu0 }
 0x48f   :  { %v2131_v62 = vadd.f32 %v2130_v21, %v10740_v61 }
 0x492   :  { %v2100_v35 = vpop.f32.mrf.mxu1 }
 0x493   :  { %v2101_v28 = vadd.f32 %v2100_v35, %v2087_v5 }
 0x495   :  { %v2115_v29 = vadd.f32 %v2114_v39, %v2101_v28 }
 0x496   :  { %v2198_v3 = vpop.f32.mrf.mxu0 }
 0x497   :  { %v2204_v11 = vmax.f32 %v2115_v29, 0.0 }
 0x499   :  { %v2142_v8 = vpop.f32.mrf.mxu2 }
 0x49a   :  { %v2102_v53 = vpop.f32.mrf.mxu1  ;;  %v2143_v59 = vadd.f32 %v2142_v8, %v2129_v25 }
 0x49b   :  { %v2103_v50 = vadd.f32 %v2102_v53, %v2089_v9 }
 0x49c   :  { %v2157_v13 = vadd.f32 %v2156_v40, %v2143_v59 }
 0x49d   :  { %v2117_v4 = vadd.f32 %v2116_v37, %v2103_v50 }
 0x49e   :  { %v2205_v54 = vmax.f32 %v2157_v13, 0.0  ;;  %v2200_v38 = vpop.f32.mrf.mxu0  ;;  %v7325_v13 = vld [vmem:[%s13401_s8 + $0x10] sm:$0xff] }
 0x49f   :  { %v2208_v12 = vmax.f32 %v2117_v4, 0.0 }
 0x4a1   :  { %v2212_v48 = vpack.c.bf16 %v2208_v12, %v2204_v11  ;;  %v2144_v22 = vpop.f32.mrf.mxu2  ;;  %v2184_v2 = vpop.f32.mrf.mxu3 }
 0x4a2   :  { %v2145_v60 = vadd.f32 %v2144_v22, %v2131_v62  ;;  %v7339_v22 = vld [vmem:[%s13403_s10 + $0x20] sm:$0xff] }
 0x4a3   :  { %2429 = vmatmul.bf16.vlgmr.msra.gmra.mxu0 %v2212_v48  ;;  %v2597_v48 = vld [vmem:[%s13407_s14 + $0x8] sm:$0x3] }
 0x4a4   :  { %v2159_v17 = vadd.f32 %v2158_v41, %v2145_v60  ;;  %v2596_v60 = vld [vmem:[%s13407_s14] sm:$0xff]  ;;  %v7326_v41 = vld [vmem:[%s13401_s8 + $0x18] sm:$0xff]  ;;  %s14187_s8 = smov 15  }
 0x4a6   :  { %v2209_v27 = vmax.f32 %v2159_v17, 0.0  ;;  %v7340_v17 = vld [vmem:[%s13403_s10 + $0x28] sm:$0xff] }
 0x4a8   :  { %v2213_v23 = vpack.c.bf16 %v2209_v27, %v2205_v54  ;;  %v7342_v54 = vld [vmem:[%s13403_s10 + $0x38] sm:$0xff]  ;;  %s14190_s10 = smov 113  }
 0x4a9   :  { %v2186_v46 = vpop.f32.mrf.mxu3 }
 0x4aa   :  { %2443 = vmatmul.bf16.vlgmr.msra.gmra.mxu1 %v2213_v23 }
 0x4b2   :  { %v2170_v24 = vpop.f32.mrf.mxu1 }
 0x4b3   :  { %v2171_v55 = vadd.f32 %v2170_v24, %v10725_v56  ;;  %v10794_v56 = vld [vmem:[%s14168_s3] sm:$0xff] }
 0x4b4   :  { %v10799_v8 = vperm.slane %v10794_v56, 4 }
 0x4b5   :  { %v2185_v34 = vadd.f32 %v2184_v2, %v2171_v55 }
 0x4b6   :  { %14169 = vst [vmem:[#allocation16_spill] sm:$0xff] %v10799_v8 }
 0x4b7   :  { %v2199_v32 = vadd.f32 %v2198_v3, %v2185_v34  ;;  %v10848_v3 = vperm.slane %v10794_v56, 7  ;;  %v10852_v34 = vperm.slane %v10794_v56, 6 }
 0x4b9   :  { %v2206_v15 = vmax.f32 %v2199_v32, 0.0  ;;  %14170 = vst [vmem:[#allocation121_spill] sm:$0xff] %v10848_v3 }
 0x4ba   :  { %v2172_v39 = vpop.f32.mrf.mxu1  ;;  %14171 = vst [vmem:[#allocation62_spill] sm:$0xff] %v10852_v34 }
 0x4bb   :  { %v2173_v49 = vadd.f32 %v2172_v39, %v10740_v61 }
 0x4bd   :  { %v2187_v44 = vadd.f32 %v2186_v46, %v2173_v49 }
 0x4bf   :  { %v2201_v51 = vadd.f32 %v2200_v38, %v2187_v44 }
 0x4c1   :  { %v2210_v37 = vmax.f32 %v2201_v51, 0.0  ;;  %v10857_v51 = vperm.slane %v10794_v56, 5 }
 0x4c3   :  { %v2214_v7 = vpack.c.bf16 %v2210_v37, %v2206_v15  ;;  %14172 = vst [vmem:[#allocation31_spill] sm:$0xff] %v10857_v51 }
 0x4c5   :  { %2457 = vmatmul.bf16.vlgmr.msrb.gmra.mxu3 %v2214_v7 }
 0x508   :  { %v2416_v57 = vpop.f32.mrf.mxu2 }
 0x510   :  { %v2418_v40 = vpop.f32.mrf.mxu2 }
 0x520   :  { %v2430_v35 = vpop.f32.mrf.mxu0 }
 0x521   :  { %v2431_v5 = vadd.f32 %v2430_v35, %v2416_v57 }
 0x527   :  { %v2444_v14 = vpop.f32.mrf.mxu1 }
 0x528   :  { %v2445_v28 = vadd.f32 %v2444_v14, %v2431_v5  ;;  %v2432_v9 = vpop.f32.mrf.mxu0 }
 0x529   :  { %v2433_v29 = vadd.f32 %v2432_v9, %v2418_v40 }
 0x52f   :  { %v2446_v53 = vpop.f32.mrf.mxu1 }
 0x530   :  { %v2447_v50 = vadd.f32 %v2446_v53, %v2433_v29  ;;  %v10862_v29 = vperm.slane %v10794_v56, 3 }
 0x532   :  { %14173 = vst [vmem:[#allocation120_spill] sm:$0xff] %v10862_v29 }
 0x548   :  { %v2458_v58 = vpop.f32.mrf.mxu3 }
 0x549   :  { %v2459_v61 = vadd.f32 %v2458_v58, %v2445_v28 }
 0x54b   :  { %2513 = vrot.lane.b32.xlu1 %v2459_v61, %s13630_s4  ;;  %2522 = vrot.lane.b32.xlu2 %v2459_v61, %s13628_s24  ;;  %v2500_v25 = vmul.f32 %v10799_v8, %v2459_v61 }
 0x54d   :  { %v2502_v59 = vpack.c.bf16 %v2500_v25, %v2500_v25 }
 0x54f   :  { %v10806_v12 = vunpack.c.l.b16 %v2502_v59  ;;  %v10867_v59 = vperm.slane %v10794_v56, 2 }
 0x550   :  { %v2460_v19 = vpop.f32.mrf.mxu3 }
 0x551   :  { %v2461_v21 = vadd.f32 %v2460_v19, %v2447_v50  ;;  %14174 = vst [vmem:[#allocation15_spill] sm:$0xff] %v10867_v59 }
 0x553   :  { %2506 = vrot.lane.b32.xlu1 %v2461_v21, %s13634_s2  ;;  %2515 = vrot.lane.b32.xlu2 %v2461_v21, %s13630_s4  ;;  %v2501_v4 = vmul.f32 %v10799_v8, %v2461_v21 }
 0x554   :  { %2524 = vrot.lane.b32.xlu0 %v2461_v21, %s13628_s24 }
 0x555   :  { %v2503_v11 = vpack.c.bf16 %v2501_v4, %v2501_v4 }
 0x557   :  { %v10808_v1 = vunpack.c.l.b16 %v2503_v11 }
 0x559   :  { %v2568_v62 = vpack.c.b16 %v10808_v1, %v10806_v12  ;;  %v7788_v1 = vld [vmem:[%s13406_s13 + $0x4] sm:$0xf] }
 0x55b   :  { %2481 = vrot.lane.b32.xlu1 %v2459_v61, %s13626_s25  ;;  %2490 = vrot.lane.b32.xlu2 %v2459_v61, %s13632_s28 }
 0x55c   :  { %2504 = vrot.lane.b32.xlu0 %v2459_v61, %s13634_s2 }
 0x563   :  { %2474 = vrot.lane.b32.xlu1 %v2461_v21, %s8075_s29  ;;  %2483 = vrot.lane.b32.xlu2 %v2461_v21, %s13626_s25 }
 0x564   :  { %2492 = vrot.lane.b32.xlu0 %v2461_v21, %s13632_s28  ;;  %s14177_s28 = sld [smem:[#allocation126_spill]] }
 0x56b   :  { %2531 = vrot.lane.b32.xlu1 %v2459_v61, %s13638_s6  ;;  %2463 = vrot.lane.b32.xlu2 %v2459_v61, %s13636_s19 }
 0x56c   :  { %2472 = vrot.lane.b32.xlu0 %v2459_v61, %s8075_s29 }
 0x573   :  { %2605 = vperm.xlu1 %7978, %v2597_v48   ;;  %2533 = vrot.lane.b32.xlu2 %v2461_v21, %s13638_s6  ;;  %s14180_s6 = sld [smem:[#allocation127_spill]] }
 0x574   :  { %2465 = vrot.lane.b32.xlu0 %v2461_v21, %s13636_s19  ;;  %s14193_s19 = smov 111  }
 0x57b   :  { %4199 = vperm.xlu1 %7978, %v7339_v22   ;;  %3627 = vperm.xlu2 %7979, %v7325_v13  }
 0x57c   :  { %2600 = vperm.xlu0 %7977, %v2596_v60  }
 0x583   :  { %4209 = vperm.xlu2 %7979, %v7341_v42   ;;  %v7984_v42 = vld [vmem:[%s14168_s3 + $0x8] ss:$0 sm:$0xff] }
 0x584   :  { %3632 = vperm.xlu0 %7977, %v7326_v41  }
 0x58b   :  { %4204 = vperm.xlu2 %7979, %v7340_v17  }
 0x58c   :  { %4214 = vperm.xlu0 %7977, %v7342_v54  }
 0x5a5   :  { %v2523_v27 = vpop.permute.xlu2 %2522 }
 0x5a6   :  { %v2527_v55 = vmul.f32 %v10848_v3, %v2523_v27 }
 0x5a8   :  { %v2529_v44 = vpack.c.bf16 %v2527_v55, %v2527_v55 }
 0x5aa   :  { %v2584_v35 = vunpack.c.l.b16 %v2529_v44 }
 0x5ad   :  { %v2516_v23 = vpop.permute.xlu2 %2515 }
 0x5ae   :  { %v2519_v38 = vmul.f32 %v10852_v34, %v2516_v23  ;;  %v10875_v23 = vperm.slane %v10794_v56, 1 }
 0x5b0   :  { %v2521_v57 = vpack.c.bf16 %v2519_v38, %v2519_v38  ;;  %14175 = vst [vmem:[#allocation35_spill] sm:$0xff] %v10875_v23 }
 0x5b2   :  { %v2579_v53 = vunpack.c.l.b16 %v2521_v57 }
 0x5b5   :  { %v2491_v2 = vpop.permute.xlu2 %2490 }
 0x5b6   :  { %v2495_v4 = vmul.f32 %v10862_v29, %v2491_v2 }
 0x5b8   :  { %v2497_v17 = vpack.c.bf16 %v2495_v4, %v2495_v4 }
 0x5bd   :  { %v2514_v24 = vpop.permute.xlu1 %2513  ;;  %v2484_v39 = vpop.permute.xlu2 %2483 }
 0x5be   :  { %v2518_v49 = vmul.f32 %v10852_v34, %v2514_v24  ;;  %v2487_v54 = vmul.f32 %v10867_v59, %v2484_v39 }
 0x5c0   :  { %v2520_v37 = vpack.c.bf16 %v2518_v49, %v2518_v49 }
 0x5c2   :  { %v2578_v28 = vunpack.c.l.b16 %v2520_v37 }
 0x5c4   :  { %v2580_v21 = vpack.c.b16 %v2579_v53, %v2578_v28 }
 0x5c5   :  { %v2507_v46 = vpop.permute.xlu1 %2506  ;;  %v2464_v58 = vpop.permute.xlu2 %2463 }
 0x5c6   :  { %v2525_v32 = vpop.permute.xlu0 %2524  ;;  %v2510_v14 = vmul.f32 %v10857_v51, %v2507_v46  ;;  %v2560_v46 = vunpack.c.l.b16 %v2497_v17  ;;  %v7789_v17 = vld [vmem:[%s13406_s13 + $0x4] sm:$0x10] }
 0x5c7   :  { %v2528_v15 = vmul.f32 %v10848_v3, %v2525_v32  ;;  %v2489_v32 = vpack.c.bf16 %v2487_v54, %v2487_v54 }
 0x5c8   :  { %v2512_v50 = vpack.c.bf16 %v2510_v14, %v2510_v14 }
 0x5c9   :  { %v2530_v7 = vpack.c.bf16 %v2528_v15, %v2528_v15  ;;  %v2555_v14 = vunpack.c.l.b16 %v2489_v32 }
 0x5ca   :  { %v2573_v11 = vunpack.c.l.b16 %v2512_v50 }
 0x5cb   :  { %v2585_v5 = vunpack.c.l.b16 %v2530_v7 }
 0x5cd   :  { %v2586_v61 = vpack.c.b16 %v2585_v5, %v2584_v35  ;;  %v2482_v9 = vpop.permute.xlu1 %2481  ;;  %v2534_v27 = vpop.permute.xlu2 %2533  ;;  %v10883_v5 = vperm.slane %v10794_v56, 0 }
 0x5ce   :  { %v2505_v40 = vpop.permute.xlu0 %2504  ;;  %v2486_v22 = vmul.f32 %v10867_v59, %v2482_v9  ;;  %v2537_v49 = vmul.f32 %v7984_v42, %v2534_v27 }
 0x5cf   :  { %v2509_v25 = vmul.f32 %v10857_v51, %v2505_v40  ;;  %2620 = vmatpush.bf16.msra.mxu2 %v2586_v61  ;;  %14176 = vst [vmem:[#allocation66_spill] sm:$0xff] %v10883_v5  ;;  %v2468_v56 = vmul.f32 %v10883_v5, %v2464_v58  ;;  %v6985_v58 = vld [vmem:[%s13406_s13] sm:$0xf] }
 0x5d0   :  { %v2488_v24 = vpack.c.bf16 %v2486_v22, %v2486_v22  ;;  %v2539_v7 = vpack.c.bf16 %v2537_v49, %v2537_v49  ;;  %v6986_v27 = vor.u32 %v7789_v17, %v6985_v58  ;;  %v7008_v58 = vld [vmem:[%s13408_s15 + $0x18] sm:$0x10] }
 0x5d1   :  { %v2511_v19 = vpack.c.bf16 %v2509_v25, %v2509_v25  ;;  %v2470_v22 = vpack.c.bf16 %v2468_v56, %v2468_v56 }
 0x5d2   :  { %v2554_v39 = vunpack.c.l.b16 %v2488_v24  ;;  %v2591_v50 = vunpack.c.l.b16 %v2539_v7  ;;  %v170_v24 = vld [vmem:[%s14177_s28] sm:$0x3]  ;;  %s14191_s28 = smov 16  }
 0x5d3   :  { %v2572_v48 = vunpack.c.l.b16 %v2511_v19  ;;  %2621 = vmatpush.bf16.msra.mxu2 %v2580_v21 }
 0x5d4   :  { %v2556_v53 = vpack.c.b16 %v2555_v14, %v2554_v39 }
 0x5d5   :  { %v2475_v13 = vpop.permute.xlu1 %2474  ;;  %v2574_v60 = vpack.c.b16 %v2573_v11, %v2572_v48 }
 0x5d6   :  { %v2493_v41 = vpop.permute.xlu0 %2492  ;;  %v2478_v44 = vmul.f32 %v10875_v23, %v2475_v13 }
 0x5d7   :  { %v2496_v2 = vmul.f32 %v10862_v29, %v2493_v41  ;;  %2622 = vmatpush.bf16.msra.mxu2 %v2574_v60 }
 0x5d8   :  { %v2480_v28 = vpack.c.bf16 %v2478_v44, %v2478_v44  ;;  %v10908_v44 = vpack.c.bf16 %v170_v24, %v170_v24 }
 0x5d9   :  { %v2498_v55 = vpack.c.bf16 %v2496_v2, %v2496_v2  ;;  %v2669_v2 = vld [vmem:[%s13409_s16] sm:$0xff] }
 0x5da   :  { %v2549_v25 = vunpack.c.l.b16 %v2480_v28  ;;  %2671 = vst [vmem:[#allocation1] ss:$4 sm:$0xff] %v2669_v2 }
 0x5db   :  { %v2561_v38 = vunpack.c.l.b16 %v2498_v55  ;;  %2623 = vmatpush.bf16.msra.mxu2 %v2568_v62  ;;  %v6987_v62 = vld [vmem:[%s13406_s13 + $0x8] sm:$0x10]  ;;  %14178 = vst [vmem:[#allocation74_spill] sm:$0xff] %v10908_v44 }
 0x5dc   :  { %v6990_v11 = vor.u32 %v7788_v1, %v6987_v62 }
 0x5dd   :  { %v2532_v15 = vpop.permute.xlu1 %2531  ;;  %v2562_v37 = vpack.c.b16 %v2561_v38, %v2560_v46 }
 0x5de   :  { %v2536_v35 = vmul.f32 %v7984_v42, %v2532_v15  ;;  %v2473_v57 = vpop.permute.xlu0 %2472  ;;  %v2542_v42 = vunpack.c.l.b16 %v2470_v22  ;;  %v7006_v22 = vld [vmem:[%s13408_s15 + $0x8] sm:$0xf] }
 0x5df   :  { %v2477_v61 = vmul.f32 %v10875_v23, %v2473_v57  ;;  %2624 = vmatpush.bf16.msra.mxu2 %v2562_v37 }
 0x5e0   :  { %v2538_v9 = vpack.c.bf16 %v2536_v35, %v2536_v35 }
 0x5e1   :  { %v2479_v40 = vpack.c.bf16 %v2477_v61, %v2477_v61  ;;  %v2673_v46 = vld.sshfl [vmem:[#allocation1 + $0x8] sm:$0xff pattern:$0x73625140]  ;;  %v2674_v15 = vld.sshfl [vmem:[#allocation1 + $0x10] sm:$0xff pattern:$0x73625140] }
 0x5e2   :  { %v2590_v12 = vunpack.c.l.b16 %v2538_v9  ;;  %v2683_v32 = vsel %vm2680_vm13, %v2673_v46, 0  ;;  %v2672_v35 = vld.sshfl [vmem:[#allocation1] sm:$0xff pattern:$0x73625140]  ;;  %v2685_v56 = vsel %vm2680_vm13, %v2674_v15, 0 }
 0x5e3   :  { %v2548_v19 = vunpack.c.l.b16 %v2479_v40  ;;  %2625 = vmatpush.bf16.msra.mxu2 %v2556_v53  ;;  %v2675_v57 = vld.sshfl [vmem:[#allocation1 + $0x18] sm:$0xff pattern:$0x73625140]  ;;  %v2681_v61 = vsel %vm2680_vm13, %v2672_v35, 0  ;;  %v2825_v40 = vld [vmem:[%s13410_s17] sm:$0xf] }
 0x5e4   :  { %v2592_v21 = vpack.c.b16 %v2591_v50, %v2590_v12  ;;  %v2687_v9 = vsel %vm2680_vm13, %v2675_v57, 0  ;;  %2696 = vmatpush.bf16.msra.mxu3 %v2681_v61  ;;  %2827 = vst [vmem:[#allocation1] ss:$9 sm:$0xff] %v2825_v40  ;;  %v7816_v61 = vld [vmem:[#allocation2 + $0xb0] sm:$0xf0] }
 0x5e5   :  { %v2550_v4 = vpack.c.b16 %v2549_v25, %v2548_v19  ;;  %v2606_v37 = vpop.permute.xlu1 %2605  ;;  %v169_v25 = vld [vmem:[%s14179_s1] sm:$0x1]  ;;  %v7840_v40 = vld [vmem:[#allocation2 + $0x170] sm:$0xf0] }
 0x5e6   :  { %v2466_v48 = vpop.permute.xlu0 %2465  ;;  %2641 = vmatpush.bf16.msrb.mxu0 %v2592_v21  ;;  %v6998_v19 = vld [vmem:[%s13408_s15] sm:$0xf]  ;;  %v7792_v21 = vld [vmem:[%s13408_s15 + $0xc] sm:$0x10] }
 0x5e7   :  { %v2469_v13 = vmul.f32 %v10883_v5, %v2466_v48  ;;  %2626 = vmatpush.bf16.msra.mxu2 %v2550_v4  ;;  %6992 = vmatmul.msk.bf16.vlgmr.msra.gmra.mxu3 %vm2676_vm14, %v10908_v44  ;;  %v7790_v4 = vld [vmem:[%s13408_s15 + $0x4] sm:$0xf]  ;;  %v7000_v48 = vld [vmem:[%s13408_s15 + $0x10] sm:$0x10] }
 0x5e9   :  { %v2471_v60 = vpack.c.bf16 %v2469_v13, %v2469_v13  ;;  %6991 = vmatmul.msk.bf16.vlgmr.msrb.gmra.mxu0 %vm865_vm11, %v6990_v11  ;;  %v6999_v11 = vor.u32 %v7792_v21, %v6998_v19  ;;  %v7793_v13 = vld [vmem:[%s13408_s15 + $0x14] sm:$0x10]  ;;  %v7813_v19 = vld [vmem:[#allocation2 + $0x98] sm:$0xf0] }
 0x5ea   :  { %2709 = vmatpush.bf16.msra.mxu0 %v2683_v32  ;;  %v7190_v21 = vld [vmem:[#allocation2 + $0x150] sm:$0xf] }
 0x5eb   :  { %v2543_v41 = vunpack.c.l.b16 %v2471_v60  ;;  %v7003_v60 = vor.u32 %v7790_v4, %v7000_v48  ;;  %v2762_v17 = vsel %vm214_vm1, %v6999_v11, 0  ;;  %v2830_v46 = vld [vmem:[#allocation1 + $0x12] sm:$0xff]  ;;  %v2831_v15 = vld [vmem:[#allocation1 + $0x1b] sm:$0xff]  ;;  %v7837_v4 = vld [vmem:[#allocation2 + $0x158] sm:$0xf0] }
 0x5ec   :  { %2780 = vmatpush.bf16.msrb.mxu3 %v2762_v17  ;;  %v7810_v17 = vld [vmem:[#allocation2 + $0x80] sm:$0xf0] }
 0x5ed   :  { %v2544_v54 = vpack.c.b16 %v2543_v41, %v2542_v42  ;;  %v7007_v42 = vor.u32 %v7793_v13, %v7006_v22  ;;  %v7791_v41 = vld [vmem:[%s13408_s15 + $0xc] sm:$0xf]  ;;  %v7286_v13 = vld [vmem:[#allocation2 + $0x210] sm:$0xf] }
 0x5ee   :  { %v2601_v38 = vpop.permute.xlu0 %2600 }
 0x5ef   :  { %2627 = vmatpush.bf16.msra.mxu2 %v2544_v54  ;;  %v7011_v54 = vor.u32 %v7791_v41, %v7008_v58  ;;  %v2768_v2 = vsel %vm214_vm1, %v7007_v42, 0  ;;  %v7082_v41 = vld [vmem:[#allocation2 + $0x78] sm:$0xf]  ;;  %v7191_v58 = vor.u32 %v7837_v4, %v7190_v21  ;;  %v7798_v21 = vld [vmem:[#allocation2 + $0x20] sm:$0xf0] }
 0x5f1   :  { %v2771_v24 = vsel %vm214_vm1, %v7011_v54, 0  ;;  %v7178_v54 = vld [vmem:[#allocation2 + $0x138] sm:$0xf] }
 0x5f2   :  { %2628 = vmatmul.bf16.vlgmr.msra.gmra.mxu2 %v6986_v27  ;;  %v2765_v27 = vsel %vm214_vm1, %v7003_v60, 0  ;;  %v7861_v60 = vld [vmem:[#allocation2 + $0x218] sm:$0xf0] }
 0x5f3   :  { %2735 = vmatpush.bf16.msrb.mxu2 %v2687_v9  ;;  %2793 = vmatpush.bf16.msrb.mxu0 %v2765_v27  ;;  %v7202_v9 = vld [vmem:[#allocation2 + $0x168] sm:$0xf]  ;;  %v7834_v27 = vld [vmem:[#allocation2 + $0x140] sm:$0xf0] }
 0x5f7   :  { %2819 = vmatpush.bf16.msra.mxu2 %v2771_v24 }
 0x5f9   :  { %6993 = vmatmul.msk.bf16.vlgmr.msra.gmra.mxu0 %vm2676_vm14, %v10908_v44 }
 0x602   :  { %6995 = vmatmul.msk.bf16.vlgmr.msrb.gmra.mxu2 %vm2676_vm14, %v10908_v44 }
 0x666   :  { %v2643_v55 = vpop.f32.mrf.mxu0 }
 0x66a   :  { %v10961_v35 = vpop.f32.mrf.mxu3 }
 0x66e   :  { %v2645_v53 = vpop.f32.mrf.mxu0 }
 0x672   :  { %v2700_v48 = vpop.f32.mrf.mxu3 }
 0x673   :  { %v7142_v48 = vld [vmem:[#allocation2 + $0xf0] sm:$0xf] }
 0x675   :  { %v2629_v49 = vpop.f32.mrf.mxu2 }
 0x676   :  { %v2630_v39 = vadd.f32 %v2629_v49, %v2601_v38  ;;  %v2829_v49 = vld [vmem:[#allocation1 + $0x9] sm:$0xff] }
 0x677   :  { %v2839_v38 = vsel %vm2836_vm15, %v2829_v49, 0  ;;  %v7070_v49 = vld [vmem:[#allocation2 + $0x60] sm:$0xf] }
 0x678   :  { %v2644_v14 = vadd.f32 %v2643_v55, %v2630_v39  ;;  %v2828_v55 = vld [vmem:[#allocation1] sm:$0xff]  ;;  %v2841_v39 = vsel %vm2836_vm15, %v2830_v46, 0  ;;  %2865 = vmatpush.bf16.msra.mxu0 %v2839_v38  ;;  %v7179_v46 = vor.u32 %v7834_v27, %v7178_v54  ;;  %v7166_v38 = vld [vmem:[#allocation2 + $0x120] sm:$0xf] }
 0x679   :  { %v2837_v32 = vsel %vm2836_vm15, %v2828_v55, 0  ;;  %v7083_v55 = vor.u32 %v7810_v17, %v7082_v41  ;;  %v7274_v41 = vld [vmem:[#allocation2 + $0x1f8] sm:$0xf]  ;;  %v7310_v27 = vld [vmem:[#allocation2 + $0x240] sm:$0xf] }
 0x67a   :  { %v2648_v12 = vmax.f32 %v2644_v14, 0.0  ;;  %2852 = vmatpush.bf16.msra.mxu3 %v2837_v32  ;;  %v7807_v32 = vld [vmem:[#allocation2 + $0x68] sm:$0xf0] }
 0x67d   :  { %v2631_v7 = vpop.f32.mrf.mxu2 }
 0x67e   :  { %v2632_v28 = vadd.f32 %v2631_v7, %v2606_v37  ;;  %v2843_v37 = vsel %vm2836_vm15, %v2831_v15, 0  ;;  %v10959_v7 = vpop.f32.mrf.mxu0  ;;  %v172_v15 = vld [vmem:[%s14180_s6] sm:$0x3]  ;;  %s14192_s6 = smov 127  }
 0x67f   :  { %2891 = vmatpush.bf16.msrb.mxu2 %v2843_v37  ;;  %v7071_v37 = vor.u32 %v7807_v32, %v7070_v49  ;;  %v7108_v49 = vld [vmem:[#allocation2 + $0xb4] sm:$0xf0] }
 0x680   :  { %v2646_v50 = vadd.f32 %v2645_v53, %v2632_v28  ;;  %v7106_v28 = vld [vmem:[#allocation2 + $0xa8] sm:$0xf]  ;;  %v7204_v32 = vld [vmem:[#allocation2 + $0x174] sm:$0xf0] }
 0x681   :  { %v7298_v53 = vld [vmem:[#allocation2 + $0x228] sm:$0xf] }
 0x682   :  { %v2649_v1 = vmax.f32 %v2646_v50, 0.0  ;;  %v7864_v50 = vld [vmem:[#allocation2 + $0x230] sm:$0xf0] }
 0x683   :  { %v7299_v11 = vor.u32 %v7864_v50, %v7298_v53  ;;  %v10972_v53 = vpack.c.bf16 %v172_v15, %v172_v15  ;;  %v7130_v15 = vld [vmem:[#allocation2 + $0xd8] sm:$0xf] }
 0x684   :  { %v2650_v62 = vpack.c.bf16 %v2649_v1, %v2648_v12 }
 0x685   :  { %v10963_v57 = vpop.f32.mrf.mxu2  ;;  %14181 = vst [vmem:[#allocation94_spill] sm:$0xff] %v10972_v53 }
 0x686   :  { %2658 = vmatpush.bf16.xpose.msrb.mxu1 %v2650_v62  ;;  %v2713_v14 = vpop.f32.mrf.mxu0  ;;  %v7107_v62 = vor.u32 %v7816_v61, %v7106_v28  ;;  %v7804_v61 = vld [vmem:[#allocation2 + $0x50] sm:$0xf0] }
 0x687   :  { %v7058_v14 = vld [vmem:[#allocation2 + $0x48] sm:$0xf] }
 0x68d   :  { %2659 = vmatmul.bf16.vlgmr.msrb.gmra.mxu1 %v169_v25  ;;  %v7203_v25 = vor.u32 %v7840_v40, %v7202_v9  ;;  %v2739_v22 = vpop.f32.mrf.mxu2  ;;  %v7154_v9 = vld [vmem:[#allocation2 + $0x108] sm:$0xf]  ;;  %v7828_v40 = vld [vmem:[#allocation2 + $0x110] sm:$0xf0] }
 0x68e   :  { %2722 = vmatpush.bf16.msra.mxu1 %v2685_v56  ;;  %v7094_v56 = vld [vmem:[#allocation2 + $0x90] sm:$0xf]  ;;  %v7825_v22 = vld [vmem:[#allocation2 + $0xf8] sm:$0xf0] }
 0x68f   :  { %v7095_v42 = vor.u32 %v7813_v19, %v7094_v56  ;;  %v7801_v56 = vld [vmem:[#allocation2 + $0x38] sm:$0xf0]  ;;  %v7034_v19 = vld [vmem:[#allocation2 + $0x18] sm:$0xf] }
 0x692   :  { %2806 = vmatpush.bf16.msrb.mxu1 %v2768_v2  ;;  %v7287_v2 = vor.u32 %v7861_v60, %v7286_v13  ;;  %v7022_v13 = vld [vmem:[#allocation2] sm:$0xf]  ;;  %v7143_v60 = vor.u32 %v7825_v22, %v7142_v48  ;;  %v7852_v48 = vld [vmem:[#allocation2 + $0x1d0] sm:$0xf0]  ;;  %v7863_v22 = vld [vmem:[#allocation2 + $0x22c] sm:$0xf] }
 0x69d   :  { %6994 = vmatmul.msk.bf16.vlgmr.msra.gmra.mxu1 %vm2676_vm14, %v10908_v44 }
 0x69e   :  { %2878 = vmatpush.bf16.msra.mxu1 %v2841_v39  ;;  %v7831_v39 = vld [vmem:[#allocation2 + $0x128] sm:$0xf0] }
 0x69f   :  { %v7167_v28 = vor.u32 %v7831_v39, %v7166_v38 }
 0x70a   :  { %v2660_v12 = vpop.f32.mrf.mxu1 }
 0x70b   :  { %v2664_v1 = vpack.c.bf16 %v2660_v12, %v2660_v12  ;;  %v7059_v12 = vor.u32 %v7804_v61, %v7058_v14  ;;  %v7855_v61 = vld [vmem:[#allocation2 + $0x1e8] sm:$0xf0] }
 0x70d   :  { %7012 = vmatmul.msk.bf16.vlgmr.msrb.gmra.mxu3 %vm13640_vm0, %v2664_v1  ;;  %7013 = vmatmul.msk.bf16.vlgmr.msrb.gmra.mxu0 %vm13640_vm0, %v2664_v1 }
 0x70e   :  { %7014 = vmatmul.msk.bf16.vlgmr.msrb.gmra.mxu1 %vm13640_vm0, %v2664_v1  ;;  %7015 = vmatmul.msk.bf16.vlgmr.msra.gmra.mxu2 %vm13640_vm0, %v2664_v1  ;;  %vm2832_vm0 = vcmask 15360   ;;  %v7155_v1 = vor.u32 %v7828_v40, %v7154_v9  ;;  %v7812_v9 = vld [vmem:[#allocation2 + $0x94] sm:$0xf] }
 0x70f   :  { %3434 = vmatpush.bf16.msrb.mxu3 %v7107_v62  ;;  %3447 = vmatpush.bf16.msrb.mxu0 %v7203_v25  ;;  %v7046_v62 = vld [vmem:[#allocation2 + $0x30] sm:$0xf] }
 0x710   :  { %3460 = vmatpush.bf16.msrb.mxu1 %v7299_v11  ;;  %v7047_v25 = vor.u32 %v7801_v56, %v7046_v62  ;;  %v7035_v11 = vor.u32 %v7798_v21, %v7034_v19  ;;  %v7192_v62 = vld [vmem:[#allocation2 + $0x15c] sm:$0xf0]  ;;  %v7819_v21 = vld [vmem:[#allocation2 + $0xc8] sm:$0xf0] }
 0x711   :  { %v7118_v19 = vld [vmem:[#allocation2 + $0xc0] sm:$0xf] }
 0x712   :  { %v2662_v24 = vpop.f32.mrf.mxu1 }
 0x713   :  { %3435 = vmatpush.bf16.msrb.mxu3 %v7095_v42  ;;  %3448 = vmatpush.bf16.msrb.mxu0 %v7191_v58  ;;  %v7795_v42 = vld [vmem:[#allocation2 + $0x8] sm:$0xf0]  ;;  %v7858_v58 = vld [vmem:[#allocation2 + $0x200] sm:$0xf0] }
 0x714   :  { %3461 = vmatpush.bf16.msrb.mxu1 %v7287_v2  ;;  %v7023_v17 = vor.u32 %v7795_v42, %v7022_v13  ;;  %v7275_v54 = vor.u32 %v7858_v58, %v7274_v41  ;;  %v7867_v2 = vld [vmem:[#allocation2 + $0x248] sm:$0xf0]  ;;  %v7300_v13 = vld [vmem:[#allocation2 + $0x234] sm:$0xf0]  ;;  %v7809_v41 = vld [vmem:[#allocation2 + $0x7c] sm:$0xf] }
 0x715   :  { %v7815_v24 = vld [vmem:[#allocation2 + $0xac] sm:$0xf]  ;;  %v7303_v42 = vor.u32 %v7863_v22, %v7300_v13  ;;  %v7084_v58 = vld [vmem:[#allocation2 + $0x84] sm:$0xf0]  ;;  %v7214_v22 = vld [vmem:[#allocation2 + $0x180] sm:$0xf] }
 0x716   :  { %v7111_v38 = vor.u32 %v7815_v24, %v7108_v49  ;;  %v7238_v24 = vld [vmem:[#allocation2 + $0x1b0] sm:$0xf]  ;;  %v7860_v49 = vld [vmem:[#allocation2 + $0x214] sm:$0xf]  ;;  %v7843_v13 = vld [vmem:[#allocation2 + $0x188] sm:$0xf0] }
 0x717   :  { %3436 = vmatpush.bf16.msrb.mxu3 %v7083_v55  ;;  %3449 = vmatpush.bf16.msrb.mxu0 %v7179_v46  ;;  %v7311_v55 = vor.u32 %v7867_v2, %v7310_v27  ;;  %v7839_v46 = vld [vmem:[#allocation2 + $0x16c] sm:$0xf]  ;;  %v7180_v27 = vld [vmem:[#allocation2 + $0x144] sm:$0xf0] }
 0x718   :  { %3462 = vmatpush.bf16.msrb.mxu1 %v7275_v54  ;;  %v7207_v39 = vor.u32 %v7839_v46, %v7204_v32  ;;  %v7087_v54 = vor.u32 %v7809_v41, %v7084_v58  ;;  %v7288_v32 = vld [vmem:[#allocation2 + $0x21c] sm:$0xf0]  ;;  %v7264_v41 = vld [vmem:[#allocation2 + $0x1ec] sm:$0xf0]  ;;  %v7800_v58 = vld [vmem:[#allocation2 + $0x34] sm:$0xf] }
 0x719   :  { %3480 = vmatpush.bf16.msra.mxu2 %v7311_v55  ;;  %v7849_v55 = vld [vmem:[#allocation2 + $0x1b8] sm:$0xf0] }
 0x71a   :  { %v10974_v50 = vpop.f32.mrf.mxu1  ;;  %v7239_v46 = vor.u32 %v7849_v55, %v7238_v24 }
 0x71b   :  { %3437 = vmatpush.bf16.msrb.mxu3 %v7071_v37  ;;  %3450 = vmatpush.bf16.msrb.mxu0 %v7167_v28  ;;  %v7822_v37 = vld [vmem:[#allocation2 + $0xe0] sm:$0xf0]  ;;  %v7262_v28 = vld [vmem:[#allocation2 + $0x1e0] sm:$0xf] }
 0x71c   :  { %v7131_v14 = vor.u32 %v7822_v37, %v7130_v15  ;;  %v7263_v40 = vor.u32 %v7855_v61, %v7262_v28  ;;  %v7291_v15 = vor.u32 %v7860_v49, %v7288_v32  ;;  %v7168_v28 = vld [vmem:[#allocation2 + $0x12c] sm:$0xf0]  ;;  %v7866_v49 = vld [vmem:[#allocation2 + $0x244] sm:$0xf] }
 0x71d   :  { %7016 = vmatmul.msk.bf16.vlgmr.msra.gmra.mxu3 %vm2832_vm0, %v10972_v53  ;;  %7017 = vmatmul.msk.bf16.vlgmr.msra.gmra.mxu0 %vm2832_vm0, %v10972_v53 }
 0x71e   :  { %7018 = vmatmul.msk.bf16.vlgmr.msra.gmra.mxu1 %vm2832_vm0, %v10972_v53  ;;  %7019 = vmatmul.msk.bf16.vlgmr.msrb.gmra.mxu2 %vm2832_vm0, %v10972_v53 }
 0x71f   :  { %3438 = vmatpush.bf16.msrb.mxu3 %v7059_v12  ;;  %3451 = vmatpush.bf16.msrb.mxu0 %v7155_v1  ;;  %v7096_v12 = vld [vmem:[#allocation2 + $0x9c] sm:$0xf0]  ;;  %v7836_v1 = vld [vmem:[#allocation2 + $0x154] sm:$0xf] }
 0x720   :  { %3486 = vmatpush.bf16.msrb.mxu2 %v7111_v38  ;;  %v7099_v56 = vor.u32 %v7812_v9, %v7096_v12  ;;  %3463 = vmatpush.bf16.msrb.mxu1 %v7263_v40  ;;  %v7806_v38 = vld [vmem:[#allocation2 + $0x64] sm:$0xf]  ;;  %v7226_v9 = vld [vmem:[#allocation2 + $0x198] sm:$0xf]  ;;  %v7857_v12 = vld [vmem:[#allocation2 + $0x1fc] sm:$0xf] }
 0x721   :  { %v7846_v40 = vld [vmem:[#allocation2 + $0x1a0] sm:$0xf0] }
 0x722   :  { %v2726_v4 = vpop.f32.mrf.mxu1 }
 0x723   :  { %3439 = vmatpush.bf16.msrb.mxu3 %v7047_v25  ;;  %3452 = vmatpush.bf16.msrb.mxu0 %v7143_v60  ;;  %v7195_v25 = vor.u32 %v7836_v1, %v7192_v62  ;;  %v7250_v4 = vld [vmem:[#allocation2 + $0x1c8] sm:$0xf]  ;;  %v7227_v1 = vor.u32 %v7846_v40, %v7226_v9 }
 0x724   :  { %3487 = vmatpush.bf16.msrb.mxu2 %v7099_v56  ;;  %v7251_v60 = vor.u32 %v7852_v48, %v7250_v4  ;;  %v7276_v62 = vld [vmem:[#allocation2 + $0x204] sm:$0xf0]  ;;  %v7803_v56 = vld [vmem:[#allocation2 + $0x4c] sm:$0xf] }
 0x725   :  { %v7827_v4 = vld [vmem:[#allocation2 + $0x10c] sm:$0xf] }
 0x726   :  { %3464 = vmatpush.bf16.msrb.mxu1 %v7251_v60  ;;  %v7215_v60 = vor.u32 %v7843_v13, %v7214_v22  ;;  %v7845_v13 = vld [vmem:[#allocation2 + $0x19c] sm:$0xf] }
 0x727   :  { %3440 = vmatpush.bf16.msrb.mxu3 %v7035_v11  ;;  %3453 = vmatpush.bf16.msrb.mxu0 %v7131_v14  ;;  %v7119_v11 = vor.u32 %v7819_v21, %v7118_v19  ;;  %v7830_v14 = vld [vmem:[#allocation2 + $0x124] sm:$0xf]  ;;  %v7279_v19 = vor.u32 %v7857_v12, %v7276_v62  ;;  %v7848_v12 = vld [vmem:[#allocation2 + $0x1b4] sm:$0xf] }
 0x728   :  { %3488 = vmatpush.bf16.msrb.mxu2 %v7087_v54  ;;  %v7171_v61 = vor.u32 %v7830_v14, %v7168_v28  ;;  %v7048_v54 = vld [vmem:[#allocation2 + $0x3c] sm:$0xf0]  ;;  %v7036_v14 = vld [vmem:[#allocation2 + $0x24] sm:$0xf0]  ;;  %v7821_v28 = vld [vmem:[#allocation2 + $0xdc] sm:$0xf] }
 0x729   :  { %v7051_v24 = vor.u32 %v7800_v58, %v7048_v54 }
 0x72a   :  { %3465 = vmatpush.bf16.msrb.mxu1 %v7239_v46  ;;  %v7312_v46 = vld [vmem:[#allocation2 + $0x24c] sm:$0xf0] }
 0x72b   :  { %3441 = vmatpush.bf16.msrb.mxu3 %v7023_v17  ;;  %v7833_v17 = vld [vmem:[#allocation2 + $0x13c] sm:$0xf]  ;;  %3454 = vmatpush.bf16.msrb.mxu0 %v7119_v11  ;;  %v7156_v11 = vld [vmem:[#allocation2 + $0x114] sm:$0xf0]  ;;  %v7315_v32 = vor.u32 %v7866_v49, %v7312_v46 }
 0x72c   :  { %v7183_v2 = vor.u32 %v7833_v17, %v7180_v27  ;;  %v7159_v48 = vor.u32 %v7827_v4, %v7156_v11  ;;  %v7824_v27 = vld [vmem:[#allocation2 + $0xf4] sm:$0xf]  ;;  %v7818_v11 = vld [vmem:[#allocation2 + $0xc4] sm:$0xf] }
 0x72e   :  { %3466 = vmatpush.bf16.msrb.mxu1 %v7227_v1  ;;  %v7240_v1 = vld [vmem:[#allocation2 + $0x1bc] sm:$0xf0] }
 0x72f   :  { %3499 = vmatpush.bf16.msra.mxu3 %v7207_v39  ;;  %3512 = vmatpush.bf16.msra.mxu0 %v7303_v42  ;;  %v7072_v39 = vld [vmem:[#allocation2 + $0x6c] sm:$0xf0]  ;;  %v7854_v42 = vld [vmem:[#allocation2 + $0x1e4] sm:$0xf] }
 0x730   :  { %v7075_v37 = vor.u32 %v7806_v38, %v7072_v39  ;;  %v7267_v17 = vor.u32 %v7854_v42, %v7264_v41  ;;  %v7851_v38 = vld [vmem:[#allocation2 + $0x1cc] sm:$0xf]  ;;  %v7252_v39 = vld [vmem:[#allocation2 + $0x1d4] sm:$0xf0]  ;;  %v7842_v41 = vld [vmem:[#allocation2 + $0x184] sm:$0xf] }
 0x732   :  { %3489 = vmatpush.bf16.msrb.mxu2 %v7075_v37  ;;  %3467 = vmatpush.bf16.msrb.mxu1 %v7215_v60  ;;  %v7797_v37 = vld [vmem:[#allocation2 + $0x1c] sm:$0xf]  ;;  %v7228_v60 = vld [vmem:[#allocation2 + $0x1a4] sm:$0xf0] }
 0x733   :  { %3500 = vmatpush.bf16.msra.mxu3 %v7195_v25  ;;  %3513 = vmatpush.bf16.msra.mxu0 %v7291_v15  ;;  %v7060_v25 = vld [vmem:[#allocation2 + $0x54] sm:$0xf0]  ;;  %v7255_v15 = vor.u32 %v7851_v38, %v7252_v39  ;;  %v7039_v9 = vor.u32 %v7797_v37, %v7036_v14  ;;  %v7231_v42 = vor.u32 %v7845_v13, %v7228_v60  ;;  %v7318_v13 = vld [vmem:[#allocation2 + $0x248] sm:$0xf]  ;;  %v7868_v60 = vld [vmem:[#allocation2 + $0x250] sm:$0xf0] }
 0x734   :  { %v7063_v21 = vor.u32 %v7803_v56, %v7060_v25  ;;  %v7243_v56 = vor.u32 %v7848_v12, %v7240_v1  ;;  %v7794_v25 = vld [vmem:[#allocation2 + $0x4] sm:$0xf]  ;;  %v7114_v12 = vld [vmem:[#allocation2 + $0xb0] sm:$0xf]  ;;  %v7817_v1 = vld [vmem:[#allocation2 + $0xb8] sm:$0xf0] }
 0x736   :  { %3490 = vmatpush.bf16.msrb.mxu2 %v7063_v21  ;;  %3532 = vmatpush.bf16.msra.mxu1 %v7315_v32 }
 0x737   :  { %3501 = vmatpush.bf16.msra.mxu3 %v7183_v2  ;;  %3514 = vmatpush.bf16.msra.mxu0 %v7279_v19  ;;  %v7144_v2 = vld [vmem:[#allocation2 + $0xfc] sm:$0xf0]  ;;  %v7024_v19 = vld [vmem:[#allocation2 + $0xc] sm:$0xf0] }
 0x738   :  { %v7147_v55 = vor.u32 %v7824_v27, %v7144_v2  ;;  %v7027_v4 = vor.u32 %v7794_v25, %v7024_v19 }
 0x73a   :  { %3491 = vmatpush.bf16.msrb.mxu2 %v7051_v24 }
 0x73b   :  { %3502 = vmatpush.bf16.msra.mxu3 %v7171_v61  ;;  %3515 = vmatpush.bf16.msra.mxu0 %v7267_v17  ;;  %v7132_v61 = vld [vmem:[#allocation2 + $0xe4] sm:$0xf0]  ;;  %v7216_v17 = vld [vmem:[#allocation2 + $0x18c] sm:$0xf0] }
 0x73c   :  { %v7135_v40 = vor.u32 %v7821_v28, %v7132_v61  ;;  %v7219_v2 = vor.u32 %v7842_v41, %v7216_v17 }
 0x73e   :  { %3492 = vmatpush.bf16.msrb.mxu2 %v7039_v9 }
 0x73f   :  { %3503 = vmatpush.bf16.msra.mxu3 %v7159_v48  ;;  %3516 = vmatpush.bf16.msra.mxu0 %v7255_v15  ;;  %v7120_v48 = vld [vmem:[#allocation2 + $0xcc] sm:$0xf0] }
 0x740   :  { %v7123_v22 = vor.u32 %v7818_v11, %v7120_v48 }
 0x742   :  { %3493 = vmatpush.bf16.msrb.mxu2 %v7027_v4 }
 0x743   :  { %3504 = vmatpush.bf16.msra.mxu3 %v7147_v55  ;;  %3517 = vmatpush.bf16.msra.mxu0 %v7243_v56  ;;  %v2901_v55 = vld [vmem:[%s13411_s18] sm:$0xf] }
 0x744   :  { %v2904_v38 = vperm.slane %v2901_v55, 1  ;;  %v2905_v37 = vperm.slane %v2901_v55, 2  ;;  %v2903_v19 = vperm.slane %v2901_v55, 0  ;;  %v2906_v11 = vperm.slane %v2901_v55, 3 }
 0x747   :  { %3505 = vmatpush.bf16.msra.mxu3 %v7135_v40  ;;  %3518 = vmatpush.bf16.msra.mxu0 %v7231_v42 }
 0x74b   :  { %3506 = vmatpush.bf16.msra.mxu3 %v7123_v22  ;;  %3519 = vmatpush.bf16.msra.mxu0 %v7219_v2  ;;  %v7115_v22 = vor.u32 %v7817_v1, %v7114_v12  ;;  %v7198_v1 = vld [vmem:[#allocation2 + $0x158] sm:$0xf] }
 0x78a   :  { %v2795_v62 = vpop.f32.mrf.mxu0 }
 0x78b   :  { %v2808_v21 = vpop.f32.mrf.mxu1  ;;  %v2796_v46 = vadd.f32 %v2795_v62, %v10959_v7 }
 0x78c   :  { %v2809_v39 = vadd.f32 %v2808_v21, %v10974_v50 }
 0x790   :  { %v2782_v58 = vpop.f32.mrf.mxu3 }
 0x791   :  { %v2821_v54 = vpop.f32.mrf.mxu2  ;;  %v2783_v56 = vadd.f32 %v2782_v58, %v10961_v35  ;;  %v7814_v35 = vld [vmem:[#allocation2 + $0xa0] sm:$0xf0]  ;;  %v7319_v58 = vor.u32 %v7868_v60, %v7318_v13  ;;  %v7186_v13 = vld [vmem:[#allocation2 + $0x140] sm:$0xf]  ;;  %v7835_v60 = vld [vmem:[#allocation2 + $0x148] sm:$0xf0] }
 0x792   :  { %v2797_v27 = vpop.f32.mrf.mxu0  ;;  %v2822_v4 = vadd.f32 %v2821_v54, %v10963_v57  ;;  %v7306_v57 = vld [vmem:[#allocation2 + $0x230] sm:$0xf]  ;;  %v7865_v54 = vld [vmem:[#allocation2 + $0x238] sm:$0xf0] }
 0x793   :  { %v2810_v24 = vpop.f32.mrf.mxu1  ;;  %v7102_v27 = vld [vmem:[#allocation2 + $0x98] sm:$0xf] }
 0x798   :  { %v2784_v49 = vpop.f32.mrf.mxu3 }
 0x799   :  { %v2823_v32 = vpop.f32.mrf.mxu2  ;;  %v7210_v49 = vld [vmem:[#allocation2 + $0x170] sm:$0xf] }
 0x79a   :  { %v2867_v15 = vpop.f32.mrf.mxu0 }
 0x79b   :  { %v2898_v14 = vadd.f32 %v2867_v15, %v2796_v46  ;;  %v2880_v28 = vpop.f32.mrf.mxu1  ;;  %v7841_v46 = vld [vmem:[#allocation2 + $0x178] sm:$0xf0]  ;;  %v7307_v15 = vor.u32 %v7865_v54, %v7306_v57  ;;  %v7174_v57 = vld [vmem:[#allocation2 + $0x128] sm:$0xf]  ;;  %v7832_v54 = vld [vmem:[#allocation2 + $0x130] sm:$0xf0] }
 0x79c   :  { %v2899_v61 = vadd.f32 %v2880_v28, %v2809_v39 }
 0x79d   :  { %v2912_v9 = vadd.f32 %v2904_v38, %v2898_v14  ;;  %v7103_v38 = vor.u32 %v7814_v35, %v7102_v27  ;;  %v7811_v14 = vld [vmem:[#allocation2 + $0x88] sm:$0xf0]  ;;  %v7066_v27 = vld [vmem:[#allocation2 + $0x50] sm:$0xf]  ;;  %v7805_v35 = vld [vmem:[#allocation2 + $0x58] sm:$0xf0] }
 0x79e   :  { %v2913_v40 = vadd.f32 %v2905_v37, %v2899_v61  ;;  %v7090_v37 = vld [vmem:[#allocation2 + $0x80] sm:$0xf]  ;;  %v7211_v61 = vor.u32 %v7841_v46, %v7210_v49  ;;  %v7054_v46 = vld [vmem:[#allocation2 + $0x38] sm:$0xf] }
 0x79f   :  { %v2916_v25 = vmax.f32 %v2912_v9, 0.0  ;;  %v7294_v9 = vld [vmem:[#allocation2 + $0x218] sm:$0xf] }
 0x7a0   :  { %v2917_v7 = vmax.f32 %v2913_v40, 0.0  ;;  %v2854_v62 = vpop.f32.mrf.mxu3  ;;  %v7862_v40 = vld [vmem:[#allocation2 + $0x220] sm:$0xf0] }
 0x7a1   :  { %v10991_v48 = vpack.c.bf16 %v2916_v25, %v2916_v25  ;;  %v2897_v50 = vadd.f32 %v2854_v62, %v2783_v56  ;;  %v2893_v21 = vpop.f32.mrf.mxu2  ;;  %v7838_v56 = vld [vmem:[#allocation2 + $0x160] sm:$0xf0]  ;;  %v7078_v62 = vld [vmem:[#allocation2 + $0x68] sm:$0xf] }
 0x7a2   :  { %v10993_v42 = vpack.c.bf16 %v2917_v7, %v2917_v7  ;;  %v2900_v41 = vadd.f32 %v2893_v21, %v2822_v4  ;;  %v2869_v17 = vpop.f32.mrf.mxu0  ;;  %v7295_v7 = vor.u32 %v7862_v40, %v7294_v9  ;;  %v7282_v21 = vld [vmem:[#allocation2 + $0x200] sm:$0xf] }
 0x7a3   :  { %v2911_v2 = vadd.f32 %v2903_v19, %v2897_v50  ;;  %v2882_v24 = vpop.f32.mrf.mxu1  ;;  %3455 = vmatmul.bf16.vlgmr.msrb.gmra.mxu0 %v10991_v48  ;;  %v7091_v19 = vor.u32 %v7811_v14, %v7090_v37  ;;  %v7199_v50 = vor.u32 %v7838_v56, %v7198_v1  ;;  %v7162_v37 = vld [vmem:[#allocation2 + $0x110] sm:$0xf]  ;;  %v7829_v14 = vld [vmem:[#allocation2 + $0x118] sm:$0xf0]  ;;  %v7042_v1 = vld [vmem:[#allocation2 + $0x20] sm:$0xf] }
 0x7a4   :  { %v2914_v55 = vadd.f32 %v2906_v11, %v2900_v41  ;;  %3468 = vmatmul.bf16.vlgmr.msrb.gmra.mxu1 %v10993_v42  ;;  %3584 = vmatpush.bf16.msrb.mxu0 %v7319_v58  ;;  %v7808_v11 = vld [vmem:[#allocation2 + $0x70] sm:$0xf0]  ;;  %v7187_v58 = vor.u32 %v7835_v60, %v7186_v13  ;;  %v7799_v56 = vld [vmem:[#allocation2 + $0x28] sm:$0xf0]  ;;  %v7234_v60 = vld [vmem:[#allocation2 + $0x1a0] sm:$0xf] }
 0x7a5   :  { %v2915_v32 = vmax.f32 %v2911_v2, 0.0  ;;  %3538 = vmatpush.bf16.msrb.mxu1 %v7115_v22  ;;  %v7859_v22 = vld [vmem:[#allocation2 + $0x208] sm:$0xf0]  ;;  %v7079_v41 = vor.u32 %v7808_v11, %v7078_v62  ;;  %v7270_v2 = vld [vmem:[#allocation2 + $0x1e8] sm:$0xf]  ;;  %v7043_v11 = vor.u32 %v7799_v56, %v7042_v1 }
 0x7a6   :  { %v2918_v39 = vmax.f32 %v2914_v55, 0.0  ;;  %v7283_v17 = vor.u32 %v7859_v22, %v7282_v21  ;;  %v7856_v24 = vld [vmem:[#allocation2 + $0x1f0] sm:$0xf0]  ;;  %v7067_v55 = vor.u32 %v7805_v35, %v7066_v27  ;;  %v7826_v62 = vld [vmem:[#allocation2 + $0x100] sm:$0xf0] }
 0x7a7   :  { %v10997_v28 = vpack.c.bf16 %v2915_v32, %v2915_v32  ;;  %v7271_v49 = vor.u32 %v7856_v24, %v7270_v2  ;;  %v7802_v32 = vld [vmem:[#allocation2 + $0x40] sm:$0xf0]  ;;  %v7030_v21 = vld [vmem:[#allocation2 + $0x8] sm:$0xf]  ;;  %v7796_v22 = vld [vmem:[#allocation2 + $0x10] sm:$0xf0] }
 0x7a8   :  { %v10999_v12 = vpack.c.bf16 %v2918_v39, %v2918_v39  ;;  %v2856_v25 = vpop.f32.mrf.mxu3  ;;  %v7258_v39 = vld [vmem:[#allocation2 + $0x1d0] sm:$0xf]  ;;  %v7055_v9 = vor.u32 %v7802_v32, %v7054_v46  ;;  %v7823_v27 = vld [vmem:[#allocation2 + $0xe8] sm:$0xf0]  ;;  %v7031_v35 = vor.u32 %v7796_v22, %v7030_v21  ;;  %v7222_v24 = vld [vmem:[#allocation2 + $0x188] sm:$0xf] }
 0x7a9   :  { %3539 = vmatpush.bf16.msrb.mxu1 %v7103_v38  ;;  %3442 = vmatmul.bf16.vlgmr.msrb.gmra.mxu3 %v10997_v28  ;;  %v2895_v4 = vpop.f32.mrf.mxu2  ;;  %v7175_v38 = vor.u32 %v7832_v54, %v7174_v57  ;;  %v7163_v25 = vor.u32 %v7829_v14, %v7162_v37  ;;  %v7844_v57 = vld [vmem:[#allocation2 + $0x190] sm:$0xf0]  ;;  %v7126_v54 = vld [vmem:[#allocation2 + $0xc8] sm:$0xf]  ;;  %v14183_v46 = vld [vmem:[#allocation6_spill] sm:$0xff] }
 0x7aa   :  { %7320 = vmatmul.msk.bf16.vlgmr.msra.gmra.mxu2 %vm865_vm11, %v10999_v12  ;;  %3564 = vmatpush.bf16.msrb.mxu3 %v7307_v15  ;;  %v7853_v15 = vld [vmem:[#allocation2 + $0x1d8] sm:$0xf0]  ;;  %v7850_v4 = vld [vmem:[#allocation2 + $0x1c0] sm:$0xf0] }
 0x7ab   :  { %3551 = vmatpush.bf16.msra.mxu2 %v7211_v61  ;;  %v14182_v61 = vld [vmem:[#allocation5_spill] sm:$0xff]  ;;  %v7259_v40 = vor.u32 %v7853_v15, %v7258_v39  ;;  %v14185_v39 = vld [vmem:[#allocation7_spill] sm:$0xff] }
 0x7ac   :  { %v7869_v15 = vld [vmem:[%s13803_s7 + $0x8] sm:$0xff] }
 0x7ad   :  { %3540 = vmatpush.bf16.msrb.mxu1 %v7091_v19  ;;  %v7246_v19 = vld [vmem:[#allocation2 + $0x1b8] sm:$0xf] }
 0x7ae   :  { %3565 = vmatpush.bf16.msrb.mxu3 %v7295_v7  ;;  %v7150_v7 = vld [vmem:[#allocation2 + $0xf8] sm:$0xf] }
 0x7af   :  { %3552 = vmatpush.bf16.msra.mxu2 %v7199_v50  ;;  %v7247_v50 = vor.u32 %v7850_v4, %v7246_v19  ;;  %v7151_v13 = vor.u32 %v7826_v62, %v7150_v7 }
 0x7b1   :  { %3541 = vmatpush.bf16.msrb.mxu1 %v7079_v41  ;;  %v7847_v41 = vld [vmem:[#allocation2 + $0x1a8] sm:$0xf0] }
 0x7b2   :  { %3566 = vmatpush.bf16.msrb.mxu3 %v7283_v17  ;;  %v7138_v17 = vld [vmem:[#allocation2 + $0xe0] sm:$0xf] }
 0x7b3   :  { %3553 = vmatpush.bf16.msra.mxu2 %v7187_v58  ;;  %3520 = vmatmul.bf16.vlgmr.msra.gmra.mxu0 %v10993_v42  ;;  %v7235_v58 = vor.u32 %v7847_v41, %v7234_v60  ;;  %v7139_v2 = vor.u32 %v7823_v27, %v7138_v17  ;;  %v3593_v41 = vld [vmem:[%s13414_s21] sm:$0x7] }
 0x7b4   :  { %7321 = vmatmul.msk.bf16.vlgmr.msra.gmra.mxu1 %vm865_vm11, %v10999_v12  ;;  %3650 = vmatpush.bf16.msra.mxu0 %v14182_v61 }
 0x7b5   :  { %3542 = vmatpush.bf16.msrb.mxu1 %v7067_v55  ;;  %v7820_v55 = vld [vmem:[#allocation2 + $0xd0] sm:$0xf0] }
 0x7b6   :  { %3567 = vmatpush.bf16.msrb.mxu3 %v7271_v49  ;;  %v7223_v49 = vor.u32 %v7844_v57, %v7222_v24  ;;  %v7127_v32 = vor.u32 %v7820_v55, %v7126_v54  ;;  %v3596_v54 = vperm.slane %v3593_v41, 1 }
 0x7b7   :  { %3554 = vmatpush.bf16.msra.mxu2 %v7175_v38  ;;  %v14184_v38 = vld [vmem:[#allocation8_spill] sm:$0xff] }
 0x7b9   :  { %3543 = vmatpush.bf16.msrb.mxu1 %v7055_v9  ;;  %3507 = vmatmul.bf16.vlgmr.msra.gmra.mxu3 %v10991_v48 }
 0x7ba   :  { %3494 = vmatmul.bf16.vlgmr.msrb.gmra.mxu2 %v10997_v28  ;;  %3568 = vmatpush.bf16.msrb.mxu3 %v7259_v40 }
 0x7bb   :  { %3555 = vmatpush.bf16.msra.mxu2 %v7163_v25 }
 0x7bd   :  { %3544 = vmatpush.bf16.msrb.mxu1 %v7043_v11 }
 0x7be   :  { %3569 = vmatpush.bf16.msrb.mxu3 %v7247_v50 }
 0x7bf   :  { %3556 = vmatpush.bf16.msra.mxu2 %v7151_v13 }
 0x7c1   :  { %3545 = vmatpush.bf16.msrb.mxu1 %v7031_v35 }
 0x7c2   :  { %3570 = vmatpush.bf16.msrb.mxu3 %v7235_v58 }
 0x7c3   :  { %3557 = vmatpush.bf16.msra.mxu2 %v7139_v2  ;;  %7322 = vmatmul.msk.bf16.vlgmr.msrb.gmra.mxu0 %vm865_vm11, %v10999_v12  ;;  %v3595_v2 = vperm.slane %v3593_v41, 0 }
 0x7c4   :  { %3546 = vmatmul.bf16.vlgmr.msrb.gmra.mxu1 %v10997_v28 }
 0x7c5   :  { %3664 = vmatpush.bf16.msra.mxu1 %v14183_v46 }
 0x7c6   :  { %3571 = vmatpush.bf16.msrb.mxu3 %v7223_v49 }
 0x7c7   :  { %3558 = vmatpush.bf16.msra.mxu2 %v7127_v32 }
 0x7c9   :  { %3572 = vmatmul.bf16.vlgmr.msrb.gmra.mxu3 %v10993_v42  ;;  %v3023_v42 = vld [vmem:[%s13413_s20] sm:$0x7] }
 0x7ca   :  { %3692 = vmatpush.bf16.msra.mxu3 %v14184_v38  ;;  %3559 = vmatmul.bf16.vlgmr.msra.gmra.mxu2 %v10991_v48  ;;  %v3025_v14 = vperm.slane %v3023_v42, 0  ;;  %v3026_v21 = vperm.slane %v3023_v42, 1 }
 0x7cb   :  { %3678 = vmatpush.bf16.msrb.mxu2 %v14185_v39  ;;  %v3027_v39 = vperm.slane %v3023_v42, 2 }
 0x7d3   :  { %7331 = vmatmul.msk.bf16.vlgmr.msra.gmra.mxu0 %vm209_vm2, %v7869_v15 }
 0x7d4   :  { %7332 = vmatmul.msk.bf16.vlgmr.msra.gmra.mxu1 %vm209_vm2, %v7869_v15 }
 0x7d9   :  { %7334 = vmatmul.msk.bf16.vlgmr.msra.gmra.mxu3 %vm209_vm2, %v7869_v15 }
 0x7da   :  { %7333 = vmatmul.msk.bf16.vlgmr.msrb.gmra.mxu2 %vm209_vm2, %v7869_v15  ;;  %vm3607_vm2 = vcmask 353280  }
 0x820   :  { %v3456_v28 = vpop.f32.mrf.mxu0 }
 0x821   :  { %v3469_v12 = vpop.f32.mrf.mxu1 }
 0x828   :  { %v3458_v37 = vpop.f32.mrf.mxu0 }
 0x829   :  { %v3471_v48 = vpop.f32.mrf.mxu1 }
 0x82c   :  { %v3443_v61 = vpop.f32.mrf.mxu3 }
 0x82d   :  { %v3444_v9 = vadd.f32 %v3443_v61, %v3025_v14  ;;  %v3482_v40 = vpop.f32.mrf.mxu2 }
 0x82f   :  { %v3457_v1 = vadd.f32 %v3456_v28, %v3444_v9 }
 0x830   :  { %v3521_v56 = vpop.f32.mrf.mxu0 }
 0x831   :  { %v3470_v25 = vadd.f32 %v3469_v12, %v3457_v1  ;;  %v3534_v19 = vpop.f32.mrf.mxu1  ;;  %v3628_v1 = vpop.permute.xlu2 %3627 }
 0x833   :  { %v3483_v4 = vadd.f32 %v3482_v40, %v3470_v25 }
 0x834   :  { %v3445_v7 = vpop.f32.mrf.mxu3 }
 0x835   :  { %v3484_v62 = vpop.f32.mrf.mxu2  ;;  %v3590_v58 = vmax.f32 %v3483_v4, 0.0 }
 0x836   :  { %v3597_v62 = vperm.slane %v3593_v41, 2 }
 0x837   :  { %v3601_v46 = vmul.f32 %v3595_v2, %v3590_v58  ;;  %v14188_v58 = vld [vmem:[#allocation10_spill] sm:$0xff] }
 0x838   :  { %v3523_v11 = vpop.f32.mrf.mxu0 }
 0x839   :  { %v3536_v50 = vpop.f32.mrf.mxu1  ;;  %v3604_v12 = vsel %vm2680_vm13, %v3601_v46, 0.0 }
 0x83c   :  { %v3508_v22 = vpop.f32.mrf.mxu3 }
 0x83d   :  { %v3495_v13 = vpop.f32.mrf.mxu2 }
 0x83e   :  { %v3496_v60 = vadd.f32 %v3495_v13, %v3026_v21 }
 0x840   :  { %v3509_v17 = vadd.f32 %v3508_v22, %v3496_v60  ;;  %v3586_v27 = vpop.f32.mrf.mxu0  ;;  %v14186_v60 = vld [vmem:[#allocation9_spill] sm:$0xff] }
 0x841   :  { %v3547_v35 = vpop.f32.mrf.mxu1 }
 0x842   :  { %v3522_v24 = vadd.f32 %v3521_v56, %v3509_v17  ;;  %v3548_v14 = vadd.f32 %v3547_v35, %v3027_v39 }
 0x844   :  { %v3535_v57 = vadd.f32 %v3534_v19, %v3522_v24  ;;  %v3510_v55 = vpop.f32.mrf.mxu3 }
 0x845   :  { %v3497_v49 = vpop.f32.mrf.mxu2 }
 0x846   :  { %v3591_v32 = vmax.f32 %v3535_v57, 0.0 }
 0x848   :  { %v3602_v38 = vmul.f32 %v3596_v54, %v3591_v32  ;;  %v3588_v15 = vpop.f32.mrf.mxu0  ;;  %v11046_v54 = vpop.permute.xlu0 %3632 }
 0x849   :  { %v3549_v28 = vpop.f32.mrf.mxu1 }
 0x84a   :  { %v3605_v37 = vsel %vm2680_vm13, %v3602_v38, 0.0 }
 0x84b   :  { %v3606_v48 = vadd.f32 %v3605_v37, %v3604_v12 }
 0x84c   :  { %v3573_v61 = vpop.f32.mrf.mxu3 }
 0x84d   :  { %v3560_v9 = vpop.f32.mrf.mxu2 }
 0x84e   :  { %v3561_v40 = vadd.f32 %v3560_v9, %v3548_v14  ;;  %v11092_v14 = vpop.permute.xlu2 %4209 }
 0x84f   :  { %14196 = vst [vmem:[#allocation11_spill] sm:$0xff] %v11092_v14 }
 0x850   :  { %v3574_v56 = vadd.f32 %v3573_v61, %v3561_v40  ;;  %v3652_v25 = vpop.f32.mrf.mxu0 }
 0x851   :  { %v3653_v19 = vadd.f32 %v3652_v25, %v3628_v1  ;;  %v3666_v4 = vpop.f32.mrf.mxu1 }
 0x852   :  { %v3587_v7 = vadd.f32 %v3586_v27, %v3574_v56  ;;  %v3667_v11 = vadd.f32 %v3666_v4, %v3628_v1  ;;  %v11133_v4 = vpop.permute.xlu0 %4214 }
 0x853   :  { %v3699_v42 = vmax.f32 %v3653_v19, 0.0  ;;  %v11131_v19 = vpop.permute.xlu1 %4199  ;;  %14199 = vst [vmem:[#allocation69_spill] sm:$0xff] %v11133_v4 }
 0x854   :  { %v3592_v50 = vmax.f32 %v3587_v7, 0.0  ;;  %v3700_v21 = vmax.f32 %v3667_v11, 0.0  ;;  %v3575_v22 = vpop.f32.mrf.mxu3  ;;  %14198 = vst [vmem:[#allocation93_spill] sm:$0xff] %v11131_v19 }
 0x855   :  { %v3562_v13 = vpop.f32.mrf.mxu2  ;;  %3935 = vrot.lane.b32.xlu1 %v3699_v42, %s8064_s5  ;;  %v3851_v17 = vmul.f32 %v3699_v42, %v14186_v60 }
 0x856   :  { %v3603_v35 = vmul.f32 %v3597_v62, %v3592_v50  ;;  %3783 = vrot.lane.b32.xlu2 %v3700_v21, %s14187_s8  ;;  %3939 = vrot.lane.b32.xlu0 %v3700_v21, %s8064_s5  ;;  %v3852_v2 = vmul.f32 %v3700_v21, %v14188_v58  ;;  %v11104_v61 = vpop.permute.xlu2 %4204 }
 0x857   :  { %14197 = vst [vmem:[#allocation73_spill] sm:$0xff] %v11104_v61 }
 0x858   :  { %v11038_v27 = vpack.c.bf16 %v3852_v2, %v3851_v17  ;;  %v3608_v41 = vsel %vm3607_vm2, %v3603_v35, 0.0  ;;  %v3654_v57 = vpop.f32.mrf.mxu0 }
 0x859   :  { %v11041_v24 = vadd.f32 %v3608_v41, %v3606_v48  ;;  %v3655_v55 = vadd.f32 %v3654_v57, %v11046_v54  ;;  %v3668_v46 = vpop.f32.mrf.mxu1 }
 0x85a   :  { %v3669_v32 = vadd.f32 %v3668_v46, %v11046_v54 }
 0x85b   :  { %14189 = vst [vmem:[#allocation14_spill] sm:$0xff] %v11041_v24  ;;  %v11049_v49 = vmax.f32 %v3655_v55, 0.0 }
 0x85c   :  { %v11072_v38 = vmax.f32 %v3669_v32, 0.0  ;;  %v3694_v15 = vpop.f32.mrf.mxu3 }
 0x85d   :  { %3899 = vrot.lane.b32.xlu1 %v3699_v42, %s14190_s10  ;;  %v3680_v39 = vpop.f32.mrf.mxu2  ;;  %v3695_v12 = vadd.f32 %v3694_v15, %v3628_v1 }
 0x85e   :  { %3743 = vrot.lane.b32.xlu2 %v3699_v42, %s14191_s28  ;;  %3903 = vrot.lane.b32.xlu0 %v3700_v21, %s14190_s10  ;;  %v3681_v28 = vadd.f32 %v3680_v39, %v3628_v1 }
 0x85f   :  { %v11088_v48 = vmax.f32 %v3695_v12, 0.0 }
 0x860   :  { %v11086_v37 = vmax.f32 %v3681_v28, 0.0 }
 0x864   :  { %v3696_v13 = vpop.f32.mrf.mxu3 }
 0x865   :  { %3863 = vrot.lane.b32.xlu1 %v3699_v42, %s14192_s6  ;;  %v3682_v40 = vpop.f32.mrf.mxu2  ;;  %v3697_v35 = vadd.f32 %v3696_v13, %v11046_v54 }
 0x866   :  { %3937 = vrot.lane.b32.xlu2 %v11049_v49, %s8064_s5  ;;  %3867 = vrot.lane.b32.xlu0 %v3700_v21, %s14192_s6  ;;  %v3683_v1 = vadd.f32 %v3682_v40, %v11046_v54 }
 0x867   :  { %v3706_v57 = vmax.f32 %v3697_v35, 0.0 }
 0x868   :  { %v11123_v25 = vmax.f32 %v3683_v1, 0.0 }
 0x86d   :  { %3971 = vrot.lane.b32.xlu1 %v3699_v42, %s14193_s19 }
 0x86e   :  { %3901 = vrot.lane.b32.xlu2 %v11049_v49, %s14190_s10  ;;  %3975 = vrot.lane.b32.xlu0 %v3700_v21, %s14193_s19 }
 0x875   :  { %3815 = vrot.lane.b32.xlu1 %v3699_v42, %s14194_s26 }
 0x876   :  { %3865 = vrot.lane.b32.xlu2 %v11049_v49, %s14192_s6  ;;  %3819 = vrot.lane.b32.xlu0 %v3700_v21, %s14194_s26 }
 0x87d   :  { %3747 = vrot.lane.b32.xlu1 %v3700_v21, %s14191_s28 }
 0x87e   :  { %3973 = vrot.lane.b32.xlu2 %v11049_v49, %s14193_s19  ;;  %3779 = vrot.lane.b32.xlu0 %v3699_v42, %s14187_s8 }
 0x885   :  { %3707 = vrot.lane.b32.xlu1 %v3699_v42, %s14195_s27 }
 0x886   :  { %3817 = vrot.lane.b32.xlu2 %v11049_v49, %s14194_s26  ;;  %3711 = vrot.lane.b32.xlu0 %v3700_v21, %s14195_s27 }
 0x88d   :  { %3941 = vrot.lane.b32.xlu1 %v11072_v38, %s8064_s5 }
 0x88e   :  { %3749 = vrot.lane.b32.xlu2 %v11072_v38, %s14191_s28  ;;  %3785 = vrot.lane.b32.xlu0 %v11072_v38, %s14187_s8 }
 0x895   :  { %3905 = vrot.lane.b32.xlu1 %v11072_v38, %s14190_s10 }
 0x896   :  { %3709 = vrot.lane.b32.xlu2 %v11049_v49, %s14195_s27  ;;  %3745 = vrot.lane.b32.xlu0 %v11049_v49, %s14191_s28 }
 0x89d   :  { %3869 = vrot.lane.b32.xlu1 %v11072_v38, %s14192_s6 }
 0x89e   :  { %3943 = vrot.lane.b32.xlu2 %v11086_v37, %s8064_s5  ;;  %3911 = vrot.lane.b32.xlu0 %v11088_v48, %s14190_s10 }
 0x8a5   :  { %3977 = vrot.lane.b32.xlu1 %v11072_v38, %s14193_s19 }
 0x8a6   :  { %3907 = vrot.lane.b32.xlu2 %v11086_v37, %s14190_s10  ;;  %3755 = vrot.lane.b32.xlu0 %v11088_v48, %s14191_s28 }
 0x8ad   :  { %3821 = vrot.lane.b32.xlu1 %v11072_v38, %s14194_s26 }
 0x8ae   :  { %3871 = vrot.lane.b32.xlu2 %v11086_v37, %s14192_s6  ;;  %3787 = vrot.lane.b32.xlu0 %v11086_v37, %s14187_s8 }
 0x8b0   :  { %v11112_v9 = vpop.permute.xlu2 %3783 }
 0x8b5   :  { %3781 = vrot.lane.b32.xlu1 %v11049_v49, %s14187_s8 }
 0x8b6   :  { %3979 = vrot.lane.b32.xlu2 %v11086_v37, %s14193_s19  ;;  %3715 = vrot.lane.b32.xlu0 %v11086_v37, %s14195_s27 }
 0x8b8   :  { %v11121_v56 = vpop.permute.xlu2 %3743 }
 0x8bd   :  { %3713 = vrot.lane.b32.xlu1 %v11072_v38, %s14195_s27 }
 0x8be   :  { %3827 = vrot.lane.b32.xlu2 %v11088_v48, %s14194_s26  ;;  %3945 = vrot.lane.b32.xlu0 %v11123_v25, %s8064_s5 }
 0x8c0   :  { %v11135_v7 = vpop.permute.xlu2 %3937 }
 0x8c5   :  { %3947 = vrot.lane.b32.xlu1 %v11088_v48, %s8064_s5 }
 0x8c6   :  { %3875 = vrot.lane.b32.xlu2 %v11088_v48, %s14192_s6  ;;  %3909 = vrot.lane.b32.xlu0 %v11123_v25, %s14190_s10 }
 0x8c7   :  { %v11143_v62 = vpop.permute.xlu1 %3935 }
 0x8c8   :  { %v11145_v11 = vpop.permute.xlu2 %3901  ;;  %v3940_v42 = vpop.permute.xlu0 %3939 }
 0x8c9   :  { %14200 = vst [vmem:[#allocation65_spill] sm:$0xff] %v11145_v11  ;;  %v3955_v31 = vsel %vm573_vm3, %v11143_v62, %v3940_v42 }
 0x8cd   :  { %3791 = vrot.lane.b32.xlu1 %v11088_v48, %s14187_s8 }
 0x8ce   :  { %3719 = vrot.lane.b32.xlu2 %v11088_v48, %s14195_s27  ;;  %3873 = vrot.lane.b32.xlu0 %v11123_v25, %s14192_s6 }
 0x8cf   :  { %v11153_v50 = vpop.permute.xlu1 %3899 }
 0x8d0   :  { %v11155_v21 = vpop.permute.xlu2 %3865  ;;  %v11157_v22 = vpop.permute.xlu0 %3903 }
 0x8d5   :  { %3823 = vrot.lane.b32.xlu1 %v11086_v37, %s14194_s26 }
 0x8d6   :  { %3751 = vrot.lane.b32.xlu2 %v11086_v37, %s14191_s28  ;;  %3981 = vrot.lane.b32.xlu0 %v11123_v25, %s14193_s19 }
 0x8d7   :  { %v11165_v17 = vpop.permute.xlu1 %3863 }
 0x8d8   :  { %14201 = vst [vmem:[#allocation24_spill] sm:$0xff] %v11165_v17  ;;  %v11168_v2 = vpop.permute.xlu2 %3973  ;;  %v11170_v41 = vpop.permute.xlu0 %3867 }
 0x8dd   :  { %3983 = vrot.lane.b32.xlu1 %v11088_v48, %s14193_s19 }
 0x8de   :  { %3949 = vrot.lane.b32.xlu2 %v3706_v57, %s8064_s5  ;;  %3829 = vrot.lane.b32.xlu0 %v3706_v57, %s14194_s26 }
 0x8df   :  { %v11176_v55 = vpop.permute.xlu1 %3971 }
 0x8e0   :  { %14202 = vst [vmem:[#allocation106_spill] sm:$0xff] %v11176_v55  ;;  %v11178_v46 = vpop.permute.xlu2 %3817  ;;  %v11180_v32 = vpop.permute.xlu0 %3975 }
 0x8e1   :  { %14203 = vst [vmem:[#allocation78_spill] sm:$0xff] %v11178_v46  ;;  %v3857_v46 = vmul.f32 %v11123_v25, %v14157_v47 }
 0x8e5   :  { %3913 = vrot.lane.b32.xlu1 %v3706_v57, %s14190_s10 }
 0x8e6   :  { %3793 = vrot.lane.b32.xlu2 %v3706_v57, %s14187_s8  ;;  %3877 = vrot.lane.b32.xlu0 %v3706_v57, %s14192_s6 }
 0x8e7   :  { %v11185_v54 = vpop.permute.xlu1 %3815 }
 0x8e8   :  { %v11187_v39 = vpop.permute.xlu2 %3749  ;;  %v11189_v15 = vpop.permute.xlu0 %3819 }
 0x8e9   :  { %14204 = vst [vmem:[#allocation80_spill] sm:$0xff] %v11189_v15 }
 0x8ed   :  { %3757 = vrot.lane.b32.xlu1 %v3706_v57, %s14191_s28 }
 0x8ee   :  { %3825 = vrot.lane.b32.xlu2 %v11123_v25, %s14194_s26  ;;  %3721 = vrot.lane.b32.xlu0 %v3706_v57, %s14195_s27 }
 0x8ef   :  { %v11195_v28 = vpop.permute.xlu1 %3747 }
 0x8f0   :  { %v11197_v12 = vpop.permute.xlu2 %3709  ;;  %v11199_v40 = vpop.permute.xlu0 %3779 }
 0x8f1   :  { %14205 = vst [vmem:[#allocation97_spill] sm:$0xff] %v11197_v12 }
 0x8f5   :  { %3789 = vrot.lane.b32.xlu1 %v11123_v25, %s14187_s8 }
 0x8f6   :  { %3985 = vrot.lane.b32.xlu2 %v3706_v57, %s14193_s19  ;;  %3753 = vrot.lane.b32.xlu0 %v11123_v25, %s14191_s28 }
 0x8f7   :  { %v11206_v1 = vpop.permute.xlu1 %3707 }
 0x8f8   :  { %v11208_v13 = vpop.permute.xlu2 %3943  ;;  %v11210_v35 = vpop.permute.xlu0 %3711 }
 0x8f9   :  { %v3953_v30 = vsel %vm573_vm3, %v3940_v42, %v11208_v13  ;;  %v3858_v42 = vmul.f32 %v3706_v57, %v14145_v26 }
 0x8fa   :  { %v3960_v43 = vmul.f32 %v3953_v30, %v14213_v16 }
 0x8fd   :  { %3717 = vrot.lane.b32.xlu1 %v11123_v25, %s14195_s27 }
 0x8ff   :  { %v3942_v53 = vpop.permute.xlu1 %3941 }
 0x900   :  { %v11214_v44 = vpop.permute.xlu2 %3907  ;;  %v11216_v5 = vpop.permute.xlu0 %3785 }
 0x901   :  { %14206 = vst [vmem:[#allocation118_spill] sm:$0xff] %v11216_v5  ;;  %v3917_v57 = vsel %vm532_vm4, %v11157_v22, %v11214_v44 }
 0x907   :  { %v11218_v23 = vpop.permute.xlu1 %3905 }
 0x908   :  { %v11220_v59 = vpop.permute.xlu2 %3871  ;;  %v11222_v29 = vpop.permute.xlu0 %3745 }
 0x90f   :  { %v11224_v51 = vpop.permute.xlu1 %3869 }
 0x910   :  { %v11226_v34 = vpop.permute.xlu2 %3979  ;;  %v11228_v3 = vpop.permute.xlu0 %3911 }
 0x917   :  { %v11230_v24 = vpop.permute.xlu1 %3977 }
 0x918   :  { %v11232_v8 = vpop.permute.xlu2 %3827  ;;  %v11234_v4 = vpop.permute.xlu0 %3755 }
 0x91f   :  { %v11236_v14 = vpop.permute.xlu1 %3821 }
 0x920   :  { %14207 = vst [vmem:[#allocation67_spill] sm:$0xff] %v11236_v14  ;;  %v11238_v61 = vpop.permute.xlu2 %3875  ;;  %v11240_v19 = vpop.permute.xlu0 %3787 }
 0x921   :  { %14208 = vst [vmem:[#allocation26_spill] sm:$0xff] %v11238_v61  ;;  %v3855_v61 = vmul.f32 %v11049_v49, %v14186_v60 }
 0x922   :  { %14209 = vst [vmem:[#allocation100_spill] sm:$0xff] %v11240_v19  ;;  %v3856_v19 = vmul.f32 %v11072_v38, %v14188_v58  ;;  %v3853_v38 = vmul.f32 %v11086_v37, %v14157_v47  ;;  %v3854_v58 = vmul.f32 %v11088_v48, %v14145_v26  ;;  %v4091_v48 = vunpack.c.l.b16 %v11038_v27  ;;  %v14219_v26 = vld [vmem:[#allocation37_spill] sm:$0xff] }
 0x927   :  { %v11242_v45 = vpop.permute.xlu1 %3781 }
 0x928   :  { %14210 = vst [vmem:[#allocation116_spill] sm:$0xff] %v11242_v45  ;;  %v11244_v36 = vpop.permute.xlu2 %3719  ;;  %v11246_v12 = vpop.permute.xlu0 %3715  ;;  %v14214_v45 = vld [vmem:[#allocation30_spill] sm:$0xff] }
 0x929   :  { %14211 = vst [vmem:[#allocation81_spill] sm:$0xff] %v11244_v36  ;;  %v3959_v36 = vmul.f32 %v3955_v31, %v14214_v45 }
 0x92a   :  { %14212 = vst [vmem:[#allocation64_spill] sm:$0xff] %v11246_v12  ;;  %v3956_v12 = vsel %vm573_vm3, %v11135_v7, %v3942_v53 }
 0x92b   :  { %v3967_v49 = vpack.c.bf16 %v3960_v43, %v3959_v36  ;;  %v3963_v60 = vmul.f32 %v3956_v12, %v14214_v45  ;;  %v3861_v43 = vpack.c.bf16 %v3856_v19, %v3855_v61  ;;  %v11285_v36 = vpack.c.bf16 %v3858_v42, %v3857_v46 }
 0x92c   :  { %v11292_v12 = vpack.c.bf16 %v3854_v58, %v3853_v38  ;;  %v3924_v45 = vmul.f32 %v3917_v57, %v14219_v26  ;;  %v3881_v58 = vsel %vm491_vm5, %v11170_v41, %v11220_v59  ;;  %v3883_v57 = vsel %vm491_vm5, %v11165_v17, %v11170_v41 }
 0x92d   :  { %14217 = vst [vmem:[#allocation86_spill] sm:$0xff] %v11285_v36  ;;  %v4151_v47 = vunpack.c.l.b16 %v3967_v49  ;;  %v4095_v46 = vunpack.c.l.b16 %v3861_v43  ;;  %v4096_v42 = vunpack.c.h.b16 %v3861_v43  ;;  %v4097_v33 = vunpack.c.l.b16 %v11285_v36  ;;  %v14221_v36 = vld [vmem:[#allocation38_spill] sm:$0xff] }
 0x92e   :  { %14218 = vst [vmem:[#allocation87_spill] sm:$0xff] %v11292_v12  ;;  %v3991_v43 = vsel %vm614_vm7, %v11176_v55, %v11180_v32 }
 0x92f   :  { %v11263_v5 = vpop.permute.xlu1 %3713  ;;  %v11333_v17 = vpack.c.b16 %v4095_v46, %v4091_v48  ;;  %v3884_v48 = vsel %vm491_vm5, %v11155_v21, %v11224_v51 }
 0x930   :  { %14215 = vst [vmem:[#allocation112_spill] sm:$0xff] %v11263_v5  ;;  %v11268_v30 = vpop.permute.xlu2 %3751  ;;  %v11270_v14 = vpop.permute.xlu0 %3945  ;;  %v14220_v5 = vld [vmem:[#allocation33_spill] sm:$0xff] }
 0x931   :  { %14216 = vst [vmem:[#allocation85_spill] sm:$0xff] %v11268_v30  ;;  %v3954_v31 = vsel %vm573_vm3, %v3942_v53, %v11270_v14  ;;  %v3919_v53 = vsel %vm532_vm4, %v11153_v50, %v11157_v22 }
 0x932   :  { %v3964_v25 = vmul.f32 %v3954_v31, %v14213_v16  ;;  %v4152_v31 = vunpack.c.h.b16 %v3967_v49  ;;  %v3923_v61 = vmul.f32 %v3919_v53, %v14220_v5  ;;  %v3835_v53 = vsel %vm434_vm8, %v11185_v54, %v11189_v15 }
 0x933   :  { %v3888_v15 = vmul.f32 %v3881_v58, %v14221_v36 }
 0x934   :  { %v3969_v37 = vpack.c.bf16 %v3964_v25, %v3963_v60  ;;  %v3920_v60 = vsel %vm532_vm4, %v11145_v11, %v11218_v23  ;;  %v14222_v11 = vld [vmem:[#allocation34_spill] sm:$0xff] }
 0x935   :  { %v3887_v55 = vmul.f32 %v3883_v57, %v14222_v11 }
 0x936   :  { %v4155_v16 = vunpack.c.l.b16 %v3969_v37  ;;  %v4156_v30 = vunpack.c.h.b16 %v3969_v37  ;;  %v4092_v37 = vunpack.c.h.b16 %v11038_v27 }
 0x937   :  { %v3948_v19 = vpop.permute.xlu1 %3947 }
 0x938   :  { %v3950_v22 = vpop.permute.xlu2 %3949  ;;  %v11305_v49 = vpop.permute.xlu0 %3909  ;;  %v4159_v38 = vpack.c.b16 %v4155_v16, %v4151_v47  ;;  %v4160_v25 = vpack.c.b16 %v4156_v30, %v4152_v31  ;;  %v3763_v16 = vsel %vm352_vm6, %v11121_v56, %v11195_v28  ;;  %v3931_v47 = vpack.c.bf16 %v3924_v45, %v3923_v61 }
 0x939   :  { %v3918_v41 = vsel %vm532_vm4, %v11218_v23, %v11305_v49  ;;  %v4093_v30 = vunpack.c.l.b16 %v11292_v12  ;;  %v3927_v31 = vmul.f32 %v3920_v60, %v14220_v5  ;;  %v11335_v45 = vpack.c.b16 %v4096_v42, %v4092_v37  ;;  %v11342_v23 = vld [vmem:[%s13807_s30 + $0x20] ss:$0 sm:$0xff]  ;;  %v14223_v60 = vld [vmem:[#allocation39_spill] sm:$0xff] }
 0x93a   :  { %4241 = vmatpush.bf16.msrb.mxu0 %v4159_v38  ;;  %4279 = vmatpush.bf16.msra.mxu2 %v4160_v25  ;;  %v3928_v27 = vmul.f32 %v3918_v41, %v14219_v26  ;;  %v3995_v38 = vmul.f32 %v11342_v23, %v3991_v43  ;;  %v11346_v25 = vmul.f32 %v3835_v53, %v14223_v60  ;;  %v4131_v46 = vunpack.c.l.b16 %v3931_v47  ;;  %v14228_v5 = vld [vmem:[#allocation78_spill] sm:$0xff] }
 0x93b   :  { %v11337_v61 = vpack.c.b16 %v4097_v33, %v4093_v30  ;;  %v11349_v58 = vmul.f32 %v3763_v16, %v14097_v63  ;;  %v3799_v33 = vsel %vm393_vm9, %v11199_v40, %v11112_v9  ;;  %v4132_v42 = vunpack.c.h.b16 %v3931_v47 }
 0x93c   :  { %v3933_v57 = vpack.c.bf16 %v3928_v27, %v3927_v31  ;;  %v3895_v43 = vpack.c.bf16 %v3888_v15, %v3887_v55  ;;  %v3989_v53 = vsel %vm614_vm7, %v11180_v32, %v11226_v34  ;;  %v3951_v30 = vsel %vm573_vm3, %v11208_v13, %v3948_v19 }
 0x93d   :  { %v3957_v31 = vsel %vm573_vm3, %v3948_v19, %v11143_v62  ;;  %v3952_v55 = vsel %vm573_vm3, %v11270_v14, %v3950_v22  ;;  %v3958_v32 = vsel %vm573_vm3, %v3950_v22, %v11135_v7  ;;  %v3891_v27 = vmul.f32 %v3884_v48, %v14222_v11  ;;  %v7992_v62 = vld [vmem:[%s13807_s30 + $0x28] ss:$0 sm:$0xff] }
 0x93e   :  { %v4135_v16 = vunpack.c.l.b16 %v3933_v57  ;;  %v4136_v41 = vunpack.c.h.b16 %v3933_v57  ;;  %v3915_v13 = vsel %vm532_vm4, %v11214_v44, %v11228_v3  ;;  %v3921_v14 = vsel %vm532_vm4, %v11228_v3, %v11153_v50 }
 0x93f   :  { %v11363_v37 = vpop.permute.xlu1 %3791  ;;  %v3996_v19 = vmul.f32 %v7992_v62, %v3989_v53  ;;  %v3961_v44 = vmul.f32 %v3951_v30, %v14047_v52  ;;  %v3962_v11 = vmul.f32 %v3957_v31, %v14048_v10  ;;  %v3965_v3 = vmul.f32 %v3952_v55, %v14047_v52 }
 0x940   :  { %v11377_v15 = vpop.permute.xlu2 %3793  ;;  %v11379_v47 = vpop.permute.xlu0 %3873  ;;  %v4139_v57 = vpack.c.b16 %v4135_v16, %v4131_v46  ;;  %v4140_v48 = vpack.c.b16 %v4136_v41, %v4132_v42  ;;  %v3966_v50 = vmul.f32 %v3958_v32, %v14048_v10  ;;  %v3764_v53 = vsel %vm352_vm6, %v11222_v29, %v11187_v39 }
 0x941   :  { %v3882_v7 = vsel %vm491_vm5, %v11224_v51, %v11379_v47  ;;  %v3727_v51 = vsel %vm311_vm10, %v11206_v1, %v11210_v35  ;;  %v4111_v42 = vunpack.c.l.b16 %v3895_v43  ;;  %v3925_v16 = vmul.f32 %v3915_v13, %v14063_v0 }
 0x942   :  { %v3892_v22 = vmul.f32 %v3882_v7, %v14221_v36  ;;  %4242 = vmatpush.bf16.msrb.mxu0 %v4139_v57  ;;  %4280 = vmatpush.bf16.msra.mxu2 %v4140_v48  ;;  %v3926_v41 = vmul.f32 %v3921_v14, %v14115_v6  ;;  %v3837_v30 = vsel %vm434_vm8, %v11232_v8, %v11185_v54  ;;  %v4112_v31 = vunpack.c.h.b16 %v3895_v43 }
 0x943   :  { %v4003_v55 = vpack.c.bf16 %v3996_v19, %v3995_v38  ;;  %v3765_v32 = vsel %vm352_vm6, %v11234_v4, %v11121_v56  ;;  %v3992_v13 = vsel %vm614_vm7, %v11168_v2, %v11230_v24  ;;  %v11425_v14 = vpack.c.bf16 %v3962_v11, %v3961_v44  ;;  %v14224_v38 = vld [vmem:[#allocation48_spill] sm:$0xff]  ;;  %v14225_v19 = vld [vmem:[#allocation46_spill] sm:$0xff]  ;;  %v14226_v11 = vld [vmem:[#allocation57_spill] sm:$0xff] }
 0x944   :  { %v3897_v46 = vpack.c.bf16 %v3892_v22, %v3891_v27  ;;  %v3804_v22 = vmul.f32 %v3799_v33, %v14086_v18  ;;  %v11427_v57 = vpack.c.bf16 %v3966_v50, %v3965_v3  ;;  %v11432_v43 = vmul.f32 %v3727_v51, %v14224_v38 }
 0x945   :  { %v3839_v56 = vmul.f32 %v3837_v30, %v14225_v19  ;;  %v11438_v52 = vmul.f32 %v3764_v53, %v14097_v63  ;;  %v11440_v36 = vpack.c.bf16 %v3926_v41, %v3925_v16  ;;  %v3767_v44 = vmul.f32 %v3765_v32, %v14226_v11  ;;  %v14227_v30 = vld [vmem:[#allocation67_spill] sm:$0xff]  ;;  %v14229_v53 = vld [vmem:[#allocation118_spill] sm:$0xff]  ;;  %v14230_v16 = vld [vmem:[#allocation116_spill] sm:$0xff] }
 0x946   :  { %v4115_v27 = vunpack.c.l.b16 %v3897_v46  ;;  %v4116_v7 = vunpack.c.h.b16 %v3897_v46  ;;  %v4171_v50 = vunpack.c.l.b16 %v4003_v55  ;;  %v3999_v51 = vmul.f32 %v11342_v23, %v3992_v13  ;;  %v7870_v13 = vld [vmem:[%s13402_s9 + $0x24] sm:$0xf] }
 0x947   :  { %v11429_v54 = vpop.permute.xlu1 %3823  ;;  %v3800_v41 = vsel %vm393_vm9, %v14230_v16, %v14229_v53  ;;  %v4153_v32 = vunpack.c.l.b16 %v11425_v14  ;;  %v3801_v23 = vsel %vm393_vm9, %v11363_v37, %v11199_v40  ;;  %v11475_v40 = vpack.c.bf16 %v11349_v58, %v3767_v44  ;;  %v14234_v58 = vld [vmem:[#allocation81_spill] sm:$0xff] }
 0x948   :  { %v11435_v48 = vpop.permute.xlu2 %3825  ;;  %v3982_v46 = vpop.permute.xlu0 %3981  ;;  %v4119_v33 = vpack.c.b16 %v4115_v27, %v4111_v42  ;;  %v4120_v10 = vpack.c.b16 %v4116_v7, %v4112_v31  ;;  %v3836_v42 = vsel %vm434_vm8, %v14228_v5, %v14227_v30  ;;  %v4172_v27 = vunpack.c.h.b16 %v4003_v55  ;;  %v14231_v55 = vld [vmem:[#allocation26_spill] sm:$0xff] }
 0x949   :  { %v3990_v3 = vsel %vm614_vm7, %v11230_v24, %v3982_v46  ;;  %v4157_v24 = vunpack.c.l.b16 %v11427_v57  ;;  %v11462_v7 = vpack.c.bf16 %v11346_v25, %v3839_v56  ;;  %v3844_v25 = vmul.f32 %v3836_v42, %v14223_v60 }
 0x94a   :  { %v4000_v31 = vmul.f32 %v7992_v62, %v3990_v3  ;;  %4243 = vmatpush.bf16.msrb.mxu0 %v4119_v33  ;;  %4281 = vmatpush.bf16.msra.mxu2 %v4120_v10  ;;  %v3802_v10 = vsel %vm393_vm9, %v11377_v15, %v14230_v16  ;;  %v7347_v33 = vld [vmem:[%s13402_s9 + $0x28] sm:$0xf0]  ;;  %v3879_v56 = vsel %vm491_vm5, %v11220_v59, %v14231_v55  ;;  %v14232_v3 = vld [vmem:[#allocation24_spill] sm:$0xff] }
 0x94b   :  { %v14233_v16 = vld [vmem:[#allocation43_spill] sm:$0xff]  ;;  %v3729_v59 = vsel %vm311_vm10, %v14234_v58, %v11206_v1  ;;  %v4161_v60 = vpack.c.b16 %v4157_v24, %v4153_v32  ;;  %v7993_v1 = vld [vmem:[%s13807_s30 + $0x30] ss:$0 sm:$0xff]  ;;  %v7994_v24 = vld [vmem:[%s13807_s30 + $0x38] ss:$0 sm:$0xff] }
 0x94c   :  { %v4005_v62 = vpack.c.bf16 %v4000_v31, %v3999_v51  ;;  %v3885_v51 = vsel %vm491_vm5, %v14231_v55, %v14232_v3  ;;  %v3808_v31 = vmul.f32 %v3800_v41, %v14086_v18  ;;  %v3803_v63 = vmul.f32 %v3801_v23, %v14233_v16  ;;  %v14236_v23 = vld [vmem:[#allocation106_spill] sm:$0xff] }
 0x94d   :  { %v3807_v44 = vmul.f32 %v3802_v10, %v14233_v16  ;;  %v11495_v55 = vor.u32 %v7870_v13, %v7347_v33 }
 0x94e   :  { %v4175_v26 = vunpack.c.l.b16 %v4005_v62  ;;  %v4176_v12 = vunpack.c.h.b16 %v4005_v62  ;;  %4244 = vmatpush.bf16.msrb.mxu0 %v11333_v17  ;;  %4282 = vmatpush.bf16.msra.mxu2 %v11335_v45  ;;  %v3811_v33 = vpack.c.bf16 %v3804_v22, %v3803_v63  ;;  %v4071_v22 = vunpack.c.l.b16 %v11462_v7 }
 0x94f   :  { %v3984_v42 = vpop.permute.xlu1 %3983  ;;  %14235 = vst [vmem:[#allocation99_spill] sm:$0xff] %v11495_v55 }
 0x950   :  { %v3987_v41 = vsel %vm614_vm7, %v11226_v34, %v3984_v42  ;;  %v3993_v17 = vsel %vm614_vm7, %v3984_v42, %v14236_v23  ;;  %v3986_v45 = vpop.permute.xlu2 %3985  ;;  %v11503_v62 = vpop.permute.xlu0 %3829  ;;  %v4179_v3 = vpack.c.b16 %v4175_v26, %v4171_v50  ;;  %v4180_v18 = vpack.c.b16 %v4176_v12, %v4172_v27  ;;  %v14237_v23 = vld [vmem:[#allocation100_spill] sm:$0xff] }
 0x951   :  { %v3997_v32 = vmul.f32 %v7993_v1, %v3987_v41  ;;  %v3998_v10 = vmul.f32 %v7994_v24, %v3993_v17  ;;  %v3988_v34 = vsel %vm614_vm7, %v3982_v46, %v3986_v45  ;;  %v3994_v13 = vsel %vm614_vm7, %v3986_v45, %v11168_v2  ;;  %v14239_v17 = vld [vmem:[#allocation53_spill] sm:$0xff] }
 0x952   :  { %v4001_v26 = vmul.f32 %v7993_v1, %v3988_v34  ;;  %v4002_v12 = vmul.f32 %v7994_v24, %v3994_v13  ;;  %v3838_v50 = vsel %vm434_vm8, %v11503_v62, %v14228_v5  ;;  %4267 = vmatpush.bf16.msrb.mxu1 %v4179_v3  ;;  %v3813_v27 = vpack.c.bf16 %v3808_v31, %v3807_v44  ;;  %v14238_v31 = vld [vmem:[#allocation51_spill] sm:$0xff]  ;;  %v14240_v3 = vld [vmem:[#allocation56_spill] sm:$0xff] }
 0x953   :  { %v11520_v42 = vpack.c.bf16 %v3998_v10, %v3997_v32  ;;  %v3843_v41 = vmul.f32 %v3838_v50, %v14225_v19  ;;  %4305 = vmatpush.bf16.msrb.mxu3 %v4180_v18  ;;  %v4133_v46 = vunpack.c.l.b16 %v11440_v36  ;;  %v3797_v63 = vsel %vm393_vm9, %v11112_v9, %v14237_v23  ;;  %v14241_v32 = vld [vmem:[#allocation112_spill] sm:$0xff]  ;;  %v14242_v9 = vld [vmem:[#allocation97_spill] sm:$0xff] }
 0x954   :  { %v11528_v2 = vpack.c.bf16 %v4002_v12, %v4001_v26  ;;  %v4072_v5 = vunpack.c.h.b16 %v11462_v7  ;;  %v3889_v44 = vmul.f32 %v3879_v56, %v14238_v31  ;;  %v3890_v45 = vmul.f32 %v3885_v51, %v14239_v17  ;;  %v14243_v26 = vld [vmem:[#allocation65_spill] sm:$0xff] }
 0x955   :  { %v4173_v18 = vunpack.c.l.b16 %v11520_v42  ;;  %7359 = vmatmul.msk.bf16.vlgmr.msrb.gmra.mxu1 %vm865_vm11, %v11495_v55  ;;  %v3731_v1 = vmul.f32 %v3729_v59, %v14240_v3  ;;  %v3728_v24 = vsel %vm311_vm10, %v14242_v9, %v14241_v32  ;;  %v4051_v7 = vunpack.c.l.b16 %v3811_v33 }
 0x956   :  { %4317 = vmatpush.bf16.msra.mxu1 %v4161_v60  ;;  %v3849_v60 = vpack.c.bf16 %v3844_v25, %v3843_v41  ;;  %v4177_v10 = vunpack.c.l.b16 %v11528_v2  ;;  %7361 = vmatmul.msk.bf16.vlgmr.msrb.gmra.mxu3 %vm865_vm11, %v11495_v55  ;;  %v4055_v25 = vunpack.c.l.b16 %v3813_v27  ;;  %v4052_v13 = vunpack.c.h.b16 %v3811_v33 }
 0x957   :  { %v3914_v56 = vpop.permute.xlu1 %3913  ;;  %v4056_v16 = vunpack.c.h.b16 %v3813_v27  ;;  %v11561_v27 = vpack.c.bf16 %v3890_v45, %v3889_v44  ;;  %v14246_v45 = vld [vmem:[#allocation80_spill] sm:$0xff] }
 0x958   :  { %v4075_v51 = vunpack.c.l.b16 %v3849_v60  ;;  %v4076_v34 = vunpack.c.h.b16 %v3849_v60  ;;  %v3916_v59 = vsel %vm532_vm4, %v11305_v49, %v3914_v56  ;;  %v3922_v12 = vsel %vm532_vm4, %v3914_v56, %v14243_v26  ;;  %v3878_v50 = vpop.permute.xlu0 %3877 }
 0x959   :  { %v4181_v41 = vpack.c.b16 %v4177_v10, %v4173_v18  ;;  %v3929_v19 = vmul.f32 %v3916_v59, %v14063_v0  ;;  %v3930_v55 = vmul.f32 %v3922_v12, %v14115_v6  ;;  %v3880_v60 = vsel %vm491_vm5, %v11379_v47, %v3878_v50  ;;  %v14244_v18 = vld [vmem:[#allocation58_spill] sm:$0xff]  ;;  %v14245_v47 = vld [vmem:[#allocation64_spill] sm:$0xff] }
 0x95a   :  { %v3886_v33 = vsel %vm491_vm5, %v3878_v50, %v11155_v21  ;;  %v3893_v49 = vmul.f32 %v3880_v60, %v14238_v31  ;;  %v4079_v56 = vpack.c.b16 %v4075_v51, %v4071_v22  ;;  %v4080_v26 = vpack.c.b16 %v4076_v34, %v4072_v5  ;;  %v14250_v50 = vld [vmem:[#allocation49_spill] sm:$0xff] }
 0x95b   :  { %v3894_v32 = vmul.f32 %v3886_v33, %v14239_v17  ;;  %4343 = vmatpush.bf16.msra.mxu3 %v4181_v41  ;;  %v3805_v10 = vmul.f32 %v3797_v63, %v14244_v18  ;;  %v11564_v59 = vpack.c.bf16 %v3930_v55, %v3929_v19  ;;  %v4031_v12 = vunpack.c.l.b16 %v11475_v40  ;;  %v14290_v17 = vld [vmem:[#allocation30_spill] sm:$0xff] }
 0x95c   :  { %v11571_v21 = vsel %vm311_vm10, %v14245_v47, %v14234_v58  ;;  %v3725_v22 = vsel %vm311_vm10, %v11210_v35, %v14245_v47  ;;  %4245 = vmatpush.bf16.msrb.mxu0 %v4079_v56  ;;  %4283 = vmatpush.bf16.msra.mxu2 %v4080_v26  ;;  %v4032_v19 = vunpack.c.h.b16 %v11475_v40  ;;  %v11581_v55 = vpack.c.bf16 %v11432_v43, %v3731_v1  ;;  %v14251_v26 = vld [vmem:[#allocation23_spill] sm:$0xff] }
 0x95d   :  { %v11577_v5 = vpack.c.bf16 %v3894_v32, %v3893_v49  ;;  %v3736_v63 = vmul.f32 %v3728_v24, %v14224_v38  ;;  %v3832_v58 = vsel %vm434_vm8, %v11435_v48, %v11503_v62  ;;  %v4137_v44 = vunpack.c.l.b16 %v11564_v59 }
 0x95e   :  { %v3795_v35 = vsel %vm393_vm9, %v14237_v23, %v11363_v37  ;;  %v3833_v43 = vsel %vm434_vm8, %v14246_v45, %v11429_v54  ;;  %v4059_v40 = vpack.c.b16 %v4055_v25, %v4051_v7  ;;  %v4060_v1 = vpack.c.b16 %v4056_v16, %v4052_v13  ;;  %v7872_v23 = vld [vmem:[%s13402_s9 + $0x34] sm:$0xf]  ;;  %v7355_v16 = vld [vmem:[%s13402_s9 + $0x38] sm:$0xf0]  ;;  %v14249_v25 = vld [vmem:[#allocation59_spill] sm:$0xff] }
 0x95f   :  { %v3831_v32 = vsel %vm434_vm8, %v11429_v54, %v11232_v8  ;;  %v3834_v62 = vsel %vm434_vm8, %v14227_v30, %v11435_v48  ;;  %v3758_v24 = vpop.permute.xlu1 %3757  ;;  %v4141_v51 = vpack.c.b16 %v4137_v44, %v4133_v46  ;;  %v4117_v37 = vunpack.c.l.b16 %v11577_v5  ;;  %v14247_v7 = vld [vmem:[#allocation85_spill] sm:$0xff]  ;;  %v14248_v54 = vld [vmem:[#allocation50_spill] sm:$0xff] }
 0x960   :  { %v3761_v8 = vsel %vm352_vm6, %v11195_v28, %v14247_v7  ;;  %v3846_v34 = vmul.f32 %v3832_v58, %v14248_v54  ;;  %4246 = vmatpush.bf16.msrb.mxu0 %v4059_v40  ;;  %4284 = vmatpush.bf16.msra.mxu2 %v4060_v1  ;;  %v3766_v48 = vsel %vm352_vm6, %v3758_v24, %v11222_v29  ;;  %v11620_v30 = vpop.permute.xlu0 %3721  ;;  %v4113_v46 = vunpack.c.l.b16 %v11561_v27  ;;  %v14252_v1 = vld [vmem:[#allocation13_spill] sm:$0xff] }
 0x961   :  { %v3806_v13 = vmul.f32 %v3795_v35, %v14249_v25  ;;  %v3841_v41 = vmul.f32 %v3833_v43, %v14250_v50  ;;  %v3771_v60 = vmul.f32 %v3766_v48, %v14226_v11  ;;  %v3730_v28 = vsel %vm311_vm10, %v11620_v30, %v14242_v9  ;;  %4318 = vmatpush.bf16.msra.mxu1 %v4141_v51 }
 0x962   :  { %v3842_v33 = vmul.f32 %v3831_v32, %v14248_v54  ;;  %v3845_v29 = vmul.f32 %v3834_v62, %v14250_v50  ;;  %v3735_v49 = vmul.f32 %v3730_v28, %v14240_v3  ;;  %v11633_v56 = vor.u32 %v7872_v23, %v7355_v16 }
 0x963   :  { %v11636_v47 = vmul.f32 %v3725_v22, %v14251_v26  ;;  %v3777_v58 = vpack.c.bf16 %v11438_v52, %v3771_v60  ;;  %v4121_v44 = vpack.c.b16 %v4117_v37, %v4113_v46  ;;  %v4011_v35 = vunpack.c.l.b16 %v11581_v55  ;;  %v14253_v46 = vld [vmem:[#allocation17_spill] sm:$0xff] }
 0x964   :  { %v3759_v9 = vsel %vm352_vm6, %v14247_v7, %v11234_v4  ;;  %v11644_v45 = vpack.c.bf16 %v3846_v34, %v3845_v29  ;;  %v3741_v43 = vpack.c.bf16 %v3736_v63, %v3735_v49  ;;  %v4012_v40 = vunpack.c.h.b16 %v11581_v55 }
 0x965   :  { %v3769_v32 = vmul.f32 %v3761_v8, %v14252_v1  ;;  %v4154_v22 = vunpack.c.h.b16 %v11425_v14  ;;  %4319 = vmatpush.bf16.msra.mxu1 %v4121_v44  ;;  %v4035_v62 = vunpack.c.l.b16 %v3777_v58  ;;  %v4036_v52 = vunpack.c.h.b16 %v3777_v58 }
 0x966   :  { %v4158_v51 = vunpack.c.h.b16 %v11427_v57  ;;  %v11650_v37 = vpack.c.bf16 %v3806_v13, %v3805_v10  ;;  %v11652_v23 = vpack.c.bf16 %v3842_v33, %v3841_v41  ;;  %v4174_v4 = vunpack.c.h.b16 %v11520_v42  ;;  %7362 = vmatmul.msk.bf16.gmra.mxu3 %vm865_vm11, %v11633_v56  ;;  %7360 = vmatmul.msk.bf16.gmra.mxu1 %vm865_vm11, %v11633_v56 }
 0x967   :  { %v4178_v55 = vunpack.c.h.b16 %v11528_v2  ;;  %v3790_v14 = vpop.permute.xlu1 %3789  ;;  %v4039_v63 = vpack.c.b16 %v4035_v62, %v4031_v12  ;;  %v4040_v16 = vpack.c.b16 %v4036_v52, %v4032_v19  ;;  %v4015_v7 = vunpack.c.l.b16 %v3741_v43 }
 0x968   :  { %v3796_v57 = vsel %vm393_vm9, %v3790_v14, %v11377_v15  ;;  %v3798_v42 = vsel %vm393_vm9, %v14229_v53, %v3790_v14  ;;  %v3754_v10 = vpop.permute.xlu0 %3753  ;;  %v4016_v8 = vunpack.c.h.b16 %v3741_v43  ;;  %v4077_v34 = vunpack.c.l.b16 %v11644_v45  ;;  %v7345_v15 = vld [vmem:[%s13402_s9 + $0x20] sm:$0xf]  ;;  %v7871_v53 = vld [vmem:[%s13402_s9 + $0x24] sm:$0xf0] }
 0x969   :  { %v3809_v48 = vmul.f32 %v3798_v42, %v14244_v18  ;;  %v3810_v2 = vmul.f32 %v3796_v57, %v14249_v25  ;;  %v3760_v12 = vsel %vm352_vm6, %v3754_v10, %v3758_v24  ;;  %v3762_v19 = vsel %vm352_vm6, %v11187_v39, %v3754_v10  ;;  %4247 = vmatpush.bf16.msrb.mxu0 %v4039_v63  ;;  %v14254_v24 = vld [vmem:[#allocation18_spill] sm:$0xff] }
 0x96a   :  { %v3770_v13 = vmul.f32 %v3759_v9, %v14253_v46  ;;  %v3773_v41 = vmul.f32 %v3762_v19, %v14252_v1  ;;  %v3774_v60 = vmul.f32 %v3760_v12, %v14253_v46  ;;  %4285 = vmatpush.bf16.msra.mxu2 %v4040_v16  ;;  %4320 = vmatpush.bf16.msra.mxu1 %v11337_v61  ;;  %v4073_v39 = vunpack.c.l.b16 %v11652_v23  ;;  %v14257_v12 = vld [vmem:[#allocation99_spill] sm:$0xff] }
 0x96b   :  { %v3734_v28 = vmul.f32 %v11571_v21, %v14254_v24  ;;  %v3814_v33 = vpack.c.bf16 %v3810_v2, %v3809_v48  ;;  %v4019_v29 = vpack.c.b16 %v4015_v7, %v4011_v35  ;;  %v4162_v49 = vpack.c.b16 %v4158_v51, %v4154_v22  ;;  %v14256_v48 = vld [vmem:[#allocation86_spill] sm:$0xff] }
 0x96c   :  { %v3778_v58 = vpack.c.bf16 %v3774_v60, %v3773_v41  ;;  %v4020_v44 = vpack.c.b16 %v4016_v8, %v4012_v40  ;;  %v4081_v43 = vpack.c.b16 %v4077_v34, %v4073_v39  ;;  %v11687_v62 = vor.u32 %v7871_v53, %v7345_v15  ;;  %v14258_v15 = vld [vmem:[#allocation87_spill] sm:$0xff]  ;;  %v7873_v41 = vld [vmem:[%s13402_s9 + $0x34] sm:$0xf0] }
 0x96d   :  { %4248 = vmatpush.bf16.msrb.mxu0 %v4019_v29  ;;  %v4182_v9 = vpack.c.b16 %v4178_v55, %v4174_v4  ;;  %v4053_v52 = vunpack.c.l.b16 %v11650_v37  ;;  %v4057_v14 = vunpack.c.l.b16 %v3814_v33  ;;  %v4138_v61 = vunpack.c.h.b16 %v11564_v59  ;;  %v14255_v4 = vld [vmem:[#allocation112_spill] sm:$0xff] }
 0x96e   :  { %v3776_v63 = vpack.c.bf16 %v3770_v13, %v3769_v32  ;;  %4286 = vmatpush.bf16.msra.mxu2 %v4020_v44  ;;  %4321 = vmatpush.bf16.msra.mxu1 %v4081_v43  ;;  %v4134_v22 = vunpack.c.h.b16 %v11440_v36  ;;  %v3740_v40 = vpack.c.bf16 %v3734_v28, %v11636_v47  ;;  %v4037_v59 = vunpack.c.l.b16 %v3778_v58 }
 0x96f   :  { %v3718_v21 = vpop.permute.xlu1 %3717  ;;  %v4061_v35 = vpack.c.b16 %v4057_v14, %v4053_v52  ;;  %v4118_v47 = vunpack.c.h.b16 %v11577_v5  ;;  %v4098_v2 = vunpack.c.h.b16 %v14256_v48  ;;  %v4094_v5 = vunpack.c.h.b16 %v14258_v15 }
 0x970   :  { %v3724_v51 = vsel %vm311_vm10, %v3718_v21, %v11620_v30  ;;  %v3726_v55 = vsel %vm311_vm10, %v14255_v4, %v3718_v21  ;;  %4249 = vmatmul.bf16.vlgmr.msrb.gmra.mxu0 %v11687_v62  ;;  %v4142_v36 = vpack.c.b16 %v4138_v61, %v4134_v22  ;;  %v4033_v7 = vunpack.c.l.b16 %v3776_v63 }
 0x971   :  { %4355 = vmatpush.bf16.msra.mxu0 %v4162_v49  ;;  %v3737_v32 = vmul.f32 %v3726_v55, %v14251_v26  ;;  %v3738_v16 = vmul.f32 %v3724_v51, %v14254_v24  ;;  %4287 = vmatmul.bf16.vlgmr.msra.gmra.mxu2 %v11687_v62  ;;  %v4114_v30 = vunpack.c.h.b16 %v11561_v27  ;;  %v4013_v8 = vunpack.c.l.b16 %v3740_v40  ;;  %v7353_v27 = vld [vmem:[%s13402_s9 + $0x30] sm:$0xf]  ;;  %s14482_s9 = smov 120  }
 0x972   :  { %4381 = vmatpush.bf16.msrb.mxu2 %v4182_v9  ;;  %4322 = vmatpush.bf16.msra.mxu1 %v4061_v35  ;;  %v4041_v42 = vpack.c.b16 %v4037_v59, %v4033_v7  ;;  %v4102_v53 = vpack.c.b16 %v4098_v2, %v4094_v5  ;;  %v4078_v13 = vunpack.c.h.b16 %v11644_v45  ;;  %v4074_v60 = vunpack.c.h.b16 %v11652_v23  ;;  %v14259_v35 = vld [vmem:[#allocation93_spill] sm:$0xff] }
 0x973   :  { %v3742_v57 = vpack.c.bf16 %v3738_v16, %v3737_v32  ;;  %v4122_v10 = vpack.c.b16 %v4118_v47, %v4114_v30  ;;  %v7354_v39 = vor.u32 %v7873_v41, %v7353_v27  ;;  %v4058_v29 = vunpack.c.h.b16 %v3814_v33  ;;  %v14260_v16 = vld [vmem:[#allocation73_spill] sm:$0xff] }
 0x974   :  { %v4082_v28 = vpack.c.b16 %v4078_v13, %v4074_v60  ;;  %v4054_v45 = vunpack.c.h.b16 %v11650_v37  ;;  %v4038_v44 = vunpack.c.h.b16 %v3778_v58  ;;  %v4034_v43 = vunpack.c.h.b16 %v3776_v63  ;;  %v14261_v30 = vld [vmem:[#allocation9_spill] sm:$0xff] }
 0x975   :  { %4356 = vmatpush.bf16.msra.mxu0 %v4142_v36  ;;  %v4017_v34 = vunpack.c.l.b16 %v3742_v57  ;;  %v4018_v52 = vunpack.c.h.b16 %v3742_v57  ;;  %v4014_v23 = vunpack.c.h.b16 %v3740_v40 }
 0x976   :  { %4323 = vmatpush.bf16.msra.mxu1 %v4041_v42  ;;  %7363 = vmatmul.msk.bf16.vlgmr.msra.gmra.mxu3 %vm865_vm11, %v14257_v12  ;;  %v4062_v49 = vpack.c.b16 %v4058_v29, %v4054_v45  ;;  %v4042_v9 = vpack.c.b16 %v4038_v44, %v4034_v43 }
 0x977   :  { %v4021_v19 = vpack.c.b16 %v4017_v34, %v4013_v8  ;;  %v4022_v14 = vpack.c.b16 %v4018_v52, %v4014_v23  ;;  %v14264_v52 = vld [vmem:[#allocation69_spill] sm:$0xff] }
 0x979   :  { %4357 = vmatpush.bf16.msra.mxu0 %v4122_v10  ;;  %v14262_v10 = vld [vmem:[#allocation10_spill] sm:$0xff] }
 0x97a   :  { %4324 = vmatpush.bf16.msra.mxu1 %v4021_v19 }
 0x97d   :  { %4358 = vmatpush.bf16.msra.mxu0 %v4102_v53  ;;  %4325 = vmatmul.bf16.vlgmr.msra.gmra.mxu1 %v11687_v62 }
 0x980   :  { %4254 = vmatmul.bf16.gmra.mxu0 %v7354_v39 }
 0x981   :  { %4359 = vmatpush.bf16.msra.mxu0 %v4082_v28  ;;  %4292 = vmatmul.bf16.gmra.mxu2 %v7354_v39  ;;  %v14263_v28 = vld [vmem:[#allocation11_spill] sm:$0xff] }
 0x985   :  { %4360 = vmatpush.bf16.msra.mxu0 %v4062_v49 }
 0x986   :  { %7364 = vmatmul.msk.bf16.gmra.mxu3 %vm865_vm11, %v11633_v56 }
 0x989   :  { %4361 = vmatpush.bf16.msra.mxu0 %v4042_v9 }
 0x98d   :  { %4362 = vmatpush.bf16.msra.mxu0 %v4022_v14  ;;  %4330 = vmatmul.bf16.gmra.mxu1 %v7354_v39 }
 0x990   :  { %4363 = vmatmul.bf16.vlgmr.msra.gmra.mxu0 %v11687_v62 }
 0x991   :  { %7365 = vmatmul.msk.bf16.vlgmr.msrb.gmra.mxu2 %vm865_vm11, %v14257_v12 }
 0x9a0   :  { %4368 = vmatmul.bf16.gmra.mxu0 %v7354_v39 }
 0x9a1   :  { %7366 = vmatmul.msk.bf16.gmra.mxu2 %vm865_vm11, %v11633_v56 }
 0x9d2   :  { %v4269_v37 = vpop.f32.mrf.mxu1 }
 0x9d9   :  { %v4307_v33 = vpop.f32.mrf.mxu3 }
 0x9da   :  { %v4271_v58 = vpop.f32.mrf.mxu1 }
 0x9e1   :  { %v4309_v61 = vpop.f32.mrf.mxu3 }
 0x9e3   :  { %v4274_v63 = vpop.f32.mrf.mxu1 }
 0x9e9   :  { %v4312_v40 = vpop.f32.mrf.mxu3 }
 0x9eb   :  { %v4276_v56 = vpop.f32.mrf.mxu1 }
 0x9ed   :  { %v4250_v21 = vpop.f32.mrf.mxu0 }
 0x9ee   :  { %v4251_v22 = vadd.f32 %v4250_v21, %v14259_v35 }
 0x9f0   :  { %v4270_v51 = vadd.f32 %v4269_v37, %v4251_v22 }
 0x9f1   :  { %v4314_v7 = vpop.f32.mrf.mxu3 }
 0x9f2   :  { %v11727_v4 = vmax.f32 %v4270_v51, 0.0 }
 0x9f4   :  { %v4288_v62 = vpop.f32.mrf.mxu2  ;;  %4937 = vrot.lane.b32.xlu1 %v11727_v4, %s14193_s19  ;;  %4865 = vrot.lane.b32.xlu0 %v11727_v4, %s8064_s5  ;;  %v4697_v42 = vmul.f32 %v11727_v4, %v14261_v30 }
 0x9f5   :  { %v4289_v55 = vadd.f32 %v4288_v62, %v14259_v35  ;;  %v4252_v59 = vpop.f32.mrf.mxu0 }
 0x9f6   :  { %v4253_v36 = vadd.f32 %v4252_v59, %v14260_v16 }
 0x9f7   :  { %v4308_v32 = vadd.f32 %v4307_v33, %v4289_v55 }
 0x9f8   :  { %v4272_v57 = vadd.f32 %v4271_v58, %v4253_v36 }
 0x9f9   :  { %v11735_v47 = vmax.f32 %v4308_v32, 0.0  ;;  %v4345_v27 = vpop.f32.mrf.mxu3 }
 0x9fa   :  { %v4397_v19 = vmax.f32 %v4272_v57, 0.0  ;;  %v4326_v15 = vpop.f32.mrf.mxu1 }
 0x9fb   :  { %4873 = vrot.lane.b32.xlu2 %v11735_v47, %s8064_s5  ;;  %v4698_v8 = vmul.f32 %v11735_v47, %v14262_v10  ;;  %v4327_v13 = vadd.f32 %v4326_v15, %v14259_v35 }
 0x9fc   :  { %v4290_v34 = vpop.f32.mrf.mxu2  ;;  %4409 = vrot.lane.b32.xlu1 %v11727_v4, %s14195_s27  ;;  %4793 = vrot.lane.b32.xlu0 %v11727_v4, %s14190_s10  ;;  %v4701_v41 = vmul.f32 %v4397_v19, %v14261_v30 }
 0x9fd   :  { %v4291_v48 = vadd.f32 %v4290_v34, %v14260_v16  ;;  %v4255_v2 = vpop.f32.mrf.mxu0  ;;  %v11748_v12 = vpack.c.bf16 %v4698_v8, %v4697_v42  ;;  %v4346_v43 = vadd.f32 %v4345_v27, %v4327_v13 }
 0x9fe   :  { %v4256_v29 = vadd.f32 %v4255_v2, %v14263_v28 }
 0x9ff   :  { %v4310_v5 = vadd.f32 %v4309_v61, %v4291_v48  ;;  %v5178_v14 = vunpack.c.h.b16 %v11748_v12  ;;  %v11770_v61 = vmax.f32 %v4346_v43, 0.0 }
 0xa00   :  { %v4275_v33 = vadd.f32 %v4274_v63, %v4256_v29 }
 0xa01   :  { %v11750_v53 = vmax.f32 %v4310_v5, 0.0  ;;  %14266 = vst [vmem:[#allocation77_spill] sm:$0xff] %v11770_v61 }
 0xa03   :  { %4801 = vrot.lane.b32.xlu2 %v11735_v47, %s14190_s10  ;;  %v4702_v60 = vmul.f32 %v11750_v53, %v14262_v10 }
 0xa04   :  { %v4293_v39 = vpop.f32.mrf.mxu2  ;;  %4867 = vrot.lane.b32.xlu1 %v4397_v19, %s8064_s5  ;;  %4721 = vrot.lane.b32.xlu0 %v11727_v4, %s14192_s6 }
 0xa05   :  { %v4294_v45 = vadd.f32 %v4293_v39, %v14263_v28  ;;  %v4257_v49 = vpop.f32.mrf.mxu0  ;;  %v11763_v44 = vpack.c.bf16 %v4702_v60, %v4701_v41 }
 0xa06   :  { %v4258_v23 = vadd.f32 %v4257_v49, %v14264_v52 }
 0xa07   :  { %v4313_v9 = vadd.f32 %v4312_v40, %v4294_v45  ;;  %v5182_v37 = vunpack.c.h.b16 %v11763_v44  ;;  %v11780_v40 = vmax.f32 %v4275_v33, 0.0 }
 0xa08   :  { %v4277_v22 = vadd.f32 %v4276_v56, %v4258_v23 }
 0xa09   :  { %v11768_v58 = vpack.c.b16 %v5182_v37, %v5178_v14  ;;  %v11772_v21 = vmax.f32 %v4313_v9, 0.0  ;;  %v4705_v32 = vmul.f32 %v11780_v40, %v14261_v30 }
 0xa0a   :  { %v11783_v62 = vmax.f32 %v4277_v22, 0.0 }
 0xa0b   :  { %14265 = vst [vmem:[#allocation61_spill] sm:$0xff] %v11768_v58  ;;  %4729 = vrot.lane.b32.xlu2 %v11735_v47, %s14192_s6  ;;  %v4706_v56 = vmul.f32 %v11772_v21, %v14262_v10 }
 0xa0c   :  { %v4295_v51 = vpop.f32.mrf.mxu2  ;;  %4881 = vrot.lane.b32.xlu1 %v11770_v61, %s8064_s5  ;;  %4625 = vrot.lane.b32.xlu0 %v11727_v4, %s14194_s26  ;;  %v4709_v36 = vmul.f32 %v11783_v62, %v14261_v30  ;;  %v4347_v30 = vpop.f32.mrf.mxu3 }
 0xa0d   :  { %v4296_v63 = vadd.f32 %v4295_v51, %v14264_v52  ;;  %v11797_v42 = vpack.c.bf16 %v4706_v56, %v4705_v32 }
 0xa0f   :  { %v4315_v55 = vadd.f32 %v4314_v7, %v4296_v63  ;;  %v5186_v8 = vunpack.c.h.b16 %v11797_v42 }
 0xa11   :  { %v11787_v59 = vmax.f32 %v4315_v55, 0.0 }
 0xa13   :  { %4633 = vrot.lane.b32.xlu2 %v11735_v47, %s14194_s26  ;;  %v4710_v57 = vmul.f32 %v11787_v59, %v14262_v10 }
 0xa14   :  { %4795 = vrot.lane.b32.xlu1 %v4397_v19, %s14190_s10  ;;  %4553 = vrot.lane.b32.xlu0 %v11727_v4, %s14187_s8  ;;  %v4350_v45 = vpop.f32.mrf.mxu3 }
 0xa15   :  { %v11802_v7 = vpack.c.bf16 %v4710_v57, %v4709_v36 }
 0xa17   :  { %v5190_v34 = vunpack.c.h.b16 %v11802_v7 }
 0xa19   :  { %v11806_v48 = vpack.c.b16 %v5190_v34, %v5186_v8 }
 0xa1b   :  { %14267 = vst [vmem:[#allocation84_spill] sm:$0xff] %v11806_v48  ;;  %4561 = vrot.lane.b32.xlu2 %v11735_v47, %s14187_s8 }
 0xa1c   :  { %4809 = vrot.lane.b32.xlu1 %v11770_v61, %s14190_s10  ;;  %4481 = vrot.lane.b32.xlu0 %v11727_v4, %s14191_s28  ;;  %v4328_v4 = vpop.f32.mrf.mxu1  ;;  %v4352_v38 = vpop.f32.mrf.mxu3 }
 0xa23   :  { %4489 = vrot.lane.b32.xlu2 %v11735_v47, %s14191_s28 }
 0xa24   :  { %4723 = vrot.lane.b32.xlu1 %v4397_v19, %s14192_s6  ;;  %4945 = vrot.lane.b32.xlu0 %v11735_v47, %s14193_s19  ;;  %v4331_v39 = vpop.f32.mrf.mxu1 }
 0xa25   :  { %v4332_v29 = vadd.f32 %v4331_v39, %v14263_v28 }
 0xa27   :  { %v4351_v43 = vadd.f32 %v4350_v45, %v4332_v29  ;;  %v14288_v45 = vld [vmem:[#allocation27_spill] sm:$0xff] }
 0xa29   :  { %v11900_v14 = vmax.f32 %v4351_v43, 0.0 }
 0xa2b   :  { %4641 = vrot.lane.b32.xlu2 %v11770_v61, %s14194_s26  ;;  %14275 = vst [vmem:[#allocation101_spill] sm:$0xff] %v11900_v14 }
 0xa2c   :  { %4737 = vrot.lane.b32.xlu1 %v11770_v61, %s14192_s6  ;;  %4417 = vrot.lane.b32.xlu0 %v11735_v47, %s14195_s27  ;;  %v4329_v47 = vadd.f32 %v4328_v4, %v14260_v16  ;;  %v4333_v58 = vpop.f32.mrf.mxu1 }
 0xa2e   :  { %v4348_v10 = vadd.f32 %v4347_v30, %v4329_v47 }
 0xa30   :  { %v11845_v2 = vmax.f32 %v4348_v10, 0.0 }
 0xa32   :  { %14268 = vst [vmem:[#allocation111_spill] sm:$0xff] %v11845_v2 }
 0xa33   :  { %4939 = vrot.lane.b32.xlu2 %v4397_v19, %s14193_s19 }
 0xa34   :  { %4627 = vrot.lane.b32.xlu1 %v4397_v19, %s14194_s26  ;;  %4497 = vrot.lane.b32.xlu0 %v11770_v61, %s14191_s28 }
 0xa3b   :  { %4953 = vrot.lane.b32.xlu2 %v11770_v61, %s14193_s19 }
 0xa3c   :  { %4555 = vrot.lane.b32.xlu1 %v4397_v19, %s14187_s8  ;;  %4875 = vrot.lane.b32.xlu0 %v11750_v53, %s8064_s5 }
 0xa43   :  { %4411 = vrot.lane.b32.xlu2 %v4397_v19, %s14195_s27 }
 0xa44   :  { %4483 = vrot.lane.b32.xlu1 %v4397_v19, %s14191_s28  ;;  %4803 = vrot.lane.b32.xlu0 %v11750_v53, %s14190_s10 }
 0xa4b   :  { %4569 = vrot.lane.b32.xlu2 %v11770_v61, %s14187_s8 }
 0xa4c   :  { %4947 = vrot.lane.b32.xlu1 %v11750_v53, %s14193_s19  ;;  %4731 = vrot.lane.b32.xlu0 %v11750_v53, %s14192_s6 }
 0xa53   :  { %4883 = vrot.lane.b32.xlu2 %v11845_v2, %s8064_s5 }
 0xa54   :  { %4419 = vrot.lane.b32.xlu1 %v11750_v53, %s14195_s27  ;;  %4635 = vrot.lane.b32.xlu0 %v11750_v53, %s14194_s26 }
 0xa55   :  { %v11853_v19 = vpop.permute.xlu2 %4873 }
 0xa5b   :  { %4811 = vrot.lane.b32.xlu2 %v11845_v2, %s14190_s10 }
 0xa5c   :  { %4499 = vrot.lane.b32.xlu1 %v11845_v2, %s14191_s28  ;;  %4563 = vrot.lane.b32.xlu0 %v11750_v53, %s14187_s8 }
 0xa5d   :  { %v11861_v15 = vpop.permute.xlu2 %4801 }
 0xa63   :  { %4739 = vrot.lane.b32.xlu2 %v11845_v2, %s14192_s6 }
 0xa64   :  { %4949 = vrot.lane.b32.xlu1 %v11772_v21, %s14193_s19  ;;  %4491 = vrot.lane.b32.xlu0 %v11750_v53, %s14191_s28 }
 0xa65   :  { %v11869_v5 = vpop.permute.xlu2 %4729 }
 0xa66   :  { %v11871_v13 = vpop.permute.xlu1 %4937  ;;  %v11873_v27 = vpop.permute.xlu0 %4865 }
 0xa67   :  { %14269 = vst [vmem:[#allocation72_spill] sm:$0xff] %v11871_v13 }
 0xa68   :  { %14270 = vst [vmem:[#allocation115_spill] sm:$0xff] %v11873_v27 }
 0xa6b   :  { %4941 = vrot.lane.b32.xlu2 %v11780_v40, %s14193_s19 }
 0xa6c   :  { %4421 = vrot.lane.b32.xlu1 %v11772_v21, %s14195_s27  ;;  %4869 = vrot.lane.b32.xlu0 %v11780_v40, %s8064_s5 }
 0xa6d   :  { %v11881_v41 = vpop.permute.xlu2 %4633 }
 0xa6e   :  { %v11883_v60 = vpop.permute.xlu1 %4409  ;;  %v11885_v53 = vpop.permute.xlu0 %4793 }
 0xa6f   :  { %14271 = vst [vmem:[#allocation68_spill] sm:$0xff] %v11883_v60 }
 0xa70   :  { %14272 = vst [vmem:[#allocation105_spill] sm:$0xff] %v11885_v53 }
 0xa73   :  { %4413 = vrot.lane.b32.xlu2 %v11780_v40, %s14195_s27 }
 0xa74   :  { %4871 = vrot.lane.b32.xlu1 %v11783_v62, %s8064_s5  ;;  %4797 = vrot.lane.b32.xlu0 %v11780_v40, %s14190_s10 }
 0xa75   :  { %v11894_v49 = vpop.permute.xlu2 %4561 }
 0xa76   :  { %v11896_v9 = vpop.permute.xlu1 %4867  ;;  %v11898_v23 = vpop.permute.xlu0 %4721 }
 0xa77   :  { %14273 = vst [vmem:[#allocation60_spill] sm:$0xff] %v11896_v9 }
 0xa78   :  { %14274 = vst [vmem:[#allocation70_spill] sm:$0xff] %v11898_v23 }
 0xa7b   :  { %4877 = vrot.lane.b32.xlu2 %v11772_v21, %s8064_s5 }
 0xa7c   :  { %4885 = vrot.lane.b32.xlu1 %v11900_v14, %s8064_s5  ;;  %4725 = vrot.lane.b32.xlu0 %v11780_v40, %s14192_s6 }
 0xa7d   :  { %v11908_v37 = vpop.permute.xlu2 %4489 }
 0xa7e   :  { %v11910_v33 = vpop.permute.xlu1 %4881  ;;  %v11912_v22 = vpop.permute.xlu0 %4625 }
 0xa7f   :  { %14276 = vst [vmem:[#allocation19_spill] sm:$0xff] %v11910_v33  ;;  %v4901_v29 = vsel %vm573_vm3, %v11853_v19, %v11910_v33  ;;  %v4334_v33 = vadd.f32 %v4333_v58, %v14264_v52 }
 0xa80   :  { %14277 = vst [vmem:[#allocation109_spill] sm:$0xff] %v11912_v22  ;;  %v4914_v43 = vmul.f32 %v4901_v29, %v14288_v45 }
 0xa83   :  { %4805 = vrot.lane.b32.xlu2 %v11772_v21, %s14190_s10 }
 0xa84   :  { %4799 = vrot.lane.b32.xlu1 %v11783_v62, %s14190_s10  ;;  %4629 = vrot.lane.b32.xlu0 %v11780_v40, %s14194_s26 }
 0xa85   :  { %v11920_v51 = vpop.permute.xlu2 %4641 }
 0xa86   :  { %v11922_v63 = vpop.permute.xlu1 %4795  ;;  %v11924_v55 = vpop.permute.xlu0 %4553 }
 0xa87   :  { %14278 = vst [vmem:[#allocation113_spill] sm:$0xff] %v11922_v63 }
 0xa88   :  { %14279 = vst [vmem:[#allocation114_spill] sm:$0xff] %v11924_v55 }
 0xa8b   :  { %4733 = vrot.lane.b32.xlu2 %v11772_v21, %s14192_s6 }
 0xa8c   :  { %4813 = vrot.lane.b32.xlu1 %v11900_v14, %s14190_s10  ;;  %4557 = vrot.lane.b32.xlu0 %v11780_v40, %s14187_s8 }
 0xa8d   :  { %v11932_v56 = vpop.permute.xlu2 %4939 }
 0xa8e   :  { %14280 = vst [vmem:[#allocation83_spill] sm:$0xff] %v11932_v56  ;;  %v11934_v32 = vpop.permute.xlu1 %4809  ;;  %v11936_v36 = vpop.permute.xlu0 %4481 }
 0xa8f   :  { %14281 = vst [vmem:[#allocation103_spill] sm:$0xff] %v11934_v32  ;;  %v4829_v0 = vsel %vm532_vm4, %v11861_v15, %v11934_v32  ;;  %v14293_v32 = vld [vmem:[#allocation33_spill] sm:$0xff] }
 0xa93   :  { %4637 = vrot.lane.b32.xlu2 %v11772_v21, %s14194_s26 }
 0xa94   :  { %4727 = vrot.lane.b32.xlu1 %v11783_v62, %s14192_s6  ;;  %4485 = vrot.lane.b32.xlu0 %v11780_v40, %s14191_s28 }
 0xa95   :  { %v11944_v57 = vpop.permute.xlu2 %4953 }
 0xa96   :  { %14282 = vst [vmem:[#allocation104_spill] sm:$0xff] %v11944_v57  ;;  %v11946_v8 = vpop.permute.xlu1 %4723  ;;  %v11948_v34 = vpop.permute.xlu0 %4945 }
 0xa97   :  { %14283 = vst [vmem:[#allocation110_spill] sm:$0xff] %v11946_v8 }
 0xa9b   :  { %4565 = vrot.lane.b32.xlu2 %v11772_v21, %s14187_s8 }
 0xa9c   :  { %4741 = vrot.lane.b32.xlu1 %v11900_v14, %s14192_s6  ;;  %4643 = vrot.lane.b32.xlu0 %v11845_v2, %s14194_s26 }
 0xa9d   :  { %v11956_v4 = vpop.permute.xlu2 %4411 }
 0xa9e   :  { %14284 = vst [vmem:[#allocation123_spill] sm:$0xff] %v11956_v4  ;;  %v11958_v47 = vpop.permute.xlu1 %4737  ;;  %v11960_v40 = vpop.permute.xlu0 %4417 }
 0xa9f   :  { %14285 = vst [vmem:[#allocation108_spill] sm:$0xff] %v11958_v47 }
 0xaa0   :  { %14286 = vst [vmem:[#allocation91_spill] sm:$0xff] %v11960_v40 }
 0xaa3   :  { %4493 = vrot.lane.b32.xlu2 %v11772_v21, %s14191_s28  ;;  %v4905_v21 = vsel %vm573_vm3, %v11873_v27, %v11853_v19 }
 0xaa4   :  { %4631 = vrot.lane.b32.xlu1 %v11783_v62, %s14194_s26  ;;  %4955 = vrot.lane.b32.xlu0 %v11845_v2, %s14193_s19  ;;  %v4913_v31 = vmul.f32 %v4905_v21, %v14290_v17 }
 0xaa5   :  { %v11968_v30 = vpop.permute.xlu2 %4569 }
 0xaa6   :  { %v11970_v10 = vpop.permute.xlu1 %4627  ;;  %v11972_v39 = vpop.permute.xlu0 %4497  ;;  %v12000_v6 = vpack.c.bf16 %v4914_v43, %v4913_v31  ;;  %v14292_v31 = vld [vmem:[#allocation37_spill] sm:$0xff] }
 0xaa7   :  { %14287 = vst [vmem:[#allocation90_spill] sm:$0xff] %v11970_v10  ;;  %v4842_v43 = vmul.f32 %v4829_v0, %v14292_v31 }
 0xaa8   :  { %v5298_v58 = vunpack.c.h.b16 %v12000_v6 }
 0xaab   :  { %4951 = vrot.lane.b32.xlu2 %v11787_v59, %s14193_s19 }
 0xaac   :  { %4559 = vrot.lane.b32.xlu1 %v11783_v62, %s14187_s8  ;;  %4571 = vrot.lane.b32.xlu0 %v11845_v2, %s14187_s8 }
 0xaad   :  { %v11989_v48 = vpop.permute.xlu2 %4883 }
 0xaae   :  { %14289 = vst [vmem:[#allocation119_spill] sm:$0xff] %v11989_v48  ;;  %v11992_v24 = vpop.permute.xlu1 %4555  ;;  %v4876_v26 = vpop.permute.xlu0 %4875 }
 0xaaf   :  { %14291 = vst [vmem:[#allocation25_spill] sm:$0xff] %v11992_v24  ;;  %v4902_v19 = vsel %vm573_vm3, %v4876_v26, %v11989_v48  ;;  %v4906_v29 = vsel %vm573_vm3, %v11896_v9, %v4876_v26  ;;  %v4833_v48 = vsel %vm532_vm4, %v11885_v53, %v11861_v15 }
 0xab0   :  { %v4917_v21 = vmul.f32 %v4906_v29, %v14290_v17  ;;  %v4918_v27 = vmul.f32 %v4902_v19, %v14288_v45  ;;  %v4353_v29 = vadd.f32 %v4352_v38, %v4334_v33  ;;  %v4841_v15 = vmul.f32 %v4833_v48, %v14293_v32 }
 0xab2   :  { %v12013_v26 = vpack.c.bf16 %v4918_v27, %v4917_v21  ;;  %v4857_v9 = vpack.c.bf16 %v4842_v43, %v4841_v15  ;;  %v12039_v33 = vmax.f32 %v4353_v29, 0.0 }
 0xab3   :  { %4423 = vrot.lane.b32.xlu2 %v11787_v59, %s14195_s27 }
 0xab4   :  { %4487 = vrot.lane.b32.xlu1 %v11783_v62, %s14191_s28  ;;  %4645 = vrot.lane.b32.xlu0 %v11900_v14, %s14194_s26  ;;  %v5302_v19 = vunpack.c.h.b16 %v12013_v26  ;;  %14296 = vst [vmem:[#allocation71_spill] sm:$0xff] %v12039_v33  ;;  %v5257_v15 = vunpack.c.l.b16 %v4857_v9  ;;  %v5258_v29 = vunpack.c.h.b16 %v4857_v9 }
 0xab5   :  { %v12025_v27 = vpop.permute.xlu2 %4811 }
 0xab6   :  { %14294 = vst [vmem:[#allocation117_spill] sm:$0xff] %v12025_v27  ;;  %v12027_v21 = vpop.permute.xlu1 %4483  ;;  %v4804_v0 = vpop.permute.xlu0 %4803  ;;  %v12029_v53 = vpack.c.b16 %v5302_v19, %v5298_v58  ;;  %v4757_v58 = vsel %vm491_vm5, %v11869_v5, %v11958_v47  ;;  %v4761_v19 = vsel %vm491_vm5, %v11898_v23, %v11869_v5  ;;  %v14299_v47 = vld [vmem:[#allocation34_spill] sm:$0xff] }
 0xab7   :  { %v4830_v3 = vsel %vm532_vm4, %v4804_v0, %v12025_v27  ;;  %v4834_v24 = vsel %vm532_vm4, %v11922_v63, %v4804_v0 }
 0xab8   :  { %14295 = vst [vmem:[#allocation89_spill] sm:$0xff] %v12029_v53  ;;  %v4845_v38 = vmul.f32 %v4834_v24, %v14293_v32  ;;  %v4846_v48 = vmul.f32 %v4830_v3, %v14292_v31  ;;  %v14297_v24 = vld [vmem:[#allocation38_spill] sm:$0xff]  ;;  %v4769_v53 = vmul.f32 %v4761_v19, %v14299_v47 }
 0xab9   :  { %v4770_v0 = vmul.f32 %v4757_v58, %v14297_v24 }
 0xaba   :  { %v4859_v43 = vpack.c.bf16 %v4846_v48, %v4845_v38 }
 0xabb   :  { %4887 = vrot.lane.b32.xlu2 %v12039_v33, %s8064_s5 }
 0xabc   :  { %4573 = vrot.lane.b32.xlu1 %v11900_v14, %s14187_s8  ;;  %4943 = vrot.lane.b32.xlu0 %v11783_v62, %s14193_s19  ;;  %v5261_v3 = vunpack.c.l.b16 %v4859_v43  ;;  %v5262_v38 = vunpack.c.h.b16 %v4859_v43  ;;  %v4785_v43 = vpack.c.bf16 %v4770_v0, %v4769_v53 }
 0xabd   :  { %v12056_v48 = vpop.permute.xlu2 %4739 }
 0xabe   :  { %14298 = vst [vmem:[#allocation75_spill] sm:$0xff] %v12056_v48  ;;  %v12059_v5 = vpop.permute.xlu1 %4947  ;;  %v4732_v23 = vpop.permute.xlu0 %4731  ;;  %v12061_v63 = vpack.c.b16 %v5261_v3, %v5257_v15  ;;  %v12063_v27 = vpack.c.b16 %v5262_v38, %v5258_v29  ;;  %v5217_v15 = vunpack.c.l.b16 %v4785_v43  ;;  %v5218_v29 = vunpack.c.h.b16 %v4785_v43 }
 0xabf   :  { %v4758_v58 = vsel %vm491_vm5, %v4732_v23, %v12056_v48  ;;  %v4762_v9 = vsel %vm491_vm5, %v11946_v8, %v4732_v23 }
 0xac0   :  { %14300 = vst [vmem:[#allocation45_spill] sm:$0xff] %v12061_v63  ;;  %v4773_v10 = vmul.f32 %v4762_v9, %v14299_v47  ;;  %v4774_v19 = vmul.f32 %v4758_v58, %v14297_v24 }
 0xac1   :  { %14301 = vst [vmem:[#allocation47_spill] sm:$0xff] %v12063_v27 }
 0xac2   :  { %v4787_v4 = vpack.c.bf16 %v4774_v19, %v4773_v10  ;;  %v4364_v19 = vpop.f32.mrf.mxu0 }
 0xac3   :  { %4815 = vrot.lane.b32.xlu2 %v12039_v33, %s14190_s10 }
 0xac4   :  { %4647 = vrot.lane.b32.xlu1 %v12039_v33, %s14194_s26  ;;  %4957 = vrot.lane.b32.xlu0 %v11900_v14, %s14193_s19  ;;  %v5221_v3 = vunpack.c.l.b16 %v4787_v4  ;;  %v5222_v38 = vunpack.c.h.b16 %v4787_v4 }
 0xac5   :  { %v12079_v23 = vpop.permute.xlu2 %4941 }
 0xac6   :  { %14302 = vst [vmem:[#allocation95_spill] sm:$0xff] %v12079_v23  ;;  %v12081_v53 = vpop.permute.xlu1 %4419  ;;  %v12083_v0 = vpop.permute.xlu0 %4635  ;;  %v12085_v10 = vpack.c.b16 %v5221_v3, %v5217_v15  ;;  %v12087_v58 = vpack.c.b16 %v5222_v38, %v5218_v29  ;;  %v4365_v3 = vadd.f32 %v4364_v19, %v14259_v35 }
 0xac7   :  { %14303 = vst [vmem:[#allocation88_spill] sm:$0xff] %v12081_v53  ;;  %v4383_v15 = vpop.f32.mrf.mxu2 }
 0xac8   :  { %14304 = vst [vmem:[#allocation102_spill] sm:$0xff] %v12085_v10 }
 0xac9   :  { %14305 = vst [vmem:[#allocation63_spill] sm:$0xff] %v12087_v58 }
 0xacb   :  { %4743 = vrot.lane.b32.xlu2 %v12039_v33, %s14192_s6 }
 0xacc   :  { %4959 = vrot.lane.b32.xlu1 %v12039_v33, %s14193_s19  ;;  %4415 = vrot.lane.b32.xlu0 %v11783_v62, %s14195_s27  ;;  %v4384_v62 = vadd.f32 %v4383_v15, %v4365_v3  ;;  %v4366_v3 = vpop.f32.mrf.mxu0 }
 0xacd   :  { %v12095_v4 = vpop.permute.xlu2 %4413 }
 0xace   :  { %14306 = vst [vmem:[#allocation52_spill] sm:$0xff] %v12095_v4  ;;  %v12097_v9 = vpop.permute.xlu1 %4499  ;;  %v12099_v43 = vpop.permute.xlu0 %4563  ;;  %v12114_v8 = vmax.f32 %v4384_v62, 0.0  ;;  %v4367_v62 = vadd.f32 %v4366_v3, %v14260_v16 }
 0xacf   :  { %v4385_v48 = vpop.f32.mrf.mxu2 }
 0xad0   :  { %14307 = vst [vmem:[#allocation12_spill] sm:$0xff] %v12114_v8  ;;  %v4386_v27 = vadd.f32 %v4385_v48, %v4367_v62 }
 0xad2   :  { %v12141_v53 = vmax.f32 %v4386_v27, 0.0 }
 0xad3   :  { %4575 = vrot.lane.b32.xlu2 %v12039_v33, %s14187_s8 }
 0xad4   :  { %4503 = vrot.lane.b32.xlu1 %v12039_v33, %s14191_s28  ;;  %4501 = vrot.lane.b32.xlu0 %v11900_v14, %s14191_s28  ;;  %14312 = vst [vmem:[#allocation79_spill] sm:$0xff] %v12141_v53 }
 0xad5   :  { %v12108_v29 = vpop.permute.xlu2 %4877 }
 0xad6   :  { %v12110_v38 = vpop.permute.xlu1 %4949  ;;  %v12112_v58 = vpop.permute.xlu0 %4491 }
 0xad7   :  { %v4388_v40 = vpop.f32.mrf.mxu2 }
 0xadb   :  { %4433 = vrot.lane.b32.xlu2 %v12114_v8, %s14195_s27 }
 0xadc   :  { %4649 = vrot.lane.b32.xlu1 %v12114_v8, %s14194_s26  ;;  %4879 = vrot.lane.b32.xlu0 %v11787_v59, %s8064_s5 }
 0xadd   :  { %v12122_v35 = vpop.permute.xlu2 %4805 }
 0xade   :  { %v12124_v19 = vpop.permute.xlu1 %4421  ;;  %v12126_v15 = vpop.permute.xlu0 %4869 }
 0xadf   :  { %14308 = vst [vmem:[#allocation76_spill] sm:$0xff] %v12124_v19 }
 0xae0   :  { %14309 = vst [vmem:[#allocation124_spill] sm:$0xff] %v12126_v15 }
 0xae3   :  { %4817 = vrot.lane.b32.xlu2 %v12114_v8, %s14190_s10 }
 0xae4   :  { %4577 = vrot.lane.b32.xlu1 %v12114_v8, %s14187_s8  ;;  %4807 = vrot.lane.b32.xlu0 %v11787_v59, %s14190_s10 }
 0xae5   :  { %v12135_v10 = vpop.permute.xlu2 %4733 }
 0xae6   :  { %v12137_v4 = vpop.permute.xlu1 %4871  ;;  %v12139_v19 = vpop.permute.xlu0 %4797 }
 0xae7   :  { %14310 = vst [vmem:[#allocation96_spill] sm:$0xff] %v12137_v4 }
 0xae8   :  { %14311 = vst [vmem:[#allocation122_spill] sm:$0xff] %v12139_v19 }
 0xaeb   :  { %4651 = vrot.lane.b32.xlu2 %v12141_v53, %s14194_s26 }
 0xaec   :  { %4505 = vrot.lane.b32.xlu1 %v12114_v8, %s14191_s28  ;;  %4735 = vrot.lane.b32.xlu0 %v11787_v59, %s14192_s6 }
 0xaed   :  { %v12149_v16 = vpop.permute.xlu2 %4637 }
 0xaee   :  { %14313 = vst [vmem:[#allocation32_spill] sm:$0xff] %v12149_v16  ;;  %v12151_v48 = vpop.permute.xlu1 %4885  ;;  %v12153_v3 = vpop.permute.xlu0 %4725 }
 0xaef   :  { %14314 = vst [vmem:[#allocation22_spill] sm:$0xff] %v12151_v48  ;;  %v4369_v16 = vpop.f32.mrf.mxu0 }
 0xaf0   :  { %14315 = vst [vmem:[#allocation82_spill] sm:$0xff] %v12153_v3  ;;  %v4370_v63 = vadd.f32 %v4369_v16, %v14263_v28 }
 0xaf3   :  { %4579 = vrot.lane.b32.xlu2 %v12141_v53, %s14187_s8 }
 0xaf4   :  { %4889 = vrot.lane.b32.xlu1 %v12114_v8, %s8064_s5  ;;  %4639 = vrot.lane.b32.xlu0 %v11787_v59, %s14194_s26 }
 0xaf5   :  { %v12161_v27 = vpop.permute.xlu2 %4565 }
 0xaf6   :  { %14316 = vst [vmem:[#allocation29_spill] sm:$0xff] %v12161_v27  ;;  %v12163_v62 = vpop.permute.xlu1 %4799  ;;  %v12165_v60 = vpop.permute.xlu0 %4629  ;;  %v4389_v27 = vadd.f32 %v4388_v40, %v4370_v63 }
 0xaf7   :  { %14317 = vst [vmem:[#allocation107_spill] sm:$0xff] %v12163_v62  ;;  %v4371_v40 = vpop.f32.mrf.mxu0 }
 0xaf8   :  { %14318 = vst [vmem:[#allocation28_spill] sm:$0xff] %v12165_v60  ;;  %v12180_v60 = vmax.f32 %v4389_v27, 0.0  ;;  %v4372_v27 = vadd.f32 %v4371_v40, %v14264_v52 }
 0xafa   :  { %14322 = vst [vmem:[#allocation5_spill] sm:$0xff] %v12180_v60 }
 0xafb   :  { %4507 = vrot.lane.b32.xlu2 %v12141_v53, %s14191_s28 }
 0xafc   :  { %4961 = vrot.lane.b32.xlu1 %v12114_v8, %s14193_s19  ;;  %4567 = vrot.lane.b32.xlu0 %v11787_v59, %s14187_s8 }
 0xafd   :  { %v12174_v55 = vpop.permute.xlu2 %4493 }
 0xafe   :  { %14319 = vst [vmem:[#allocation98_spill] sm:$0xff] %v12174_v55  ;;  %v12176_v22 = vpop.permute.xlu1 %4813  ;;  %v12178_v46 = vpop.permute.xlu0 %4557 }
 0xaff   :  { %14320 = vst [vmem:[#allocation44_spill] sm:$0xff] %v12176_v22  ;;  %v4390_v55 = vpop.f32.mrf.mxu2 }
 0xb00   :  { %14321 = vst [vmem:[#allocation92_spill] sm:$0xff] %v12178_v46 }
 0xb03   :  { %4891 = vrot.lane.b32.xlu2 %v12141_v53, %s8064_s5 }
 0xb04   :  { %4653 = vrot.lane.b32.xlu1 %v12180_v60, %s14194_s26  ;;  %4495 = vrot.lane.b32.xlu0 %v11787_v59, %s14191_s28  ;;  %v4391_v59 = vadd.f32 %v4390_v55, %v4372_v27 }
 0xb05   :  { %v12188_v28 = vpop.permute.xlu2 %4951 }
 0xb06   :  { %v12190_v16 = vpop.permute.xlu1 %4727  ;;  %v12192_v63 = vpop.permute.xlu0 %4485 }
 0xb07   :  { %14323 = vst [vmem:[#allocation6_spill] sm:$0xff] %v12190_v16 }
 0xb08   :  { %14324 = vst [vmem:[#allocation8_spill] sm:$0xff] %v12192_v63  ;;  %v12207_v63 = vmax.f32 %v4391_v59, 0.0 }
 0xb0a   :  { %14327 = vst [vmem:[#allocation78_spill] sm:$0xff] %v12207_v63 }
 0xb0b   :  { %4821 = vrot.lane.b32.xlu2 %v12180_v60, %s14190_s10 }
 0xb0c   :  { %4581 = vrot.lane.b32.xlu1 %v12180_v60, %s14187_s8  ;;  %4435 = vrot.lane.b32.xlu0 %v12141_v53, %s14195_s27 }
 0xb0d   :  { %v12201_v46 = vpop.permute.xlu2 %4423 }
 0xb0e   :  { %14325 = vst [vmem:[#allocation7_spill] sm:$0xff] %v12201_v46  ;;  %v12203_v24 = vpop.permute.xlu1 %4741  ;;  %v12205_v16 = vpop.permute.xlu0 %4643 }
 0xb0f   :  { %14326 = vst [vmem:[#allocation67_spill] sm:$0xff] %v12203_v24 }
 0xb13   :  { %4655 = vrot.lane.b32.xlu2 %v12207_v63, %s14194_s26 }
 0xb14   :  { %4509 = vrot.lane.b32.xlu1 %v12180_v60, %s14191_s28  ;;  %4819 = vrot.lane.b32.xlu0 %v12141_v53, %s14190_s10 }
 0xb15   :  { %v12215_v52 = vpop.permute.xlu2 %4887 }
 0xb16   :  { %14328 = vst [vmem:[#allocation118_spill] sm:$0xff] %v12215_v52  ;;  %v12217_v55 = vpop.permute.xlu1 %4631  ;;  %v12219_v40 = vpop.permute.xlu0 %4955 }
 0xb17   :  { %14329 = vst [vmem:[#allocation116_spill] sm:$0xff] %v12217_v55 }
 0xb18   :  { %14330 = vst [vmem:[#allocation26_spill] sm:$0xff] %v12219_v40 }
 0xb1b   :  { %4583 = vrot.lane.b32.xlu2 %v12207_v63, %s14187_s8  ;;  %s14485_s8 = smov 119  }
 0xb1c   :  { %4965 = vrot.lane.b32.xlu1 %v12180_v60, %s14193_s19  ;;  %4437 = vrot.lane.b32.xlu0 %v12180_v60, %s14195_s27 }
 0xb1d   :  { %v12227_v27 = vpop.permute.xlu2 %4815 }
 0xb1e   :  { %14331 = vst [vmem:[#allocation24_spill] sm:$0xff] %v12227_v27  ;;  %v12229_v59 = vpop.permute.xlu1 %4559  ;;  %v12231_v46 = vpop.permute.xlu0 %4571 }
 0xb1f   :  { %14332 = vst [vmem:[#allocation81_spill] sm:$0xff] %v12229_v59 }
 0xb23   :  { %4511 = vrot.lane.b32.xlu2 %v12207_v63, %s14191_s28 }
 0xb24   :  { %4439 = vrot.lane.b32.xlu1 %v12207_v63, %s14195_s27  ;;  %4893 = vrot.lane.b32.xlu0 %v12180_v60, %s8064_s5 }
 0xb25   :  { %v12239_v55 = vpop.permute.xlu2 %4743 }
 0xb26   :  { %14333 = vst [vmem:[#allocation106_spill] sm:$0xff] %v12239_v55  ;;  %v12241_v47 = vpop.permute.xlu1 %4487  ;;  %v12243_v11 = vpop.permute.xlu0 %4645 }
 0xb27   :  { %14334 = vst [vmem:[#allocation100_spill] sm:$0xff] %v12241_v47 }
 0xb28   :  { %14335 = vst [vmem:[#allocation97_spill] sm:$0xff] %v12243_v11 }
 0xb2b   :  { %4963 = vrot.lane.b32.xlu2 %v12141_v53, %s14193_s19 }
 0xb2c   :  { %4895 = vrot.lane.b32.xlu1 %v12207_v63, %s8064_s5  ;;  %4429 = vrot.lane.b32.xlu0 %v11900_v14, %s14195_s27  ;;  %s14484_s5 = smov 7  }
 0xb2d   :  { %v12251_v59 = vpop.permute.xlu2 %4575 }
 0xb2e   :  { %14336 = vst [vmem:[#allocation65_spill] sm:$0xff] %v12251_v59  ;;  %v12253_v24 = vpop.permute.xlu1 %4573  ;;  %v12255_v62 = vpop.permute.xlu0 %4943 }
 0xb2f   :  { %14337 = vst [vmem:[#allocation58_spill] sm:$0xff] %v12253_v24  ;;  %v4979_v24 = vsel %vm614_vm7, %v12079_v23, %v12110_v38 }
 0xb30   :  { %14338 = vst [vmem:[#allocation64_spill] sm:$0xff] %v12255_v62 }
 0xb33   :  { %4967 = vrot.lane.b32.xlu2 %v12207_v63, %s14193_s19 }
 0xb34   :  { %4431 = vrot.lane.b32.xlu1 %v12039_v33, %s14195_s27  ;;  %4823 = vrot.lane.b32.xlu0 %v12207_v63, %s14190_s10  ;;  %v4974_v33 = vsel %vm614_vm7, %v12059_v5, %v12219_v40  ;;  %s14486_s10 = smov 9  }
 0xb35   :  { %v12263_v47 = vpop.permute.xlu2 %4433 }
 0xb36   :  { %14339 = vst [vmem:[#allocation80_spill] sm:$0xff] %v12263_v47  ;;  %v12265_v11 = vpop.permute.xlu1 %4647  ;;  %v12267_v14 = vpop.permute.xlu0 %4957 }
 0xb37   :  { %14340 = vst [vmem:[#allocation85_spill] sm:$0xff] %v12265_v11  ;;  %v4975_v59 = vsel %vm614_vm7, %v12110_v38, %v12267_v14  ;;  %v4973_v11 = vsel %vm614_vm7, %v11948_v34, %v11944_v57  ;;  %v7995_v38 = vld [vmem:[%s13807_s30 + $0x28] ss:$0 sm:$0xff] }
 0xb38   :  { %14341 = vst [vmem:[#allocation49_spill] sm:$0xff] %v12267_v14  ;;  %v4977_v14 = vsel %vm614_vm7, %v11871_v13, %v11948_v34  ;;  %v4994_v23 = vmul.f32 %v7995_v38, %v4975_v59  ;;  %v4980_v34 = vsel %vm614_vm7, %v12255_v62, %v12188_v28  ;;  %v7996_v59 = vld [vmem:[%s13807_s30 + $0x20] ss:$0 sm:$0xff]  ;;  %v4990_v13 = vmul.f32 %v7995_v38, %v4974_v33 }
 0xb39   :  { %v4985_v47 = vmul.f32 %v7996_v59, %v4977_v14  ;;  %v4986_v55 = vmul.f32 %v7995_v38, %v4973_v11 }
 0xb3b   :  { %4749 = vrot.lane.b32.xlu2 %v12180_v60, %s14192_s6  ;;  %v4978_v60 = vsel %vm614_vm7, %v11932_v56, %v12059_v5  ;;  %v4997_v56 = vmul.f32 %v7996_v59, %v4980_v34  ;;  %v12327_v33 = vpack.c.bf16 %v4986_v55, %v4985_v47  ;;  %v4661_v55 = vsel %vm434_vm8, %v11881_v41, %v11920_v51 }
 0xb3c   :  { %4425 = vrot.lane.b32.xlu1 %v11770_v61, %s14195_s27  ;;  %4751 = vrot.lane.b32.xlu0 %v12207_v63, %s14192_s6  ;;  %v4993_v61 = vmul.f32 %v7996_v59, %v4979_v24  ;;  %v4989_v62 = vmul.f32 %v7996_v59, %v4978_v60 }
 0xb3d   :  { %v12306_v40 = vpop.permute.xlu2 %4817 }
 0xb3e   :  { %14342 = vst [vmem:[#allocation13_spill] sm:$0xff] %v12306_v40  ;;  %v12311_v57 = vpop.permute.xlu1 %4959  ;;  %v12313_v63 = vpop.permute.xlu0 %4415  ;;  %v12319_v40 = vpack.c.bf16 %v4994_v23, %v4993_v61  ;;  %v12321_v25 = vpack.c.bf16 %v4990_v13, %v4989_v62  ;;  %v7371_v23 = vld [vmem:[%s13405_s12 + $0x10] sm:$0xff]  ;;  %v5337_v62 = vunpack.c.l.b16 %v12327_v33 }
 0xb3f   :  { %14343 = vst [vmem:[#allocation112_spill] sm:$0xff] %v12311_v57  ;;  %v4976_v5 = vsel %vm614_vm7, %v12188_v28, %v12311_v57  ;;  %v7372_v28 = vld [vmem:[%s13405_s12 + $0x18] sm:$0xff] }
 0xb40   :  { %14344 = vst [vmem:[#allocation86_spill] sm:$0xff] %v12313_v63  ;;  %v4998_v27 = vmul.f32 %v7995_v38, %v4976_v5  ;;  %v5345_v11 = vunpack.c.l.b16 %v12319_v40  ;;  %v5341_v47 = vunpack.c.l.b16 %v12321_v25  ;;  %v4903_v38 = vsel %vm573_vm3, %v12108_v29, %v12151_v48 }
 0xb41   :  { %v4922_v59 = vmul.f32 %v4903_v38, %v14288_v45 }
 0xb42   :  { %v12323_v24 = vpack.c.bf16 %v4998_v27, %v4997_v56  ;;  %v4521_v27 = vsel %vm352_vm6, %v11936_v36, %v11908_v37  ;;  %v5353_v34 = vpack.c.b16 %v5341_v47, %v5337_v62  ;;  %v14346_v62 = vld [vmem:[#allocation36_spill] sm:$0xff] }
 0xb43   :  { %4427 = vrot.lane.b32.xlu2 %v11845_v2, %s14195_s27  ;;  %v12375_v5 = vmul.f32 %v4521_v27, %v14346_v62 }
 0xb44   :  { %v5349_v14 = vunpack.c.l.b16 %v12323_v24  ;;  %4747 = vrot.lane.b32.xlu1 %v12141_v53, %s14192_s6  ;;  %4745 = vrot.lane.b32.xlu0 %v12114_v8, %s14192_s6 }
 0xb45   :  { %v12335_v61 = vpop.permute.xlu2 %4651 }
 0xb46   :  { %v12337_v13 = vpop.permute.xlu1 %4503  ;;  %v12339_v60 = vpop.permute.xlu0 %4501  ;;  %v5357_v56 = vpack.c.b16 %v5349_v14, %v5345_v11  ;;  %v4907_v11 = vsel %vm573_vm3, %v12126_v15, %v12108_v29  ;;  %v4658_v14 = vsel %vm434_vm8, %v12205_v16, %v12335_v61  ;;  %v5297_v29 = vunpack.c.l.b16 %v12000_v6 }
 0xb47   :  { %14345 = vst [vmem:[#allocation99_spill] sm:$0xff] %v12337_v13  ;;  %v5301_v6 = vunpack.c.l.b16 %v12013_v26  ;;  %v4921_v47 = vmul.f32 %v4907_v11, %v14290_v17  ;;  %v4680_v8 = vmul.f32 %v4658_v14, %v14248_v54 }
 0xb48   :  { %5439 = vmatpush.bf16.msrb.mxu0 %v5357_v56  ;;  %v4831_v56 = vsel %vm532_vm4, %v12122_v35, %v12176_v22 }
 0xb49   :  { %v4933_v53 = vpack.c.bf16 %v4922_v59, %v4921_v47  ;;  %v4518_v47 = vsel %vm352_vm6, %v12112_v58, %v12097_v9 }
 0xb4b   :  { %5379 = vperm.xlu2 %7979, %v7371_v23   ;;  %v4675_v23 = vmul.f32 %v4661_v55, %v14250_v50  ;;  %v4662_v55 = vsel %vm434_vm8, %v12083_v0, %v12205_v16  ;;  %v4835_v16 = vsel %vm532_vm4, %v12139_v19, %v12122_v35  ;;  %v4522_v35 = vsel %vm352_vm6, %v12027_v21, %v12112_v58  ;;  %v14347_v58 = vld [vmem:[#allocation59_spill] sm:$0xff] }
 0xb4c   :  { %5384 = vperm.xlu0 %7977, %v7372_v28   ;;  %5440 = vmatpush.bf16.msrb.mxu0 %v5353_v34  ;;  %v4589_v28 = vsel %vm393_vm9, %v11894_v49, %v11968_v30  ;;  %v4517_v34 = vsel %vm352_vm6, %v11908_v37, %v11972_v39  ;;  %v4679_v22 = vmul.f32 %v4662_v55, %v14250_v50 }
 0xb4d   :  { %v12378_v2 = vpop.permute.xlu2 %4579  ;;  %v4603_v48 = vmul.f32 %v4589_v28, %v14244_v18  ;;  %v12427_v19 = vmul.f32 %v4517_v34, %v14252_v1  ;;  %v4849_v28 = vmul.f32 %v4835_v16, %v14293_v32  ;;  %v5306_v34 = vunpack.c.h.b16 %v4933_v53 }
 0xb4e   :  { %v12393_v27 = vpop.permute.xlu1 %4649  ;;  %v4880_v38 = vpop.permute.xlu0 %4879  ;;  %v4692_v59 = vpack.c.bf16 %v4680_v8, %v4679_v22  ;;  %v4534_v22 = vmul.f32 %v4522_v35, %v14346_v62  ;;  %v5305_v8 = vunpack.c.l.b16 %v4933_v53 }
 0xb4f   :  { %v4657_v37 = vsel %vm434_vm8, %v11920_v51, %v12393_v27  ;;  %v4904_v11 = vsel %vm573_vm3, %v4880_v38, %v12215_v52  ;;  %v4908_v14 = vsel %vm573_vm3, %v12137_v4, %v4880_v38 }
 0xb50   :  { %v4676_v26 = vmul.f32 %v4657_v37, %v14248_v54  ;;  %v4925_v51 = vmul.f32 %v4908_v14, %v14290_v17  ;;  %v4926_v15 = vmul.f32 %v4904_v11, %v14288_v45  ;;  %v4850_v37 = vmul.f32 %v4831_v56, %v14292_v31 }
 0xb51   :  { %v4586_v17 = vsel %vm393_vm9, %v12231_v46, %v12378_v2  ;;  %v4590_v56 = vsel %vm393_vm9, %v12099_v43, %v12231_v46  ;;  %v5144_v63 = vunpack.c.h.b16 %v4692_v59 }
 0xb52   :  { %v4690_v52 = vpack.c.bf16 %v4676_v26, %v4675_v23  ;;  %v4935_v45 = vpack.c.bf16 %v4926_v15, %v4925_v51  ;;  %v5313_v23 = vpack.c.b16 %v5301_v6, %v5297_v29  ;;  %v4763_v15 = vsel %vm491_vm5, %v12153_v3, %v12135_v10  ;;  %v14350_v3 = vld [vmem:[#allocation107_spill] sm:$0xff] }
 0xb53   :  { %v4861_v38 = vpack.c.bf16 %v4850_v37, %v4849_v28  ;;  %v4608_v26 = vmul.f32 %v4586_v17, %v14347_v58  ;;  %v4607_v46 = vmul.f32 %v4590_v56, %v14244_v18  ;;  %v5143_v6 = vunpack.c.l.b16 %v4692_v59  ;;  %v14349_v17 = vld [vmem:[#allocation24_spill] sm:$0xff]  ;;  %v14351_v56 = vld [vmem:[#allocation67_spill] sm:$0xff] }
 0xb54   :  { %v5309_v16 = vunpack.c.l.b16 %v4935_v45  ;;  %v5139_v51 = vunpack.c.l.b16 %v4690_v52  ;;  %v5310_v29 = vunpack.c.h.b16 %v4935_v45 }
 0xb55   :  { %v4508_v55 = vpop.permute.xlu2 %4507  ;;  %v4620_v13 = vpack.c.bf16 %v4608_v26, %v4607_v46 }
 0xb56   :  { %v12448_v11 = vpop.permute.xlu1 %4577  ;;  %v4808_v14 = vpop.permute.xlu0 %4807  ;;  %v4526_v35 = vsel %vm352_vm6, %v4508_v55, %v12027_v21  ;;  %v5140_v21 = vunpack.c.h.b16 %v4690_v52  ;;  %v12471_v54 = vpack.c.b16 %v5143_v6, %v5139_v51  ;;  %v12479_v52 = vpack.c.b16 %v5310_v29, %v5306_v34 }
 0xb57   :  { %14348 = vst [vmem:[#allocation87_spill] sm:$0xff] %v12448_v11  ;;  %v4585_v53 = vsel %vm393_vm9, %v11968_v30, %v12448_v11  ;;  %v4832_v28 = vsel %vm532_vm4, %v4808_v14, %v14349_v17  ;;  %v4836_v45 = vsel %vm532_vm4, %v14350_v3, %v4808_v14  ;;  %v4759_v30 = vsel %vm491_vm5, %v12135_v10, %v14351_v56  ;;  %v14352_v14 = vld [vmem:[#allocation57_spill] sm:$0xff]  ;;  %v14353_v56 = vld [vmem:[#allocation34_spill] sm:$0xff] }
 0xb58   :  { %v4604_v37 = vmul.f32 %v4585_v53, %v14347_v58  ;;  %v4853_v4 = vmul.f32 %v4836_v45, %v14293_v32  ;;  %v4854_v57 = vmul.f32 %v4832_v28, %v14292_v31  ;;  %v5317_v58 = vpack.c.b16 %v5309_v16, %v5305_v8  ;;  %14354 = vst [vmem:[#allocation93_spill] sm:$0xff] %v12479_v52  ;;  %v14394_v52 = vld [vmem:[#allocation116_spill] sm:$0xff] }
 0xb59   :  { %v4514_v17 = vsel %vm352_vm6, %v12097_v9, %v4508_v55  ;;  %v4533_v3 = vmul.f32 %v4526_v35, %v14352_v14  ;;  %v4535_v10 = vmul.f32 %v4518_v47, %v14252_v1  ;;  %v4777_v32 = vmul.f32 %v4763_v15, %v14353_v56  ;;  %v14357_v9 = vld [vmem:[#allocation17_spill] sm:$0xff]  ;;  %v14358_v35 = vld [vmem:[#allocation106_spill] sm:$0xff] }
 0xb5a   :  { %v4618_v53 = vpack.c.bf16 %v4604_v37, %v4603_v48  ;;  %v4863_v11 = vpack.c.bf16 %v4854_v57, %v4853_v4  ;;  %5419 = vmatpush.bf16.msrb.mxu3 %v5317_v58  ;;  %v5265_v31 = vunpack.c.l.b16 %v4861_v38  ;;  %v14355_v48 = vld [vmem:[#allocation38_spill] sm:$0xff]  ;;  %v5266_v51 = vunpack.c.h.b16 %v4861_v38 }
 0xb5b   :  { %v4778_v8 = vmul.f32 %v4759_v30, %v14355_v48  ;;  %v12484_v46 = vpack.c.b16 %v5144_v63, %v5140_v21  ;;  %v4536_v55 = vmul.f32 %v4514_v17, %v14357_v9  ;;  %v5103_v47 = vunpack.c.l.b16 %v4620_v13 }
 0xb5c   :  { %v5269_v16 = vunpack.c.l.b16 %v4863_v11  ;;  %v5099_v59 = vunpack.c.l.b16 %v4618_v53  ;;  %v5270_v6 = vunpack.c.h.b16 %v4863_v11  ;;  %v4547_v15 = vpack.c.bf16 %v4534_v22, %v4533_v3  ;;  %v14359_v11 = vld [vmem:[#allocation6_spill] sm:$0xff] }
 0xb5d   :  { %v12482_v26 = vpop.permute.xlu2 %4891  ;;  %14356 = vst [vmem:[#allocation73_spill] sm:$0xff] %v12484_v46  ;;  %v5100_v29 = vunpack.c.h.b16 %v4618_v53  ;;  %v4789_v21 = vpack.c.bf16 %v4778_v8, %v4777_v32  ;;  %v4548_v53 = vpack.c.bf16 %v4536_v55, %v4535_v10  ;;  %v14390_v46 = vld [vmem:[#allocation98_spill] sm:$0xff] }
 0xb5e   :  { %v4506_v57 = vpop.permute.xlu1 %4505  ;;  %v4736_v4 = vpop.permute.xlu0 %4735  ;;  %5420 = vmatpush.bf16.msrb.mxu3 %v5313_v23  ;;  %v5277_v17 = vpack.c.b16 %v5269_v16, %v5265_v31  ;;  %v12505_v45 = vpack.c.b16 %v5103_v47, %v5099_v59  ;;  %v12507_v30 = vpack.c.b16 %v5270_v6, %v5266_v51 }
 0xb5f   :  { %v4513_v34 = vsel %vm352_vm6, %v11972_v39, %v4506_v57  ;;  %v4525_v58 = vsel %vm352_vm6, %v4506_v57, %v11936_v36  ;;  %v4760_v37 = vsel %vm491_vm5, %v4736_v4, %v14358_v35  ;;  %v4764_v3 = vsel %vm491_vm5, %v14359_v11, %v4736_v4 }
 0xb60   :  { %v4529_v63 = vmul.f32 %v4525_v58, %v14352_v14  ;;  %v4532_v38 = vmul.f32 %v4513_v34, %v14357_v9  ;;  %v4781_v39 = vmul.f32 %v4764_v3, %v14353_v56  ;;  %v4782_v22 = vmul.f32 %v4760_v37, %v14355_v48  ;;  %14360 = vst [vmem:[#allocation9_spill] sm:$0xff] %v12507_v30  ;;  %v14369_v3 = vld [vmem:[#allocation39_spill] sm:$0xff] }
 0xb61   :  { %v5104_v36 = vunpack.c.h.b16 %v4620_v13  ;;  %v5061_v56 = vunpack.c.l.b16 %v4547_v15  ;;  %v5062_v48 = vunpack.c.h.b16 %v4547_v15  ;;  %v14362_v13 = vld [vmem:[#allocation109_spill] sm:$0xff]  ;;  %v14365_v15 = vunpack.c.l.b16 %v11797_v42  ;;  %v14372_v42 = vld [vmem:[#allocation91_spill] sm:$0xff] }
 0xb62   :  { %v4545_v23 = vpack.c.bf16 %v12375_v5, %v4529_v63  ;;  %v4546_v28 = vpack.c.bf16 %v4532_v38, %v12427_v19  ;;  %v4791_v57 = vpack.c.bf16 %v4782_v22, %v4781_v39  ;;  %5421 = vmatpush.bf16.msrb.mxu3 %v5277_v17  ;;  %v4665_v5 = vsel %vm434_vm8, %v14362_v13, %v11881_v41  ;;  %v14363_v19 = vld [vmem:[#allocation114_spill] sm:$0xff]  ;;  %v14370_v22 = vld [vmem:[#allocation45_spill] sm:$0xff] }
 0xb63   :  { %v12509_v34 = vpack.c.b16 %v5104_v36, %v5100_v29  ;;  %v4593_v31 = vsel %vm393_vm9, %v14363_v19, %v11894_v49  ;;  %v5225_v41 = vunpack.c.l.b16 %v4789_v21  ;;  %v14366_v29 = vunpack.c.l.b16 %v11802_v7 }
 0xb64   :  { %v5057_v4 = vunpack.c.l.b16 %v4545_v23  ;;  %v5058_v58 = vunpack.c.h.b16 %v4545_v23  ;;  %v5229_v10 = vunpack.c.l.b16 %v4791_v57  ;;  %v5059_v8 = vunpack.c.l.b16 %v4546_v28 }
 0xb65   :  { %14361 = vst [vmem:[#allocation10_spill] sm:$0xff] %v12509_v34  ;;  %v12519_v32 = vpop.permute.xlu2 %4821  ;;  %v5230_v47 = vunpack.c.h.b16 %v4791_v57  ;;  %v5060_v6 = vunpack.c.h.b16 %v4546_v28  ;;  %v5197_v49 = vpack.c.b16 %v14366_v29, %v14365_v15  ;;  %v14367_v63 = vunpack.c.l.b16 %v11748_v12  ;;  %v14371_v28 = vld [vmem:[#allocation42_spill] sm:$0xff]  ;;  %v14374_v12 = vld [vmem:[#allocation80_spill] sm:$0xff] }
 0xb66   :  { %14364 = vst [vmem:[#allocation11_spill] sm:$0xff] %v12519_v32  ;;  %v12521_v16 = vpop.permute.xlu1 %4889  ;;  %v12523_v51 = vpop.permute.xlu0 %4639  ;;  %v12525_v55 = vpack.c.b16 %v5061_v56, %v5057_v4  ;;  %v12527_v59 = vpack.c.b16 %v5062_v48, %v5058_v58  ;;  %v14368_v38 = vunpack.c.l.b16 %v11763_v44  ;;  %v4674_v39 = vmul.f32 %v4665_v5, %v14369_v3  ;;  %5422 = vmatpush.bf16.msrb.mxu3 %v14370_v22  ;;  %v14373_v4 = vld [vmem:[#allocation68_spill] sm:$0xff]  ;;  %v14376_v48 = vld [vmem:[#allocation123_spill] sm:$0xff]  ;;  %v14379_v15 = vld [vmem:[#allocation90_spill] sm:$0xff] }
 0xb67   :  { %v5063_v17 = vunpack.c.l.b16 %v4548_v53  ;;  %v5226_v36 = vunpack.c.h.b16 %v4789_v21  ;;  %v5064_v23 = vunpack.c.h.b16 %v4548_v53  ;;  %v12542_v57 = vmul.f32 %v4593_v31, %v14371_v28  ;;  %v14375_v58 = vld [vmem:[#allocation88_spill] sm:$0xff] }
 0xb68   :  { %v12537_v37 = vpack.c.b16 %v14368_v38, %v14367_v63  ;;  %v4449_v7 = vsel %vm311_vm10, %v14373_v4, %v14372_v42  ;;  %v4453_v44 = vsel %vm311_vm10, %v14374_v12, %v14373_v4  ;;  %v5237_v56 = vpack.c.b16 %v5229_v10, %v5225_v41  ;;  %v14380_v63 = vld [vmem:[#allocation25_spill] sm:$0xff]  ;;  %v14381_v41 = vld [vmem:[#allocation76_spill] sm:$0xff] }
 0xb69   :  { %v4450_v21 = vsel %vm311_vm10, %v14376_v48, %v14375_v58  ;;  %v12556_v53 = vpack.c.b16 %v5063_v17, %v5059_v8  ;;  %v12558_v5 = vpack.c.b16 %v5230_v47, %v5226_v36  ;;  %v12560_v31 = vpack.c.b16 %v5064_v23, %v5060_v6  ;;  %v14382_v6 = vld [vmem:[#allocation52_spill] sm:$0xff] }
 0xb6a   :  { %v4666_v29 = vsel %vm434_vm8, %v14379_v15, %v12083_v0  ;;  %v4594_v10 = vsel %vm393_vm9, %v14380_v63, %v12099_v43  ;;  %v4670_v8 = vsel %vm434_vm8, %v12335_v61, %v14379_v15  ;;  %v5338_v47 = vunpack.c.h.b16 %v12327_v33  ;;  %v14383_v22 = vld [vmem:[#allocation32_spill] sm:$0xff]  ;;  %5423 = vmatpush.bf16.msrb.mxu3 %v5237_v56  ;;  %v14388_v15 = vld [vmem:[#allocation29_spill] sm:$0xff] }
 0xb6b   :  { %14377 = vst [vmem:[#allocation69_spill] sm:$0xff] %v12558_v5  ;;  %v4451_v38 = vsel %vm311_vm10, %v14382_v6, %v14381_v41  ;;  %v14384_v17 = vld [vmem:[#allocation28_spill] sm:$0xff]  ;;  %v4669_v43 = vsel %vm434_vm8, %v12393_v27, %v14362_v13  ;;  %v4678_v35 = vmul.f32 %v4666_v29, %v14369_v3  ;;  %v14392_v27 = vld [vmem:[#allocation46_spill] sm:$0xff]  ;;  %v5342_v42 = vunpack.c.h.b16 %v12321_v25 }
 0xb6c   :  { %14378 = vst [vmem:[#allocation27_spill] sm:$0xff] %v12560_v31  ;;  %v4667_v0 = vsel %vm434_vm8, %v14384_v17, %v14383_v22  ;;  %v14385_v36 = vld [vmem:[#allocation56_spill] sm:$0xff]  ;;  %v4677_v13 = vmul.f32 %v4670_v8, %v14392_v27  ;;  %v4606_v12 = vmul.f32 %v4594_v10, %v14371_v28  ;;  %v4673_v8 = vmul.f32 %v4669_v43, %v14392_v27  ;;  %v14395_v10 = vld [vmem:[#allocation102_spill] sm:$0xff] }
 0xb6d   :  { %v4457_v23 = vmul.f32 %v4453_v44, %v14385_v36  ;;  %v14386_v61 = vld [vmem:[#allocation48_spill] sm:$0xff]  ;;  %v4656_v11 = vpop.permute.xlu2 %4655  ;;  %v4682_v29 = vmul.f32 %v4667_v0, %v14369_v3  ;;  %v14397_v43 = vld [vmem:[#allocation58_spill] sm:$0xff]  ;;  %v5346_v41 = vunpack.c.h.b16 %v12319_v40 }
 0xb6e   :  { %v4458_v33 = vmul.f32 %v4449_v7, %v14386_v61  ;;  %v12590_v4 = vmul.f32 %v4450_v21, %v14386_v61  ;;  %v14389_v31 = vld [vmem:[#allocation92_spill] sm:$0xff]  ;;  %v4598_v7 = vsel %vm393_vm9, %v12378_v2, %v14380_v63  ;;  %v12606_v56 = vpop.permute.xlu1 %4961  ;;  %v12608_v21 = vpop.permute.xlu0 %4567  ;;  %v12613_v30 = vmul.f32 %v4451_v38, %v14386_v61  ;;  %5424 = vmatpush.bf16.msrb.mxu3 %v14395_v10  ;;  %v14396_v38 = vld [vmem:[#allocation97_spill] sm:$0xff] }
 0xb6f   :  { %v4595_v34 = vsel %vm393_vm9, %v14389_v31, %v14388_v15  ;;  %v14391_v5 = vld [vmem:[#allocation8_spill] sm:$0xff]  ;;  %v4672_v25 = vsel %vm434_vm8, %v4656_v11, %v14394_v52  ;;  %v4663_v0 = vsel %vm434_vm8, %v14383_v22, %v14396_v38  ;;  %v12640_v32 = vpack.c.bf16 %v4678_v35, %v4677_v13 }
 0xb70   :  { %14387 = vst [vmem:[#allocation30_spill] sm:$0xff] %v12590_v4  ;;  %v4523_v44 = vsel %vm352_vm6, %v14391_v5, %v14390_v46  ;;  %v12618_v58 = vmul.f32 %v4595_v34, %v14371_v28  ;;  %v12623_v63 = vpack.c.bf16 %v4458_v33, %v4457_v23  ;;  %v4591_v34 = vsel %vm393_vm9, %v14388_v15, %v14397_v43  ;;  %v14398_v23 = vld [vmem:[#allocation43_spill] sm:$0xff] }
 0xb71   :  { %14393 = vst [vmem:[#allocation37_spill] sm:$0xff] %v12613_v30  ;;  %v12621_v2 = vmul.f32 %v4523_v44, %v14346_v62  ;;  %v5350_v44 = vunpack.c.h.b16 %v12323_v24  ;;  %v4605_v33 = vmul.f32 %v4598_v7, %v14398_v23  ;;  %v4668_v10 = vsel %vm434_vm8, %v14394_v52, %v12523_v51  ;;  %v14399_v24 = vld [vmem:[#allocation85_spill] sm:$0xff]  ;;  %v14400_v52 = vld [vmem:[#allocation7_spill] sm:$0xff] }
 0xb72   :  { %v5354_v4 = vpack.c.b16 %v5342_v42, %v5338_v47  ;;  %v4519_v22 = vsel %vm352_vm6, %v14390_v46, %v12339_v60  ;;  %v12650_v15 = vpack.c.bf16 %v4674_v39, %v4673_v8  ;;  %v4660_v7 = vsel %vm434_vm8, %v14399_v24, %v4656_v11  ;;  %v14401_v42 = vld [vmem:[#allocation86_spill] sm:$0xff]  ;;  %5425 = vmatpush.bf16.msrb.mxu3 %v5197_v49 }
 0xb73   :  { %v4685_v40 = vmul.f32 %v4672_v25, %v14392_v27  ;;  %v4683_v35 = vmul.f32 %v4663_v0, %v14250_v50  ;;  %v12658_v13 = vmul.f32 %v4591_v34, %v14244_v18  ;;  %v12664_v47 = vsel %vm311_vm10, %v14401_v42, %v14400_v52  ;;  %v14402_v52 = vld [vmem:[#allocation87_spill] sm:$0xff]  ;;  %v14403_v46 = vld [vmem:[#allocation50_spill] sm:$0xff] }
 0xb74   :  { %v12667_v39 = vpack.c.bf16 %v4606_v12, %v4605_v33  ;;  %v4664_v11 = vsel %vm434_vm8, %v12523_v51, %v14399_v24  ;;  %v4686_v8 = vmul.f32 %v4668_v10, %v14369_v3  ;;  %v5358_v0 = vpack.c.b16 %v5350_v44, %v5346_v41  ;;  %v14404_v10 = vld [vmem:[#allocation81_spill] sm:$0xff] }
 0xb75   :  { %v4584_v25 = vpop.permute.xlu2 %4583  ;;  %v12675_v34 = vmul.f32 %v4519_v22, %v14252_v1  ;;  %v4597_v49 = vsel %vm393_vm9, %v14402_v52, %v14363_v19  ;;  %v4688_v12 = vmul.f32 %v4660_v7, %v14403_v46  ;;  %v5141_v42 = vunpack.c.l.b16 %v12640_v32 }
 0xb76   :  { %v4654_v33 = vpop.permute.xlu1 %4653  ;;  %v12682_v30 = vpop.permute.xlu0 %4495  ;;  %v4695_v51 = vpack.c.bf16 %v4686_v8, %v4685_v40  ;;  %v5137_v44 = vunpack.c.l.b16 %v12650_v15  ;;  %v4687_v19 = vmul.f32 %v4664_v11, %v14250_v50  ;;  %v4600_v22 = vsel %vm393_vm9, %v4584_v25, %v14404_v10  ;;  %5426 = vmatpush.bf16.msrb.mxu3 %v12537_v37 }
 0xb77   :  { %v4659_v3 = vsel %vm434_vm8, %v14396_v38, %v4654_v33  ;;  %v4671_v41 = vsel %vm434_vm8, %v4654_v33, %v14384_v17  ;;  %v4601_v38 = vmul.f32 %v4597_v49, %v14398_v23  ;;  %v5138_v40 = vunpack.c.h.b16 %v12650_v15  ;;  %v7377_v15 = vld [vmem:[%s13404_s11 + $0x24] sm:$0xf0]  ;;  %v14405_v33 = vld [vmem:[#allocation65_spill] sm:$0xff] }
 0xb78   :  { %v4681_v24 = vmul.f32 %v4671_v41, %v14392_v27  ;;  %v4684_v7 = vmul.f32 %v4659_v3, %v14403_v46  ;;  %v5142_v17 = vunpack.c.h.b16 %v12640_v32  ;;  %v5101_v52 = vunpack.c.l.b16 %v12667_v39  ;;  %v7874_v27 = vld [vmem:[%s13404_s11 + $0x1c] sm:$0xf] }
 0xb79   :  { %v4696_v50 = vpack.c.bf16 %v4688_v12, %v4687_v19  ;;  %v4596_v11 = vsel %vm393_vm9, %v14404_v10, %v12608_v21  ;;  %v5149_v46 = vunpack.c.l.b16 %v4695_v51  ;;  %v4613_v32 = vmul.f32 %v4600_v22, %v14398_v23 }
 0xb7a   :  { %5481 = vmatpush.bf16.msra.mxu3 %v5358_v0  ;;  %v4693_v37 = vpack.c.bf16 %v4682_v29, %v4681_v24  ;;  %v4694_v8 = vpack.c.bf16 %v4684_v7, %v4683_v35  ;;  %v5153_v0 = vpack.c.b16 %v5141_v42, %v5137_v44  ;;  %v12714_v49 = vor.u32 %v7874_v27, %v7377_v15 }
 0xb7b   :  { %v5150_v12 = vunpack.c.h.b16 %v4695_v51  ;;  %v4588_v29 = vsel %vm393_vm9, %v14405_v33, %v4584_v25  ;;  %v12720_v41 = vpack.c.bf16 %v12542_v57, %v4601_v38  ;;  %v4592_v19 = vsel %vm393_vm9, %v12608_v21, %v14405_v33  ;;  %v14406_v57 = vld [vmem:[#allocation59_spill] sm:$0xff] }
 0xb7c   :  { %v5145_v35 = vunpack.c.l.b16 %v4693_v37  ;;  %v5146_v3 = vunpack.c.h.b16 %v4693_v37  ;;  %v4614_v10 = vmul.f32 %v4596_v11, %v14371_v28  ;;  %v5147_v42 = vunpack.c.l.b16 %v4694_v8  ;;  %5427 = vmatmul.bf16.vlgmr.msrb.gmra.mxu3 %v12714_v49  ;;  %v14407_v11 = vld [vmem:[#allocation100_spill] sm:$0xff] }
 0xb7d   :  { %v4512_v44 = vpop.permute.xlu2 %4511  ;;  %v5151_v51 = vunpack.c.l.b16 %v4696_v50  ;;  %v5148_v22 = vunpack.c.h.b16 %v4694_v8  ;;  %v4616_v38 = vmul.f32 %v4588_v29, %v14406_v57 }
 0xb7e   :  { %5482 = vmatpush.bf16.msra.mxu3 %v5354_v4  ;;  %v4582_v24 = vpop.permute.xlu1 %4581  ;;  %v12727_v7 = vpop.permute.xlu0 %4435  ;;  %v5157_v25 = vpack.c.b16 %v5149_v46, %v5145_v35  ;;  %v5158_v37 = vpack.c.b16 %v5150_v12, %v5146_v3  ;;  %v4623_v27 = vpack.c.bf16 %v4614_v10, %v4613_v32  ;;  %v5152_v4 = vunpack.c.h.b16 %v4696_v50  ;;  %v14408_v50 = vld [vmem:[#allocation99_spill] sm:$0xff] }
 0xb7f   :  { %v4587_v21 = vsel %vm393_vm9, %v14397_v43, %v4582_v24  ;;  %v4599_v28 = vsel %vm393_vm9, %v4582_v24, %v14389_v31  ;;  %v4528_v8 = vsel %vm352_vm6, %v4512_v44, %v14407_v11  ;;  %v4615_v32 = vmul.f32 %v4592_v19, %v14244_v18 }
 0xb80   :  { %v4609_v15 = vmul.f32 %v4599_v28, %v14398_v23  ;;  %v4612_v46 = vmul.f32 %v4587_v21, %v14406_v57  ;;  %5405 = vmatpush.bf16.msrb.mxu1 %v5157_v25  ;;  %5447 = vmatpush.bf16.msra.mxu2 %v5158_v37  ;;  %v4524_v43 = vsel %vm352_vm6, %v14407_v11, %v12682_v30  ;;  %v5109_v19 = vunpack.c.l.b16 %v4623_v27 }
 0xb81   :  { %v5159_v12 = vpack.c.b16 %v5151_v51, %v5147_v42  ;;  %v5154_v31 = vpack.c.b16 %v5142_v17, %v5138_v40  ;;  %v4516_v33 = vsel %vm352_vm6, %v14408_v50, %v4512_v44  ;;  %v12754_v35 = vpack.c.b16 %v5152_v4, %v5148_v22  ;;  %v14410_v4 = vld [vmem:[#allocation72_spill] sm:$0xff] }
 0xb82   :  { %v4621_v29 = vpack.c.bf16 %v12618_v58, %v4609_v15  ;;  %v12752_v23 = vpack.c.bf16 %v4612_v46, %v12658_v13  ;;  %v12756_v3 = vpack.c.bf16 %v4616_v38, %v4615_v32  ;;  %v4520_v18 = vsel %vm352_vm6, %v12682_v30, %v14408_v50  ;;  %v14411_v32 = vld [vmem:[#allocation26_spill] sm:$0xff]  ;;  %v7998_v50 = vld [vmem:[%s13807_s30 + $0x38] ss:$0 sm:$0xff] }
 0xb83   :  { %v4541_v40 = vmul.f32 %v4528_v8, %v14352_v14  ;;  %5489 = vmatpush.bf16.msra.mxu0 %v5159_v12  ;;  %v5097_v17 = vunpack.c.l.b16 %v12720_v41  ;;  %v5110_v10 = vunpack.c.h.b16 %v4623_v27  ;;  %v4542_v42 = vmul.f32 %v4524_v43, %v14346_v62  ;;  %v14409_v27 = vld [vmem:[#allocation104_spill] sm:$0xff]  ;;  %v14412_v12 = vld [vmem:[#allocation83_spill] sm:$0xff] }
 0xb84   :  { %5406 = vmatpush.bf16.msrb.mxu1 %v5153_v0  ;;  %5448 = vmatpush.bf16.msra.mxu2 %v5154_v31  ;;  %v5105_v58 = vunpack.c.l.b16 %v4621_v29  ;;  %v5106_v13 = vunpack.c.h.b16 %v4621_v29  ;;  %v4544_v44 = vmul.f32 %v4516_v33, %v14357_v9  ;;  %v5107_v22 = vunpack.c.l.b16 %v12752_v23  ;;  %v7383_v31 = vld [vmem:[%s13404_s11 + $0x20] sm:$0xf] }
 0xb85   :  { %v4964_v51 = vpop.permute.xlu2 %4963  ;;  %v5098_v30 = vunpack.c.h.b16 %v12720_v41  ;;  %v4543_v24 = vmul.f32 %v4520_v18, %v14252_v1  ;;  %v5102_v38 = vunpack.c.h.b16 %v12667_v39  ;;  %v4551_v21 = vpack.c.bf16 %v4542_v42, %v4541_v40  ;;  %v7997_v39 = vld [vmem:[%s13807_s30 + $0x30] ss:$0 sm:$0xff] }
 0xb86   :  { %v4510_v25 = vpop.permute.xlu1 %4509  ;;  %v12769_v37 = vpop.permute.xlu0 %4819  ;;  %v5117_v0 = vpack.c.b16 %v5109_v19, %v5105_v58  ;;  %v5118_v57 = vpack.c.b16 %v5110_v10, %v5106_v13  ;;  %v5111_v1 = vunpack.c.l.b16 %v12756_v3  ;;  %v4969_v28 = vsel %vm614_vm7, %v14409_v27, %v12606_v56 }
 0xb87   :  { %5490 = vmatpush.bf16.msra.mxu0 %v12471_v54  ;;  %v4515_v62 = vsel %vm352_vm6, %v12339_v60, %v4510_v25  ;;  %v4527_v41 = vsel %vm352_vm6, %v4510_v25, %v14391_v5  ;;  %v4981_v54 = vsel %vm614_vm7, %v12606_v56, %v14410_v4  ;;  %v4552_v8 = vpack.c.bf16 %v4544_v44, %v4543_v24 }
 0xb88   :  { %v4537_v11 = vmul.f32 %v4527_v41, %v14352_v14  ;;  %v4540_v60 = vmul.f32 %v4515_v62, %v14357_v9  ;;  %5407 = vmatpush.bf16.msrb.mxu1 %v5117_v0  ;;  %5449 = vmatpush.bf16.msra.mxu2 %v5118_v57  ;;  %v5119_v5 = vpack.c.b16 %v5111_v1, %v5107_v22  ;;  %v5069_v29 = vunpack.c.l.b16 %v4551_v21  ;;  %v14416_v1 = vld [vmem:[#allocation95_spill] sm:$0xff] }
 0xb89   :  { %v5113_v15 = vpack.c.b16 %v5101_v52, %v5097_v17  ;;  %v5114_v46 = vpack.c.b16 %v5102_v38, %v5098_v30  ;;  %v4970_v43 = vsel %vm614_vm7, %v14411_v32, %v4964_v51  ;;  %v4982_v56 = vsel %vm614_vm7, %v4964_v51, %v14412_v12  ;;  %v14413_v51 = vld [vmem:[#allocation112_spill] sm:$0xff]  ;;  %v14417_v12 = vld [vmem:[#allocation119_spill] sm:$0xff] }
 0xb8a   :  { %v4549_v14 = vpack.c.bf16 %v12621_v2, %v4537_v11  ;;  %v4550_v9 = vpack.c.bf16 %v4540_v60, %v12675_v34  ;;  %v4987_v52 = vmul.f32 %v7997_v39, %v4969_v28  ;;  %v4988_v33 = vmul.f32 %v7998_v50, %v4981_v54  ;;  %v7876_v2 = vld [vmem:[%s13404_s11 + $0x28] sm:$0xf0]  ;;  %v14414_v30 = vld [vmem:[#allocation64_spill] sm:$0xff] }
 0xb8b   :  { %5491 = vmatpush.bf16.msra.mxu0 %v5119_v5  ;;  %v5070_v18 = vunpack.c.h.b16 %v4551_v21  ;;  %v12812_v58 = vor.u32 %v7876_v2, %v7383_v31  ;;  %v4991_v19 = vmul.f32 %v7997_v39, %v4970_v43  ;;  %v4992_v13 = vmul.f32 %v7998_v50, %v4982_v56 }
 0xb8c   :  { %5408 = vmatpush.bf16.msrb.mxu1 %v5113_v15  ;;  %v5065_v34 = vunpack.c.l.b16 %v4549_v14  ;;  %v5066_v40 = vunpack.c.h.b16 %v4549_v14  ;;  %v5067_v17 = vunpack.c.l.b16 %v4550_v9  ;;  %5450 = vmatpush.bf16.msra.mxu2 %v5114_v46  ;;  %v5071_v42 = vunpack.c.l.b16 %v4552_v8 }
 0xb8d   :  { %v4968_v10 = vpop.permute.xlu2 %4967  ;;  %v5108_v44 = vunpack.c.h.b16 %v12752_v23  ;;  %7386 = vmatmul.msk.bf16.vlgmr.msra.gmra.mxu3 %vm2031_vm12, %v12812_v58  ;;  %v14415_v23 = vld [vmem:[#allocation49_spill] sm:$0xff]  ;;  %v5112_v11 = vunpack.c.h.b16 %v12756_v3  ;;  %7385 = vmatmul.msk.bf16.vlgmr.msrb.gmra.mxu0 %vm2031_vm12, %v12812_v58  ;;  %v5068_v5 = vunpack.c.h.b16 %v4550_v9  ;;  %v5072_v15 = vunpack.c.h.b16 %v4552_v8  ;;  %v14418_v9 = vld [vmem:[#allocation60_spill] sm:$0xff] }
 0xb8e   :  { %v4972_v22 = vsel %vm614_vm7, %v14413_v51, %v4968_v10  ;;  %v4984_v24 = vsel %vm614_vm7, %v4968_v10, %v14414_v30  ;;  %v4966_v25 = vpop.permute.xlu1 %4965  ;;  %v12821_v0 = vpop.permute.xlu0 %4437  ;;  %v5077_v57 = vpack.c.b16 %v5069_v29, %v5065_v34  ;;  %v5078_v38 = vpack.c.b16 %v5070_v18, %v5066_v40  ;;  %v14421_v18 = vld [vmem:[#allocation105_spill] sm:$0xff]  ;;  %v14422_v40 = vld [vmem:[#allocation19_spill] sm:$0xff] }
 0xb8f   :  { %v4999_v21 = vmul.f32 %v7997_v39, %v4972_v22  ;;  %v5000_v62 = vmul.f32 %v7998_v50, %v4984_v24  ;;  %5492 = vmatpush.bf16.msra.mxu0 %v12505_v45  ;;  %v4971_v41 = vsel %vm614_vm7, %v14415_v23, %v4966_v25  ;;  %v4983_v27 = vsel %vm614_vm7, %v4966_v25, %v14416_v1  ;;  %v14425_v51 = vld [vmem:[#allocation41_spill] sm:$0xff]  ;;  %v14426_v22 = vld [vmem:[#allocation86_spill] sm:$0xff]  ;;  %v14429_v23 = vld [vmem:[#allocation124_spill] sm:$0xff] }
 0xb90   :  { %v4995_v28 = vmul.f32 %v7997_v39, %v4971_v41  ;;  %v4996_v4 = vmul.f32 %v7998_v50, %v4983_v27  ;;  %5409 = vmatpush.bf16.msrb.mxu1 %v5077_v57  ;;  %v5079_v54 = vpack.c.b16 %v5071_v42, %v5067_v17  ;;  %v4455_v45 = vsel %vm311_vm10, %v12821_v0, %v14382_v6  ;;  %v14423_v17 = vld [vmem:[#allocation115_spill] sm:$0xff]  ;;  %v14430_v41 = vld [vmem:[#allocation54_spill] sm:$0xff] }
 0xb91   :  { %v12833_v60 = vpack.c.bf16 %v5000_v62, %v4999_v21  ;;  %5451 = vmatpush.bf16.msra.mxu2 %v5078_v38  ;;  %v4454_v46 = vsel %vm311_vm10, %v12727_v7, %v14376_v48  ;;  %v12845_v32 = vpack.c.bf16 %v4992_v13, %v4991_v19  ;;  %v12849_v43 = vpack.c.b16 %v5112_v11, %v5108_v44  ;;  %v14428_v21 = vld [vmem:[#allocation22_spill] sm:$0xff]  ;;  %v14432_v11 = vld [vmem:[#allocation11_spill] sm:$0xff] }
 0xb92   :  { %v12847_v3 = vpack.c.bf16 %v4996_v4, %v4995_v28  ;;  %v4898_v6 = vsel %vm573_vm3, %v14417_v12, %v12482_v26  ;;  %v12855_v56 = vpack.c.bf16 %v4988_v33, %v4987_v52  ;;  %v5018_v8 = vunpack.c.h.b16 %v12623_v63  ;;  %v14419_v52 = vld [vmem:[#allocation13_spill] sm:$0xff]  ;;  %v14420_v33 = vld [vmem:[#allocation103_spill] sm:$0xff]  ;;  %v14431_v4 = vld [vmem:[#allocation30_spill] sm:$0xff] }
 0xb93   :  { %5493 = vmatpush.bf16.msra.mxu0 %v5079_v54  ;;  %v12858_v14 = vpack.c.b16 %v5072_v15, %v5068_v5  ;;  %v4910_v48 = vsel %vm573_vm3, %v12482_v26, %v14418_v9  ;;  %v5351_v31 = vunpack.c.l.b16 %v12833_v60  ;;  %v4465_v50 = vmul.f32 %v4455_v45, %v14385_v36  ;;  %v14433_v45 = vld [vmem:[#allocation44_spill] sm:$0xff]  ;;  %v14434_v5 = vld [vmem:[#allocation122_spill] sm:$0xff] }
 0xb94   :  { %v5347_v39 = vunpack.c.l.b16 %v12847_v3  ;;  %5410 = vmatpush.bf16.msrb.mxu1 %v12525_v55  ;;  %v4825_v29 = vsel %vm532_vm4, %v14420_v33, %v14419_v52  ;;  %v4837_v2 = vsel %vm532_vm4, %v14419_v52, %v14421_v18  ;;  %v4470_v26 = vmul.f32 %v12664_v47, %v14386_v61  ;;  %v14424_v47 = vld [vmem:[#allocation40_spill] sm:$0xff] }
 0xb95   :  { %v4461_v34 = vmul.f32 %v4454_v46, %v14385_v36  ;;  %5452 = vmatpush.bf16.msra.mxu2 %v12527_v59  ;;  %v4897_v55 = vsel %vm573_vm3, %v14422_v40, %v12521_v16  ;;  %v4909_v19 = vsel %vm573_vm3, %v12521_v16, %v14423_v17  ;;  %v5343_v61 = vunpack.c.l.b16 %v12845_v32  ;;  %v14427_v16 = vld [vmem:[#allocation37_spill] sm:$0xff]  ;;  %v12900_v57 = vpop.permute.xlu2 %4749 }
 0xb96   :  { %v12888_v13 = vpop.permute.xlu1 %4439  ;;  %v4894_v10 = vpop.permute.xlu0 %4893  ;;  %v5359_v42 = vpack.c.b16 %v5351_v31, %v5347_v39  ;;  %v4919_v44 = vmul.f32 %v4898_v6, %v14424_v47  ;;  %v4920_v59 = vmul.f32 %v4910_v48, %v14425_v51  ;;  %v5339_v24 = vunpack.c.l.b16 %v12855_v56  ;;  %v14435_v6 = vld [vmem:[#allocation55_spill] sm:$0xff] }
 0xb97   :  { %5494 = vmatpush.bf16.msra.mxu0 %v12556_v53  ;;  %v4456_v30 = vsel %vm311_vm10, %v12888_v13, %v14426_v22  ;;  %v4477_v25 = vpack.c.bf16 %v14427_v16, %v4465_v50  ;;  %v4899_v62 = vsel %vm573_vm3, %v14428_v21, %v4894_v10  ;;  %v4911_v53 = vsel %vm573_vm3, %v4894_v10, %v14429_v23  ;;  %v14439_v16 = vld [vmem:[#allocation96_spill] sm:$0xff] }
 0xb98   :  { %v4469_v38 = vmul.f32 %v4456_v30, %v14385_v36  ;;  %5523 = vmatpush.bf16.msrb.mxu3 %v5359_v42  ;;  %v4843_v1 = vmul.f32 %v4825_v29, %v14430_v41  ;;  %v4915_v27 = vmul.f32 %v4897_v55, %v14424_v47  ;;  %v4916_v28 = vmul.f32 %v4909_v19, %v14425_v51  ;;  %v14438_v30 = vld [vmem:[#allocation118_spill] sm:$0xff] }
 0xb99   :  { %v4475_v54 = vpack.c.bf16 %v14431_v4, %v4461_v34  ;;  %v4827_v36 = vsel %vm532_vm4, %v14433_v45, %v14432_v11  ;;  %v4839_v15 = vsel %vm532_vm4, %v14432_v11, %v14434_v5  ;;  %v5355_v12 = vpack.c.b16 %v5343_v61, %v5339_v24  ;;  %v14441_v11 = vld [vmem:[#allocation23_spill] sm:$0xff] }
 0xb9a   :  { %v4479_v46 = vpack.c.bf16 %v4470_v26, %v4469_v38  ;;  %v4844_v9 = vmul.f32 %v4837_v2, %v14435_v6  ;;  %v12922_v48 = vpack.c.bf16 %v4920_v59, %v4919_v44  ;;  %v4923_v31 = vmul.f32 %v4899_v62, %v14424_v47  ;;  %v14436_v2 = vld [vmem:[#allocation117_spill] sm:$0xff]  ;;  %v14440_v62 = vld [vmem:[#allocation76_spill] sm:$0xff] }
 0xb9b   :  { %v4924_v39 = vmul.f32 %v4911_v53, %v14425_v51  ;;  %v5025_v50 = vunpack.c.l.b16 %v4477_v25  ;;  %v5026_v33 = vunpack.c.h.b16 %v4477_v25  ;;  %v4851_v18 = vmul.f32 %v4827_v36, %v14430_v41  ;;  %v14437_v44 = vld [vmem:[#allocation113_spill] sm:$0xff]  ;;  %v14442_v36 = vld [vmem:[#allocation18_spill] sm:$0xff] }
 0xb9c   :  { %5524 = vmatpush.bf16.msrb.mxu3 %v5355_v12  ;;  %v5029_v52 = vunpack.c.l.b16 %v4479_v46  ;;  %v5030_v29 = vunpack.c.h.b16 %v4479_v46  ;;  %v4852_v34 = vmul.f32 %v4839_v15, %v14435_v6  ;;  %v12928_v40 = vpack.c.bf16 %v4916_v28, %v4915_v27  ;;  %v7375_v53 = vld [vmem:[%s13404_s11 + $0x18] sm:$0xf]  ;;  %v7875_v27 = vld [vmem:[%s13404_s11 + $0x20] sm:$0xf0] }
 0xb9d   :  { %v5021_v26 = vunpack.c.l.b16 %v4475_v54  ;;  %v4826_v55 = vsel %vm532_vm4, %v14436_v2, %v12769_v37  ;;  %v5022_v61 = vunpack.c.h.b16 %v4475_v54  ;;  %v4838_v59 = vsel %vm532_vm4, %v12769_v37, %v14437_v44  ;;  %v4428_v4 = vpop.permute.xlu2 %4427 }
 0xb9e   :  { %v4896_v17 = vpop.permute.xlu1 %4895  ;;  %v4430_v19 = vpop.permute.xlu0 %4429  ;;  %v5037_v10 = vpack.c.b16 %v5029_v52, %v5025_v50  ;;  %v5038_v42 = vpack.c.b16 %v5030_v29, %v5026_v33  ;;  %v4934_v22 = vpack.c.bf16 %v4924_v39, %v4923_v31  ;;  %v5303_v28 = vunpack.c.l.b16 %v12922_v48  ;;  %v14444_v29 = vld [vmem:[#allocation67_spill] sm:$0xff] }
 0xb9f   :  { %v4900_v24 = vsel %vm573_vm3, %v14438_v30, %v4896_v17  ;;  %v4912_v25 = vsel %vm573_vm3, %v4896_v17, %v14439_v16  ;;  %7387 = vmatmul.msk.bf16.vlgmr.msrb.gmra.mxu3 %vm2031_vm12, %v12812_v58  ;;  %v4443_v37 = vsel %vm311_vm10, %v4430_v19, %v12821_v0  ;;  %v4447_v23 = vsel %vm311_vm10, %v14440_v62, %v4430_v19  ;;  %v14450_v30 = vld [vmem:[#allocation107_spill] sm:$0xff] }
 0xba0   :  { %v4927_v38 = vmul.f32 %v4900_v24, %v14424_v47  ;;  %v4928_v21 = vmul.f32 %v4912_v25, %v14425_v51  ;;  %5411 = vmatpush.bf16.msrb.mxu1 %v5037_v10  ;;  %v12960_v47 = vpack.c.bf16 %v4844_v9, %v4843_v1  ;;  %v12962_v51 = vpack.c.bf16 %v4852_v34, %v4851_v18  ;;  %v14445_v34 = vld [vmem:[#allocation82_spill] sm:$0xff] }
 0xba1   :  { %5453 = vmatpush.bf16.msra.mxu2 %v5038_v42  ;;  %v5299_v0 = vunpack.c.l.b16 %v12928_v40  ;;  %v4467_v45 = vmul.f32 %v4447_v23, %v14441_v11  ;;  %v4468_v5 = vmul.f32 %v4443_v37, %v14442_v36  ;;  %v14443_v15 = vunpack.c.l.b16 %v12623_v63  ;;  %v14451_v37 = vld [vmem:[#allocation51_spill] sm:$0xff]  ;;  %v14452_v23 = vld [vmem:[#allocation53_spill] sm:$0xff] }
 0xba2   :  { %v4936_v54 = vpack.c.bf16 %v4928_v21, %v4927_v38  ;;  %v4847_v12 = vmul.f32 %v4826_v55, %v14430_v41  ;;  %v4848_v1 = vmul.f32 %v4838_v59, %v14435_v6  ;;  %v5034_v9 = vpack.c.b16 %v5022_v61, %v5018_v8  ;;  %v14446_v8 = vld [vmem:[#allocation93_spill] sm:$0xff]  ;;  %v14447_v55 = vld [vmem:[#allocation88_spill] sm:$0xff] }
 0xba3   :  { %v5033_v46 = vpack.c.b16 %v5021_v26, %v14443_v15  ;;  %v12974_v31 = vor.u32 %v7875_v27, %v7375_v53  ;;  %v5307_v39 = vunpack.c.l.b16 %v4934_v22  ;;  %v5308_v50 = vunpack.c.h.b16 %v4934_v22  ;;  %v14449_v22 = vld [vmem:[#allocation24_spill] sm:$0xff] }
 0xba4   :  { %v5311_v52 = vunpack.c.l.b16 %v4936_v54  ;;  %v5312_v33 = vunpack.c.h.b16 %v4936_v54  ;;  %v4755_v18 = vsel %vm491_vm5, %v14444_v29, %v12900_v57  ;;  %v4767_v26 = vsel %vm491_vm5, %v12900_v57, %v14445_v34 }
 0xba5   :  { %5412 = vmatpush.bf16.msrb.mxu1 %v5033_v46  ;;  %v4442_v63 = vsel %vm311_vm10, %v4428_v4, %v12727_v7  ;;  %5454 = vmatpush.bf16.msra.mxu2 %v5034_v9  ;;  %v5300_v2 = vunpack.c.h.b16 %v12928_v40  ;;  %v4446_v17 = vsel %vm311_vm10, %v14447_v55, %v4428_v4  ;;  %v12992_v19 = vpack.c.bf16 %v4468_v5, %v4467_v45  ;;  %v14448_v7 = vld [vmem:[#allocation7_spill] sm:$0xff]  ;;  %v14453_v5 = vld [vmem:[#allocation89_spill] sm:$0xff] }
 0xba6   :  { %v4432_v10 = vpop.permute.xlu1 %4431  ;;  %v4824_v42 = vpop.permute.xlu0 %4823  ;;  %v5319_v61 = vpack.c.b16 %v5311_v52, %v5307_v39  ;;  %v5320_v44 = vpack.c.b16 %v5312_v33, %v5308_v50  ;;  %v4860_v21 = vpack.c.bf16 %v4848_v1, %v4847_v12  ;;  %v4779_v62 = vmul.f32 %v4755_v18, %v14451_v37  ;;  %v14456_v55 = vld [vmem:[#allocation91_spill] sm:$0xff] }
 0xba7   :  { %v4444_v57 = vsel %vm311_vm10, %v4432_v10, %v12888_v13  ;;  %v4448_v59 = vsel %vm311_vm10, %v14448_v7, %v4432_v10  ;;  %v4828_v40 = vsel %vm532_vm4, %v14449_v22, %v4824_v42  ;;  %v4840_v24 = vsel %vm532_vm4, %v4824_v42, %v14450_v30  ;;  %v14457_v10 = vld [vmem:[#allocation106_spill] sm:$0xff] }
 0xba8   :  { %5413 = vmatmul.bf16.vlgmr.msrb.gmra.mxu1 %v12974_v31  ;;  %v4471_v16 = vmul.f32 %v4448_v59, %v14441_v11  ;;  %v4472_v25 = vmul.f32 %v4444_v57, %v14442_v36  ;;  %v4855_v13 = vmul.f32 %v4828_v40, %v14430_v41  ;;  %v4856_v38 = vmul.f32 %v4840_v24, %v14435_v6 }
 0xba9   :  { %5461 = vmatpush.bf16.msra.mxu1 %v14446_v8  ;;  %5455 = vmatmul.bf16.vlgmr.msra.gmra.mxu2 %v12974_v31  ;;  %v4780_v53 = vmul.f32 %v4767_v26, %v14452_v23  ;;  %v5304_v27 = vunpack.c.h.b16 %v12922_v48  ;;  %v4463_v4 = vmul.f32 %v4446_v17, %v14441_v11  ;;  %v4464_v54 = vmul.f32 %v4442_v63, %v14442_v36  ;;  %v14455_v8 = vld [vmem:[#allocation80_spill] sm:$0xff] }
 0xbaa   :  { %5503 = vmatpush.bf16.msrb.mxu2 %v5319_v61  ;;  %5545 = vmatpush.bf16.msra.mxu3 %v5320_v44  ;;  %v13017_v45 = vpack.c.bf16 %v4472_v25, %v4471_v16  ;;  %v4864_v41 = vpack.c.bf16 %v4856_v38, %v4855_v13  ;;  %v5315_v6 = vpack.c.b16 %v5303_v28, %v5299_v0  ;;  %v5267_v46 = vunpack.c.l.b16 %v12962_v51  ;;  %v14454_v0 = vld [vmem:[#allocation9_spill] sm:$0xff]  ;;  %v14458_v61 = vld [vmem:[#allocation6_spill] sm:$0xff]  ;;  %v14459_v25 = vld [vmem:[#allocation47_spill] sm:$0xff] }
 0xbab   :  { %v5316_v15 = vpack.c.b16 %v5304_v27, %v5300_v2  ;;  %v5268_v12 = vunpack.c.h.b16 %v12962_v51  ;;  %v5027_v1 = vunpack.c.l.b16 %v12992_v19  ;;  %v4790_v50 = vpack.c.bf16 %v4780_v53, %v4779_v62 }
 0xbac   :  { %v5031_v9 = vunpack.c.l.b16 %v13017_v45  ;;  %v5271_v48 = vunpack.c.l.b16 %v4864_v41  ;;  %v5272_v39 = vunpack.c.h.b16 %v4864_v41  ;;  %v5259_v52 = vunpack.c.l.b16 %v12960_v47 }
 0xbad   :  { %5462 = vmatpush.bf16.msra.mxu1 %v14453_v5  ;;  %v5263_v33 = vunpack.c.l.b16 %v4860_v21  ;;  %v5264_v29 = vunpack.c.h.b16 %v4860_v21  ;;  %v13025_v18 = vpack.c.bf16 %v4464_v54, %v4463_v4  ;;  %v5260_v40 = vunpack.c.h.b16 %v12960_v47  ;;  %v14460_v47 = vld [vmem:[#allocation21_spill] sm:$0xff]  ;;  %v14462_v5 = vld [vmem:[#allocation20_spill] sm:$0xff] }
 0xbae   :  { %5504 = vmatpush.bf16.msrb.mxu2 %v5315_v6  ;;  %5546 = vmatpush.bf16.msra.mxu3 %v5316_v15  ;;  %v4426_v28 = vpop.permute.xlu1 %4425  ;;  %v4752_v34 = vpop.permute.xlu0 %4751  ;;  %v5039_v51 = vpack.c.b16 %v5031_v9, %v5027_v1  ;;  %v5279_v26 = vpack.c.b16 %v5271_v48, %v5267_v46  ;;  %v5280_v63 = vpack.c.b16 %v5272_v39, %v5268_v12  ;;  %v5348_v30 = vunpack.c.h.b16 %v12847_v3  ;;  %v14461_v54 = vld [vmem:[#allocation5_spill] sm:$0xff]  ;;  %v14463_v6 = vld [vmem:[#allocation71_spill] sm:$0xff] }
 0xbaf   :  { %v4441_v2 = vsel %vm311_vm10, %v4426_v28, %v14455_v8  ;;  %v4445_v17 = vsel %vm311_vm10, %v14456_v55, %v4426_v28  ;;  %v4756_v42 = vsel %vm491_vm5, %v14457_v10, %v4752_v34  ;;  %v4768_v44 = vsel %vm491_vm5, %v4752_v34, %v14458_v61  ;;  %v14465_v12 = vld [vmem:[#allocation69_spill] sm:$0xff]  ;;  %v14468_v28 = vld [vmem:[#allocation108_spill] sm:$0xff]  ;;  %v14471_v61 = vld [vmem:[#allocation79_spill] sm:$0xff] }
 0xbb0   :  { %v4459_v57 = vmul.f32 %v4445_v17, %v14441_v11  ;;  %v4460_v7 = vmul.f32 %v4441_v2, %v14442_v36  ;;  %v4783_v59 = vmul.f32 %v4756_v42, %v14451_v37  ;;  %v4784_v22 = vmul.f32 %v4768_v44, %v14452_v23  ;;  %5495 = vmatpush.bf16.msra.mxu0 %v5039_v51  ;;  %v14469_v51 = vld [vmem:[#allocation70_spill] sm:$0xff]  ;;  %v14470_v10 = vld [vmem:[#allocation101_spill] sm:$0xff] }
 0xbb1   :  { %5463 = vmatpush.bf16.msra.mxu1 %v14454_v0  ;;  %v5275_v13 = vpack.c.b16 %v5263_v33, %v5259_v52  ;;  %v5352_v11 = vunpack.c.h.b16 %v12833_v60  ;;  %v5276_v36 = vpack.c.b16 %v5264_v29, %v5260_v40  ;;  %v5227_v38 = vunpack.c.l.b16 %v4790_v50  ;;  %v14464_v60 = vld [vmem:[#allocation78_spill] sm:$0xff]  ;;  %v14466_v33 = vld [vmem:[#allocation75_spill] sm:$0xff] }
 0xbb2   :  { %5505 = vmatpush.bf16.msrb.mxu2 %v5279_v26  ;;  %5547 = vmatpush.bf16.msra.mxu3 %v5280_v63  ;;  %v13046_v24 = vpack.c.bf16 %v4460_v7, %v4459_v57  ;;  %v4792_v16 = vpack.c.bf16 %v4784_v22, %v4783_v59  ;;  %v5228_v21 = vunpack.c.h.b16 %v4790_v50  ;;  %v5023_v53 = vunpack.c.l.b16 %v13025_v18  ;;  %v14467_v29 = vld [vmem:[#allocation110_spill] sm:$0xff]  ;;  %v14472_v7 = vld [vmem:[#allocation63_spill] sm:$0xff]  ;;  %v14473_v22 = vld [vmem:[#allocation12_spill] sm:$0xff] }
 0xbb3   :  { %v5344_v3 = vunpack.c.h.b16 %v12845_v32  ;;  %v4708_v41 = vmul.f32 %v14461_v54, %v14460_v47  ;;  %v4711_v15 = vmul.f32 %v14463_v6, %v14462_v5  ;;  %v4712_v46 = vmul.f32 %v14464_v60, %v14460_v47 }
 0xbb4   :  { %v5019_v62 = vunpack.c.l.b16 %v13046_v24  ;;  %v5231_v27 = vunpack.c.l.b16 %v4792_v16  ;;  %v5232_v4 = vunpack.c.h.b16 %v4792_v16  ;;  %v5360_v52 = vpack.c.b16 %v5352_v11, %v5348_v30 }
 0xbb5   :  { %5464 = vmatpush.bf16.msra.mxu1 %v14459_v25  ;;  %v5340_v17 = vunpack.c.h.b16 %v12855_v56  ;;  %v4707_v42 = vmul.f32 %v14470_v10, %v14462_v5  ;;  %v4704_v20 = vmul.f32 %v14471_v61, %v14460_v47  ;;  %v4720_v59 = vpack.c.bf16 %v4712_v46, %v4711_v15  ;;  %v14474_v56 = vld [vmem:[#allocation111_spill] sm:$0xff]  ;;  %v14477_v15 = vld [vmem:[#allocation61_spill] sm:$0xff] }
 0xbb6   :  { %5506 = vmatpush.bf16.msrb.mxu2 %v5275_v13  ;;  %5548 = vmatpush.bf16.msra.mxu3 %v5276_v36  ;;  %v4748_v1 = vpop.permute.xlu1 %4747  ;;  %v4746_v9 = vpop.permute.xlu0 %4745  ;;  %v5035_v48 = vpack.c.b16 %v5023_v53, %v5019_v62  ;;  %v5239_v39 = vpack.c.b16 %v5231_v27, %v5227_v38  ;;  %v5240_v50 = vpack.c.b16 %v5232_v4, %v5228_v21  ;;  %v14475_v36 = vld [vmem:[#allocation77_spill] sm:$0xff]  ;;  %v14476_v62 = vld [vmem:[#allocation84_spill] sm:$0xff]  ;;  %v8014_v10 = vld [vmem:[%s14165_s0 + $0x48] sm:$0xff]  ;;  %vm3617_vm3 = vcmask 1024  }
 0xbb7   :  { %v4754_v32 = vsel %vm491_vm5, %v14466_v33, %v4748_v1  ;;  %v4766_v0 = vsel %vm491_vm5, %v4748_v1, %v14467_v29  ;;  %v4753_v34 = vsel %vm491_vm5, %v14468_v28, %v4746_v9  ;;  %v4765_v26 = vsel %vm491_vm5, %v4746_v9, %v14469_v51  ;;  %v8000_v1 = vld [vmem:[%s14165_s0 + $0x70] sm:$0xff]  ;;  %v8001_v33 = vld [vmem:[%s14165_s0 + $0x68] sm:$0xff]  ;;  %v14479_v28 = vld [vmem:[#allocation10_spill] sm:$0xff] }
 0xbb8   :  { %v4775_v63 = vmul.f32 %v4754_v32, %v14451_v37  ;;  %v4776_v8 = vmul.f32 %v4766_v0, %v14452_v23  ;;  %v4771_v2 = vmul.f32 %v4753_v34, %v14451_v37  ;;  %v4772_v55 = vmul.f32 %v4765_v26, %v14452_v23  ;;  %5496 = vmatpush.bf16.msra.mxu0 %v5035_v48  ;;  %v8003_v32 = vld [vmem:[%s14165_s0 + $0xf8] sm:$0xff]  ;;  %v8004_v29 = vld [vmem:[%s14165_s0 + $0x30] sm:$0xff]  ;;  %v8005_v0 = vld [vmem:[%s14165_s0 + $0x60] sm:$0xff] }
 0xbb9   :  { %5465 = vmatpush.bf16.msra.mxu1 %v14465_v12  ;;  %v5356_v37 = vpack.c.b16 %v5344_v3, %v5340_v17  ;;  %v4718_v23 = vpack.c.bf16 %v4708_v41, %v4707_v42  ;;  %v4700_v40 = vmul.f32 %v14473_v22, %v14460_v47  ;;  %v4703_v30 = vmul.f32 %v14474_v56, %v14462_v5  ;;  %v7999_v47 = vld [vmem:[%s14165_s0 + $0x78] sm:$0xff]  ;;  %v8009_v34 = vld [vmem:[%s14165_s0 + $0xe8] sm:$0xff]  ;;  %v8010_v26 = vld [vmem:[%s14165_s0 + $0x20] sm:$0xff] }
 0xbba   :  { %5507 = vmatpush.bf16.msrb.mxu2 %v5239_v39  ;;  %5549 = vmatpush.bf16.msra.mxu3 %v5240_v50  ;;  %v4788_v44 = vpack.c.bf16 %v4776_v8, %v4775_v63  ;;  %v4786_v57 = vpack.c.bf16 %v4772_v55, %v4771_v2  ;;  %v4699_v38 = vmul.f32 %v14475_v36, %v14462_v5  ;;  %v5191_v4 = vunpack.c.l.b16 %v4720_v59  ;;  %v8011_v63 = vld [vmem:[%s14165_s0 + $0x50] sm:$0xff]  ;;  %v8012_v8 = vld [vmem:[%s14165_s0 + $0xe0] sm:$0xff]  ;;  %v14480_v2 = vld [vmem:[#allocation27_spill] sm:$0xff]  ;;  %v5380_v36 = vpop.permute.xlu2 %5379 }
 0xbbb   :  { %5497 = vmatmul.bf16.vlgmr.msra.gmra.mxu0 %v12974_v31  ;;  %v4716_v21 = vpack.c.bf16 %v4704_v20, %v4703_v30  ;;  %v5192_v3 = vunpack.c.h.b16 %v4720_v59  ;;  %v5187_v54 = vunpack.c.l.b16 %v4718_v23  ;;  %v5188_v41 = vunpack.c.h.b16 %v4718_v23  ;;  %v8013_v17 = vld [vmem:[%s14165_s0 + $0x18] sm:$0xff]  ;;  %v8017_v20 = vld [vmem:[%s14165_s0 + $0x40] sm:$0xff]  ;;  %v8022_v59 = vld [vmem:[%s14165_s0 + $0xb0] sm:$0xff] }
 0xbbc   :  { %5565 = vmatpush.bf16.msrb.mxu0 %v5360_v52  ;;  %v5219_v16 = vunpack.c.l.b16 %v4786_v57  ;;  %v5223_v25 = vunpack.c.l.b16 %v4788_v44  ;;  %v5220_v13 = vunpack.c.h.b16 %v4786_v57  ;;  %v5224_v11 = vunpack.c.h.b16 %v4788_v44  ;;  %v14478_v52 = vld [vmem:[#allocation73_spill] sm:$0xff]  ;;  %v8018_v44 = vld [vmem:[%s14165_s0 + $0xd0] sm:$0xff]  ;;  %v8020_v57 = vld [vmem:[%s14165_s0 + $0x8] sm:$0xff] }
 0xbbd   :  { %5466 = vmatpush.bf16.msra.mxu1 %v14472_v7  ;;  %v4714_v6 = vpack.c.bf16 %v4700_v40, %v4699_v38  ;;  %v5199_v5 = vpack.c.b16 %v5191_v4, %v5187_v54  ;;  %v5200_v60 = vpack.c.b16 %v5192_v3, %v5188_v41  ;;  %v5183_v46 = vunpack.c.l.b16 %v4716_v21  ;;  %v8015_v42 = vld [vmem:[%s14165_s0 + $0xd8] sm:$0xff]  ;;  %v8021_v7 = vld [vmem:[%s14165_s0 + $0xc8] sm:$0xff]  ;;  %v8024_v23 = vld [vmem:[%s14165_s0 + $0xc0] sm:$0xff] }
 0xbbe   :  { %v5235_v53 = vpack.c.b16 %v5223_v25, %v5219_v16  ;;  %v5236_v27 = vpack.c.b16 %v5224_v11, %v5220_v13  ;;  %v5184_v12 = vunpack.c.h.b16 %v4716_v21  ;;  %v5032_v51 = vunpack.c.h.b16 %v13017_v45  ;;  %v8026_v22 = vld [vmem:[%s14165_s0 + $0xa0] sm:$0xff]  ;;  %v8027_v40 = vld [vmem:[%s14165_s0 + $0x98] sm:$0xff]  ;;  %v8028_v56 = vld [vmem:[%s14165_s0 + $0x90] sm:$0xff]  ;;  %v5385_v21 = vpop.permute.xlu0 %5384 }
 0xbbf   :  { %v5179_v9 = vunpack.c.l.b16 %v4714_v6  ;;  %v5180_v48 = vunpack.c.h.b16 %v4714_v6  ;;  %v5020_v55 = vunpack.c.h.b16 %v13046_v24  ;;  %v8016_v24 = vld [vmem:[%s14165_s0 + $0x10] sm:$0xff]  ;;  %v8029_v30 = vld [vmem:[%s14165_s0 + $0x88] sm:$0xff]  ;;  %v8030_v16 = vld [vmem:[%s14165_s0 + $0x80] sm:$0xff] }
 0xbc0   :  { %5566 = vmatpush.bf16.msrb.mxu0 %v5356_v37  ;;  %5508 = vmatpush.bf16.msrb.mxu2 %v5235_v53  ;;  %v8023_v37 = vld [vmem:[%s14165_s0] sm:$0xff] }
 0xbc1   :  { %5467 = vmatpush.bf16.msra.mxu1 %v14476_v62  ;;  %5550 = vmatpush.bf16.msra.mxu3 %v5236_v27  ;;  %v5195_v39 = vpack.c.b16 %v5183_v46, %v5179_v9  ;;  %v5196_v50 = vpack.c.b16 %v5184_v12, %v5180_v48 }
 0xbc4   :  { %5599 = vmatpush.bf16.msra.mxu0 %v7999_v47  ;;  %5509 = vmatpush.bf16.msrb.mxu2 %v5199_v5 }
 0xbc5   :  { %5468 = vmatpush.bf16.msra.mxu1 %v14477_v15  ;;  %5551 = vmatpush.bf16.msra.mxu3 %v5200_v60 }
 0xbc8   :  { %5600 = vmatpush.bf16.msra.mxu0 %v8000_v1  ;;  %5469 = vmatmul.bf16.vlgmr.msra.gmra.mxu1 %v12714_v49 }
 0xbc9   :  { %5531 = vmatpush.bf16.msrb.mxu1 %v12754_v35  ;;  %5510 = vmatpush.bf16.msrb.mxu2 %v5195_v39  ;;  %v8002_v35 = vld [vmem:[%s14165_s0 + $0x38] sm:$0xff] }
 0xbca   :  { %5552 = vmatpush.bf16.msra.mxu3 %v5196_v50 }
 0xbcb   :  { %7388 = vmatmul.msk.bf16.vlgmr.msrb.gmra.mxu0 %vm2031_vm12, %v12812_v58  ;;  %v8008_v58 = vld [vmem:[%s14165_s0 + $0x58] sm:$0xff] }
 0xbcc   :  { %5601 = vmatpush.bf16.msra.mxu0 %v8001_v33  ;;  %5511 = vmatmul.bf16.vlgmr.msrb.gmra.mxu2 %v12714_v49 }
 0xbcd   :  { %5532 = vmatpush.bf16.msrb.mxu1 %v14478_v52  ;;  %5585 = vmatpush.bf16.msra.mxu2 %v8002_v35 }
 0xbce   :  { %5627 = vmatpush.bf16.msrb.mxu3 %v8003_v32 }
 0xbcf   :  { %5553 = vmatmul.bf16.vlgmr.msra.gmra.mxu3 %v12714_v49  ;;  %v8007_v49 = vld [vmem:[%s14165_s0 + $0x28] sm:$0xff] }
 0xbd0   :  { %5602 = vmatpush.bf16.msra.mxu0 %v8005_v0 }
 0xbd1   :  { %5533 = vmatpush.bf16.msrb.mxu1 %v12849_v43  ;;  %5586 = vmatpush.bf16.msra.mxu2 %v8004_v29  ;;  %v8006_v43 = vld [vmem:[%s14165_s0 + $0xf0] sm:$0xff] }
 0xbd2   :  { %5628 = vmatpush.bf16.msrb.mxu3 %v8006_v43 }
 0xbd4   :  { %5603 = vmatpush.bf16.msra.mxu0 %v8008_v58 }
 0xbd5   :  { %5534 = vmatpush.bf16.msrb.mxu1 %v14479_v28  ;;  %5587 = vmatpush.bf16.msra.mxu2 %v8007_v49 }
 0xbd6   :  { %5629 = vmatpush.bf16.msrb.mxu3 %v8009_v34 }
 0xbd8   :  { %5604 = vmatpush.bf16.msra.mxu0 %v8011_v63 }
 0xbd9   :  { %5535 = vmatpush.bf16.msrb.mxu1 %v12858_v14  ;;  %5588 = vmatpush.bf16.msra.mxu2 %v8010_v26  ;;  %v5028_v14 = vunpack.c.h.b16 %v12992_v19  ;;  %v5024_v19 = vunpack.c.h.b16 %v13025_v18  ;;  %v8019_v18 = vld [vmem:[%s14165_s0 + $0xb8] sm:$0xff] }
 0xbda   :  { %5630 = vmatpush.bf16.msrb.mxu3 %v8012_v8 }
 0xbdb   :  { %v5040_v45 = vpack.c.b16 %v5032_v51, %v5028_v14  ;;  %v5036_v61 = vpack.c.b16 %v5024_v19, %v5020_v55 }
 0xbdc   :  { %5605 = vmatpush.bf16.msra.mxu0 %v8014_v10 }
 0xbdd   :  { %5536 = vmatpush.bf16.msrb.mxu1 %v14480_v2  ;;  %5589 = vmatpush.bf16.msra.mxu2 %v8013_v17 }
 0xbde   :  { %5631 = vmatpush.bf16.msrb.mxu3 %v8015_v42 }
 0xbe0   :  { %5606 = vmatpush.bf16.msra.mxu0 %v8017_v20 }
 0xbe1   :  { %5537 = vmatpush.bf16.msrb.mxu1 %v5040_v45  ;;  %5590 = vmatpush.bf16.msra.mxu2 %v8016_v24 }
 0xbe2   :  { %5632 = vmatpush.bf16.msrb.mxu3 %v8018_v44 }
 0xbe5   :  { %5538 = vmatpush.bf16.msrb.mxu1 %v5036_v61  ;;  %5591 = vmatpush.bf16.msra.mxu2 %v8020_v57 }
 0xbe6   :  { %5633 = vmatpush.bf16.msrb.mxu3 %v8021_v7 }
 0xbe8   :  { %5539 = vmatmul.bf16.vlgmr.msrb.gmra.mxu1 %v12974_v31  ;;  %v8025_v31 = vld [vmem:[%s14165_s0 + $0xa8] sm:$0xff]  ;;  %s14481_s0 = smov 121  }
 0xbe9   :  { %5613 = vmatpush.bf16.msra.mxu1 %v8019_v18  ;;  %5592 = vmatpush.bf16.msra.mxu2 %v8023_v37 }
 0xbea   :  { %5634 = vmatpush.bf16.msrb.mxu3 %v8024_v23 }
 0xbed   :  { %5614 = vmatpush.bf16.msra.mxu1 %v8022_v59 }
 0xbf1   :  { %5615 = vmatpush.bf16.msra.mxu1 %v8025_v31 }
 0xbf5   :  { %5616 = vmatpush.bf16.msra.mxu1 %v8026_v22 }
 0xbf9   :  { %5617 = vmatpush.bf16.msra.mxu1 %v8027_v40 }
 0xbfd   :  { %5618 = vmatpush.bf16.msra.mxu1 %v8028_v56 }
 0xbff   :  { %v5428_v25 = vpop.f32.mrf.mxu3 }
 0xc01   :  { %5619 = vmatpush.bf16.msra.mxu1 %v8029_v30 }
 0xc05   :  { %5620 = vmatpush.bf16.msra.mxu1 %v8030_v16 }
 0xc07   :  { %v5430_v27 = vpop.f32.mrf.mxu3 }
 0xc0a   :  { %v5442_v11 = vpop.f32.mrf.mxu0 }
 0xc10   :  { %v5484_v60 = vpop.f32.mrf.mxu3 }
 0xc12   :  { %v5444_v3 = vpop.f32.mrf.mxu0 }
 0xc18   :  { %v5486_v12 = vpop.f32.mrf.mxu3 }
 0xc22   :  { %v5526_v32 = vpop.f32.mrf.mxu3 }
 0xc25   :  { %v5414_v13 = vpop.f32.mrf.mxu1 }
 0xc26   :  { %v5415_v38 = vadd.f32 %v5414_v13, %v5380_v36 }
 0xc28   :  { %v5429_v62 = vadd.f32 %v5428_v25, %v5415_v38 }
 0xc2a   :  { %v5443_v47 = vadd.f32 %v5442_v11, %v5429_v62  ;;  %v5528_v8 = vpop.f32.mrf.mxu3 }
 0xc2c   :  { %v5573_v6 = vmax.f32 %v5443_v47, 0.0  ;;  %v5456_v46 = vpop.f32.mrf.mxu2 }
 0xc2d   :  { %v5416_v53 = vpop.f32.mrf.mxu1  ;;  %v5457_v9 = vadd.f32 %v5456_v46, %v5380_v36 }
 0xc2e   :  { %v5417_v4 = vadd.f32 %v5416_v53, %v5385_v21 }
 0xc30   :  { %v5431_v54 = vadd.f32 %v5430_v27, %v5417_v4 }
 0xc32   :  { %v5445_v41 = vadd.f32 %v5444_v3, %v5431_v54  ;;  %v14483_v3 = vld [vmem:[#allocation16_spill] sm:$0xff] }
 0xc34   :  { %v5577_v15 = vmax.f32 %v5445_v41, 0.0  ;;  %v5458_v48 = vpop.f32.mrf.mxu2 }
 0xc35   :  { %v5459_v52 = vadd.f32 %v5458_v48, %v5385_v21  ;;  %v14487_v48 = vld [vmem:[#allocation14_spill] sm:$0xff] }
 0xc36   :  { %v5581_v5 = vpack.c.bf16 %v5577_v15, %v5573_v6 }
 0xc38   :  { %5593 = vmatmul.bf16.vlgmr.msra.gmra.mxu2 %v5581_v5  ;;  %v5498_v50 = vpop.f32.mrf.mxu0 }
 0xc39   :  { %v5499_v58 = vadd.f32 %v5498_v50, %v5380_v36 }
 0xc40   :  { %v5500_v51 = vpop.f32.mrf.mxu0 }
 0xc41   :  { %v5501_v63 = vadd.f32 %v5500_v51, %v5385_v21 }
 0xc45   :  { %v5470_v1 = vpop.f32.mrf.mxu1 }
 0xc46   :  { %v5471_v39 = vadd.f32 %v5470_v1, %v5457_v9  ;;  %v7392_v1 = vld [vmem:[%s13407_s14 + $0x18] sm:$0x3]  ;;  %v7391_v9 = vld [vmem:[%s13407_s14 + $0x10] sm:$0xff] }
 0xc48   :  { %v5485_v35 = vadd.f32 %v5484_v60, %v5471_v39  ;;  %v5568_v24 = vpop.f32.mrf.mxu0 }
 0xc4a   :  { %v5574_v28 = vmax.f32 %v5485_v35, 0.0 }
 0xc4d   :  { %v5472_v33 = vpop.f32.mrf.mxu1 }
 0xc4e   :  { %v5473_v29 = vadd.f32 %v5472_v33, %v5459_v52  ;;  %v14488_v52 = vld [vmem:[#allocation121_spill] sm:$0xff] }
 0xc4f   :  { %v5512_v43 = vpop.f32.mrf.mxu2 }
 0xc50   :  { %v5487_v0 = vadd.f32 %v5486_v12, %v5473_v29  ;;  %v5513_v26 = vadd.f32 %v5512_v43, %v5499_v58  ;;  %v5570_v23 = vpop.f32.mrf.mxu0 }
 0xc52   :  { %v5578_v49 = vmax.f32 %v5487_v0, 0.0  ;;  %v5527_v14 = vadd.f32 %v5526_v32, %v5513_v26  ;;  %v5554_v19 = vpop.f32.mrf.mxu3 }
 0xc54   :  { %v5582_v34 = vpack.c.bf16 %v5578_v49, %v5574_v28  ;;  %v5575_v17 = vmax.f32 %v5527_v14, 0.0  ;;  %v14489_v49 = vld [vmem:[#allocation62_spill] sm:$0xff] }
 0xc56   :  { %5607 = vmatmul.bf16.vlgmr.msra.gmra.mxu0 %v5582_v34 }
 0xc57   :  { %v5514_v2 = vpop.f32.mrf.mxu2 }
 0xc58   :  { %v5515_v45 = vadd.f32 %v5514_v2, %v5501_v63  ;;  %v14490_v2 = vld [vmem:[#allocation31_spill] sm:$0xff] }
 0xc5a   :  { %v5529_v55 = vadd.f32 %v5528_v8, %v5515_v45  ;;  %v5556_v7 = vpop.f32.mrf.mxu3 }
 0xc5c   :  { %v5579_v10 = vmax.f32 %v5529_v55, 0.0 }
 0xc5e   :  { %v5583_v42 = vpack.c.bf16 %v5579_v10, %v5575_v17 }
 0xc60   :  { %5621 = vmatmul.bf16.vlgmr.msra.gmra.mxu1 %v5583_v42 }
 0xc65   :  { %v5540_v61 = vpop.f32.mrf.mxu1 }
 0xc66   :  { %v5541_v20 = vadd.f32 %v5540_v61, %v5380_v36 }
 0xc68   :  { %v5555_v44 = vadd.f32 %v5554_v19, %v5541_v20 }
 0xc6a   :  { %v5569_v59 = vadd.f32 %v5568_v24, %v5555_v44 }
 0xc6c   :  { %v5576_v22 = vmax.f32 %v5569_v59, 0.0 }
 0xc6d   :  { %v5542_v18 = vpop.f32.mrf.mxu1 }
 0xc6e   :  { %v5543_v57 = vadd.f32 %v5542_v18, %v5385_v21 }
 0xc70   :  { %v5557_v37 = vadd.f32 %v5556_v7, %v5543_v57  ;;  %v14491_v57 = vld [vmem:[#allocation120_spill] sm:$0xff] }
 0xc72   :  { %v5571_v31 = vadd.f32 %v5570_v23, %v5557_v37 }
 0xc74   :  { %v5580_v40 = vmax.f32 %v5571_v31, 0.0 }
 0xc76   :  { %v5584_v56 = vpack.c.bf16 %v5580_v40, %v5576_v22 }
 0xc78   :  { %5635 = vmatmul.bf16.vlgmr.msrb.gmra.mxu3 %v5584_v56 }
 0xcbb   :  { %v5594_v16 = vpop.f32.mrf.mxu2 }
 0xcc3   :  { %v5596_v21 = vpop.f32.mrf.mxu2 }
 0xcd3   :  { %v5608_v30 = vpop.f32.mrf.mxu0 }
 0xcd4   :  { %v5609_v13 = vadd.f32 %v5608_v30, %v5594_v16  ;;  %v14492_v30 = vld [vmem:[#allocation15_spill] sm:$0xff] }
 0xcdb   :  { %v5610_v36 = vpop.f32.mrf.mxu0 }
 0xcdc   :  { %v5611_v27 = vadd.f32 %v5610_v36, %v5596_v21 }
 0xcdd   :  { %v5622_v25 = vpop.f32.mrf.mxu1 }
 0xcde   :  { %v5623_v11 = vadd.f32 %v5622_v25, %v5609_v13 }
 0xce5   :  { %v5624_v53 = vpop.f32.mrf.mxu1 }
 0xce6   :  { %v5625_v4 = vadd.f32 %v5624_v53, %v5611_v27 }
 0xcfb   :  { %v5636_v38 = vpop.f32.mrf.mxu3 }
 0xcfc   :  { %v5637_v62 = vadd.f32 %v5636_v38, %v5623_v11 }
 0xcfe   :  { %5685 = vrot.lane.b32.xlu0 %v5637_v62, %s14481_s0  ;;  %5693 = vrot.lane.b32.xlu1 %v5637_v62, %s14482_s9  ;;  %v5673_v47 = vmul.f32 %v5637_v62, %v14483_v3 }
 0xd00   :  { %v5675_v15 = vpack.c.bf16 %v5673_v47, %v5673_v47 }
 0xd02   :  { %v13210_v60 = vunpack.c.l.b16 %v5675_v15  ;;  %v14494_v15 = vld [vmem:[#allocation66_spill] sm:$0xff] }
 0xd03   :  { %v5638_v54 = vpop.f32.mrf.mxu3 }
 0xd04   :  { %v5639_v41 = vadd.f32 %v5638_v54, %v5625_v4 }
 0xd06   :  { %5679 = vrot.lane.b32.xlu0 %v5639_v41, %s14192_s6  ;;  %5687 = vrot.lane.b32.xlu1 %v5639_v41, %s14481_s0  ;;  %v5674_v6 = vmul.f32 %v5639_v41, %v14483_v3 }
 0xd07   :  { %5695 = vrot.lane.b32.xlu2 %v5639_v41, %s14482_s9 }
 0xd08   :  { %v5676_v5 = vpack.c.bf16 %v5674_v6, %v5674_v6 }
 0xd0a   :  { %v13212_v46 = vunpack.c.l.b16 %v5676_v5 }
 0xd0c   :  { %v5737_v12 = vpack.c.b16 %v13212_v46, %v13210_v60 }
 0xd0e   :  { %5657 = vrot.lane.b32.xlu0 %v5637_v62, %s14484_s5  ;;  %5665 = vrot.lane.b32.xlu1 %v5637_v62, %s14194_s26 }
 0xd0f   :  { %5677 = vrot.lane.b32.xlu2 %v5637_v62, %s14192_s6 }
 0xd16   :  { %5651 = vrot.lane.b32.xlu0 %v5639_v41, %s8075_s29  ;;  %5659 = vrot.lane.b32.xlu1 %v5639_v41, %s14484_s5 }
 0xd17   :  { %5667 = vrot.lane.b32.xlu2 %v5639_v41, %s14194_s26 }
 0xd1e   :  { %5701 = vrot.lane.b32.xlu0 %v5637_v62, %s14485_s8  ;;  %5641 = vrot.lane.b32.xlu1 %v5637_v62, %s14486_s10 }
 0xd1f   :  { %5649 = vrot.lane.b32.xlu2 %v5637_v62, %s8075_s29  ;;  %v14493_v62 = vld [vmem:[#allocation35_spill] sm:$0xff] }
 0xd26   :  { %5776 = vperm.xlu0 %7977, %v7392_v1   ;;  %5703 = vrot.lane.b32.xlu1 %v5639_v41, %s14485_s8 }
 0xd27   :  { %5643 = vrot.lane.b32.xlu2 %v5639_v41, %s14486_s10 }
 0xd2f   :  { %5771 = vperm.xlu2 %7979, %v7391_v9  }
 0xd50   :  { %3610 = vadd.xlane.f32.xlu1 %v14487_v48 }
 0xd61   :  { %v5696_v39 = vpop.permute.xlu2 %5695 }
 0xd62   :  { %v5698_v33 = vmul.f32 %v5696_v39, %v14488_v52 }
 0xd64   :  { %v5700_v29 = vpack.c.bf16 %v5698_v33, %v5698_v33 }
 0xd66   :  { %v5754_v28 = vunpack.c.l.b16 %v5700_v29 }
 0xd69   :  { %v5678_v50 = vpop.permute.xlu2 %5677 }
 0xd6a   :  { %v5681_v14 = vmul.f32 %v5678_v50, %v14490_v2 }
 0xd6c   :  { %v5683_v19 = vpack.c.bf16 %v5681_v14, %v5681_v14  ;;  %v7877_v14 = vld [vmem:[%s13406_s13 + $0x14] sm:$0xf] }
 0xd6e   :  { %v5741_v23 = vunpack.c.l.b16 %v5683_v19 }
 0xd70   :  { %v5686_v35 = vpop.permute.xlu0 %5685  ;;  %v5694_v32 = vpop.permute.xlu1 %5693 }
 0xd71   :  { %v5697_v0 = vmul.f32 %v5694_v32, %v14488_v52  ;;  %v5689_v58 = vmul.f32 %v5686_v35, %v14489_v49  ;;  %v5668_v51 = vpop.permute.xlu2 %5667  ;;  %v8031_v32 = vld [vmem:[%s14168_s3 + $0x8] ss:$0 sm:$0xff] }
 0xd72   :  { %v5670_v7 = vmul.f32 %v5668_v51, %v14491_v57 }
 0xd73   :  { %v5699_v43 = vpack.c.bf16 %v5697_v0, %v5697_v0  ;;  %v5691_v45 = vpack.c.bf16 %v5689_v58, %v5689_v58 }
 0xd74   :  { %v5672_v56 = vpack.c.bf16 %v5670_v7, %v5670_v7 }
 0xd75   :  { %v5753_v34 = vunpack.c.l.b16 %v5699_v43  ;;  %v5747_v61 = vunpack.c.l.b16 %v5691_v45  ;;  %v7395_v43 = vld [vmem:[%s13406_s13 + $0x10] sm:$0xf]  ;;  %v7397_v45 = vld [vmem:[%s13406_s13 + $0x18] sm:$0x10] }
 0xd76   :  { %v5730_v13 = vunpack.c.l.b16 %v5672_v56 }
 0xd77   :  { %v5755_v26 = vpack.c.b16 %v5754_v28, %v5753_v34  ;;  %v7878_v28 = vld [vmem:[%s13406_s13 + $0x14] sm:$0x10] }
 0xd78   :  { %v5680_v63 = vpop.permute.xlu0 %5679  ;;  %v5688_v8 = vpop.permute.xlu1 %5687  ;;  %v7396_v34 = vor.u32 %v7878_v28, %v7395_v43 }
 0xd79   :  { %v5682_v55 = vmul.f32 %v5680_v63, %v14490_v2  ;;  %v5690_v17 = vmul.f32 %v5688_v8, %v14489_v49  ;;  %5791 = vmatpush.bf16.msrb.mxu2 %v5755_v26  ;;  %v5650_v18 = vpop.permute.xlu2 %5649 }
 0xd7a   :  { %v5653_v36 = vmul.f32 %v5650_v18, %v14493_v62 }
 0xd7b   :  { %v5684_v10 = vpack.c.bf16 %v5682_v55, %v5682_v55  ;;  %v5692_v42 = vpack.c.bf16 %v5690_v17, %v5690_v17  ;;  %v7400_v17 = vor.u32 %v7877_v14, %v7397_v45  ;;  %v7620_v14 = vld [vmem:[#allocation2 + $0x3c0] sm:$0xf]  ;;  %v7929_v45 = vld [vmem:[#allocation2 + $0x3c8] sm:$0xf0] }
 0xd7c   :  { %v5655_v41 = vpack.c.bf16 %v5653_v36, %v5653_v36 }
 0xd7d   :  { %v5748_v24 = vunpack.c.l.b16 %v5692_v42  ;;  %v5742_v20 = vunpack.c.l.b16 %v5684_v10  ;;  %v7985_v10 = vld [vmem:[%s13415_s22] ss:$0 sm:$0xff] }
 0xd7e   :  { %v5717_v50 = vunpack.c.l.b16 %v5655_v41  ;;  %v7421_v41 = vld [vmem:[%s13408_s15 + $0x28] sm:$0xf] }
 0xd7f   :  { %v5749_v44 = vpack.c.b16 %v5748_v24, %v5747_v61  ;;  %v5743_v22 = vpack.c.b16 %v5742_v20, %v5741_v23  ;;  %v7406_v61 = vld [vmem:[%s13409_s16 + $0x8] sm:$0xff] }
 0xd80   :  { %v5658_v59 = vpop.permute.xlu0 %5657  ;;  %v5666_v37 = vpop.permute.xlu1 %5665  ;;  %5844 = vst [vmem:[#allocation1] ss:$4 sm:$0xff] %v7406_v61  ;;  %v7512_v61 = vld [vmem:[#allocation2 + $0x2e8] sm:$0xf] }
 0xd81   :  { %v5669_v31 = vmul.f32 %v5666_v37, %v14491_v57  ;;  %5792 = vmatpush.bf16.msrb.mxu2 %v5749_v44  ;;  %v5661_v16 = vmul.f32 %v5658_v59, %v14492_v30  ;;  %v5644_v4 = vpop.permute.xlu2 %5643 }
 0xd82   :  { %v5646_v5 = vmul.f32 %v5644_v4, %v14494_v15  ;;  %v7881_v4 = vld [vmem:[%s13408_s15 + $0x2c] sm:$0x10] }
 0xd83   :  { %v5671_v40 = vpack.c.bf16 %v5669_v31, %v5669_v31  ;;  %v5663_v21 = vpack.c.bf16 %v5661_v16, %v5661_v16 }
 0xd84   :  { %v5648_v52 = vpack.c.bf16 %v5646_v5, %v5646_v5 }
 0xd85   :  { %5793 = vmatpush.bf16.msrb.mxu2 %v5743_v22  ;;  %v5729_v25 = vunpack.c.l.b16 %v5671_v40  ;;  %v5723_v6 = vunpack.c.l.b16 %v5663_v21  ;;  %v14495_v22 = vld [vmem:[#allocation74_spill] sm:$0xff] }
 0xd86   :  { %v5712_v35 = vunpack.c.l.b16 %v5648_v52 }
 0xd87   :  { %v5731_v3 = vpack.c.b16 %v5730_v13, %v5729_v25  ;;  %v5845_v20 = vld.sshfl [vmem:[#allocation1] sm:$0xff pattern:$0x73625140]  ;;  %v5846_v44 = vld.sshfl [vmem:[#allocation1 + $0x8] sm:$0xff pattern:$0x73625140] }
 0xd88   :  { %v5652_v11 = vpop.permute.xlu0 %5651  ;;  %v5660_v38 = vpop.permute.xlu1 %5659  ;;  %v5849_v18 = vsel %vm2680_vm13, %v5845_v20, 0  ;;  %v5851_v57 = vsel %vm2680_vm13, %v5846_v44, 0  ;;  %v5848_v59 = vld.sshfl [vmem:[#allocation1 + $0x18] sm:$0xff pattern:$0x73625140] }
 0xd89   :  { %v5654_v53 = vmul.f32 %v5652_v11, %v14493_v62  ;;  %v5662_v27 = vmul.f32 %v5660_v38, %v14492_v30  ;;  %5794 = vmatpush.bf16.msrb.mxu2 %v5737_v12  ;;  %5864 = vmatpush.bf16.msra.mxu3 %v5849_v18  ;;  %v5855_v37 = vsel %vm2680_vm13, %v5848_v59, 0  ;;  %v5772_v23 = vpop.permute.xlu2 %5771  ;;  %v5847_v11 = vld.sshfl [vmem:[#allocation1 + $0x10] sm:$0xff pattern:$0x73625140]  ;;  %v7902_v20 = vld [vmem:[#allocation2 + $0x2f0] sm:$0xf0] }
 0xd8a   :  { %v5853_v21 = vsel %vm2680_vm13, %v5847_v11, 0  ;;  %v7608_v44 = vld [vmem:[#allocation2 + $0x3a8] sm:$0xf]  ;;  %v7926_v18 = vld [vmem:[#allocation2 + $0x3b0] sm:$0xf0] }
 0xd8b   :  { %v5656_v47 = vpack.c.bf16 %v5654_v53, %v5654_v53  ;;  %v5664_v54 = vpack.c.bf16 %v5662_v27, %v5662_v27  ;;  %v8032_v53 = vld [vmem:[%s14179_s1] sm:$0x1]  ;;  %v7950_v59 = vld [vmem:[#allocation2 + $0x470] sm:$0xf0] }
 0xd8c   :  { %7407 = vmatmul.msk.bf16.vlgmr.msra.gmra.mxu3 %vm2676_vm14, %v14495_v22  ;;  %v7413_v27 = vld [vmem:[%s13408_s15 + $0x20] sm:$0xf] }
 0xd8d   :  { %v5724_v1 = vunpack.c.l.b16 %v5664_v54  ;;  %5795 = vmatpush.bf16.msrb.mxu2 %v5731_v3  ;;  %v5718_v9 = vunpack.c.l.b16 %v5656_v47  ;;  %v7879_v3 = vld [vmem:[%s13408_s15 + $0x24] sm:$0xf]  ;;  %v7414_v47 = vor.u32 %v7881_v4, %v7413_v27  ;;  %v7415_v54 = vld [vmem:[%s13408_s15 + $0x30] sm:$0x10] }
 0xd8e   :  { %v7893_v4 = vld [vmem:[#allocation2 + $0x2a8] sm:$0xf0] }
 0xd8f   :  { %v5725_v48 = vpack.c.b16 %v5724_v1, %v5723_v6  ;;  %v5719_v46 = vpack.c.b16 %v5718_v9, %v5717_v50  ;;  %v7882_v6 = vld [vmem:[%s13408_s15 + $0x34] sm:$0x10]  ;;  %v7880_v1 = vld [vmem:[%s13408_s15 + $0x2c] sm:$0xf]  ;;  %v7423_v9 = vld [vmem:[%s13408_s15 + $0x38] sm:$0x10] }
 0xd90   :  { %v5642_v39 = vpop.permute.xlu1 %5641  ;;  %v5702_v60 = vpop.permute.xlu0 %5701  ;;  %v7422_v5 = vor.u32 %v7882_v6, %v7421_v41 }
 0xd91   :  { %v5645_v33 = vmul.f32 %v5642_v39, %v14494_v15  ;;  %5796 = vmatpush.bf16.msrb.mxu2 %v5725_v48  ;;  %v5705_v29 = vmul.f32 %v8031_v32, %v5702_v60  ;;  %v7418_v15 = vor.u32 %v7879_v3, %v7415_v54  ;;  %v5929_v48 = vsel %vm214_vm1, %v7414_v47, 0  ;;  %v7431_v60 = vld [vmem:[%s13410_s17 + $0x4] sm:$0xf]  ;;  %v7572_v3 = vld [vmem:[#allocation2 + $0x360] sm:$0xf] }
 0xd92   :  { %v7426_v39 = vor.u32 %v7880_v1, %v7423_v9  ;;  %5947 = vmatpush.bf16.msrb.mxu3 %v5929_v48  ;;  %v5935_v52 = vsel %vm214_vm1, %v7422_v5, 0  ;;  %5995 = vst [vmem:[#allocation1] ss:$9 sm:$0xff] %v7431_v60  ;;  %v7917_v47 = vld [vmem:[#allocation2 + $0x368] sm:$0xf0]  ;;  %v14500_v1 = vld [vmem:[#allocation94_spill] sm:$0xff] }
 0xd93   :  { %v5647_v12 = vpack.c.bf16 %v5645_v33, %v5645_v33  ;;  %v5707_v51 = vpack.c.bf16 %v5705_v29, %v5705_v29  ;;  %v5932_v50 = vsel %vm214_vm1, %v7418_v15, 0  ;;  %v7573_v6 = vor.u32 %v7917_v47, %v7572_v3  ;;  %v7464_v15 = vld [vmem:[#allocation2 + $0x288] sm:$0xf]  ;;  %v7890_v5 = vld [vmem:[#allocation2 + $0x290] sm:$0xf0] }
 0xd94   :  { %v5938_v33 = vsel %vm214_vm1, %v7426_v39, 0  ;;  %vm14496_vm1 = vcmask 80896   ;;  %v7465_v9 = vor.u32 %v7890_v5, %v7464_v15  ;;  %v7452_v48 = vld [vmem:[#allocation2 + $0x270] sm:$0xf]  ;;  %v7887_v39 = vld [vmem:[#allocation2 + $0x278] sm:$0xf0] }
 0xd95   :  { %v5711_v0 = vunpack.c.l.b16 %v5647_v12  ;;  %5797 = vmatpush.bf16.msrb.mxu2 %v5719_v46  ;;  %v5759_v8 = vunpack.c.l.b16 %v5707_v51  ;;  %vm14497_vm4 = vmmov %vm14496_vm1  ;;  %v7914_v60 = vld [vmem:[#allocation2 + $0x350] sm:$0xf0]  ;;  %v7706_v47 = vld [vmem:[#allocation2 + $0x474] sm:$0xf0] }
 0xd96   :  { %vm14498_vm5 = vmmov %vm14496_vm1 }
 0xd97   :  { %v5713_v49 = vpack.c.b16 %v5712_v35, %v5711_v0  ;;  %vm14499_vm6 = vmmov %vm14496_vm1 }
 0xd98   :  { %v5704_v58 = vpop.permute.xlu1 %5703  ;;  %v5777_v40 = vpop.permute.xlu0 %5776 }
 0xd99   :  { %v5706_v26 = vmul.f32 %v8031_v32, %v5704_v58  ;;  %5798 = vmatpush.bf16.msrb.mxu2 %v5713_v49  ;;  %v5996_v46 = vld [vmem:[#allocation1] sm:$0xff]  ;;  %v5997_v12 = vld [vmem:[#allocation1 + $0x9] sm:$0xff]  ;;  %v5998_v35 = vld [vmem:[#allocation1 + $0x12] sm:$0xff] }
 0xd9a   :  { %v6000_v32 = vsel %vm2836_vm15, %v5996_v46, 0  ;;  %v6002_v29 = vsel %vm2836_vm15, %v5997_v12, 0  ;;  %v6004_v0 = vsel %vm2836_vm15, %v5998_v35, 0  ;;  %v5999_v43 = vld [vmem:[#allocation1 + $0x1b] sm:$0xff]  ;;  %v7884_v35 = vld [vmem:[#allocation2 + $0x260] sm:$0xf0] }
 0xd9b   :  { %v5708_v63 = vpack.c.bf16 %v5706_v26, %v5706_v26  ;;  %6015 = vmatpush.bf16.msra.mxu3 %v6000_v32  ;;  %v6006_v28 = vsel %vm2836_vm15, %v5999_v43, 0  ;;  %v7440_v46 = vld [vmem:[#allocation2 + $0x258] sm:$0xf]  ;;  %v7692_v32 = vld [vmem:[#allocation2 + $0x450] sm:$0xf] }
 0xd9c   :  { %5799 = vmatmul.bf16.vlgmr.msrb.gmra.mxu2 %v7396_v34 }
 0xd9d   :  { %v5760_v2 = vunpack.c.l.b16 %v5708_v63  ;;  %5903 = vmatpush.bf16.msra.mxu2 %v5855_v37  ;;  %v7524_v63 = vld [vmem:[#allocation2 + $0x300] sm:$0xf]  ;;  %v7513_v37 = vor.u32 %v7902_v20, %v7512_v61  ;;  %v7944_v61 = vld [vmem:[#allocation2 + $0x440] sm:$0xf0] }
 0xd9f   :  { %v5761_v55 = vpack.c.b16 %v5760_v2, %v5759_v8  ;;  %v7905_v2 = vld [vmem:[#allocation2 + $0x308] sm:$0xf0] }
 0xda1   :  { %5812 = vmatpush.bf16.msrb.mxu0 %v5761_v55  ;;  %5986 = vmatpush.bf16.msrb.mxu2 %v5938_v33  ;;  %v7716_v55 = vld [vmem:[#allocation2 + $0x480] sm:$0xf]  ;;  %v7560_v33 = vld [vmem:[#allocation2 + $0x348] sm:$0xf] }
 0xda2   :  { %v7561_v12 = vor.u32 %v7914_v60, %v7560_v33  ;;  %v7694_v60 = vld [vmem:[#allocation2 + $0x45c] sm:$0xf0] }
 0xda4   :  { %7401 = vmatmul.msk.bf16.vlgmr.msrb.gmra.mxu0 %vm865_vm11, %v7400_v17  ;;  %v7953_v17 = vld [vmem:[#allocation2 + $0x488] sm:$0xf0] }
 0xda5   :  { %5877 = vmatpush.bf16.msra.mxu0 %v5851_v57  ;;  %v7717_v57 = vor.u32 %v7953_v17, %v7716_v55  ;;  %v7548_v17 = vld [vmem:[#allocation2 + $0x330] sm:$0xf] }
 0xda9   :  { %5960 = vmatpush.bf16.msrb.mxu0 %v5932_v50 }
 0xdac   :  { %7410 = vmatmul.msk.bf16.vlgmr.msra.gmra.mxu2 %vm2676_vm14, %v14495_v22 }
 0xdad   :  { %6054 = vmatpush.bf16.msra.mxu2 %v6006_v28  ;;  %v7728_v28 = vld [vmem:[#allocation2 + $0x498] sm:$0xf] }
 0xdb4   :  { %7408 = vmatmul.msk.bf16.vlgmr.msra.gmra.mxu0 %vm2676_vm14, %v14495_v22 }
 0xdb5   :  { %6028 = vmatpush.bf16.msra.mxu0 %v6002_v29  ;;  %v7947_v29 = vld [vmem:[#allocation2 + $0x458] sm:$0xf0] }
 0xdb6   :  { %v7693_v43 = vor.u32 %v7947_v29, %v7692_v32  ;;  %v7916_v29 = vld [vmem:[#allocation2 + $0x364] sm:$0xf] }
 0xdc3   :  { %v3611_v42 = vpop.xlane.xlu1 %3610 }
 0xdc4   :  { %v3616_v19 = vadd.f32 %v7985_v10, %v3611_v42 }
 0xdc6   :  { %3618 = vst.msk [vmem:[%s13416_s23] sm:$0x3] %vm3617_vm3, %v3616_v19  ;;  %v7525_v19 = vor.u32 %v7905_v2, %v7524_v63  ;;  %v7928_v2 = vld [vmem:[#allocation2 + $0x3c4] sm:$0xf] }
 0xe0f   :  { %v13329_v58 = vpop.f32.mrf.mxu3 }
 0xe17   :  { %v5868_v26 = vpop.f32.mrf.mxu3 }
 0xe18   :  { %v7904_v26 = vld [vmem:[#allocation2 + $0x304] sm:$0xf] }
 0xe1f   :  { %v5800_v24 = vpop.f32.mrf.mxu2 }
 0xe20   :  { %v5801_v31 = vadd.f32 %v5800_v24, %v5772_v23  ;;  %v7621_v24 = vor.u32 %v7929_v45, %v7620_v14  ;;  %v7500_v23 = vld [vmem:[#allocation2 + $0x2d0] sm:$0xf] }
 0xe21   :  { %v5814_v7 = vpop.f32.mrf.mxu0  ;;  %v7622_v14 = vld [vmem:[#allocation2 + $0x3cc] sm:$0xf0] }
 0xe22   :  { %v5815_v30 = vadd.f32 %v5814_v7, %v5801_v31  ;;  %v7704_v7 = vld [vmem:[#allocation2 + $0x468] sm:$0xf]  ;;  %v7609_v31 = vor.u32 %v7926_v18, %v7608_v44  ;;  %v7625_v55 = vor.u32 %v7928_v2, %v7622_v14  ;;  %v7514_v44 = vld [vmem:[#allocation2 + $0x2f4] sm:$0xf0]  ;;  %v7925_v18 = vld [vmem:[#allocation2 + $0x3ac] sm:$0xf] }
 0xe23   :  { %v7889_v2 = vld [vmem:[#allocation2 + $0x28c] sm:$0xf]  ;;  %v7466_v14 = vld [vmem:[#allocation2 + $0x294] sm:$0xf0] }
 0xe24   :  { %v5819_v38 = vmax.f32 %v5815_v30, 0.0  ;;  %v7705_v30 = vor.u32 %v7950_v59, %v7704_v7 }
 0xe27   :  { %v5802_v56 = vpop.f32.mrf.mxu2 }
 0xe28   :  { %v5803_v16 = vadd.f32 %v5802_v56, %v5777_v40  ;;  %v7596_v40 = vld [vmem:[#allocation2 + $0x390] sm:$0xf]  ;;  %v7923_v56 = vld [vmem:[#allocation2 + $0x398] sm:$0xf0] }
 0xe29   :  { %v5816_v25 = vpop.f32.mrf.mxu0  ;;  %v7597_v11 = vor.u32 %v7923_v56, %v7596_v40  ;;  %v7941_v40 = vld [vmem:[#allocation2 + $0x428] sm:$0xf0]  ;;  %v7952_v56 = vld [vmem:[#allocation2 + $0x484] sm:$0xf] }
 0xe2a   :  { %v5817_v13 = vadd.f32 %v5816_v25, %v5803_v16 }
 0xe2c   :  { %v5820_v62 = vmax.f32 %v5817_v13, 0.0  ;;  %v7488_v13 = vld [vmem:[#allocation2 + $0x2b8] sm:$0xf] }
 0xe2e   :  { %v5821_v36 = vpack.c.bf16 %v5820_v62, %v5819_v38  ;;  %v7896_v38 = vld [vmem:[#allocation2 + $0x2c0] sm:$0xf0]  ;;  %v7584_v62 = vld [vmem:[#allocation2 + $0x378] sm:$0xf] }
 0xe2f   :  { %v13331_v34 = vpop.f32.mrf.mxu2 }
 0xe30   :  { %5829 = vmatpush.bf16.xpose.msrb.mxu1 %v5821_v36  ;;  %v7920_v36 = vld [vmem:[#allocation2 + $0x380] sm:$0xf0] }
 0xe31   :  { %v13327_v49 = vpop.f32.mrf.mxu0  ;;  %v7585_v27 = vor.u32 %v7920_v36, %v7584_v62  ;;  %v7598_v36 = vld [vmem:[#allocation2 + $0x39c] sm:$0xf0] }
 0xe37   :  { %5830 = vmatmul.bf16.vlgmr.msrb.gmra.mxu1 %v8032_v53  ;;  %v5907_v8 = vpop.f32.mrf.mxu2  ;;  %v7476_v53 = vld [vmem:[#allocation2 + $0x2a0] sm:$0xf] }
 0xe38   :  { %5890 = vmatpush.bf16.msra.mxu1 %v5853_v21  ;;  %v7489_v21 = vor.u32 %v7896_v38, %v7488_v13  ;;  %v7477_v41 = vor.u32 %v7893_v4, %v7476_v53  ;;  %v7526_v8 = vld [vmem:[#allocation2 + $0x30c] sm:$0xf0]  ;;  %v7898_v13 = vld [vmem:[#allocation2 + $0x2d4] sm:$0xf]  ;;  %v7656_v53 = vld [vmem:[#allocation2 + $0x408] sm:$0xf] }
 0xe39   :  { %v5881_v51 = vpop.f32.mrf.mxu0  ;;  %v7529_v45 = vor.u32 %v7904_v26, %v7526_v8  ;;  %v7922_v38 = vld [vmem:[#allocation2 + $0x394] sm:$0xf]  ;;  %v7949_v4 = vld [vmem:[#allocation2 + $0x46c] sm:$0xf]  ;;  %v7943_v26 = vld [vmem:[#allocation2 + $0x43c] sm:$0xf] }
 0xe3a   :  { %v7956_v51 = vld [vmem:[#allocation2 + $0x4a0] sm:$0xf0]  ;;  %v7709_v15 = vor.u32 %v7949_v4, %v7706_v47  ;;  %v7682_v8 = vld [vmem:[#allocation2 + $0x444] sm:$0xf0]  ;;  %v7934_v4 = vld [vmem:[#allocation2 + $0x3f4] sm:$0xf] }
 0xe3b   :  { %v7729_v63 = vor.u32 %v7956_v51, %v7728_v28  ;;  %v7632_v28 = vld [vmem:[#allocation2 + $0x3d8] sm:$0xf]  ;;  %v7932_v51 = vld [vmem:[#allocation2 + $0x3e0] sm:$0xf0] }
 0xe3c   :  { %5973 = vmatpush.bf16.msrb.mxu1 %v5935_v52  ;;  %v7453_v52 = vor.u32 %v7887_v39, %v7452_v48  ;;  %v7644_v39 = vld [vmem:[#allocation2 + $0x3f0] sm:$0xf] }
 0xe47   :  { %7409 = vmatmul.msk.bf16.vlgmr.msra.gmra.mxu1 %vm2676_vm14, %v14495_v22  ;;  %v7899_v22 = vld [vmem:[#allocation2 + $0x2d8] sm:$0xf0] }
 0xe48   :  { %6041 = vmatpush.bf16.msra.mxu1 %v6004_v0  ;;  %v7501_v25 = vor.u32 %v7899_v22, %v7500_v23  ;;  %v7441_v0 = vor.u32 %v7884_v35, %v7440_v46  ;;  %v7908_v23 = vld [vmem:[#allocation2 + $0x320] sm:$0xf0] }
 0xe49   :  { %v7892_v46 = vld [vmem:[#allocation2 + $0x2a4] sm:$0xf] }
 0xeb4   :  { %v5831_v10 = vpop.f32.mrf.mxu1 }
 0xeb5   :  { %v5835_v42 = vpack.c.bf16 %v5831_v10, %v5831_v10  ;;  %v7911_v10 = vld [vmem:[#allocation2 + $0x338] sm:$0xf0] }
 0xeb7   :  { %7427 = vmatmul.msk.bf16.vlgmr.msrb.gmra.mxu3 %vm14496_vm1, %v5835_v42  ;;  %7428 = vmatmul.msk.bf16.vlgmr.msrb.gmra.mxu0 %vm14497_vm4, %v5835_v42 }
 0xeb8   :  { %7429 = vmatmul.msk.bf16.vlgmr.msrb.gmra.mxu1 %vm14498_vm5, %v5835_v42  ;;  %7430 = vmatmul.msk.bf16.vlgmr.msrb.gmra.mxu2 %vm14499_vm6, %v5835_v42  ;;  %v7549_v42 = vor.u32 %v7911_v10, %v7548_v17  ;;  %v7469_v17 = vor.u32 %v7889_v2, %v7466_v14  ;;  %v7913_v10 = vld [vmem:[#allocation2 + $0x34c] sm:$0xf] }
 0xeb9   :  { %6600 = vmatpush.bf16.msrb.mxu3 %v7525_v19  ;;  %6613 = vmatpush.bf16.msrb.mxu0 %v7621_v24  ;;  %v7680_v19 = vld [vmem:[#allocation2 + $0x438] sm:$0xf]  ;;  %v7901_v24 = vld [vmem:[#allocation2 + $0x2ec] sm:$0xf] }
 0xeba   :  { %6626 = vmatpush.bf16.msrb.mxu1 %v7717_v57  ;;  %6646 = vmatpush.bf16.msrb.mxu2 %v7729_v63  ;;  %v7681_v20 = vor.u32 %v7944_v61, %v7680_v19  ;;  %v7610_v57 = vld [vmem:[#allocation2 + $0x3b4] sm:$0xf0]  ;;  %v7517_v7 = vor.u32 %v7901_v24, %v7514_v44  ;;  %v7633_v63 = vor.u32 %v7932_v51, %v7632_v28  ;;  %v7955_v19 = vld [vmem:[#allocation2 + $0x49c] sm:$0xf]  ;;  %v7940_v44 = vld [vmem:[#allocation2 + $0x424] sm:$0xf] }
 0xebb   :  { %v7613_v59 = vor.u32 %v7925_v18, %v7610_v57  ;;  %v7670_v18 = vld [vmem:[#allocation2 + $0x42c] sm:$0xf0] }
 0xebc   :  { %v5833_v16 = vpop.f32.mrf.mxu1 }
 0xebd   :  { %6601 = vmatpush.bf16.msrb.mxu3 %v7513_v37  ;;  %6614 = vmatpush.bf16.msrb.mxu0 %v7609_v31  ;;  %v7536_v37 = vld [vmem:[#allocation2 + $0x318] sm:$0xf]  ;;  %v7668_v31 = vld [vmem:[#allocation2 + $0x420] sm:$0xf] }
 0xebe   :  { %6627 = vmatpush.bf16.msrb.mxu1 %v7705_v30  ;;  %v7537_v22 = vor.u32 %v7908_v23, %v7536_v37  ;;  %v7718_v30 = vld [vmem:[#allocation2 + $0x48c] sm:$0xf0]  ;;  %v7669_v16 = vor.u32 %v7941_v40, %v7668_v31  ;;  %v7454_v37 = vld [vmem:[#allocation2 + $0x27c] sm:$0xf0]  ;;  %v7910_v23 = vld [vmem:[#allocation2 + $0x334] sm:$0xf] }
 0xebf   :  { %v7550_v31 = vld [vmem:[#allocation2 + $0x33c] sm:$0xf0] }
 0xec0   :  { %v7553_v40 = vor.u32 %v7910_v23, %v7550_v31 }
 0xec1   :  { %6602 = vmatpush.bf16.msrb.mxu3 %v7501_v25  ;;  %6615 = vmatpush.bf16.msrb.mxu0 %v7597_v11  ;;  %v7721_v25 = vor.u32 %v7952_v56, %v7718_v30  ;;  %v7502_v11 = vld [vmem:[#allocation2 + $0x2dc] sm:$0xf0]  ;;  %v7937_v56 = vld [vmem:[#allocation2 + $0x40c] sm:$0xf]  ;;  %v7658_v30 = vld [vmem:[#allocation2 + $0x414] sm:$0xf0] }
 0xec2   :  { %6628 = vmatpush.bf16.msrb.mxu1 %v7693_v43  ;;  %v7505_v62 = vor.u32 %v7898_v13, %v7502_v11  ;;  %v7661_v11 = vor.u32 %v7937_v56, %v7658_v30  ;;  %v7508_v56 = vld [vmem:[#allocation2 + $0x2d8] sm:$0xf]  ;;  %v7900_v30 = vld [vmem:[#allocation2 + $0x2e0] sm:$0xf0] }
 0xec4   :  { %v13337_v54 = vpop.f32.mrf.mxu1 }
 0xec5   :  { %6603 = vmatpush.bf16.msrb.mxu3 %v7489_v21  ;;  %6616 = vmatpush.bf16.msrb.mxu0 %v7585_v27  ;;  %v7601_v21 = vor.u32 %v7922_v38, %v7598_v36  ;;  %v7938_v27 = vld [vmem:[#allocation2 + $0x410] sm:$0xf0]  ;;  %v7538_v36 = vld [vmem:[#allocation2 + $0x324] sm:$0xf0] }
 0xec6   :  { %6629 = vmatpush.bf16.msrb.mxu1 %v7681_v20  ;;  %v7657_v3 = vor.u32 %v7938_v27, %v7656_v53  ;;  %v7730_v20 = vld [vmem:[#allocation2 + $0x4a4] sm:$0xf0] }
 0xec7   :  { %7432 = vmatmul.msk.bf16.vlgmr.msra.gmra.mxu3 %vm2832_vm0, %v14500_v1  ;;  %7433 = vmatmul.msk.bf16.vlgmr.msra.gmra.mxu0 %vm2832_vm0, %v14500_v1  ;;  %v7733_v57 = vor.u32 %v7955_v19, %v7730_v20 }
 0xec8   :  { %7434 = vmatmul.msk.bf16.vlgmr.msra.gmra.mxu1 %vm2832_vm0, %v14500_v1  ;;  %7435 = vmatmul.msk.bf16.vlgmr.msra.gmra.mxu2 %vm2832_vm0, %v14500_v1  ;;  %v7919_v1 = vld [vmem:[#allocation2 + $0x37c] sm:$0xf] }
 0xec9   :  { %6604 = vmatpush.bf16.msrb.mxu3 %v7477_v41  ;;  %6617 = vmatpush.bf16.msrb.mxu0 %v7573_v6  ;;  %v7895_v41 = vld [vmem:[#allocation2 + $0x2bc] sm:$0xf]  ;;  %v7490_v6 = vld [vmem:[#allocation2 + $0x2c4] sm:$0xf0] }
 0xeca   :  { %6652 = vmatpush.bf16.msra.mxu2 %v7529_v45  ;;  %6630 = vmatpush.bf16.msrb.mxu1 %v7669_v16  ;;  %v7493_v5 = vor.u32 %v7895_v41, %v7490_v6  ;;  %v7883_v16 = vld [vmem:[#allocation2 + $0x25c] sm:$0xf] }
 0xecb   :  { %v7931_v6 = vld [vmem:[#allocation2 + $0x3dc] sm:$0xf] }
 0xecc   :  { %v5894_v50 = vpop.f32.mrf.mxu1 }
 0xecd   :  { %6605 = vmatpush.bf16.msrb.mxu3 %v7465_v9  ;;  %6618 = vmatpush.bf16.msrb.mxu0 %v7561_v12  ;;  %v7586_v9 = vld [vmem:[#allocation2 + $0x384] sm:$0xf0]  ;;  %v7935_v50 = vld [vmem:[#allocation2 + $0x3f8] sm:$0xf0]  ;;  %v7478_v12 = vld [vmem:[#allocation2 + $0x2ac] sm:$0xf0] }
 0xece   :  { %6653 = vmatpush.bf16.msra.mxu2 %v7517_v7  ;;  %v7589_v48 = vor.u32 %v7919_v1, %v7586_v9  ;;  %6631 = vmatpush.bf16.msrb.mxu1 %v7657_v3  ;;  %v7645_v33 = vor.u32 %v7935_v50, %v7644_v39  ;;  %v7481_v32 = vor.u32 %v7892_v46, %v7478_v12  ;;  %v7646_v3 = vld [vmem:[#allocation2 + $0x3fc] sm:$0xf0] }
 0xecf   :  { %v7673_v7 = vor.u32 %v7940_v44, %v7670_v18  ;;  %v7649_v41 = vor.u32 %v7934_v4, %v7646_v3  ;;  %v7954_v18 = vld [vmem:[#allocation2 + $0x490] sm:$0xf0]  ;;  %v7496_v3 = vld [vmem:[#allocation2 + $0x2c0] sm:$0xf] }
 0xed1   :  { %6606 = vmatpush.bf16.msrb.mxu3 %v7453_v52  ;;  %6619 = vmatpush.bf16.msrb.mxu0 %v7549_v42  ;;  %v7946_v52 = vld [vmem:[#allocation2 + $0x454] sm:$0xf]  ;;  %v7562_v42 = vld [vmem:[#allocation2 + $0x354] sm:$0xf0] }
 0xed2   :  { %6654 = vmatpush.bf16.msra.mxu2 %v7505_v62  ;;  %v7697_v35 = vor.u32 %v7946_v52, %v7694_v60  ;;  %6632 = vmatpush.bf16.msrb.mxu1 %v7645_v33  ;;  %v7565_v24 = vor.u32 %v7913_v10, %v7562_v42  ;;  %v7907_v62 = vld [vmem:[#allocation2 + $0x31c] sm:$0xf]  ;;  %v7957_v10 = vld [vmem:[#allocation2 + $0x4a8] sm:$0xf0] }
 0xed3   :  { %v7541_v53 = vor.u32 %v7907_v62, %v7538_v36  ;;  %v7616_v62 = vld [vmem:[#allocation2 + $0x3b0] sm:$0xf]  ;;  %v7927_v36 = vld [vmem:[#allocation2 + $0x3b8] sm:$0xf0] }
 0xed5   :  { %6607 = vmatpush.bf16.msrb.mxu3 %v7441_v0  ;;  %6620 = vmatpush.bf16.msrb.mxu0 %v7537_v22  ;;  %v7574_v0 = vld [vmem:[#allocation2 + $0x36c] sm:$0xf0] }
 0xed6   :  { %6655 = vmatpush.bf16.msra.mxu2 %v7493_v5  ;;  %v7577_v43 = vor.u32 %v7916_v29, %v7574_v0  ;;  %6633 = vmatpush.bf16.msrb.mxu1 %v7633_v63  ;;  %v7436_v5 = vld [vmem:[%s13411_s18 + $0x4] sm:$0xf]  ;;  %v7532_v0 = vld [vmem:[#allocation2 + $0x308] sm:$0xf] }
 0xed7   :  { %v6068_v50 = vperm.slane %v7436_v5, 1  ;;  %v6069_v60 = vperm.slane %v7436_v5, 2  ;;  %v6070_v2 = vperm.slane %v7436_v5, 3 }
 0xed9   :  { %6665 = vmatpush.bf16.msra.mxu3 %v7625_v55  ;;  %6678 = vmatpush.bf16.msra.mxu0 %v7721_v25  ;;  %v7685_v55 = vor.u32 %v7943_v26, %v7682_v8  ;;  %v7442_v25 = vld [vmem:[#allocation2 + $0x264] sm:$0xf0]  ;;  %v6067_v26 = vperm.slane %v7436_v5, 0  ;;  %v7604_v5 = vld [vmem:[#allocation2 + $0x398] sm:$0xf] }
 0xeda   :  { %6656 = vmatpush.bf16.msra.mxu2 %v7481_v32  ;;  %6698 = vmatpush.bf16.msra.mxu1 %v7733_v57  ;;  %v7445_v38 = vor.u32 %v7883_v16, %v7442_v25 }
 0xedd   :  { %6666 = vmatpush.bf16.msra.mxu3 %v7613_v59  ;;  %6679 = vmatpush.bf16.msra.mxu0 %v7709_v15  ;;  %v7886_v59 = vld [vmem:[#allocation2 + $0x274] sm:$0xf]  ;;  %v7634_v15 = vld [vmem:[#allocation2 + $0x3e4] sm:$0xf0] }
 0xede   :  { %6657 = vmatpush.bf16.msra.mxu2 %v7469_v17  ;;  %v7457_v22 = vor.u32 %v7886_v59, %v7454_v37  ;;  %v7637_v9 = vor.u32 %v7931_v6, %v7634_v15  ;;  %v7736_v17 = vld [vmem:[#allocation2 + $0x4a0] sm:$0xf]  ;;  %v7628_v59 = vld [vmem:[#allocation2 + $0x3c8] sm:$0xf]  ;;  %v7930_v37 = vld [vmem:[#allocation2 + $0x3d0] sm:$0xf0] }
 0xedf   :  { %v7737_v20 = vor.u32 %v7957_v10, %v7736_v17  ;;  %v7629_v25 = vor.u32 %v7930_v37, %v7628_v59  ;;  %v7700_v6 = vld [vmem:[#allocation2 + $0x458] sm:$0xf]  ;;  %v7948_v15 = vld [vmem:[#allocation2 + $0x460] sm:$0xf0]  ;;  %v7939_v17 = vld [vmem:[#allocation2 + $0x418] sm:$0xf0] }
 0xee0   :  { %v7568_v10 = vld [vmem:[#allocation2 + $0x350] sm:$0xf] }
 0xee1   :  { %6667 = vmatpush.bf16.msra.mxu3 %v7601_v21  ;;  %6680 = vmatpush.bf16.msra.mxu0 %v7697_v35 }
 0xee2   :  { %6658 = vmatpush.bf16.msra.mxu2 %v7457_v22 }
 0xee5   :  { %6668 = vmatpush.bf16.msra.mxu3 %v7589_v48  ;;  %6681 = vmatpush.bf16.msra.mxu0 %v7685_v55 }
 0xee6   :  { %6659 = vmatpush.bf16.msra.mxu2 %v7445_v38 }
 0xee9   :  { %6669 = vmatpush.bf16.msra.mxu3 %v7577_v43  ;;  %6682 = vmatpush.bf16.msra.mxu0 %v7673_v7  ;;  %v7906_v43 = vld [vmem:[#allocation2 + $0x310] sm:$0xf0] }
 0xeea   :  { %v7533_v55 = vor.u32 %v7906_v43, %v7532_v0  ;;  %v7891_v0 = vld [vmem:[#allocation2 + $0x298] sm:$0xf0] }
 0xeed   :  { %6670 = vmatpush.bf16.msra.mxu3 %v7565_v24  ;;  %6683 = vmatpush.bf16.msra.mxu0 %v7661_v11  ;;  %v7903_v24 = vld [vmem:[#allocation2 + $0x2f8] sm:$0xf0] }
 0xeee   :  { %v7951_v11 = vld [vmem:[#allocation2 + $0x478] sm:$0xf0] }
 0xef1   :  { %6671 = vmatpush.bf16.msra.mxu3 %v7553_v40  ;;  %6684 = vmatpush.bf16.msra.mxu0 %v7649_v41  ;;  %v7617_v41 = vor.u32 %v7927_v36, %v7616_v62 }
 0xef5   :  { %6672 = vmatpush.bf16.msra.mxu3 %v7541_v53  ;;  %6685 = vmatpush.bf16.msra.mxu0 %v7637_v9  ;;  %v7509_v53 = vor.u32 %v7900_v30, %v7508_v56  ;;  %v7909_v56 = vld [vmem:[#allocation2 + $0x328] sm:$0xf0] }
 0xf34   :  { %v5962_v45 = vpop.f32.mrf.mxu0 }
 0xf35   :  { %v5975_v61 = vpop.f32.mrf.mxu1  ;;  %v5963_v48 = vadd.f32 %v5962_v45, %v13327_v49 }
 0xf36   :  { %v5976_v52 = vadd.f32 %v5975_v61, %v13337_v54  ;;  %v7520_v61 = vld [vmem:[#allocation2 + $0x2f0] sm:$0xf] }
 0xf37   :  { %v7521_v31 = vor.u32 %v7903_v24, %v7520_v61 }
 0xf3a   :  { %v5949_v13 = vpop.f32.mrf.mxu3 }
 0xf3b   :  { %v5988_v21 = vpop.f32.mrf.mxu2  ;;  %v5950_v28 = vadd.f32 %v5949_v13, %v13329_v58  ;;  %v7712_v13 = vld [vmem:[#allocation2 + $0x470] sm:$0xf] }
 0xf3c   :  { %v5964_v27 = vpop.f32.mrf.mxu0  ;;  %v5989_v49 = vadd.f32 %v5988_v21, %v13331_v34  ;;  %v7724_v34 = vld [vmem:[#allocation2 + $0x488] sm:$0xf]  ;;  %v7713_v4 = vor.u32 %v7951_v11, %v7712_v13 }
 0xf3d   :  { %v5977_v47 = vpop.f32.mrf.mxu1  ;;  %v7725_v40 = vor.u32 %v7954_v18, %v7724_v34  ;;  %v7652_v34 = vld [vmem:[#allocation2 + $0x3f8] sm:$0xf]  ;;  %v7936_v18 = vld [vmem:[#allocation2 + $0x400] sm:$0xf0] }
 0xf3e   :  { %v7897_v47 = vld [vmem:[#allocation2 + $0x2c8] sm:$0xf0]  ;;  %v7653_v37 = vor.u32 %v7936_v18, %v7652_v34 }
 0xf3f   :  { %v7497_v9 = vor.u32 %v7897_v47, %v7496_v3 }
 0xf42   :  { %v5951_v1 = vpop.f32.mrf.mxu3 }
 0xf43   :  { %v5990_v39 = vpop.f32.mrf.mxu2  ;;  %v7924_v1 = vld [vmem:[#allocation2 + $0x3a0] sm:$0xf0] }
 0xf44   :  { %v6030_v33 = vpop.f32.mrf.mxu0  ;;  %v7484_v39 = vld [vmem:[#allocation2 + $0x2a8] sm:$0xf] }
 0xf45   :  { %v6061_v46 = vadd.f32 %v6030_v33, %v5963_v48  ;;  %v6043_v12 = vpop.f32.mrf.mxu1  ;;  %v7701_v48 = vor.u32 %v7948_v15, %v7700_v6  ;;  %v7688_v33 = vld [vmem:[#allocation2 + $0x440] sm:$0xf] }
 0xf46   :  { %v6062_v35 = vadd.f32 %v6043_v12, %v5976_v52  ;;  %v7605_v52 = vor.u32 %v7924_v1, %v7604_v5  ;;  %v7921_v12 = vld [vmem:[#allocation2 + $0x388] sm:$0xf0] }
 0xf47   :  { %v6076_v32 = vadd.f32 %v6068_v50, %v6061_v46  ;;  %v7894_v50 = vld [vmem:[#allocation2 + $0x2b0] sm:$0xf0]  ;;  %v7592_v46 = vld [vmem:[#allocation2 + $0x380] sm:$0xf] }
 0xf48   :  { %v6077_v29 = vadd.f32 %v6069_v60, %v6062_v35  ;;  %v7945_v60 = vld [vmem:[#allocation2 + $0x448] sm:$0xf0]  ;;  %v7485_v35 = vor.u32 %v7894_v50, %v7484_v39  ;;  %v7593_v43 = vor.u32 %v7921_v12, %v7592_v46 }
 0xf49   :  { %v6080_v51 = vmax.f32 %v6076_v32, 0.0  ;;  %v7689_v32 = vor.u32 %v7945_v60, %v7688_v33 }
 0xf4a   :  { %v6081_v63 = vmax.f32 %v6077_v29, 0.0  ;;  %v6017_v8 = vpop.f32.mrf.mxu3  ;;  %v7472_v29 = vld [vmem:[#allocation2 + $0x290] sm:$0xf] }
 0xf4b   :  { %v13354_v54 = vpack.c.bf16 %v6080_v51, %v6080_v51  ;;  %v6060_v14 = vadd.f32 %v6017_v8, %v5950_v28  ;;  %v6056_v45 = vpop.f32.mrf.mxu2  ;;  %v7676_v28 = vld [vmem:[#allocation2 + $0x428] sm:$0xf]  ;;  %v7942_v51 = vld [vmem:[#allocation2 + $0x430] sm:$0xf0] }
 0xf4c   :  { %v13356_v42 = vpack.c.bf16 %v6081_v63, %v6081_v63  ;;  %v6063_v19 = vadd.f32 %v6056_v45, %v5989_v49  ;;  %v6032_v58 = vpop.f32.mrf.mxu0  ;;  %v7918_v49 = vld [vmem:[#allocation2 + $0x370] sm:$0xf0]  ;;  %v7473_v63 = vor.u32 %v7891_v0, %v7472_v29  ;;  %v7677_v8 = vor.u32 %v7942_v51, %v7676_v28 }
 0xf4d   :  { %v6075_v44 = vadd.f32 %v6067_v26, %v6060_v14  ;;  %6621 = vmatmul.bf16.vlgmr.msrb.gmra.mxu0 %v13354_v54  ;;  %v6045_v57 = vpop.f32.mrf.mxu1  ;;  %v7580_v26 = vld [vmem:[#allocation2 + $0x368] sm:$0xf]  ;;  %v7888_v14 = vld [vmem:[#allocation2 + $0x280] sm:$0xf0]  ;;  %v7448_v58 = vld [vmem:[#allocation2 + $0x260] sm:$0xf] }
 0xf4e   :  { %v6078_v7 = vadd.f32 %v6070_v2, %v6063_v19  ;;  %6634 = vmatmul.bf16.vlgmr.msrb.gmra.mxu1 %v13356_v42  ;;  %6750 = vmatpush.bf16.msrb.mxu0 %v7737_v20  ;;  %v7460_v2 = vld [vmem:[#allocation2 + $0x278] sm:$0xf]  ;;  %v7581_v45 = vor.u32 %v7918_v49, %v7580_v26  ;;  %v7915_v19 = vld [vmem:[#allocation2 + $0x358] sm:$0xf0]  ;;  %v7885_v20 = vld [vmem:[#allocation2 + $0x268] sm:$0xf0] }
 0xf4f   :  { %v6079_v23 = vmax.f32 %v6075_v44, 0.0  ;;  %6704 = vmatpush.bf16.msrb.mxu1 %v7533_v55  ;;  %v7664_v55 = vld [vmem:[#allocation2 + $0x410] sm:$0xf]  ;;  %v7461_v61 = vor.u32 %v7888_v14, %v7460_v2  ;;  %v7569_v44 = vor.u32 %v7915_v19, %v7568_v10  ;;  %v7556_v57 = vld [vmem:[#allocation2 + $0x338] sm:$0xf]  ;;  %v7449_v59 = vor.u32 %v7885_v20, %v7448_v58 }
 0xf50   :  { %v6082_v22 = vmax.f32 %v6078_v7, 0.0  ;;  %v7665_v24 = vor.u32 %v7939_v17, %v7664_v55  ;;  %v7912_v7 = vld [vmem:[#allocation2 + $0x340] sm:$0xf0] }
 0xf51   :  { %v13360_v16 = vpack.c.bf16 %v6079_v23, %v6079_v23  ;;  %v7557_v23 = vor.u32 %v7912_v7, %v7556_v57 }
 0xf52   :  { %v13362_v38 = vpack.c.bf16 %v6082_v22, %v6082_v22  ;;  %v6019_v21 = vpop.f32.mrf.mxu3  ;;  %v7933_v22 = vld [vmem:[#allocation2 + $0x3e8] sm:$0xf0] }
 0xf53   :  { %6705 = vmatpush.bf16.msrb.mxu1 %v7521_v31  ;;  %6608 = vmatmul.bf16.vlgmr.msrb.gmra.mxu3 %v13360_v16  ;;  %v6058_v27 = vpop.f32.mrf.mxu2  ;;  %v7640_v31 = vld [vmem:[#allocation2 + $0x3e0] sm:$0xf] }
 0xf54   :  { %7738 = vmatmul.msk.bf16.vlgmr.msrb.gmra.mxu2 %vm865_vm11, %v13362_v38  ;;  %6730 = vmatpush.bf16.msrb.mxu3 %v7725_v40  ;;  %v7544_v40 = vld [vmem:[#allocation2 + $0x320] sm:$0xf]  ;;  %v7641_v30 = vor.u32 %v7933_v22, %v7640_v31 }
 0xf55   :  { %6717 = vmatpush.bf16.msrb.mxu2 %v7629_v25  ;;  %v7545_v25 = vor.u32 %v7909_v56, %v7544_v40 }
 0xf57   :  { %6706 = vmatpush.bf16.msrb.mxu1 %v7509_v53 }
 0xf58   :  { %6731 = vmatpush.bf16.msrb.mxu3 %v7713_v4 }
 0xf59   :  { %6718 = vmatpush.bf16.msrb.mxu2 %v7617_v41 }
 0xf5b   :  { %6707 = vmatpush.bf16.msrb.mxu1 %v7497_v9 }
 0xf5c   :  { %6732 = vmatpush.bf16.msrb.mxu3 %v7701_v48 }
 0xf5d   :  { %6719 = vmatpush.bf16.msrb.mxu2 %v7605_v52  ;;  %6686 = vmatmul.bf16.vlgmr.msra.gmra.mxu0 %v13356_v42 }
 0xf5e   :  { %7739 = vmatmul.msk.bf16.vlgmr.msra.gmra.mxu1 %vm865_vm11, %v13362_v38 }
 0xf5f   :  { %6708 = vmatpush.bf16.msrb.mxu1 %v7485_v35 }
 0xf60   :  { %6733 = vmatpush.bf16.msrb.mxu3 %v7689_v32 }
 0xf61   :  { %6720 = vmatpush.bf16.msrb.mxu2 %v7593_v43  ;;  %v7741_v43 = vld [vmem:[%s13414_s21 + $0x3] sm:$0x7] }
 0xf62   :  { %v6763_v51 = vperm.slane %v7741_v43, 1  ;;  %v6762_v2 = vperm.slane %v7741_v43, 0  ;;  %v6764_v19 = vperm.slane %v7741_v43, 2 }
 0xf63   :  { %6709 = vmatpush.bf16.msrb.mxu1 %v7473_v63  ;;  %6673 = vmatmul.bf16.vlgmr.msra.gmra.mxu3 %v13354_v54 }
 0xf64   :  { %6660 = vmatmul.bf16.vlgmr.msra.gmra.mxu2 %v13360_v16  ;;  %6734 = vmatpush.bf16.msrb.mxu3 %v7677_v8 }
 0xf65   :  { %6721 = vmatpush.bf16.msrb.mxu2 %v7581_v45 }
 0xf67   :  { %6710 = vmatpush.bf16.msrb.mxu1 %v7461_v61 }
 0xf68   :  { %6735 = vmatpush.bf16.msrb.mxu3 %v7665_v24 }
 0xf69   :  { %6722 = vmatpush.bf16.msrb.mxu2 %v7569_v44 }
 0xf6b   :  { %6711 = vmatpush.bf16.msrb.mxu1 %v7449_v59  ;;  %v7986_v59 = vld [vmem:[%s13415_s22 + $0x1] ss:$0 sm:$0xff] }
 0xf6c   :  { %6736 = vmatpush.bf16.msrb.mxu3 %v7653_v37 }
 0xf6d   :  { %6723 = vmatpush.bf16.msrb.mxu2 %v7557_v23  ;;  %7740 = vmatmul.msk.bf16.vlgmr.msrb.gmra.mxu0 %vm865_vm11, %v13362_v38 }
 0xf6e   :  { %6712 = vmatmul.bf16.vlgmr.msrb.gmra.mxu1 %v13360_v16  ;;  %v7437_v16 = vld [vmem:[%s13413_s20 + $0x3] sm:$0x7] }
 0xf6f   :  { %v6191_v6 = vperm.slane %v7437_v16, 0  ;;  %v6193_v35 = vperm.slane %v7437_v16, 2 }
 0xf70   :  { %6737 = vmatpush.bf16.msrb.mxu3 %v7641_v30 }
 0xf71   :  { %6724 = vmatpush.bf16.msrb.mxu2 %v7545_v25 }
 0xf73   :  { %6738 = vmatmul.bf16.vlgmr.msrb.gmra.mxu3 %v13356_v42  ;;  %v6192_v42 = vperm.slane %v7437_v16, 1 }
 0xf74   :  { %6725 = vmatmul.bf16.vlgmr.msrb.gmra.mxu2 %v13354_v54 }
 0xfca   :  { %v6622_v13 = vpop.f32.mrf.mxu0 }
 0xfcb   :  { %v6635_v11 = vpop.f32.mrf.mxu1 }
 0xfd2   :  { %v6624_v62 = vpop.f32.mrf.mxu0 }
 0xfd3   :  { %v6637_v36 = vpop.f32.mrf.mxu1 }
 0xfd6   :  { %v6609_v21 = vpop.f32.mrf.mxu3 }
 0xfd7   :  { %v6648_v53 = vpop.f32.mrf.mxu2  ;;  %v6610_v5 = vadd.f32 %v6609_v21, %v6191_v6 }
 0xfd9   :  { %v6623_v50 = vadd.f32 %v6622_v13, %v6610_v5 }
 0xfda   :  { %v6687_v27 = vpop.f32.mrf.mxu0 }
 0xfdb   :  { %v6700_v4 = vpop.f32.mrf.mxu1  ;;  %v6636_v46 = vadd.f32 %v6635_v11, %v6623_v50 }
 0xfdd   :  { %v6649_v0 = vadd.f32 %v6648_v53, %v6636_v46 }
 0xfde   :  { %v6611_v3 = vpop.f32.mrf.mxu3 }
 0xfdf   :  { %v6650_v47 = vpop.f32.mrf.mxu2  ;;  %v6756_v8 = vmax.f32 %v6649_v0, 0.0 }
 0xfe1   :  { %v6768_v17 = vmul.f32 %v6762_v2, %v6756_v8 }
 0xfe2   :  { %v6689_v38 = vpop.f32.mrf.mxu0 }
 0xfe3   :  { %v6702_v41 = vpop.f32.mrf.mxu1  ;;  %v6771_v44 = vsel %vm2680_vm13, %v6768_v17, 0.0 }
 0xfe6   :  { %v6674_v15 = vpop.f32.mrf.mxu3 }
 0xfe7   :  { %v6661_v54 = vpop.f32.mrf.mxu2 }
 0xfe8   :  { %v6662_v1 = vadd.f32 %v6661_v54, %v6192_v42 }
 0xfea   :  { %v6675_v9 = vadd.f32 %v6674_v15, %v6662_v1  ;;  %v6752_v48 = vpop.f32.mrf.mxu0 }
 0xfeb   :  { %v6713_v39 = vpop.f32.mrf.mxu1 }
 0xfec   :  { %v6688_v52 = vadd.f32 %v6687_v27, %v6675_v9  ;;  %v6714_v26 = vadd.f32 %v6713_v39, %v6193_v35 }
 0xfee   :  { %v6676_v33 = vpop.f32.mrf.mxu3  ;;  %v6701_v12 = vadd.f32 %v6700_v4, %v6688_v52 }
 0xfef   :  { %v6663_v60 = vpop.f32.mrf.mxu2 }
 0xff0   :  { %v6757_v28 = vmax.f32 %v6701_v12, 0.0 }
 0xff2   :  { %v6754_v32 = vpop.f32.mrf.mxu0  ;;  %v6769_v45 = vmul.f32 %v6763_v51, %v6757_v28 }
 0xff3   :  { %v6715_v29 = vpop.f32.mrf.mxu1 }
 0xff4   :  { %v6772_v58 = vsel %vm2680_vm13, %v6769_v45, 0.0 }
 0xff5   :  { %v6773_v18 = vadd.f32 %v6772_v58, %v6771_v44 }
 0xff6   :  { %v6739_v49 = vpop.f32.mrf.mxu3 }
 0xff7   :  { %v6726_v63 = vpop.f32.mrf.mxu2 }
 0xff8   :  { %v6727_v14 = vadd.f32 %v6726_v63, %v6714_v26 }
 0xffa   :  { %v6740_v55 = vadd.f32 %v6739_v49, %v6727_v14 }
 0xffc   :  { %v6753_v10 = vadd.f32 %v6752_v48, %v6740_v55 }
 0xffe   :  { %v6758_v61 = vmax.f32 %v6753_v10, 0.0  ;;  %v6741_v24 = vpop.f32.mrf.mxu3 }
 0xfff   :  { %v6728_v20 = vpop.f32.mrf.mxu2 }
0x1000   :  { %v6770_v34 = vmul.f32 %v6764_v19, %v6758_v61 }
0x1002   :  { %v6774_v57 = vsel %vm3607_vm2, %v6770_v34, 0.0 }
0x1003   :  { %v6775_v7 = vadd.f32 %v6774_v57, %v6773_v18 }
0x1005   :  { %6776 = vadd.xlane.f32.xlu2 %v6775_v7 }
0x1078   :  { %v6777_v37 = vpop.xlane.xlu2 %6776 }
0x1079   :  { %v6783_v23 = vadd.f32 %v7986_v59, %v6777_v37 }
0x107b   :  { %7743 = vst.msk [vmem:[%s13416_s23 + $0x2] sm:$0x3] %vm3617_vm3, %v6783_v23 }
0x107c   :  { %6790 = vsyncpa [#allocation3], 1 }

</bundles_post_ra>
